<compile_context>
chip_gen: v5e
topology: v5e:2x2
jax: 0.10.0
libtpu: 0.0.40
codegen_flags: <defaults>
</compile_context>

<pallas_src>
import functools

import jax
import jax.numpy as jnp
import numpy as np
from jax import lax
from jax.experimental import pallas as pl
from jax.experimental.pallas import tpu as pltpu

NEG = 0.01        # LeakyReLU slope inside head / EdgeBlock / tail
NEG2 = 0.2        # LeakyReLU slope after each EdgeConv
BN_SCALE = float(1.0 / np.sqrt(1.0 + 1e-5))   # eval-mode BatchNorm fold factor
MXU_DTYPE = jnp.bfloat16                       # weights pre-cast host-side


def leaky(y, slope):
    # max(y, slope*y) == LeakyReLU(slope) for 0 < slope < 1.
    return jnp.maximum(y, slope * y)


def mdot(a, b):
    """MXU matmul, bf16 inputs (weights already bf16), f32 accumulation."""
    return jnp.dot(a.astype(MXU_DTYPE), b.astype(MXU_DTYPE),
                   preferred_element_type=jnp.float32)


def fdot_tn(a, b):
    """f32 A @ B^T (contract last dims of both), f32 accumulation."""
    return lax.dot_general(a, b, (((1,), (1,)), ((), ())),
                           preferred_element_type=jnp.float32)


# --------------------------------------------------------------------------
# Head: conv(3+nz->128) + lrelu + conv(128->128) + lrelu.
# B folded into M (single grid step, M = B*N fills the MXU rows).
# --------------------------------------------------------------------------
def _head_kernel(x_ref, w1_ref, b1_ref, w2_ref, b2_ref, o_ref):
    y = leaky(mdot(x_ref[...], w1_ref[...]) + b1_ref[...], NEG)
    o_ref[...] = leaky(mdot(y, w2_ref[...]) + b2_ref[...], NEG)


def head_mlp(x, w1, b1, w2, b2):
    M, K = x.shape
    D1 = w1.shape[1]
    D2 = w2.shape[1]
    return pl.pallas_call(
        _head_kernel,
        out_shape=jax.ShapeDtypeStruct((M, D2), jnp.float32),
        grid=(1,),
        in_specs=[
            pl.BlockSpec((M, K), lambda i: (0, 0)),
            pl.BlockSpec((K, D1), lambda i: (0, 0)),
            pl.BlockSpec((1, D1), lambda i: (0, 0)),
            pl.BlockSpec((D1, D2), lambda i: (0, 0)),
            pl.BlockSpec((1, D2), lambda i: (0, 0)),
        ],
        out_specs=pl.BlockSpec((M, D2), lambda i: (0, 0)),
        compiler_params=pltpu.CompilerParams(dimension_semantics=("arbitrary",)),
    )(x, w1, b1, w2, b2)


# --------------------------------------------------------------------------
# Fused per-batch EdgeBlock (pdist + kNN + gather + conv_w + conv_x + softmax
# + conv_out[1,k]) + trailing LeakyReLU(0.2) + AdaptivePointNorm.
# --------------------------------------------------------------------------
def _edge_adain_kernel(k, feat_ref, style_ref,
                       w1w_ref, w1b_ref, w2w_ref, w2b_ref,
                       xcw_ref, xdw_ref, xb_ref, oww_ref, owb_ref,
                       gw_ref, gb_ref, bw_ref, bb_ref, o_ref):
    feat = feat_ref[0]                                   # [N, C] central features (f32)
    N = feat.shape[0]

    # ---- pairwise squared distances, diagonal = +inf (self excluded) ----
    gram = fdot_tn(feat, feat)                           # [N, N] f32
    row = lax.broadcasted_iota(jnp.int32, (N, N), 0)
    col = lax.broadcasted_iota(jnp.int32, (N, N), 1)
    eye = row == col
    colf = col.astype(jnp.float32)
    sq_col = jnp.sum(feat * feat, axis=-1, keepdims=True)                       # [N, 1]
    sq_row = jnp.sum(jnp.where(eye, gram, 0.0), axis=0, keepdims=True)          # [1, N]
    dist = sq_col + sq_row - 2.0 * gram
    dist = jnp.where(eye, jnp.inf, dist)

    # ---- iterative k-nearest selection -> stacked one-hot gather [k*N, N] ----
    onehots = []
    for _ in range(k):                                   # k is a compile-time constant
        dmin = jnp.min(dist, axis=-1, keepdims=True)                             # [N, 1]
        sel = jnp.min(jnp.where(dist <= dmin, colf, jnp.float32(N)),
                      axis=-1, keepdims=True)            # first argmin (ties -> low idx)
        hit = colf == sel                                # [N, N] one-hot row selector
        onehots.append(hit.astype(jnp.float32))
        dist = jnp.where(hit, jnp.inf, dist)
    onehot = jnp.concatenate(onehots, axis=0)            # [k*N, N]

    # neighbor gather as a matmul (kept f32 for exactness), diff = neighbor - central
    gathered = lax.dot_general(onehot, feat, (((1,), (0,)), ((), ())),
                               preferred_element_type=jnp.float32)               # [k*N, C]
    diff = gathered - jnp.concatenate([feat] * k, axis=0)                         # [k*N, C]

    # ---- conv_w (2 layers, BN folded) on diff; conv_x on (central, diff) ----
    h = leaky(mdot(diff, w1w_ref[...]) + w1b_ref[...], NEG)                       # [kN, F2]
    wlog = leaky(mdot(h, w2w_ref[...]) + w2b_ref[...], NEG)                       # [kN, Fo]
    xc = mdot(feat, xcw_ref[...]) + xb_ref[...]                                   # [N, Fo]
    xd = mdot(diff, xdw_ref[...])                                                 # [kN, Fo]
    xall = leaky(jnp.concatenate([xc] * k, axis=0) + xd, NEG)                     # [kN, Fo]

    Fo = xall.shape[-1]
    wlog = wlog.reshape(k, N, Fo)
    xall = xall.reshape(k, N, Fo)

    # softmax over the k neighbors (EUP reciprocal)
    m = jnp.max(wlog, axis=0)                                                     # [N, Fo]
    e = jnp.exp(wlog - m[None])                                                   # [k, N, Fo]
    inv = pl.reciprocal(jnp.sum(e, axis=0), approx=True)                          # [N, Fo]

    # conv_out with kernel [1, k]: contraction over (neighbor, channel) as k matmuls
    acc = mdot((e[0] * inv) * xall[0], oww_ref[0])
    for j in range(1, k):
        acc = acc + mdot((e[j] * inv) * xall[j], oww_ref[j])
    y = leaky(acc + owb_ref[...], NEG2)                  # EdgeConv output + lrelu(0.2)

    # ---- AdaptivePointNorm: style proj + InstanceNorm1d (no affine) + modulation ----
    st = style_ref[0]                                    # [N, S]
    gamma = mdot(st, gw_ref[...]) + gb_ref[...]          # [N, Fo]
    beta = mdot(st, bw_ref[...]) + bb_ref[...]
    mu = jnp.mean(y, axis=0, keepdims=True)
    var = jnp.mean(jnp.square(y - mu), axis=0, keepdims=True)
    o_ref[0] = gamma * ((y - mu) * lax.rsqrt(var + 1e-5)) + beta


def edge_adain(feat, style, p, k):
    """feat: [B, N, Fin], style: [B, N, S] -> [B, N, Fout]."""
    B, N, C = feat.shape
    S = style.shape[-1]
    F2 = p["w1_w"].shape[1]
    Fo = p["x_b"].shape[1]

    def wspec(shape):
        return pl.BlockSpec(shape, lambda b, _s=shape: (0,) * len(_s))

    return pl.pallas_call(
        functools.partial(_edge_adain_kernel, k),
        out_shape=jax.ShapeDtypeStruct((B, N, Fo), jnp.float32),
        grid=(B,),
        in_specs=[
            pl.BlockSpec((1, N, C), lambda b: (b, 0, 0)),
            pl.BlockSpec((1, N, S), lambda b: (b, 0, 0)),
            wspec((C, F2)), wspec((1, F2)),
            wspec((F2, Fo)), wspec((1, Fo)),
            wspec((C, Fo)), wspec((C, Fo)), wspec((1, Fo)),
            wspec((k, Fo, Fo)), wspec((1, Fo)),
            wspec((S, Fo)), wspec((1, Fo)),
            wspec((S, Fo)), wspec((1, Fo)),
        ],
        out_specs=pl.BlockSpec((1, N, Fo), lambda b: (b, 0, 0)),
        compiler_params=pltpu.CompilerParams(dimension_semantics=("parallel",)),
    )(feat, style,
      p["w1_w"], p["w1_b"], p["w2_w"], p["w2_b"],
      p["xc_w"], p["xd_w"], p["x_b"],
      p["out_w"], p["out_b"],
      p["g_w"], p["g_b"], p["b_w"], p["b_b"])


# --------------------------------------------------------------------------
# Fused global branch + tail: max-pool -> g1 -> g2 -> tail conv1(fg half)
# -> tail conv1(x2 half) -> conv2 -> conv3 -> tanh, output [B, 3, N].
# --------------------------------------------------------------------------
def _final_kernel(x_ref, g1w_ref, g1b_ref, g2w_ref, g2b_ref,
                  t1fw_ref, t1b_ref, t1xw_ref, t2w_ref, t2b_ref,
                  w3t_ref, b3_ref, o_ref):
    x2 = x_ref[0]                                                   # [N, 128]
    g = jnp.max(x2, axis=0, keepdims=True)                          # [1, 128] max over points
    hh = leaky(mdot(g, g1w_ref[...]) + g1b_ref[...], NEG)           # [1, 128]
    fg = leaky(mdot(hh, g2w_ref[...]) + g2b_ref[...], NEG)          # [1, 512]
    fgt = mdot(fg, t1fw_ref[...]) + t1b_ref[...]                    # [1, 256] conv1 fg half + bias
    y = leaky(mdot(x2, t1xw_ref[...]) + fgt, NEG)                   # [N, 256] conv1 x2 half
    y = leaky(mdot(y, t2w_ref[...]) + t2b_ref[...], NEG)            # [N, 64]
    # conv3 kept f32:  out[c, n] = sum_f w3t[c, f] * y[n, f]  -> channels-first [3, N]
    o = fdot_tn(w3t_ref[...], y)                                    # [3, N]
    o_ref[0] = jnp.tanh(o + b3_ref[...])


def final_stage(x2, p):
    B, N, C = x2.shape
    D1 = p["g1_w"].shape[1]
    D2 = p["g2_w"].shape[1]
    H1 = p["t1_fg_w"].shape[1]
    H2 = p["t2_w"].shape[1]

    def wspec(shape):
        return pl.BlockSpec(shape, lambda b, _s=shape: (0,) * len(_s))

    return pl.pallas_call(
        _final_kernel,
        out_shape=jax.ShapeDtypeStruct((B, 3, N), jnp.float32),
        grid=(B,),
        in_specs=[
            pl.BlockSpec((1, N, C), lambda b: (b, 0, 0)),
            wspec((C, D1)), wspec((1, D1)),
            wspec((D1, D2)), wspec((1, D2)),
            wspec((D2, H1)), wspec((1, H1)),
            wspec((C, H1)),
            wspec((H1, H2)), wspec((1, H2)),
            wspec((3, H2)), wspec((3, 1)),
        ],
        out_specs=pl.BlockSpec((1, 3, N), lambda b: (b, 0, 0)),
        compiler_params=pltpu.CompilerParams(dimension_semantics=("parallel",)),
    )(x2, p["g1_w"], p["g1_b"], p["g2_w"], p["g2_b"],
      p["t1_fg_w"], p["t1_b"], p["t1_x_w"],
      p["t2_w"], p["t2_b"], p["t3_wT"], p["t3_b"])


# --------------------------------------------------------------------------
# Full forward pass:  x [B,N,3], z [B,N,nz] -> [B,3,N]  (PyTorch convention)
# --------------------------------------------------------------------------
def generator_forward(params, x, z, k):
    B, N, _ = x.shape
    dim = params["head2_w"].shape[1]

    # style = head(cat([x, z]))  — single grid step on [B*N, 3+nz]
    style_in = jnp.concatenate([x, z], axis=-1).reshape(B * N, -1)
    style = head_mlp(style_in, params["head1_w"], params["head1_b"],
                     params["head2_w"], params["head2_b"]).reshape(B, N, dim)

    pc = x                                               # use_head=False
    x1 = edge_adain(pc, style, params["edge1"], k)       # EdgeConv1 + lrelu1 + adain1
    x2 = edge_adain(x1, style, params["edge2"], k)       # EdgeConv2 + lrelu2 + adain2
    return final_stage(x2, params)                       # global_conv + tail (off=False)


# --------------------------------------------------------------------------
# Deterministic synthetic parameters.  Matmul weights stored [Cin, Cout]
# (transposed vs. PyTorch) and pre-cast to bf16; biases f32 shaped (1, C);
# conv_x split into central/diff halves; tail conv1 split into fg/x2 halves;
# conv3 kept f32, stored pre-transposed [3, 64].
# --------------------------------------------------------------------------
def init_params(key, nz, k, dim=128):
    keys = iter(jax.random.split(key, 64))

    def wmat(shape, std=0.1, scale=1.0):
        v = jax.random.normal(next(keys), shape, jnp.float32) * (std * scale)
        return v.astype(MXU_DTYPE)                       # pre-cast: halves weight DMA

    def bias(n, std=0.01, scale=1.0, value=None):
        if value is not None:
            v = jnp.full((n,), value, jnp.float32)
        else:
            v = jax.random.normal(next(keys), (n,), jnp.float32) * (std * scale)
        return v.reshape(1, n)

    def edge_adain_params(Fin, Fout, style_dim):
        return {
            # conv_w: Conv2d(Fin,Fout/2,1)+BN, Conv2d(Fout/2,Fout,1)+BN (BN folded)
            "w1_w": wmat((Fin, Fout // 2), scale=BN_SCALE), "w1_b": bias(Fout // 2, scale=BN_SCALE),
            "w2_w": wmat((Fout // 2, Fout), scale=BN_SCALE), "w2_b": bias(Fout, scale=BN_SCALE),
            # conv_x: Conv2d(2Fin,Fout,1)+BN split into central/diff halves
            "xc_w": wmat((Fin, Fout), scale=BN_SCALE), "xd_w": wmat((Fin, Fout), scale=BN_SCALE),
            "x_b": bias(Fout, scale=BN_SCALE),
            # conv_out: Conv2d(Fout,Fout,[1,k]) stored as [k, Fin, Fout]
            "out_w": wmat((k, Fout, Fout)), "out_b": bias(Fout),
            # AdaptivePointNorm style conv: weight ~ N(0,1), gamma bias=1, beta bias=0
            "g_w": wmat((style_dim, Fout), std=1.0), "g_b": bias(Fout, value=1.0),
            "b_w": wmat((style_dim, Fout), std=1.0), "b_b": bias(Fout, value=0.0),
        }

    return {
        "head1_w": wmat((3 + nz, dim)), "head1_b": bias(dim),
        "head2_w": wmat((dim, dim)), "head2_b": bias(dim),
        "edge1": edge_adain_params(3, 64, dim),
        "edge2": edge_adain_params(64, dim, dim),
        # global_conv: Linear+BN (folded) x2
        "g1_w": wmat((dim, dim), scale=BN_SCALE), "g1_b": bias(dim, scale=BN_SCALE),
        "g2_w": wmat((dim, 512), scale=BN_SCALE), "g2_b": bias(512, scale=BN_SCALE),
        # tail conv1 split: fg half [512,256] and x2 half [128,256]
        "t1_fg_w": wmat((512, 256)), "t1_x_w": wmat((dim, 256)), "t1_b": bias(256),
        "t2_w": wmat((256, 64)), "t2_b": bias(64),
        # final conv3 kept f32, stored [3, 64]; bias [3, 1]
        "t3_wT": jax.random.normal(next(keys), (3, 64), jnp.float32) * 0.1,
        "t3_b": jax.random.normal(next(keys), (3, 1), jnp.float32) * 0.01,
    }


if __name__ == "__main__":
    B, N, nz, k = 2, 64, 32, 5           # opts.np=64, opts.nz=32, opts.nk=10 -> k=5
    key = jax.random.PRNGKey(0)
    kx, kz, kp = jax.random.split(key, 3)
    x = jax.random.normal(kx, (B, N, 3), jnp.float32)
    z = jax.random.normal(kz, (B, N, nz), jnp.float32)
    params = init_params(kp, nz, k)

    fwd = jax.jit(functools.partial(generator_forward, k=k))
    out = jax.block_until_ready(fwd(params, x, z))
    assert out.shape == (B, 3, N), out.shape
    assert bool(jnp.all(jnp.isfinite(out)))
    print("KERNEL_OK")
</pallas_src>

<mosaic_0001>
module attributes {stable_mosaic.version = 11 : i64} {
  func.func @_head_kernel(%arg0: i32, %arg1: memref<128x35xf32, #tpu.memory_space<vmem>>, %arg2: memref<35x128xbf16, #tpu.memory_space<vmem>>, %arg3: memref<1x128xf32, #tpu.memory_space<vmem>>, %arg4: memref<128x128xbf16, #tpu.memory_space<vmem>>, %arg5: memref<1x128xf32, #tpu.memory_space<vmem>>, %arg6: memref<128x128xf32, #tpu.memory_space<vmem>>) attributes {dimension_semantics = [#tpu.dimension_semantics<arbitrary>], iteration_bounds = array<i64: 1>, scalar_prefetch = 0 : i64, scratch_operands = 0 : i64, tpu.core_type = #tpu.core_type<tc>, window_params = [{pipeline_mode = #tpu.pipeline_mode<synchronous>, transform_indices = @transform_0, window_bounds = array<i64: 128, 35>}, {pipeline_mode = #tpu.pipeline_mode<synchronous>, transform_indices = @transform_1, window_bounds = array<i64: 35, 128>}, {pipeline_mode = #tpu.pipeline_mode<synchronous>, transform_indices = @transform_2, window_bounds = array<i64: 1, 128>}, {pipeline_mode = #tpu.pipeline_mode<synchronous>, transform_indices = @transform_3, window_bounds = array<i64: 128, 128>}, {pipeline_mode = #tpu.pipeline_mode<synchronous>, transform_indices = @transform_4, window_bounds = array<i64: 1, 128>}, {pipeline_mode = #tpu.pipeline_mode<synchronous>, transform_indices = @transform_5, window_bounds = array<i64: 128, 128>}]} {
    %c0 = arith.constant 0 : index
    %c0_0 = arith.constant 0 : index
    %0 = vector.load %arg1[%c0, %c0_0] : memref<128x35xf32, #tpu.memory_space<vmem>>, vector<128x35xf32>
    %c0_1 = arith.constant 0 : index
    %c0_2 = arith.constant 0 : index
    %1 = vector.load %arg2[%c0_1, %c0_2] : memref<35x128xbf16, #tpu.memory_space<vmem>>, vector<35x128xbf16>
    %2 = arith.truncf %0 : vector<128x35xf32> to vector<128x35xbf16>
    %cst = arith.constant dense<0.000000e+00> : vector<128x128xf32>
    %3 = tpu.matmul %2, %1, %cst {dimension_numbers = #tpu.dot_dimension_numbers<[1], [0], [0], [1], [0, 0, 1, 1], [], []>} : vector<128x35xbf16>, vector<35x128xbf16>, vector<128x128xf32> -> vector<128x128xf32>
    %c0_3 = arith.constant 0 : index
    %c0_4 = arith.constant 0 : index
    %4 = vector.load %arg3[%c0_3, %c0_4] : memref<1x128xf32, #tpu.memory_space<vmem>>, vector<1x128xf32>
    %5 = vector.broadcast %4 : vector<1x128xf32> to vector<128x128xf32>
    %6 = arith.addf %3, %5 : vector<128x128xf32>
    %cst_5 = arith.constant 0.00999999977 : f32
    %7 = vector.broadcast %cst_5 : f32 to vector<128x128xf32>
    %8 = arith.mulf %7, %6 : vector<128x128xf32>
    %9 = arith.maximumf %6, %8 : vector<128x128xf32>
    %c0_6 = arith.constant 0 : index
    %c0_7 = arith.constant 0 : index
    %10 = vector.load %arg4[%c0_6, %c0_7] : memref<128x128xbf16, #tpu.memory_space<vmem>>, vector<128x128xbf16>
    %11 = arith.truncf %9 : vector<128x128xf32> to vector<128x128xbf16>
    %cst_8 = arith.constant dense<0.000000e+00> : vector<128x128xf32>
    %12 = tpu.matmul %11, %10, %cst_8 {dimension_numbers = #tpu.dot_dimension_numbers<[1], [0], [0], [1], [0, 0, 1, 1], [], []>} : vector<128x128xbf16>, vector<128x128xbf16>, vector<128x128xf32> -> vector<128x128xf32>
    %c0_9 = arith.constant 0 : index
    %c0_10 = arith.constant 0 : index
    %13 = vector.load %arg5[%c0_9, %c0_10] : memref<1x128xf32, #tpu.memory_space<vmem>>, vector<1x128xf32>
    %14 = vector.broadcast %13 : vector<1x128xf32> to vector<128x128xf32>
    %15 = arith.addf %12, %14 : vector<128x128xf32>
    %cst_11 = arith.constant 0.00999999977 : f32
    %16 = vector.broadcast %cst_11 : f32 to vector<128x128xf32>
    %17 = arith.mulf %16, %15 : vector<128x128xf32>
    %18 = arith.maximumf %15, %17 : vector<128x128xf32>
    %c0_12 = arith.constant 0 : index
    %c0_13 = arith.constant 0 : index
    %19 = vector.load %arg6[%c0_12, %c0_13] : memref<128x128xf32, #tpu.memory_space<vmem>>, vector<128x128xf32>
    tpu.vector_store %arg6[%c0_12, %c0_13], %18 {strides = array<i32>} : memref<128x128xf32, #tpu.memory_space<vmem>>, vector<128x128xf32>,
    return
  }
  func.func @transform_0(%arg0: i32) -> (i32, i32) {
    %c0_i32 = arith.constant 0 : i32
    %c0_i32_0 = arith.constant 0 : i32
    %c0_i32_1 = arith.constant 0 : i32
    return %c0_i32, %c0_i32_0 : i32, i32
  }
  func.func @transform_1(%arg0: i32) -> (i32, i32) {
    %c0_i32 = arith.constant 0 : i32
    %c0_i32_0 = arith.constant 0 : i32
    %c0_i32_1 = arith.constant 0 : i32
    return %c0_i32, %c0_i32_0 : i32, i32
  }
  func.func @transform_2(%arg0: i32) -> (i32, i32) {
    %c0_i32 = arith.constant 0 : i32
    %c0_i32_0 = arith.constant 0 : i32
    %c0_i32_1 = arith.constant 0 : i32
    return %c0_i32, %c0_i32_0 : i32, i32
  }
  func.func @transform_3(%arg0: i32) -> (i32, i32) {
    %c0_i32 = arith.constant 0 : i32
    %c0_i32_0 = arith.constant 0 : i32
    %c0_i32_1 = arith.constant 0 : i32
    return %c0_i32, %c0_i32_0 : i32, i32
  }
  func.func @transform_4(%arg0: i32) -> (i32, i32) {
    %c0_i32 = arith.constant 0 : i32
    %c0_i32_0 = arith.constant 0 : i32
    %c0_i32_1 = arith.constant 0 : i32
    return %c0_i32, %c0_i32_0 : i32, i32
  }
  func.func @transform_5(%arg0: i32) -> (i32, i32) {
    %c0_i32 = arith.constant 0 : i32
    %c0_i32_0 = arith.constant 0 : i32
    %c0_i32_1 = arith.constant 0 : i32
    return %c0_i32, %c0_i32_0 : i32, i32
  }
}

module attributes {stable_mosaic.version = 11 : i64} {
  func.func @_edge_adain_kernel(%arg0: i32, %arg1: memref<1x64x3xf32, #tpu.memory_space<vmem>>, %arg2: memref<1x64x128xf32, #tpu.memory_space<vmem>>, %arg3: memref<3x32xbf16, #tpu.memory_space<vmem>>, %arg4: memref<1x32xf32, #tpu.memory_space<vmem>>, %arg5: memref<32x64xbf16, #tpu.memory_space<vmem>>, %arg6: memref<1x64xf32, #tpu.memory_space<vmem>>, %arg7: memref<3x64xbf16, #tpu.memory_space<vmem>>, %arg8: memref<3x64xbf16, #tpu.memory_space<vmem>>, %arg9: memref<1x64xf32, #tpu.memory_space<vmem>>, %arg10: memref<5x64x64xbf16, #tpu.memory_space<vmem>>, %arg11: memref<1x64xf32, #tpu.memory_space<vmem>>, %arg12: memref<128x64xbf16, #tpu.memory_space<vmem>>, %arg13: memref<1x64xf32, #tpu.memory_space<vmem>>, %arg14: memref<128x64xbf16, #tpu.memory_space<vmem>>, %arg15: memref<1x64xf32, #tpu.memory_space<vmem>>, %arg16: memref<1x64x64xf32, #tpu.memory_space<vmem>>) attributes {dimension_semantics = [#tpu.dimension_semantics<parallel>], iteration_bounds = array<i64: 2>, scalar_prefetch = 0 : i64, scratch_operands = 0 : i64, tpu.core_type = #tpu.core_type<tc>, window_params = [{transform_indices = @transform_0, window_bounds = array<i64: 1, 64, 3>}, {transform_indices = @transform_1, window_bounds = array<i64: 1, 64, 128>}, {pipeline_mode = #tpu.pipeline_mode<synchronous>, transform_indices = @transform_2, window_bounds = array<i64: 3, 32>}, {pipeline_mode = #tpu.pipeline_mode<synchronous>, transform_indices = @transform_3, window_bounds = array<i64: 1, 32>}, {pipeline_mode = #tpu.pipeline_mode<synchronous>, transform_indices = @transform_4, window_bounds = array<i64: 32, 64>}, {pipeline_mode = #tpu.pipeline_mode<synchronous>, transform_indices = @transform_5, window_bounds = array<i64: 1, 64>}, {pipeline_mode = #tpu.pipeline_mode<synchronous>, transform_indices = @transform_6, window_bounds = array<i64: 3, 64>}, {pipeline_mode = #tpu.pipeline_mode<synchronous>, transform_indices = @transform_7, window_bounds = array<i64: 3, 64>}, {pipeline_mode = #tpu.pipeline_mode<synchronous>, transform_indices = @transform_8, window_bounds = array<i64: 1, 64>}, {pipeline_mode = #tpu.pipeline_mode<synchronous>, transform_indices = @transform_9, window_bounds = array<i64: 5, 64, 64>}, {pipeline_mode = #tpu.pipeline_mode<synchronous>, transform_indices = @transform_10, window_bounds = array<i64: 1, 64>}, {pipeline_mode = #tpu.pipeline_mode<synchronous>, transform_indices = @transform_11, window_bounds = array<i64: 128, 64>}, {pipeline_mode = #tpu.pipeline_mode<synchronous>, transform_indices = @transform_12, window_bounds = array<i64: 1, 64>}, {pipeline_mode = #tpu.pipeline_mode<synchronous>, transform_indices = @transform_13, window_bounds = array<i64: 128, 64>}, {pipeline_mode = #tpu.pipeline_mode<synchronous>, transform_indices = @transform_14, window_bounds = array<i64: 1, 64>}, {transform_indices = @transform_15, window_bounds = array<i64: 1, 64, 64>}]} {
    %c0 = arith.constant 0 : index
    %c0_0 = arith.constant 0 : index
    %c0_1 = arith.constant 0 : index
    %0 = vector.load %arg1[%c0, %c0_0, %c0_1] : memref<1x64x3xf32, #tpu.memory_space<vmem>>, vector<1x64x3xf32>
    %1 = vector.shape_cast %0 : vector<1x64x3xf32> to vector<64x3xf32>
    %cst = arith.constant dense<0.000000e+00> : vector<64x64xf32>
    %2 = tpu.matmul %1, %1, %cst {dimension_numbers = #tpu.dot_dimension_numbers<[1], [1], [0], [0], [0, 0, 1, 0], [], []>} : vector<64x3xf32>, vector<64x3xf32>, vector<64x64xf32> -> vector<64x64xf32>
    %3 = tpu.iota {dimensions = array<i32: 0>} : vector<64x64xi32>
    %4 = tpu.iota {dimensions = array<i32: 1>} : vector<64x64xi32>
    %5 = arith.cmpi eq, %3, %4 : vector<64x64xi32>
    %6 = arith.sitofp %4 : vector<64x64xi32> to vector<64x64xf32>
    %7 = arith.mulf %1, %1 : vector<64x3xf32>
    %cst_2 = arith.constant dense<0.000000e+00> : vector<64xf32>
    %8 = vector.multi_reduction <add>, %7, %cst_2 [1] : vector<64x3xf32> to vector<64xf32>
    %9 = vector.shape_cast %8 : vector<64xf32> to vector<64x1xf32>
    %cst_3 = arith.constant 0.000000e+00 : f32
    %10 = vector.broadcast %cst_3 : f32 to vector<64x64xf32>
    %11 = arith.select %5, %2, %10 : vector<64x64xi1>, vector<64x64xf32>
    %cst_4 = arith.constant dense<0.000000e+00> : vector<64xf32>
    %12 = vector.multi_reduction <add>, %11, %cst_4 [0] : vector<64x64xf32> to vector<64xf32>
    %13 = vector.shape_cast %12 : vector<64xf32> to vector<1x64xf32>
    %14 = vector.broadcast %9 : vector<64x1xf32> to vector<64x64xf32>
    %15 = vector.broadcast %13 : vector<1x64xf32> to vector<64x64xf32>
    %16 = arith.addf %14, %15 : vector<64x64xf32>
    %cst_5 = arith.constant 2.000000e+00 : f32
    %17 = vector.broadcast %cst_5 : f32 to vector<64x64xf32>
    %18 = arith.mulf %17, %2 : vector<64x64xf32>
    %19 = arith.subf %16, %18 : vector<64x64xf32>
    %cst_6 = arith.constant 0x7F800000 : f32
    %20 = vector.broadcast %cst_6 : f32 to vector<64x64xf32>
    %21 = arith.select %5, %20, %19 : vector<64x64xi1>, vector<64x64xf32>
    %cst_7 = arith.constant dense<0x7F800000> : vector<64xf32>
    %22 = vector.multi_reduction <minimumf>, %21, %cst_7 [1] : vector<64x64xf32> to vector<64xf32>
    %23 = vector.shape_cast %22 : vector<64xf32> to vector<64x1xf32>
    %24 = vector.broadcast %23 : vector<64x1xf32> to vector<64x64xf32>
    %25 = arith.cmpf ole, %21, %24 : vector<64x64xf32>
    %cst_8 = arith.constant 6.400000e+01 : f32
    %26 = vector.broadcast %cst_8 : f32 to vector<64x64xf32>
    %27 = arith.select %25, %6, %26 : vector<64x64xi1>, vector<64x64xf32>
    %cst_9 = arith.constant dense<0x7F800000> : vector<64xf32>
    %28 = vector.multi_reduction <minimumf>, %27, %cst_9 [1] : vector<64x64xf32> to vector<64xf32>
    %29 = vector.shape_cast %28 : vector<64xf32> to vector<64x1xf32>
    %30 = vector.broadcast %29 : vector<64x1xf32> to vector<64x64xf32>
    %31 = arith.cmpf oeq, %6, %30 : vector<64x64xf32>
    %32 = arith.extui %31 : vector<64x64xi1> to vector<64x64xi32>
    %33 = arith.sitofp %32 : vector<64x64xi32> to vector<64x64xf32>
    %cst_10 = arith.constant 0x7F800000 : f32
    %34 = vector.broadcast %cst_10 : f32 to vector<64x64xf32>
    %35 = arith.select %31, %34, %21 : vector<64x64xi1>, vector<64x64xf32>
    %cst_11 = arith.constant dense<0x7F800000> : vector<64xf32>
    %36 = vector.multi_reduction <minimumf>, %35, %cst_11 [1] : vector<64x64xf32> to vector<64xf32>
    %37 = vector.shape_cast %36 : vector<64xf32> to vector<64x1xf32>
    %38 = vector.broadcast %37 : vector<64x1xf32> to vector<64x64xf32>
    %39 = arith.cmpf ole, %35, %38 : vector<64x64xf32>
    %cst_12 = arith.constant 6.400000e+01 : f32
    %40 = vector.broadcast %cst_12 : f32 to vector<64x64xf32>
    %41 = arith.select %39, %6, %40 : vector<64x64xi1>, vector<64x64xf32>
    %cst_13 = arith.constant dense<0x7F800000> : vector<64xf32>
    %42 = vector.multi_reduction <minimumf>, %41, %cst_13 [1] : vector<64x64xf32> to vector<64xf32>
    %43 = vector.shape_cast %42 : vector<64xf32> to vector<64x1xf32>
    %44 = vector.broadcast %43 : vector<64x1xf32> to vector<64x64xf32>
    %45 = arith.cmpf oeq, %6, %44 : vector<64x64xf32>
    %46 = arith.extui %45 : vector<64x64xi1> to vector<64x64xi32>
    %47 = arith.sitofp %46 : vector<64x64xi32> to vector<64x64xf32>
    %cst_14 = arith.constant 0x7F800000 : f32
    %48 = vector.broadcast %cst_14 : f32 to vector<64x64xf32>
    %49 = arith.select %45, %48, %35 : vector<64x64xi1>, vector<64x64xf32>
    %cst_15 = arith.constant dense<0x7F800000> : vector<64xf32>
    %50 = vector.multi_reduction <minimumf>, %49, %cst_15 [1] : vector<64x64xf32> to vector<64xf32>
    %51 = vector.shape_cast %50 : vector<64xf32> to vector<64x1xf32>
    %52 = vector.broadcast %51 : vector<64x1xf32> to vector<64x64xf32>
    %53 = arith.cmpf ole, %49, %52 : vector<64x64xf32>
    %cst_16 = arith.constant 6.400000e+01 : f32
    %54 = vector.broadcast %cst_16 : f32 to vector<64x64xf32>
    %55 = arith.select %53, %6, %54 : vector<64x64xi1>, vector<64x64xf32>
    %cst_17 = arith.constant dense<0x7F800000> : vector<64xf32>
    %56 = vector.multi_reduction <minimumf>, %55, %cst_17 [1] : vector<64x64xf32> to vector<64xf32>
    %57 = vector.shape_cast %56 : vector<64xf32> to vector<64x1xf32>
    %58 = vector.broadcast %57 : vector<64x1xf32> to vector<64x64xf32>
    %59 = arith.cmpf oeq, %6, %58 : vector<64x64xf32>
    %60 = arith.extui %59 : vector<64x64xi1> to vector<64x64xi32>
    %61 = arith.sitofp %60 : vector<64x64xi32> to vector<64x64xf32>
    %cst_18 = arith.constant 0x7F800000 : f32
    %62 = vector.broadcast %cst_18 : f32 to vector<64x64xf32>
    %63 = arith.select %59, %62, %49 : vector<64x64xi1>, vector<64x64xf32>
    %cst_19 = arith.constant dense<0x7F800000> : vector<64xf32>
    %64 = vector.multi_reduction <minimumf>, %63, %cst_19 [1] : vector<64x64xf32> to vector<64xf32>
    %65 = vector.shape_cast %64 : vector<64xf32> to vector<64x1xf32>
    %66 = vector.broadcast %65 : vector<64x1xf32> to vector<64x64xf32>
    %67 = arith.cmpf ole, %63, %66 : vector<64x64xf32>
    %cst_20 = arith.constant 6.400000e+01 : f32
    %68 = vector.broadcast %cst_20 : f32 to vector<64x64xf32>
    %69 = arith.select %67, %6, %68 : vector<64x64xi1>, vector<64x64xf32>
    %cst_21 = arith.constant dense<0x7F800000> : vector<64xf32>
    %70 = vector.multi_reduction <minimumf>, %69, %cst_21 [1] : vector<64x64xf32> to vector<64xf32>
    %71 = vector.shape_cast %70 : vector<64xf32> to vector<64x1xf32>
    %72 = vector.broadcast %71 : vector<64x1xf32> to vector<64x64xf32>
    %73 = arith.cmpf oeq, %6, %72 : vector<64x64xf32>
    %74 = arith.extui %73 : vector<64x64xi1> to vector<64x64xi32>
    %75 = arith.sitofp %74 : vector<64x64xi32> to vector<64x64xf32>
    %cst_22 = arith.constant 0x7F800000 : f32
    %76 = vector.broadcast %cst_22 : f32 to vector<64x64xf32>
    %77 = arith.select %73, %76, %63 : vector<64x64xi1>, vector<64x64xf32>
    %cst_23 = arith.constant dense<0x7F800000> : vector<64xf32>
    %78 = vector.multi_reduction <minimumf>, %77, %cst_23 [1] : vector<64x64xf32> to vector<64xf32>
    %79 = vector.shape_cast %78 : vector<64xf32> to vector<64x1xf32>
    %80 = vector.broadcast %79 : vector<64x1xf32> to vector<64x64xf32>
    %81 = arith.cmpf ole, %77, %80 : vector<64x64xf32>
    %cst_24 = arith.constant 6.400000e+01 : f32
    %82 = vector.broadcast %cst_24 : f32 to vector<64x64xf32>
    %83 = arith.select %81, %6, %82 : vector<64x64xi1>, vector<64x64xf32>
    %cst_25 = arith.constant dense<0x7F800000> : vector<64xf32>
    %84 = vector.multi_reduction <minimumf>, %83, %cst_25 [1] : vector<64x64xf32> to vector<64xf32>
    %85 = vector.shape_cast %84 : vector<64xf32> to vector<64x1xf32>
    %86 = vector.broadcast %85 : vector<64x1xf32> to vector<64x64xf32>
    %87 = arith.cmpf oeq, %6, %86 : vector<64x64xf32>
    %88 = arith.extui %87 : vector<64x64xi1> to vector<64x64xi32>
    %89 = arith.sitofp %88 : vector<64x64xi32> to vector<64x64xf32>
    %90 = tpu.concatenate %33, %47, %61, %75, %89 in 0 : vector<64x64xf32>, vector<64x64xf32>, vector<64x64xf32>, vector<64x64xf32>, vector<64x64xf32> -> vector<320x64xf32>
    %cst_26 = arith.constant dense<0.000000e+00> : vector<320x3xf32>
    %91 = tpu.matmul %90, %1, %cst_26 {dimension_numbers = #tpu.dot_dimension_numbers<[1], [0], [0], [1], [0, 0, 1, 1], [], []>} : vector<320x64xf32>, vector<64x3xf32>, vector<320x3xf32> -> vector<320x3xf32>
    %92 = tpu.concatenate %1, %1, %1, %1, %1 in 0 : vector<64x3xf32>, vector<64x3xf32>, vector<64x3xf32>, vector<64x3xf32>, vector<64x3xf32> -> vector<320x3xf32>
    %93 = arith.subf %91, %92 : vector<320x3xf32>
    %c0_27 = arith.constant 0 : index
    %c0_28 = arith.constant 0 : index
    %94 = vector.load %arg3[%c0_27, %c0_28] : memref<3x32xbf16, #tpu.memory_space<vmem>>, vector<3x32xbf16>
    %95 = arith.truncf %93 : vector<320x3xf32> to vector<320x3xbf16>
    %cst_29 = arith.constant dense<0.000000e+00> : vector<320x32xf32>
    %96 = tpu.matmul %95, %94, %cst_29 {dimension_numbers = #tpu.dot_dimension_numbers<[1], [0], [0], [1], [0, 0, 1, 1], [], []>} : vector<320x3xbf16>, vector<3x32xbf16>, vector<320x32xf32> -> vector<320x32xf32>
    %c0_30 = arith.constant 0 : index
    %c0_31 = arith.constant 0 : index
    %97 = vector.load %arg4[%c0_30, %c0_31] : memref<1x32xf32, #tpu.memory_space<vmem>>, vector<1x32xf32>
    %98 = vector.broadcast %97 : vector<1x32xf32> to vector<320x32xf32>
    %99 = arith.addf %96, %98 : vector<320x32xf32>
    %cst_32 = arith.constant 0.00999999977 : f32
    %100 = vector.broadcast %cst_32 : f32 to vector<320x32xf32>
    %101 = arith.mulf %100, %99 : vector<320x32xf32>
    %102 = arith.maximumf %99, %101 : vector<320x32xf32>
    %c0_33 = arith.constant 0 : index
    %c0_34 = arith.constant 0 : index
    %103 = vector.load %arg5[%c0_33, %c0_34] : memref<32x64xbf16, #tpu.memory_space<vmem>>, vector<32x64xbf16>
    %104 = arith.truncf %102 : vector<320x32xf32> to vector<320x32xbf16>
    %cst_35 = arith.constant dense<0.000000e+00> : vector<320x64xf32>
    %105 = tpu.matmul %104, %103, %cst_35 {dimension_numbers = #tpu.dot_dimension_numbers<[1], [0], [0], [1], [0, 0, 1, 1], [], []>} : vector<320x32xbf16>, vector<32x64xbf16>, vector<320x64xf32> -> vector<320x64xf32>
    %c0_36 = arith.constant 0 : index
    %c0_37 = arith.constant 0 : index
    %106 = vector.load %arg6[%c0_36, %c0_37] : memref<1x64xf32, #tpu.memory_space<vmem>>, vector<1x64xf32>
    %107 = vector.broadcast %106 : vector<1x64xf32> to vector<320x64xf32>
    %108 = arith.addf %105, %107 : vector<320x64xf32>
    %cst_38 = arith.constant 0.00999999977 : f32
    %109 = vector.broadcast %cst_38 : f32 to vector<320x64xf32>
    %110 = arith.mulf %109, %108 : vector<320x64xf32>
    %111 = arith.maximumf %108, %110 : vector<320x64xf32>
    %c0_39 = arith.constant 0 : index
    %c0_40 = arith.constant 0 : index
    %112 = vector.load %arg7[%c0_39, %c0_40] : memref<3x64xbf16, #tpu.memory_space<vmem>>, vector<3x64xbf16>
    %113 = arith.truncf %1 : vector<64x3xf32> to vector<64x3xbf16>
    %cst_41 = arith.constant dense<0.000000e+00> : vector<64x64xf32>
    %114 = tpu.matmul %113, %112, %cst_41 {dimension_numbers = #tpu.dot_dimension_numbers<[1], [0], [0], [1], [0, 0, 1, 1], [], []>} : vector<64x3xbf16>, vector<3x64xbf16>, vector<64x64xf32> -> vector<64x64xf32>
    %c0_42 = arith.constant 0 : index
    %c0_43 = arith.constant 0 : index
    %115 = vector.load %arg9[%c0_42, %c0_43] : memref<1x64xf32, #tpu.memory_space<vmem>>, vector<1x64xf32>
    %116 = vector.broadcast %115 : vector<1x64xf32> to vector<64x64xf32>
    %117 = arith.addf %114, %116 : vector<64x64xf32>
    %c0_44 = arith.constant 0 : index
    %c0_45 = arith.constant 0 : index
    %118 = vector.load %arg8[%c0_44, %c0_45] : memref<3x64xbf16, #tpu.memory_space<vmem>>, vector<3x64xbf16>
    %119 = arith.truncf %93 : vector<320x3xf32> to vector<320x3xbf16>
    %cst_46 = arith.constant dense<0.000000e+00> : vector<320x64xf32>
    %120 = tpu.matmul %119, %118, %cst_46 {dimension_numbers = #tpu.dot_dimension_numbers<[1], [0], [0], [1], [0, 0, 1, 1], [], []>} : vector<320x3xbf16>, vector<3x64xbf16>, vector<320x64xf32> -> vector<320x64xf32>
    %121 = tpu.concatenate %117, %117, %117, %117, %117 in 0 : vector<64x64xf32>, vector<64x64xf32>, vector<64x64xf32>, vector<64x64xf32>, vector<64x64xf32> -> vector<320x64xf32>
    %122 = arith.addf %121, %120 : vector<320x64xf32>
    %cst_47 = arith.constant 0.00999999977 : f32
    %123 = vector.broadcast %cst_47 : f32 to vector<320x64xf32>
    %124 = arith.mulf %123, %122 : vector<320x64xf32>
    %125 = arith.maximumf %122, %124 : vector<320x64xf32>
    %126 = vector.shape_cast %111 : vector<320x64xf32> to vector<5x64x64xf32>
    %127 = vector.shape_cast %125 : vector<320x64xf32> to vector<5x64x64xf32>
    %cst_48 = arith.constant dense<0xFF800000> : vector<64x64xf32>
    %128 = vector.multi_reduction <maximumf>, %126, %cst_48 [0] : vector<5x64x64xf32> to vector<64x64xf32>
    %129 = vector.shape_cast %128 : vector<64x64xf32> to vector<1x64x64xf32>
    %130 = vector.broadcast %129 : vector<1x64x64xf32> to vector<5x64x64xf32>
    %131 = arith.subf %126, %130 : vector<5x64x64xf32>
    %132 = math.exp %131 : vector<5x64x64xf32>
    %cst_49 = arith.constant dense<0.000000e+00> : vector<64x64xf32>
    %133 = vector.multi_reduction <add>, %132, %cst_49 [0] : vector<5x64x64xf32> to vector<64x64xf32>
    %134 = tpu.reciprocal %133 {approx = true} : vector<64x64xf32> -> vector<64x64xf32>
    %135 = vector.extract_strided_slice %132 {offsets = [0, 0, 0], sizes = [1, 64, 64], strides = [1, 1, 1]} : vector<5x64x64xf32> to vector<1x64x64xf32>
    %136 = vector.shape_cast %135 : vector<1x64x64xf32> to vector<64x64xf32>
    %137 = arith.mulf %136, %134 : vector<64x64xf32>
    %138 = vector.extract_strided_slice %127 {offsets = [0, 0, 0], sizes = [1, 64, 64], strides = [1, 1, 1]} : vector<5x64x64xf32> to vector<1x64x64xf32>
    %139 = vector.shape_cast %138 : vector<1x64x64xf32> to vector<64x64xf32>
    %140 = arith.mulf %137, %139 : vector<64x64xf32>
    %c0_50 = arith.constant 0 : index
    %c0_51 = arith.constant 0 : index
    %c0_52 = arith.constant 0 : index
    %141 = vector.load %arg10[%c0_50, %c0_51, %c0_52] : memref<5x64x64xbf16, #tpu.memory_space<vmem>>, vector<1x64x64xbf16>
    %142 = vector.shape_cast %141 : vector<1x64x64xbf16> to vector<64x64xbf16>
    %143 = arith.truncf %140 : vector<64x64xf32> to vector<64x64xbf16>
    %cst_53 = arith.constant dense<0.000000e+00> : vector<64x64xf32>
    %144 = tpu.matmul %143, %142, %cst_53 {dimension_numbers = #tpu.dot_dimension_numbers<[1], [0], [0], [1], [0, 0, 1, 1], [], []>} : vector<64x64xbf16>, vector<64x64xbf16>, vector<64x64xf32> -> vector<64x64xf32>
    %145 = vector.extract_strided_slice %132 {offsets = [1, 0, 0], sizes = [1, 64, 64], strides = [1, 1, 1]} : vector<5x64x64xf32> to vector<1x64x64xf32>
    %146 = vector.shape_cast %145 : vector<1x64x64xf32> to vector<64x64xf32>
    %147 = arith.mulf %146, %134 : vector<64x64xf32>
    %148 = vector.extract_strided_slice %127 {offsets = [1, 0, 0], sizes = [1, 64, 64], strides = [1, 1, 1]} : vector<5x64x64xf32> to vector<1x64x64xf32>
    %149 = vector.shape_cast %148 : vector<1x64x64xf32> to vector<64x64xf32>
    %150 = arith.mulf %147, %149 : vector<64x64xf32>
    %c1 = arith.constant 1 : index
    %c0_54 = arith.constant 0 : index
    %c0_55 = arith.constant 0 : index
    %151 = vector.load %arg10[%c1, %c0_54, %c0_55] : memref<5x64x64xbf16, #tpu.memory_space<vmem>>, vector<1x64x64xbf16>
    %152 = vector.shape_cast %151 : vector<1x64x64xbf16> to vector<64x64xbf16>
    %153 = arith.truncf %150 : vector<64x64xf32> to vector<64x64xbf16>
    %cst_56 = arith.constant dense<0.000000e+00> : vector<64x64xf32>
    %154 = tpu.matmul %153, %152, %cst_56 {dimension_numbers = #tpu.dot_dimension_numbers<[1], [0], [0], [1], [0, 0, 1, 1], [], []>} : vector<64x64xbf16>, vector<64x64xbf16>, vector<64x64xf32> -> vector<64x64xf32>
    %155 = arith.addf %144, %154 : vector<64x64xf32>
    %156 = vector.extract_strided_slice %132 {offsets = [2, 0, 0], sizes = [1, 64, 64], strides = [1, 1, 1]} : vector<5x64x64xf32> to vector<1x64x64xf32>
    %157 = vector.shape_cast %156 : vector<1x64x64xf32> to vector<64x64xf32>
    %158 = arith.mulf %157, %134 : vector<64x64xf32>
    %159 = vector.extract_strided_slice %127 {offsets = [2, 0, 0], sizes = [1, 64, 64], strides = [1, 1, 1]} : vector<5x64x64xf32> to vector<1x64x64xf32>
    %160 = vector.shape_cast %159 : vector<1x64x64xf32> to vector<64x64xf32>
    %161 = arith.mulf %158, %160 : vector<64x64xf32>
    %c2 = arith.constant 2 : index
    %c0_57 = arith.constant 0 : index
    %c0_58 = arith.constant 0 : index
    %162 = vector.load %arg10[%c2, %c0_57, %c0_58] : memref<5x64x64xbf16, #tpu.memory_space<vmem>>, vector<1x64x64xbf16>
    %163 = vector.shape_cast %162 : vector<1x64x64xbf16> to vector<64x64xbf16>
    %164 = arith.truncf %161 : vector<64x64xf32> to vector<64x64xbf16>
    %cst_59 = arith.constant dense<0.000000e+00> : vector<64x64xf32>
    %165 = tpu.matmul %164, %163, %cst_59 {dimension_numbers = #tpu.dot_dimension_numbers<[1], [0], [0], [1], [0, 0, 1, 1], [], []>} : vector<64x64xbf16>, vector<64x64xbf16>, vector<64x64xf32> -> vector<64x64xf32>
    %166 = arith.addf %155, %165 : vector<64x64xf32>
    %167 = vector.extract_strided_slice %132 {offsets = [3, 0, 0], sizes = [1, 64, 64], strides = [1, 1, 1]} : vector<5x64x64xf32> to vector<1x64x64xf32>
    %168 = vector.shape_cast %167 : vector<1x64x64xf32> to vector<64x64xf32>
    %169 = arith.mulf %168, %134 : vector<64x64xf32>
    %170 = vector.extract_strided_slice %127 {offsets = [3, 0, 0], sizes = [1, 64, 64], strides = [1, 1, 1]} : vector<5x64x64xf32> to vector<1x64x64xf32>
    %171 = vector.shape_cast %170 : vector<1x64x64xf32> to vector<64x64xf32>
    %172 = arith.mulf %169, %171 : vector<64x64xf32>
    %c3 = arith.constant 3 : index
    %c0_60 = arith.constant 0 : index
    %c0_61 = arith.constant 0 : index
    %173 = vector.load %arg10[%c3, %c0_60, %c0_61] : memref<5x64x64xbf16, #tpu.memory_space<vmem>>, vector<1x64x64xbf16>
    %174 = vector.shape_cast %173 : vector<1x64x64xbf16> to vector<64x64xbf16>
    %175 = arith.truncf %172 : vector<64x64xf32> to vector<64x64xbf16>
    %cst_62 = arith.constant dense<0.000000e+00> : vector<64x64xf32>
    %176 = tpu.matmul %175, %174, %cst_62 {dimension_numbers = #tpu.dot_dimension_numbers<[1], [0], [0], [1], [0, 0, 1, 1], [], []>} : vector<64x64xbf16>, vector<64x64xbf16>, vector<64x64xf32> -> vector<64x64xf32>
    %177 = arith.addf %166, %176 : vector<64x64xf32>
    %178 = vector.extract_strided_slice %132 {offsets = [4, 0, 0], sizes = [1, 64, 64], strides = [1, 1, 1]} : vector<5x64x64xf32> to vector<1x64x64xf32>
    %179 = vector.shape_cast %178 : vector<1x64x64xf32> to vector<64x64xf32>
    %180 = arith.mulf %179, %134 : vector<64x64xf32>
    %181 = vector.extract_strided_slice %127 {offsets = [4, 0, 0], sizes = [1, 64, 64], strides = [1, 1, 1]} : vector<5x64x64xf32> to vector<1x64x64xf32>
    %182 = vector.shape_cast %181 : vector<1x64x64xf32> to vector<64x64xf32>
    %183 = arith.mulf %180, %182 : vector<64x64xf32>
    %c4 = arith.constant 4 : index
    %c0_63 = arith.constant 0 : index
    %c0_64 = arith.constant 0 : index
    %184 = vector.load %arg10[%c4, %c0_63, %c0_64] : memref<5x64x64xbf16, #tpu.memory_space<vmem>>, vector<1x64x64xbf16>
    %185 = vector.shape_cast %184 : vector<1x64x64xbf16> to vector<64x64xbf16>
    %186 = arith.truncf %183 : vector<64x64xf32> to vector<64x64xbf16>
    %cst_65 = arith.constant dense<0.000000e+00> : vector<64x64xf32>
    %187 = tpu.matmul %186, %185, %cst_65 {dimension_numbers = #tpu.dot_dimension_numbers<[1], [0], [0], [1], [0, 0, 1, 1], [], []>} : vector<64x64xbf16>, vector<64x64xbf16>, vector<64x64xf32> -> vector<64x64xf32>
    %188 = arith.addf %177, %187 : vector<64x64xf32>
    %c0_66 = arith.constant 0 : index
    %c0_67 = arith.constant 0 : index
    %189 = vector.load %arg11[%c0_66, %c0_67] : memref<1x64xf32, #tpu.memory_space<vmem>>, vector<1x64xf32>
    %190 = vector.broadcast %189 : vector<1x64xf32> to vector<64x64xf32>
    %191 = arith.addf %188, %190 : vector<64x64xf32>
    %cst_68 = arith.constant 2.000000e-01 : f32
    %192 = vector.broadcast %cst_68 : f32 to vector<64x64xf32>
    %193 = arith.mulf %192, %191 : vector<64x64xf32>
    %194 = arith.maximumf %191, %193 : vector<64x64xf32>
    %c0_69 = arith.constant 0 : index
    %c0_70 = arith.constant 0 : index
    %c0_71 = arith.constant 0 : index
    %195 = vector.load %arg2[%c0_69, %c0_70, %c0_71] : memref<1x64x128xf32, #tpu.memory_space<vmem>>, vector<1x64x128xf32>
    %196 = vector.shape_cast %195 : vector<1x64x128xf32> to vector<64x128xf32>
    %c0_72 = arith.constant 0 : index
    %c0_73 = arith.constant 0 : index
    %197 = vector.load %arg12[%c0_72, %c0_73] : memref<128x64xbf16, #tpu.memory_space<vmem>>, vector<128x64xbf16>
    %198 = arith.truncf %196 : vector<64x128xf32> to vector<64x128xbf16>
    %cst_74 = arith.constant dense<0.000000e+00> : vector<64x64xf32>
    %199 = tpu.matmul %198, %197, %cst_74 {dimension_numbers = #tpu.dot_dimension_numbers<[1], [0], [0], [1], [0, 0, 1, 1], [], []>} : vector<64x128xbf16>, vector<128x64xbf16>, vector<64x64xf32> -> vector<64x64xf32>
    %c0_75 = arith.constant 0 : index
    %c0_76 = arith.constant 0 : index
    %200 = vector.load %arg13[%c0_75, %c0_76] : memref<1x64xf32, #tpu.memory_space<vmem>>, vector<1x64xf32>
    %201 = vector.broadcast %200 : vector<1x64xf32> to vector<64x64xf32>
    %202 = arith.addf %199, %201 : vector<64x64xf32>
    %c0_77 = arith.constant 0 : index
    %c0_78 = arith.constant 0 : index
    %203 = vector.load %arg14[%c0_77, %c0_78] : memref<128x64xbf16, #tpu.memory_space<vmem>>, vector<128x64xbf16>
    %204 = arith.truncf %196 : vector<64x128xf32> to vector<64x128xbf16>
    %cst_79 = arith.constant dense<0.000000e+00> : vector<64x64xf32>
    %205 = tpu.matmul %204, %203, %cst_79 {dimension_numbers = #tpu.dot_dimension_numbers<[1], [0], [0], [1], [0, 0, 1, 1], [], []>} : vector<64x128xbf16>, vector<128x64xbf16>, vector<64x64xf32> -> vector<64x64xf32>
    %c0_80 = arith.constant 0 : index
    %c0_81 = arith.constant 0 : index
    %206 = vector.load %arg15[%c0_80, %c0_81] : memref<1x64xf32, #tpu.memory_space<vmem>>, vector<1x64xf32>
    %207 = vector.broadcast %206 : vector<1x64xf32> to vector<64x64xf32>
    %208 = arith.addf %205, %207 : vector<64x64xf32>
    %cst_82 = arith.constant dense<0.000000e+00> : vector<64xf32>
    %209 = vector.multi_reduction <add>, %194, %cst_82 [0] : vector<64x64xf32> to vector<64xf32>
    %210 = vector.shape_cast %209 : vector<64xf32> to vector<1x64xf32>
    %cst_83 = arith.constant 6.400000e+01 : f32
    %211 = vector.broadcast %cst_83 : f32 to vector<1x64xf32>
    %212 = arith.divf %210, %211 : vector<1x64xf32>
    %213 = vector.broadcast %212 : vector<1x64xf32> to vector<64x64xf32>
    %214 = arith.subf %194, %213 : vector<64x64xf32>
    %215 = arith.mulf %214, %214 : vector<64x64xf32>
    %cst_84 = arith.constant dense<0.000000e+00> : vector<64xf32>
    %216 = vector.multi_reduction <add>, %215, %cst_84 [0] : vector<64x64xf32> to vector<64xf32>
    %217 = vector.shape_cast %216 : vector<64xf32> to vector<1x64xf32>
    %cst_85 = arith.constant 6.400000e+01 : f32
    %218 = vector.broadcast %cst_85 : f32 to vector<1x64xf32>
    %219 = arith.divf %217, %218 : vector<1x64xf32>
    %220 = vector.broadcast %212 : vector<1x64xf32> to vector<64x64xf32>
    %221 = arith.subf %194, %220 : vector<64x64xf32>
    %cst_86 = arith.constant 9.99999974E-6 : f32
    %222 = vector.broadcast %cst_86 : f32 to vector<1x64xf32>
    %223 = arith.addf %219, %222 : vector<1x64xf32>
    %224 = math.rsqrt %223 : vector<1x64xf32>
    %225 = vector.broadcast %224 : vector<1x64xf32> to vector<64x64xf32>
    %226 = arith.mulf %221, %225 : vector<64x64xf32>
    %227 = arith.mulf %202, %226 : vector<64x64xf32>
    %228 = arith.addf %227, %208 : vector<64x64xf32>
    %c0_87 = arith.constant 0 : index
    %c0_88 = arith.constant 0 : index
    %c0_89 = arith.constant 0 : index
    %229 = vector.load %arg16[%c0_87, %c0_88, %c0_89] : memref<1x64x64xf32, #tpu.memory_space<vmem>>, vector<1x64x64xf32>
    %230 = vector.shape_cast %229 : vector<1x64x64xf32> to vector<64x64xf32>
    %231 = vector.shape_cast %228 : vector<64x64xf32> to vector<1x64x64xf32>
    tpu.vector_store %arg16[%c0_87, %c0_88, %c0_89], %231 {strides = array<i32>} : memref<1x64x64xf32, #tpu.memory_space<vmem>>, vector<1x64x64xf32>,
    return
  }
  func.func @transform_0(%arg0: i32) -> (i32, i32, i32) {
    %c0_i32 = arith.constant 0 : i32
    %c0_i32_0 = arith.constant 0 : i32
    %c0_i32_1 = arith.constant 0 : i32
    return %arg0, %c0_i32, %c0_i32_0 : i32, i32, i32
  }
  func.func @transform_1(%arg0: i32) -> (i32, i32, i32) {
    %c0_i32 = arith.constant 0 : i32
    %c0_i32_0 = arith.constant 0 : i32
    %c0_i32_1 = arith.constant 0 : i32
    return %arg0, %c0_i32, %c0_i32_0 : i32, i32, i32
  }
  func.func @transform_2(%arg0: i32) -> (i32, i32) {
    %c0_i32 = arith.constant 0 : i32
    %c0_i32_0 = arith.constant 0 : i32
    %c0_i32_1 = arith.constant 0 : i32
    return %c0_i32, %c0_i32_0 : i32, i32
  }
  func.func @transform_3(%arg0: i32) -> (i32, i32) {
    %c0_i32 = arith.constant 0 : i32
    %c0_i32_0 = arith.constant 0 : i32
    %c0_i32_1 = arith.constant 0 : i32
    return %c0_i32, %c0_i32_0 : i32, i32
  }
  func.func @transform_4(%arg0: i32) -> (i32, i32) {
    %c0_i32 = arith.constant 0 : i32
    %c0_i32_0 = arith.constant 0 : i32
    %c0_i32_1 = arith.constant 0 : i32
    return %c0_i32, %c0_i32_0 : i32, i32
  }
  func.func @transform_5(%arg0: i32) -> (i32, i32) {
    %c0_i32 = arith.constant 0 : i32
    %c0_i32_0 = arith.constant 0 : i32
    %c0_i32_1 = arith.constant 0 : i32
    return %c0_i32, %c0_i32_0 : i32, i32
  }
  func.func @transform_6(%arg0: i32) -> (i32, i32) {
    %c0_i32 = arith.constant 0 : i32
    %c0_i32_0 = arith.constant 0 : i32
    %c0_i32_1 = arith.constant 0 : i32
    return %c0_i32, %c0_i32_0 : i32, i32
  }
  func.func @transform_7(%arg0: i32) -> (i32, i32) {
    %c0_i32 = arith.constant 0 : i32
    %c0_i32_0 = arith.constant 0 : i32
    %c0_i32_1 = arith.constant 0 : i32
    return %c0_i32, %c0_i32_0 : i32, i32
  }
  func.func @transform_8(%arg0: i32) -> (i32, i32) {
    %c0_i32 = arith.constant 0 : i32
    %c0_i32_0 = arith.constant 0 : i32
    %c0_i32_1 = arith.constant 0 : i32
    return %c0_i32, %c0_i32_0 : i32, i32
  }
  func.func @transform_9(%arg0: i32) -> (i32, i32, i32) {
    %c0_i32 = arith.constant 0 : i32
    %c0_i32_0 = arith.constant 0 : i32
    %c0_i32_1 = arith.constant 0 : i32
    %c0_i32_2 = arith.constant 0 : i32
    return %c0_i32, %c0_i32_0, %c0_i32_1 : i32, i32, i32
  }
  func.func @transform_10(%arg0: i32) -> (i32, i32) {
    %c0_i32 = arith.constant 0 : i32
    %c0_i32_0 = arith.constant 0 : i32
    %c0_i32_1 = arith.constant 0 : i32
    return %c0_i32, %c0_i32_0 : i32, i32
  }
  func.func @transform_11(%arg0: i32) -> (i32, i32) {
    %c0_i32 = arith.constant 0 : i32
    %c0_i32_0 = arith.constant 0 : i32
    %c0_i32_1 = arith.constant 0 : i32
    return %c0_i32, %c0_i32_0 : i32, i32
  }
  func.func @transform_12(%arg0: i32) -> (i32, i32) {
    %c0_i32 = arith.constant 0 : i32
    %c0_i32_0 = arith.constant 0 : i32
    %c0_i32_1 = arith.constant 0 : i32
    return %c0_i32, %c0_i32_0 : i32, i32
  }
  func.func @transform_13(%arg0: i32) -> (i32, i32) {
    %c0_i32 = arith.constant 0 : i32
    %c0_i32_0 = arith.constant 0 : i32
    %c0_i32_1 = arith.constant 0 : i32
    return %c0_i32, %c0_i32_0 : i32, i32
  }
  func.func @transform_14(%arg0: i32) -> (i32, i32) {
    %c0_i32 = arith.constant 0 : i32
    %c0_i32_0 = arith.constant 0 : i32
    %c0_i32_1 = arith.constant 0 : i32
    return %c0_i32, %c0_i32_0 : i32, i32
  }
  func.func @transform_15(%arg0: i32) -> (i32, i32, i32) {
    %c0_i32 = arith.constant 0 : i32
    %c0_i32_0 = arith.constant 0 : i32
    %c0_i32_1 = arith.constant 0 : i32
    return %arg0, %c0_i32, %c0_i32_0 : i32, i32, i32
  }
}

module attributes {stable_mosaic.version = 11 : i64} {
  func.func @_edge_adain_kernel(%arg0: i32, %arg1: memref<1x64x64xf32, #tpu.memory_space<vmem>>, %arg2: memref<1x64x128xf32, #tpu.memory_space<vmem>>, %arg3: memref<64x64xbf16, #tpu.memory_space<vmem>>, %arg4: memref<1x64xf32, #tpu.memory_space<vmem>>, %arg5: memref<64x128xbf16, #tpu.memory_space<vmem>>, %arg6: memref<1x128xf32, #tpu.memory_space<vmem>>, %arg7: memref<64x128xbf16, #tpu.memory_space<vmem>>, %arg8: memref<64x128xbf16, #tpu.memory_space<vmem>>, %arg9: memref<1x128xf32, #tpu.memory_space<vmem>>, %arg10: memref<5x128x128xbf16, #tpu.memory_space<vmem>>, %arg11: memref<1x128xf32, #tpu.memory_space<vmem>>, %arg12: memref<128x128xbf16, #tpu.memory_space<vmem>>, %arg13: memref<1x128xf32, #tpu.memory_space<vmem>>, %arg14: memref<128x128xbf16, #tpu.memory_space<vmem>>, %arg15: memref<1x128xf32, #tpu.memory_space<vmem>>, %arg16: memref<1x64x128xf32, #tpu.memory_space<vmem>>) attributes {dimension_semantics = [#tpu.dimension_semantics<parallel>], iteration_bounds = array<i64: 2>, scalar_prefetch = 0 : i64, scratch_operands = 0 : i64, tpu.core_type = #tpu.core_type<tc>, window_params = [{transform_indices = @transform_0, window_bounds = array<i64: 1, 64, 64>}, {transform_indices = @transform_1, window_bounds = array<i64: 1, 64, 128>}, {pipeline_mode = #tpu.pipeline_mode<synchronous>, transform_indices = @transform_2, window_bounds = array<i64: 64, 64>}, {pipeline_mode = #tpu.pipeline_mode<synchronous>, transform_indices = @transform_3, window_bounds = array<i64: 1, 64>}, {pipeline_mode = #tpu.pipeline_mode<synchronous>, transform_indices = @transform_4, window_bounds = array<i64: 64, 128>}, {pipeline_mode = #tpu.pipeline_mode<synchronous>, transform_indices = @transform_5, window_bounds = array<i64: 1, 128>}, {pipeline_mode = #tpu.pipeline_mode<synchronous>, transform_indices = @transform_6, window_bounds = array<i64: 64, 128>}, {pipeline_mode = #tpu.pipeline_mode<synchronous>, transform_indices = @transform_7, window_bounds = array<i64: 64, 128>}, {pipeline_mode = #tpu.pipeline_mode<synchronous>, transform_indices = @transform_8, window_bounds = array<i64: 1, 128>}, {pipeline_mode = #tpu.pipeline_mode<synchronous>, transform_indices = @transform_9, window_bounds = array<i64: 5, 128, 128>}, {pipeline_mode = #tpu.pipeline_mode<synchronous>, transform_indices = @transform_10, window_bounds = array<i64: 1, 128>}, {pipeline_mode = #tpu.pipeline_mode<synchronous>, transform_indices = @transform_11, window_bounds = array<i64: 128, 128>}, {pipeline_mode = #tpu.pipeline_mode<synchronous>, transform_indices = @transform_12, window_bounds = array<i64: 1, 128>}, {pipeline_mode = #tpu.pipeline_mode<synchronous>, transform_indices = @transform_13, window_bounds = array<i64: 128, 128>}, {pipeline_mode = #tpu.pipeline_mode<synchronous>, transform_indices = @transform_14, window_bounds = array<i64: 1, 128>}, {transform_indices = @transform_15, window_bounds = array<i64: 1, 64, 128>}]} {
    %c0 = arith.constant 0 : index
    %c0_0 = arith.constant 0 : index
    %c0_1 = arith.constant 0 : index
    %0 = vector.load %arg1[%c0, %c0_0, %c0_1] : memref<1x64x64xf32, #tpu.memory_space<vmem>>, vector<1x64x64xf32>
    %1 = vector.shape_cast %0 : vector<1x64x64xf32> to vector<64x64xf32>
    %cst = arith.constant dense<0.000000e+00> : vector<64x64xf32>
    %2 = tpu.matmul %1, %1, %cst {dimension_numbers = #tpu.dot_dimension_numbers<[1], [1], [0], [0], [0, 0, 1, 0], [], []>} : vector<64x64xf32>, vector<64x64xf32>, vector<64x64xf32> -> vector<64x64xf32>
    %3 = tpu.iota {dimensions = array<i32: 0>} : vector<64x64xi32>
    %4 = tpu.iota {dimensions = array<i32: 1>} : vector<64x64xi32>
    %5 = arith.cmpi eq, %3, %4 : vector<64x64xi32>
    %6 = arith.sitofp %4 : vector<64x64xi32> to vector<64x64xf32>
    %7 = arith.mulf %1, %1 : vector<64x64xf32>
    %cst_2 = arith.constant dense<0.000000e+00> : vector<64xf32>
    %8 = vector.multi_reduction <add>, %7, %cst_2 [1] : vector<64x64xf32> to vector<64xf32>
    %9 = vector.shape_cast %8 : vector<64xf32> to vector<64x1xf32>
    %cst_3 = arith.constant 0.000000e+00 : f32
    %10 = vector.broadcast %cst_3 : f32 to vector<64x64xf32>
    %11 = arith.select %5, %2, %10 : vector<64x64xi1>, vector<64x64xf32>
    %cst_4 = arith.constant dense<0.000000e+00> : vector<64xf32>
    %12 = vector.multi_reduction <add>, %11, %cst_4 [0] : vector<64x64xf32> to vector<64xf32>
    %13 = vector.shape_cast %12 : vector<64xf32> to vector<1x64xf32>
    %14 = vector.broadcast %9 : vector<64x1xf32> to vector<64x64xf32>
    %15 = vector.broadcast %13 : vector<1x64xf32> to vector<64x64xf32>
    %16 = arith.addf %14, %15 : vector<64x64xf32>
    %cst_5 = arith.constant 2.000000e+00 : f32
    %17 = vector.broadcast %cst_5 : f32 to vector<64x64xf32>
    %18 = arith.mulf %17, %2 : vector<64x64xf32>
    %19 = arith.subf %16, %18 : vector<64x64xf32>
    %cst_6 = arith.constant 0x7F800000 : f32
    %20 = vector.broadcast %cst_6 : f32 to vector<64x64xf32>
    %21 = arith.select %5, %20, %19 : vector<64x64xi1>, vector<64x64xf32>
    %cst_7 = arith.constant dense<0x7F800000> : vector<64xf32>
    %22 = vector.multi_reduction <minimumf>, %21, %cst_7 [1] : vector<64x64xf32> to vector<64xf32>
    %23 = vector.shape_cast %22 : vector<64xf32> to vector<64x1xf32>
    %24 = vector.broadcast %23 : vector<64x1xf32> to vector<64x64xf32>
    %25 = arith.cmpf ole, %21, %24 : vector<64x64xf32>
    %cst_8 = arith.constant 6.400000e+01 : f32
    %26 = vector.broadcast %cst_8 : f32 to vector<64x64xf32>
    %27 = arith.select %25, %6, %26 : vector<64x64xi1>, vector<64x64xf32>
    %cst_9 = arith.constant dense<0x7F800000> : vector<64xf32>
    %28 = vector.multi_reduction <minimumf>, %27, %cst_9 [1] : vector<64x64xf32> to vector<64xf32>
    %29 = vector.shape_cast %28 : vector<64xf32> to vector<64x1xf32>
    %30 = vector.broadcast %29 : vector<64x1xf32> to vector<64x64xf32>
    %31 = arith.cmpf oeq, %6, %30 : vector<64x64xf32>
    %32 = arith.extui %31 : vector<64x64xi1> to vector<64x64xi32>
    %33 = arith.sitofp %32 : vector<64x64xi32> to vector<64x64xf32>
    %cst_10 = arith.constant 0x7F800000 : f32
    %34 = vector.broadcast %cst_10 : f32 to vector<64x64xf32>
    %35 = arith.select %31, %34, %21 : vector<64x64xi1>, vector<64x64xf32>
    %cst_11 = arith.constant dense<0x7F800000> : vector<64xf32>
    %36 = vector.multi_reduction <minimumf>, %35, %cst_11 [1] : vector<64x64xf32> to vector<64xf32>
    %37 = vector.shape_cast %36 : vector<64xf32> to vector<64x1xf32>
    %38 = vector.broadcast %37 : vector<64x1xf32> to vector<64x64xf32>
    %39 = arith.cmpf ole, %35, %38 : vector<64x64xf32>
    %cst_12 = arith.constant 6.400000e+01 : f32
    %40 = vector.broadcast %cst_12 : f32 to vector<64x64xf32>
    %41 = arith.select %39, %6, %40 : vector<64x64xi1>, vector<64x64xf32>
    %cst_13 = arith.constant dense<0x7F800000> : vector<64xf32>
    %42 = vector.multi_reduction <minimumf>, %41, %cst_13 [1] : vector<64x64xf32> to vector<64xf32>
    %43 = vector.shape_cast %42 : vector<64xf32> to vector<64x1xf32>
    %44 = vector.broadcast %43 : vector<64x1xf32> to vector<64x64xf32>
    %45 = arith.cmpf oeq, %6, %44 : vector<64x64xf32>
    %46 = arith.extui %45 : vector<64x64xi1> to vector<64x64xi32>
    %47 = arith.sitofp %46 : vector<64x64xi32> to vector<64x64xf32>
    %cst_14 = arith.constant 0x7F800000 : f32
    %48 = vector.broadcast %cst_14 : f32 to vector<64x64xf32>
    %49 = arith.select %45, %48, %35 : vector<64x64xi1>, vector<64x64xf32>
    %cst_15 = arith.constant dense<0x7F800000> : vector<64xf32>
    %50 = vector.multi_reduction <minimumf>, %49, %cst_15 [1] : vector<64x64xf32> to vector<64xf32>
    %51 = vector.shape_cast %50 : vector<64xf32> to vector<64x1xf32>
    %52 = vector.broadcast %51 : vector<64x1xf32> to vector<64x64xf32>
    %53 = arith.cmpf ole, %49, %52 : vector<64x64xf32>
    %cst_16 = arith.constant 6.400000e+01 : f32
    %54 = vector.broadcast %cst_16 : f32 to vector<64x64xf32>
    %55 = arith.select %53, %6, %54 : vector<64x64xi1>, vector<64x64xf32>
    %cst_17 = arith.constant dense<0x7F800000> : vector<64xf32>
    %56 = vector.multi_reduction <minimumf>, %55, %cst_17 [1] : vector<64x64xf32> to vector<64xf32>
    %57 = vector.shape_cast %56 : vector<64xf32> to vector<64x1xf32>
    %58 = vector.broadcast %57 : vector<64x1xf32> to vector<64x64xf32>
    %59 = arith.cmpf oeq, %6, %58 : vector<64x64xf32>
    %60 = arith.extui %59 : vector<64x64xi1> to vector<64x64xi32>
    %61 = arith.sitofp %60 : vector<64x64xi32> to vector<64x64xf32>
    %cst_18 = arith.constant 0x7F800000 : f32
    %62 = vector.broadcast %cst_18 : f32 to vector<64x64xf32>
    %63 = arith.select %59, %62, %49 : vector<64x64xi1>, vector<64x64xf32>
    %cst_19 = arith.constant dense<0x7F800000> : vector<64xf32>
    %64 = vector.multi_reduction <minimumf>, %63, %cst_19 [1] : vector<64x64xf32> to vector<64xf32>
    %65 = vector.shape_cast %64 : vector<64xf32> to vector<64x1xf32>
    %66 = vector.broadcast %65 : vector<64x1xf32> to vector<64x64xf32>
    %67 = arith.cmpf ole, %63, %66 : vector<64x64xf32>
    %cst_20 = arith.constant 6.400000e+01 : f32
    %68 = vector.broadcast %cst_20 : f32 to vector<64x64xf32>
    %69 = arith.select %67, %6, %68 : vector<64x64xi1>, vector<64x64xf32>
    %cst_21 = arith.constant dense<0x7F800000> : vector<64xf32>
    %70 = vector.multi_reduction <minimumf>, %69, %cst_21 [1] : vector<64x64xf32> to vector<64xf32>
    %71 = vector.shape_cast %70 : vector<64xf32> to vector<64x1xf32>
    %72 = vector.broadcast %71 : vector<64x1xf32> to vector<64x64xf32>
    %73 = arith.cmpf oeq, %6, %72 : vector<64x64xf32>
    %74 = arith.extui %73 : vector<64x64xi1> to vector<64x64xi32>
    %75 = arith.sitofp %74 : vector<64x64xi32> to vector<64x64xf32>
    %cst_22 = arith.constant 0x7F800000 : f32
    %76 = vector.broadcast %cst_22 : f32 to vector<64x64xf32>
    %77 = arith.select %73, %76, %63 : vector<64x64xi1>, vector<64x64xf32>
    %cst_23 = arith.constant dense<0x7F800000> : vector<64xf32>
    %78 = vector.multi_reduction <minimumf>, %77, %cst_23 [1] : vector<64x64xf32> to vector<64xf32>
    %79 = vector.shape_cast %78 : vector<64xf32> to vector<64x1xf32>
    %80 = vector.broadcast %79 : vector<64x1xf32> to vector<64x64xf32>
    %81 = arith.cmpf ole, %77, %80 : vector<64x64xf32>
    %cst_24 = arith.constant 6.400000e+01 : f32
    %82 = vector.broadcast %cst_24 : f32 to vector<64x64xf32>
    %83 = arith.select %81, %6, %82 : vector<64x64xi1>, vector<64x64xf32>
    %cst_25 = arith.constant dense<0x7F800000> : vector<64xf32>
    %84 = vector.multi_reduction <minimumf>, %83, %cst_25 [1] : vector<64x64xf32> to vector<64xf32>
    %85 = vector.shape_cast %84 : vector<64xf32> to vector<64x1xf32>
    %86 = vector.broadcast %85 : vector<64x1xf32> to vector<64x64xf32>
    %87 = arith.cmpf oeq, %6, %86 : vector<64x64xf32>
    %88 = arith.extui %87 : vector<64x64xi1> to vector<64x64xi32>
    %89 = arith.sitofp %88 : vector<64x64xi32> to vector<64x64xf32>
    %90 = tpu.concatenate %33, %47, %61, %75, %89 in 0 : vector<64x64xf32>, vector<64x64xf32>, vector<64x64xf32>, vector<64x64xf32>, vector<64x64xf32> -> vector<320x64xf32>
    %cst_26 = arith.constant dense<0.000000e+00> : vector<320x64xf32>
    %91 = tpu.matmul %90, %1, %cst_26 {dimension_numbers = #tpu.dot_dimension_numbers<[1], [0], [0], [1], [0, 0, 1, 1], [], []>} : vector<320x64xf32>, vector<64x64xf32>, vector<320x64xf32> -> vector<320x64xf32>
    %92 = tpu.concatenate %1, %1, %1, %1, %1 in 0 : vector<64x64xf32>, vector<64x64xf32>, vector<64x64xf32>, vector<64x64xf32>, vector<64x64xf32> -> vector<320x64xf32>
    %93 = arith.subf %91, %92 : vector<320x64xf32>
    %c0_27 = arith.constant 0 : index
    %c0_28 = arith.constant 0 : index
    %94 = vector.load %arg3[%c0_27, %c0_28] : memref<64x64xbf16, #tpu.memory_space<vmem>>, vector<64x64xbf16>
    %95 = arith.truncf %93 : vector<320x64xf32> to vector<320x64xbf16>
    %cst_29 = arith.constant dense<0.000000e+00> : vector<320x64xf32>
    %96 = tpu.matmul %95, %94, %cst_29 {dimension_numbers = #tpu.dot_dimension_numbers<[1], [0], [0], [1], [0, 0, 1, 1], [], []>} : vector<320x64xbf16>, vector<64x64xbf16>, vector<320x64xf32> -> vector<320x64xf32>
    %c0_30 = arith.constant 0 : index
    %c0_31 = arith.constant 0 : index
    %97 = vector.load %arg4[%c0_30, %c0_31] : memref<1x64xf32, #tpu.memory_space<vmem>>, vector<1x64xf32>
    %98 = vector.broadcast %97 : vector<1x64xf32> to vector<320x64xf32>
    %99 = arith.addf %96, %98 : vector<320x64xf32>
    %cst_32 = arith.constant 0.00999999977 : f32
    %100 = vector.broadcast %cst_32 : f32 to vector<320x64xf32>
    %101 = arith.mulf %100, %99 : vector<320x64xf32>
    %102 = arith.maximumf %99, %101 : vector<320x64xf32>
    %c0_33 = arith.constant 0 : index
    %c0_34 = arith.constant 0 : index
    %103 = vector.load %arg5[%c0_33, %c0_34] : memref<64x128xbf16, #tpu.memory_space<vmem>>, vector<64x128xbf16>
    %104 = arith.truncf %102 : vector<320x64xf32> to vector<320x64xbf16>
    %cst_35 = arith.constant dense<0.000000e+00> : vector<320x128xf32>
    %105 = tpu.matmul %104, %103, %cst_35 {dimension_numbers = #tpu.dot_dimension_numbers<[1], [0], [0], [1], [0, 0, 1, 1], [], []>} : vector<320x64xbf16>, vector<64x128xbf16>, vector<320x128xf32> -> vector<320x128xf32>
    %c0_36 = arith.constant 0 : index
    %c0_37 = arith.constant 0 : index
    %106 = vector.load %arg6[%c0_36, %c0_37] : memref<1x128xf32, #tpu.memory_space<vmem>>, vector<1x128xf32>
    %107 = vector.broadcast %106 : vector<1x128xf32> to vector<320x128xf32>
    %108 = arith.addf %105, %107 : vector<320x128xf32>
    %cst_38 = arith.constant 0.00999999977 : f32
    %109 = vector.broadcast %cst_38 : f32 to vector<320x128xf32>
    %110 = arith.mulf %109, %108 : vector<320x128xf32>
    %111 = arith.maximumf %108, %110 : vector<320x128xf32>
    %c0_39 = arith.constant 0 : index
    %c0_40 = arith.constant 0 : index
    %112 = vector.load %arg7[%c0_39, %c0_40] : memref<64x128xbf16, #tpu.memory_space<vmem>>, vector<64x128xbf16>
    %113 = arith.truncf %1 : vector<64x64xf32> to vector<64x64xbf16>
    %cst_41 = arith.constant dense<0.000000e+00> : vector<64x128xf32>
    %114 = tpu.matmul %113, %112, %cst_41 {dimension_numbers = #tpu.dot_dimension_numbers<[1], [0], [0], [1], [0, 0, 1, 1], [], []>} : vector<64x64xbf16>, vector<64x128xbf16>, vector<64x128xf32> -> vector<64x128xf32>
    %c0_42 = arith.constant 0 : index
    %c0_43 = arith.constant 0 : index
    %115 = vector.load %arg9[%c0_42, %c0_43] : memref<1x128xf32, #tpu.memory_space<vmem>>, vector<1x128xf32>
    %116 = vector.broadcast %115 : vector<1x128xf32> to vector<64x128xf32>
    %117 = arith.addf %114, %116 : vector<64x128xf32>
    %c0_44 = arith.constant 0 : index
    %c0_45 = arith.constant 0 : index
    %118 = vector.load %arg8[%c0_44, %c0_45] : memref<64x128xbf16, #tpu.memory_space<vmem>>, vector<64x128xbf16>
    %119 = arith.truncf %93 : vector<320x64xf32> to vector<320x64xbf16>
    %cst_46 = arith.constant dense<0.000000e+00> : vector<320x128xf32>
    %120 = tpu.matmul %119, %118, %cst_46 {dimension_numbers = #tpu.dot_dimension_numbers<[1], [0], [0], [1], [0, 0, 1, 1], [], []>} : vector<320x64xbf16>, vector<64x128xbf16>, vector<320x128xf32> -> vector<320x128xf32>
    %121 = tpu.concatenate %117, %117, %117, %117, %117 in 0 : vector<64x128xf32>, vector<64x128xf32>, vector<64x128xf32>, vector<64x128xf32>, vector<64x128xf32> -> vector<320x128xf32>
    %122 = arith.addf %121, %120 : vector<320x128xf32>
    %cst_47 = arith.constant 0.00999999977 : f32
    %123 = vector.broadcast %cst_47 : f32 to vector<320x128xf32>
    %124 = arith.mulf %123, %122 : vector<320x128xf32>
    %125 = arith.maximumf %122, %124 : vector<320x128xf32>
    %126 = vector.shape_cast %111 : vector<320x128xf32> to vector<5x64x128xf32>
    %127 = vector.shape_cast %125 : vector<320x128xf32> to vector<5x64x128xf32>
    %cst_48 = arith.constant dense<0xFF800000> : vector<64x128xf32>
    %128 = vector.multi_reduction <maximumf>, %126, %cst_48 [0] : vector<5x64x128xf32> to vector<64x128xf32>
    %129 = vector.shape_cast %128 : vector<64x128xf32> to vector<1x64x128xf32>
    %130 = vector.broadcast %129 : vector<1x64x128xf32> to vector<5x64x128xf32>
    %131 = arith.subf %126, %130 : vector<5x64x128xf32>
    %132 = math.exp %131 : vector<5x64x128xf32>
    %cst_49 = arith.constant dense<0.000000e+00> : vector<64x128xf32>
    %133 = vector.multi_reduction <add>, %132, %cst_49 [0] : vector<5x64x128xf32> to vector<64x128xf32>
    %134 = tpu.reciprocal %133 {approx = true} : vector<64x128xf32> -> vector<64x128xf32>
    %135 = vector.extract_strided_slice %132 {offsets = [0, 0, 0], sizes = [1, 64, 128], strides = [1, 1, 1]} : vector<5x64x128xf32> to vector<1x64x128xf32>
    %136 = vector.shape_cast %135 : vector<1x64x128xf32> to vector<64x128xf32>
    %137 = arith.mulf %136, %134 : vector<64x128xf32>
    %138 = vector.extract_strided_slice %127 {offsets = [0, 0, 0], sizes = [1, 64, 128], strides = [1, 1, 1]} : vector<5x64x128xf32> to vector<1x64x128xf32>
    %139 = vector.shape_cast %138 : vector<1x64x128xf32> to vector<64x128xf32>
    %140 = arith.mulf %137, %139 : vector<64x128xf32>
    %c0_50 = arith.constant 0 : index
    %c0_51 = arith.constant 0 : index
    %c0_52 = arith.constant 0 : index
    %141 = vector.load %arg10[%c0_50, %c0_51, %c0_52] : memref<5x128x128xbf16, #tpu.memory_space<vmem>>, vector<1x128x128xbf16>
    %142 = vector.shape_cast %141 : vector<1x128x128xbf16> to vector<128x128xbf16>
    %143 = arith.truncf %140 : vector<64x128xf32> to vector<64x128xbf16>
    %cst_53 = arith.constant dense<0.000000e+00> : vector<64x128xf32>
    %144 = tpu.matmul %143, %142, %cst_53 {dimension_numbers = #tpu.dot_dimension_numbers<[1], [0], [0], [1], [0, 0, 1, 1], [], []>} : vector<64x128xbf16>, vector<128x128xbf16>, vector<64x128xf32> -> vector<64x128xf32>
    %145 = vector.extract_strided_slice %132 {offsets = [1, 0, 0], sizes = [1, 64, 128], strides = [1, 1, 1]} : vector<5x64x128xf32> to vector<1x64x128xf32>
    %146 = vector.shape_cast %145 : vector<1x64x128xf32> to vector<64x128xf32>
    %147 = arith.mulf %146, %134 : vector<64x128xf32>
    %148 = vector.extract_strided_slice %127 {offsets = [1, 0, 0], sizes = [1, 64, 128], strides = [1, 1, 1]} : vector<5x64x128xf32> to vector<1x64x128xf32>
    %149 = vector.shape_cast %148 : vector<1x64x128xf32> to vector<64x128xf32>
    %150 = arith.mulf %147, %149 : vector<64x128xf32>
    %c1 = arith.constant 1 : index
    %c0_54 = arith.constant 0 : index
    %c0_55 = arith.constant 0 : index
    %151 = vector.load %arg10[%c1, %c0_54, %c0_55] : memref<5x128x128xbf16, #tpu.memory_space<vmem>>, vector<1x128x128xbf16>
    %152 = vector.shape_cast %151 : vector<1x128x128xbf16> to vector<128x128xbf16>
    %153 = arith.truncf %150 : vector<64x128xf32> to vector<64x128xbf16>
    %cst_56 = arith.constant dense<0.000000e+00> : vector<64x128xf32>
    %154 = tpu.matmul %153, %152, %cst_56 {dimension_numbers = #tpu.dot_dimension_numbers<[1], [0], [0], [1], [0, 0, 1, 1], [], []>} : vector<64x128xbf16>, vector<128x128xbf16>, vector<64x128xf32> -> vector<64x128xf32>
    %155 = arith.addf %144, %154 : vector<64x128xf32>
    %156 = vector.extract_strided_slice %132 {offsets = [2, 0, 0], sizes = [1, 64, 128], strides = [1, 1, 1]} : vector<5x64x128xf32> to vector<1x64x128xf32>
    %157 = vector.shape_cast %156 : vector<1x64x128xf32> to vector<64x128xf32>
    %158 = arith.mulf %157, %134 : vector<64x128xf32>
    %159 = vector.extract_strided_slice %127 {offsets = [2, 0, 0], sizes = [1, 64, 128], strides = [1, 1, 1]} : vector<5x64x128xf32> to vector<1x64x128xf32>
    %160 = vector.shape_cast %159 : vector<1x64x128xf32> to vector<64x128xf32>
    %161 = arith.mulf %158, %160 : vector<64x128xf32>
    %c2 = arith.constant 2 : index
    %c0_57 = arith.constant 0 : index
    %c0_58 = arith.constant 0 : index
    %162 = vector.load %arg10[%c2, %c0_57, %c0_58] : memref<5x128x128xbf16, #tpu.memory_space<vmem>>, vector<1x128x128xbf16>
    %163 = vector.shape_cast %162 : vector<1x128x128xbf16> to vector<128x128xbf16>
    %164 = arith.truncf %161 : vector<64x128xf32> to vector<64x128xbf16>
    %cst_59 = arith.constant dense<0.000000e+00> : vector<64x128xf32>
    %165 = tpu.matmul %164, %163, %cst_59 {dimension_numbers = #tpu.dot_dimension_numbers<[1], [0], [0], [1], [0, 0, 1, 1], [], []>} : vector<64x128xbf16>, vector<128x128xbf16>, vector<64x128xf32> -> vector<64x128xf32>
    %166 = arith.addf %155, %165 : vector<64x128xf32>
    %167 = vector.extract_strided_slice %132 {offsets = [3, 0, 0], sizes = [1, 64, 128], strides = [1, 1, 1]} : vector<5x64x128xf32> to vector<1x64x128xf32>
    %168 = vector.shape_cast %167 : vector<1x64x128xf32> to vector<64x128xf32>
    %169 = arith.mulf %168, %134 : vector<64x128xf32>
    %170 = vector.extract_strided_slice %127 {offsets = [3, 0, 0], sizes = [1, 64, 128], strides = [1, 1, 1]} : vector<5x64x128xf32> to vector<1x64x128xf32>
    %171 = vector.shape_cast %170 : vector<1x64x128xf32> to vector<64x128xf32>
    %172 = arith.mulf %169, %171 : vector<64x128xf32>
    %c3 = arith.constant 3 : index
    %c0_60 = arith.constant 0 : index
    %c0_61 = arith.constant 0 : index
    %173 = vector.load %arg10[%c3, %c0_60, %c0_61] : memref<5x128x128xbf16, #tpu.memory_space<vmem>>, vector<1x128x128xbf16>
    %174 = vector.shape_cast %173 : vector<1x128x128xbf16> to vector<128x128xbf16>
    %175 = arith.truncf %172 : vector<64x128xf32> to vector<64x128xbf16>
    %cst_62 = arith.constant dense<0.000000e+00> : vector<64x128xf32>
    %176 = tpu.matmul %175, %174, %cst_62 {dimension_numbers = #tpu.dot_dimension_numbers<[1], [0], [0], [1], [0, 0, 1, 1], [], []>} : vector<64x128xbf16>, vector<128x128xbf16>, vector<64x128xf32> -> vector<64x128xf32>
    %177 = arith.addf %166, %176 : vector<64x128xf32>
    %178 = vector.extract_strided_slice %132 {offsets = [4, 0, 0], sizes = [1, 64, 128], strides = [1, 1, 1]} : vector<5x64x128xf32> to vector<1x64x128xf32>
    %179 = vector.shape_cast %178 : vector<1x64x128xf32> to vector<64x128xf32>
    %180 = arith.mulf %179, %134 : vector<64x128xf32>
    %181 = vector.extract_strided_slice %127 {offsets = [4, 0, 0], sizes = [1, 64, 128], strides = [1, 1, 1]} : vector<5x64x128xf32> to vector<1x64x128xf32>
    %182 = vector.shape_cast %181 : vector<1x64x128xf32> to vector<64x128xf32>
    %183 = arith.mulf %180, %182 : vector<64x128xf32>
    %c4 = arith.constant 4 : index
    %c0_63 = arith.constant 0 : index
    %c0_64 = arith.constant 0 : index
    %184 = vector.load %arg10[%c4, %c0_63, %c0_64] : memref<5x128x128xbf16, #tpu.memory_space<vmem>>, vector<1x128x128xbf16>
    %185 = vector.shape_cast %184 : vector<1x128x128xbf16> to vector<128x128xbf16>
    %186 = arith.truncf %183 : vector<64x128xf32> to vector<64x128xbf16>
    %cst_65 = arith.constant dense<0.000000e+00> : vector<64x128xf32>
    %187 = tpu.matmul %186, %185, %cst_65 {dimension_numbers = #tpu.dot_dimension_numbers<[1], [0], [0], [1], [0, 0, 1, 1], [], []>} : vector<64x128xbf16>, vector<128x128xbf16>, vector<64x128xf32> -> vector<64x128xf32>
    %188 = arith.addf %177, %187 : vector<64x128xf32>
    %c0_66 = arith.constant 0 : index
    %c0_67 = arith.constant 0 : index
    %189 = vector.load %arg11[%c0_66, %c0_67] : memref<1x128xf32, #tpu.memory_space<vmem>>, vector<1x128xf32>
    %190 = vector.broadcast %189 : vector<1x128xf32> to vector<64x128xf32>
    %191 = arith.addf %188, %190 : vector<64x128xf32>
    %cst_68 = arith.constant 2.000000e-01 : f32
    %192 = vector.broadcast %cst_68 : f32 to vector<64x128xf32>
    %193 = arith.mulf %192, %191 : vector<64x128xf32>
    %194 = arith.maximumf %191, %193 : vector<64x128xf32>
    %c0_69 = arith.constant 0 : index
    %c0_70 = arith.constant 0 : index
    %c0_71 = arith.constant 0 : index
    %195 = vector.load %arg2[%c0_69, %c0_70, %c0_71] : memref<1x64x128xf32, #tpu.memory_space<vmem>>, vector<1x64x128xf32>
    %196 = vector.shape_cast %195 : vector<1x64x128xf32> to vector<64x128xf32>
    %c0_72 = arith.constant 0 : index
    %c0_73 = arith.constant 0 : index
    %197 = vector.load %arg12[%c0_72, %c0_73] : memref<128x128xbf16, #tpu.memory_space<vmem>>, vector<128x128xbf16>
    %198 = arith.truncf %196 : vector<64x128xf32> to vector<64x128xbf16>
    %cst_74 = arith.constant dense<0.000000e+00> : vector<64x128xf32>
    %199 = tpu.matmul %198, %197, %cst_74 {dimension_numbers = #tpu.dot_dimension_numbers<[1], [0], [0], [1], [0, 0, 1, 1], [], []>} : vector<64x128xbf16>, vector<128x128xbf16>, vector<64x128xf32> -> vector<64x128xf32>
    %c0_75 = arith.constant 0 : index
    %c0_76 = arith.constant 0 : index
    %200 = vector.load %arg13[%c0_75, %c0_76] : memref<1x128xf32, #tpu.memory_space<vmem>>, vector<1x128xf32>
    %201 = vector.broadcast %200 : vector<1x128xf32> to vector<64x128xf32>
    %202 = arith.addf %199, %201 : vector<64x128xf32>
    %c0_77 = arith.constant 0 : index
    %c0_78 = arith.constant 0 : index
    %203 = vector.load %arg14[%c0_77, %c0_78] : memref<128x128xbf16, #tpu.memory_space<vmem>>, vector<128x128xbf16>
    %204 = arith.truncf %196 : vector<64x128xf32> to vector<64x128xbf16>
    %cst_79 = arith.constant dense<0.000000e+00> : vector<64x128xf32>
    %205 = tpu.matmul %204, %203, %cst_79 {dimension_numbers = #tpu.dot_dimension_numbers<[1], [0], [0], [1], [0, 0, 1, 1], [], []>} : vector<64x128xbf16>, vector<128x128xbf16>, vector<64x128xf32> -> vector<64x128xf32>
    %c0_80 = arith.constant 0 : index
    %c0_81 = arith.constant 0 : index
    %206 = vector.load %arg15[%c0_80, %c0_81] : memref<1x128xf32, #tpu.memory_space<vmem>>, vector<1x128xf32>
    %207 = vector.broadcast %206 : vector<1x128xf32> to vector<64x128xf32>
    %208 = arith.addf %205, %207 : vector<64x128xf32>
    %cst_82 = arith.constant dense<0.000000e+00> : vector<128xf32>
    %209 = vector.multi_reduction <add>, %194, %cst_82 [0] : vector<64x128xf32> to vector<128xf32>
    %210 = vector.shape_cast %209 : vector<128xf32> to vector<1x128xf32>
    %cst_83 = arith.constant 6.400000e+01 : f32
    %211 = vector.broadcast %cst_83 : f32 to vector<1x128xf32>
    %212 = arith.divf %210, %211 : vector<1x128xf32>
    %213 = vector.broadcast %212 : vector<1x128xf32> to vector<64x128xf32>
    %214 = arith.subf %194, %213 : vector<64x128xf32>
    %215 = arith.mulf %214, %214 : vector<64x128xf32>
    %cst_84 = arith.constant dense<0.000000e+00> : vector<128xf32>
    %216 = vector.multi_reduction <add>, %215, %cst_84 [0] : vector<64x128xf32> to vector<128xf32>
    %217 = vector.shape_cast %216 : vector<128xf32> to vector<1x128xf32>
    %cst_85 = arith.constant 6.400000e+01 : f32
    %218 = vector.broadcast %cst_85 : f32 to vector<1x128xf32>
    %219 = arith.divf %217, %218 : vector<1x128xf32>
    %220 = vector.broadcast %212 : vector<1x128xf32> to vector<64x128xf32>
    %221 = arith.subf %194, %220 : vector<64x128xf32>
    %cst_86 = arith.constant 9.99999974E-6 : f32
    %222 = vector.broadcast %cst_86 : f32 to vector<1x128xf32>
    %223 = arith.addf %219, %222 : vector<1x128xf32>
    %224 = math.rsqrt %223 : vector<1x128xf32>
    %225 = vector.broadcast %224 : vector<1x128xf32> to vector<64x128xf32>
    %226 = arith.mulf %221, %225 : vector<64x128xf32>
    %227 = arith.mulf %202, %226 : vector<64x128xf32>
    %228 = arith.addf %227, %208 : vector<64x128xf32>
    %c0_87 = arith.constant 0 : index
    %c0_88 = arith.constant 0 : index
    %c0_89 = arith.constant 0 : index
    %229 = vector.load %arg16[%c0_87, %c0_88, %c0_89] : memref<1x64x128xf32, #tpu.memory_space<vmem>>, vector<1x64x128xf32>
    %230 = vector.shape_cast %229 : vector<1x64x128xf32> to vector<64x128xf32>
    %231 = vector.shape_cast %228 : vector<64x128xf32> to vector<1x64x128xf32>
    tpu.vector_store %arg16[%c0_87, %c0_88, %c0_89], %231 {strides = array<i32>} : memref<1x64x128xf32, #tpu.memory_space<vmem>>, vector<1x64x128xf32>,
    return
  }
  func.func @transform_0(%arg0: i32) -> (i32, i32, i32) {
    %c0_i32 = arith.constant 0 : i32
    %c0_i32_0 = arith.constant 0 : i32
    %c0_i32_1 = arith.constant 0 : i32
    return %arg0, %c0_i32, %c0_i32_0 : i32, i32, i32
  }
  func.func @transform_1(%arg0: i32) -> (i32, i32, i32) {
    %c0_i32 = arith.constant 0 : i32
    %c0_i32_0 = arith.constant 0 : i32
    %c0_i32_1 = arith.constant 0 : i32
    return %arg0, %c0_i32, %c0_i32_0 : i32, i32, i32
  }
  func.func @transform_2(%arg0: i32) -> (i32, i32) {
    %c0_i32 = arith.constant 0 : i32
    %c0_i32_0 = arith.constant 0 : i32
    %c0_i32_1 = arith.constant 0 : i32
    return %c0_i32, %c0_i32_0 : i32, i32
  }
  func.func @transform_3(%arg0: i32) -> (i32, i32) {
    %c0_i32 = arith.constant 0 : i32
    %c0_i32_0 = arith.constant 0 : i32
    %c0_i32_1 = arith.constant 0 : i32
    return %c0_i32, %c0_i32_0 : i32, i32
  }
  func.func @transform_4(%arg0: i32) -> (i32, i32) {
    %c0_i32 = arith.constant 0 : i32
    %c0_i32_0 = arith.constant 0 : i32
    %c0_i32_1 = arith.constant 0 : i32
    return %c0_i32, %c0_i32_0 : i32, i32
  }
  func.func @transform_5(%arg0: i32) -> (i32, i32) {
    %c0_i32 = arith.constant 0 : i32
    %c0_i32_0 = arith.constant 0 : i32
    %c0_i32_1 = arith.constant 0 : i32
    return %c0_i32, %c0_i32_0 : i32, i32
  }
  func.func @transform_6(%arg0: i32) -> (i32, i32) {
    %c0_i32 = arith.constant 0 : i32
    %c0_i32_0 = arith.constant 0 : i32
    %c0_i32_1 = arith.constant 0 : i32
    return %c0_i32, %c0_i32_0 : i32, i32
  }
  func.func @transform_7(%arg0: i32) -> (i32, i32) {
    %c0_i32 = arith.constant 0 : i32
    %c0_i32_0 = arith.constant 0 : i32
    %c0_i32_1 = arith.constant 0 : i32
    return %c0_i32, %c0_i32_0 : i32, i32
  }
  func.func @transform_8(%arg0: i32) -> (i32, i32) {
    %c0_i32 = arith.constant 0 : i32
    %c0_i32_0 = arith.constant 0 : i32
    %c0_i32_1 = arith.constant 0 : i32
    return %c0_i32, %c0_i32_0 : i32, i32
  }
  func.func @transform_9(%arg0: i32) -> (i32, i32, i32) {
    %c0_i32 = arith.constant 0 : i32
    %c0_i32_0 = arith.constant 0 : i32
    %c0_i32_1 = arith.constant 0 : i32
    %c0_i32_2 = arith.constant 0 : i32
    return %c0_i32, %c0_i32_0, %c0_i32_1 : i32, i32, i32
  }
  func.func @transform_10(%arg0: i32) -> (i32, i32) {
    %c0_i32 = arith.constant 0 : i32
    %c0_i32_0 = arith.constant 0 : i32
    %c0_i32_1 = arith.constant 0 : i32
    return %c0_i32, %c0_i32_0 : i32, i32
  }
  func.func @transform_11(%arg0: i32) -> (i32, i32) {
    %c0_i32 = arith.constant 0 : i32
    %c0_i32_0 = arith.constant 0 : i32
    %c0_i32_1 = arith.constant 0 : i32
    return %c0_i32, %c0_i32_0 : i32, i32
  }
  func.func @transform_12(%arg0: i32) -> (i32, i32) {
    %c0_i32 = arith.constant 0 : i32
    %c0_i32_0 = arith.constant 0 : i32
    %c0_i32_1 = arith.constant 0 : i32
    return %c0_i32, %c0_i32_0 : i32, i32
  }
  func.func @transform_13(%arg0: i32) -> (i32, i32) {
    %c0_i32 = arith.constant 0 : i32
    %c0_i32_0 = arith.constant 0 : i32
    %c0_i32_1 = arith.constant 0 : i32
    return %c0_i32, %c0_i32_0 : i32, i32
  }
  func.func @transform_14(%arg0: i32) -> (i32, i32) {
    %c0_i32 = arith.constant 0 : i32
    %c0_i32_0 = arith.constant 0 : i32
    %c0_i32_1 = arith.constant 0 : i32
    return %c0_i32, %c0_i32_0 : i32, i32
  }
  func.func @transform_15(%arg0: i32) -> (i32, i32, i32) {
    %c0_i32 = arith.constant 0 : i32
    %c0_i32_0 = arith.constant 0 : i32
    %c0_i32_1 = arith.constant 0 : i32
    return %arg0, %c0_i32, %c0_i32_0 : i32, i32, i32
  }
}

module attributes {stable_mosaic.version = 11 : i64} {
  func.func @_final_kernel(%arg0: i32, %arg1: memref<1x64x128xf32, #tpu.memory_space<vmem>>, %arg2: memref<128x128xbf16, #tpu.memory_space<vmem>>, %arg3: memref<1x128xf32, #tpu.memory_space<vmem>>, %arg4: memref<128x512xbf16, #tpu.memory_space<vmem>>, %arg5: memref<1x512xf32, #tpu.memory_space<vmem>>, %arg6: memref<512x256xbf16, #tpu.memory_space<vmem>>, %arg7: memref<1x256xf32, #tpu.memory_space<vmem>>, %arg8: memref<128x256xbf16, #tpu.memory_space<vmem>>, %arg9: memref<256x64xbf16, #tpu.memory_space<vmem>>, %arg10: memref<1x64xf32, #tpu.memory_space<vmem>>, %arg11: memref<3x64xf32, #tpu.memory_space<vmem>>, %arg12: memref<3x1xf32, #tpu.memory_space<vmem>>, %arg13: memref<1x3x64xf32, #tpu.memory_space<vmem>>) attributes {dimension_semantics = [#tpu.dimension_semantics<parallel>], iteration_bounds = array<i64: 2>, scalar_prefetch = 0 : i64, scratch_operands = 0 : i64, tpu.core_type = #tpu.core_type<tc>, window_params = [{transform_indices = @transform_0, window_bounds = array<i64: 1, 64, 128>}, {pipeline_mode = #tpu.pipeline_mode<synchronous>, transform_indices = @transform_1, window_bounds = array<i64: 128, 128>}, {pipeline_mode = #tpu.pipeline_mode<synchronous>, transform_indices = @transform_2, window_bounds = array<i64: 1, 128>}, {pipeline_mode = #tpu.pipeline_mode<synchronous>, transform_indices = @transform_3, window_bounds = array<i64: 128, 512>}, {pipeline_mode = #tpu.pipeline_mode<synchronous>, transform_indices = @transform_4, window_bounds = array<i64: 1, 512>}, {pipeline_mode = #tpu.pipeline_mode<synchronous>, transform_indices = @transform_5, window_bounds = array<i64: 512, 256>}, {pipeline_mode = #tpu.pipeline_mode<synchronous>, transform_indices = @transform_6, window_bounds = array<i64: 1, 256>}, {pipeline_mode = #tpu.pipeline_mode<synchronous>, transform_indices = @transform_7, window_bounds = array<i64: 128, 256>}, {pipeline_mode = #tpu.pipeline_mode<synchronous>, transform_indices = @transform_8, window_bounds = array<i64: 256, 64>}, {pipeline_mode = #tpu.pipeline_mode<synchronous>, transform_indices = @transform_9, window_bounds = array<i64: 1, 64>}, {pipeline_mode = #tpu.pipeline_mode<synchronous>, transform_indices = @transform_10, window_bounds = array<i64: 3, 64>}, {pipeline_mode = #tpu.pipeline_mode<synchronous>, transform_indices = @transform_11, window_bounds = array<i64: 3, 1>}, {transform_indices = @transform_12, window_bounds = array<i64: 1, 3, 64>}]} {
    %c0 = arith.constant 0 : index
    %c0_0 = arith.constant 0 : index
    %c0_1 = arith.constant 0 : index
    %0 = vector.load %arg1[%c0, %c0_0, %c0_1] : memref<1x64x128xf32, #tpu.memory_space<vmem>>, vector<1x64x128xf32>
    %1 = vector.shape_cast %0 : vector<1x64x128xf32> to vector<64x128xf32>
    %cst = arith.constant dense<0xFF800000> : vector<128xf32>
    %2 = vector.multi_reduction <maximumf>, %1, %cst [0] : vector<64x128xf32> to vector<128xf32>
    %3 = vector.shape_cast %2 : vector<128xf32> to vector<1x128xf32>
    %c0_2 = arith.constant 0 : index
    %c0_3 = arith.constant 0 : index
    %4 = vector.load %arg2[%c0_2, %c0_3] : memref<128x128xbf16, #tpu.memory_space<vmem>>, vector<128x128xbf16>
    %5 = arith.truncf %3 : vector<1x128xf32> to vector<1x128xbf16>
    %cst_4 = arith.constant dense<0.000000e+00> : vector<1x128xf32>
    %6 = tpu.matmul %5, %4, %cst_4 {dimension_numbers = #tpu.dot_dimension_numbers<[1], [0], [0], [1], [0, 0, 1, 1], [], []>} : vector<1x128xbf16>, vector<128x128xbf16>, vector<1x128xf32> -> vector<1x128xf32>
    %c0_5 = arith.constant 0 : index
    %c0_6 = arith.constant 0 : index
    %7 = vector.load %arg3[%c0_5, %c0_6] : memref<1x128xf32, #tpu.memory_space<vmem>>, vector<1x128xf32>
    %8 = arith.addf %6, %7 : vector<1x128xf32>
    %cst_7 = arith.constant 0.00999999977 : f32
    %9 = vector.broadcast %cst_7 : f32 to vector<1x128xf32>
    %10 = arith.mulf %9, %8 : vector<1x128xf32>
    %11 = arith.maximumf %8, %10 : vector<1x128xf32>
    %c0_8 = arith.constant 0 : index
    %c0_9 = arith.constant 0 : index
    %12 = vector.load %arg4[%c0_8, %c0_9] : memref<128x512xbf16, #tpu.memory_space<vmem>>, vector<128x512xbf16>
    %13 = arith.truncf %11 : vector<1x128xf32> to vector<1x128xbf16>
    %cst_10 = arith.constant dense<0.000000e+00> : vector<1x512xf32>
    %14 = tpu.matmul %13, %12, %cst_10 {dimension_numbers = #tpu.dot_dimension_numbers<[1], [0], [0], [1], [0, 0, 1, 1], [], []>} : vector<1x128xbf16>, vector<128x512xbf16>, vector<1x512xf32> -> vector<1x512xf32>
    %c0_11 = arith.constant 0 : index
    %c0_12 = arith.constant 0 : index
    %15 = vector.load %arg5[%c0_11, %c0_12] : memref<1x512xf32, #tpu.memory_space<vmem>>, vector<1x512xf32>
    %16 = arith.addf %14, %15 : vector<1x512xf32>
    %cst_13 = arith.constant 0.00999999977 : f32
    %17 = vector.broadcast %cst_13 : f32 to vector<1x512xf32>
    %18 = arith.mulf %17, %16 : vector<1x512xf32>
    %19 = arith.maximumf %16, %18 : vector<1x512xf32>
    %c0_14 = arith.constant 0 : index
    %c0_15 = arith.constant 0 : index
    %20 = vector.load %arg6[%c0_14, %c0_15] : memref<512x256xbf16, #tpu.memory_space<vmem>>, vector<512x256xbf16>
    %21 = arith.truncf %19 : vector<1x512xf32> to vector<1x512xbf16>
    %cst_16 = arith.constant dense<0.000000e+00> : vector<1x256xf32>
    %22 = tpu.matmul %21, %20, %cst_16 {dimension_numbers = #tpu.dot_dimension_numbers<[1], [0], [0], [1], [0, 0, 1, 1], [], []>} : vector<1x512xbf16>, vector<512x256xbf16>, vector<1x256xf32> -> vector<1x256xf32>
    %c0_17 = arith.constant 0 : index
    %c0_18 = arith.constant 0 : index
    %23 = vector.load %arg7[%c0_17, %c0_18] : memref<1x256xf32, #tpu.memory_space<vmem>>, vector<1x256xf32>
    %24 = arith.addf %22, %23 : vector<1x256xf32>
    %c0_19 = arith.constant 0 : index
    %c0_20 = arith.constant 0 : index
    %25 = vector.load %arg8[%c0_19, %c0_20] : memref<128x256xbf16, #tpu.memory_space<vmem>>, vector<128x256xbf16>
    %26 = arith.truncf %1 : vector<64x128xf32> to vector<64x128xbf16>
    %cst_21 = arith.constant dense<0.000000e+00> : vector<64x256xf32>
    %27 = tpu.matmul %26, %25, %cst_21 {dimension_numbers = #tpu.dot_dimension_numbers<[1], [0], [0], [1], [0, 0, 1, 1], [], []>} : vector<64x128xbf16>, vector<128x256xbf16>, vector<64x256xf32> -> vector<64x256xf32>
    %28 = vector.broadcast %24 : vector<1x256xf32> to vector<64x256xf32>
    %29 = arith.addf %27, %28 : vector<64x256xf32>
    %cst_22 = arith.constant 0.00999999977 : f32
    %30 = vector.broadcast %cst_22 : f32 to vector<64x256xf32>
    %31 = arith.mulf %30, %29 : vector<64x256xf32>
    %32 = arith.maximumf %29, %31 : vector<64x256xf32>
    %c0_23 = arith.constant 0 : index
    %c0_24 = arith.constant 0 : index
    %33 = vector.load %arg9[%c0_23, %c0_24] : memref<256x64xbf16, #tpu.memory_space<vmem>>, vector<256x64xbf16>
    %34 = arith.truncf %32 : vector<64x256xf32> to vector<64x256xbf16>
    %cst_25 = arith.constant dense<0.000000e+00> : vector<64x64xf32>
    %35 = tpu.matmul %34, %33, %cst_25 {dimension_numbers = #tpu.dot_dimension_numbers<[1], [0], [0], [1], [0, 0, 1, 1], [], []>} : vector<64x256xbf16>, vector<256x64xbf16>, vector<64x64xf32> -> vector<64x64xf32>
    %c0_26 = arith.constant 0 : index
    %c0_27 = arith.constant 0 : index
    %36 = vector.load %arg10[%c0_26, %c0_27] : memref<1x64xf32, #tpu.memory_space<vmem>>, vector<1x64xf32>
    %37 = vector.broadcast %36 : vector<1x64xf32> to vector<64x64xf32>
    %38 = arith.addf %35, %37 : vector<64x64xf32>
    %cst_28 = arith.constant 0.00999999977 : f32
    %39 = vector.broadcast %cst_28 : f32 to vector<64x64xf32>
    %40 = arith.mulf %39, %38 : vector<64x64xf32>
    %41 = arith.maximumf %38, %40 : vector<64x64xf32>
    %c0_29 = arith.constant 0 : index
    %c0_30 = arith.constant 0 : index
    %42 = vector.load %arg11[%c0_29, %c0_30] : memref<3x64xf32, #tpu.memory_space<vmem>>, vector<3x64xf32>
    %cst_31 = arith.constant dense<0.000000e+00> : vector<3x64xf32>
    %43 = tpu.matmul %42, %41, %cst_31 {dimension_numbers = #tpu.dot_dimension_numbers<[1], [1], [0], [0], [0, 0, 1, 0], [], []>} : vector<3x64xf32>, vector<64x64xf32>, vector<3x64xf32> -> vector<3x64xf32>
    %c0_32 = arith.constant 0 : index
    %c0_33 = arith.constant 0 : index
    %44 = vector.load %arg12[%c0_32, %c0_33] : memref<3x1xf32, #tpu.memory_space<vmem>>, vector<3x1xf32>
    %45 = vector.broadcast %44 : vector<3x1xf32> to vector<3x64xf32>
    %46 = arith.addf %43, %45 : vector<3x64xf32>
    %47 = math.tanh %46 : vector<3x64xf32>
    %c0_34 = arith.constant 0 : index
    %c0_35 = arith.constant 0 : index
    %c0_36 = arith.constant 0 : index
    %48 = vector.load %arg13[%c0_34, %c0_35, %c0_36] : memref<1x3x64xf32, #tpu.memory_space<vmem>>, vector<1x3x64xf32>
    %49 = vector.shape_cast %48 : vector<1x3x64xf32> to vector<3x64xf32>
    %50 = vector.shape_cast %47 : vector<3x64xf32> to vector<1x3x64xf32>
    tpu.vector_store %arg13[%c0_34, %c0_35, %c0_36], %50 {strides = array<i32>} : memref<1x3x64xf32, #tpu.memory_space<vmem>>, vector<1x3x64xf32>,
    return
  }
  func.func @transform_0(%arg0: i32) -> (i32, i32, i32) {
    %c0_i32 = arith.constant 0 : i32
    %c0_i32_0 = arith.constant 0 : i32
    %c0_i32_1 = arith.constant 0 : i32
    return %arg0, %c0_i32, %c0_i32_0 : i32, i32, i32
  }
  func.func @transform_1(%arg0: i32) -> (i32, i32) {
    %c0_i32 = arith.constant 0 : i32
    %c0_i32_0 = arith.constant 0 : i32
    %c0_i32_1 = arith.constant 0 : i32
    return %c0_i32, %c0_i32_0 : i32, i32
  }
  func.func @transform_2(%arg0: i32) -> (i32, i32) {
    %c0_i32 = arith.constant 0 : i32
    %c0_i32_0 = arith.constant 0 : i32
    %c0_i32_1 = arith.constant 0 : i32
    return %c0_i32, %c0_i32_0 : i32, i32
  }
  func.func @transform_3(%arg0: i32) -> (i32, i32) {
    %c0_i32 = arith.constant 0 : i32
    %c0_i32_0 = arith.constant 0 : i32
    %c0_i32_1 = arith.constant 0 : i32
    return %c0_i32, %c0_i32_0 : i32, i32
  }
  func.func @transform_4(%arg0: i32) -> (i32, i32) {
    %c0_i32 = arith.constant 0 : i32
    %c0_i32_0 = arith.constant 0 : i32
    %c0_i32_1 = arith.constant 0 : i32
    return %c0_i32, %c0_i32_0 : i32, i32
  }
  func.func @transform_5(%arg0: i32) -> (i32, i32) {
    %c0_i32 = arith.constant 0 : i32
    %c0_i32_0 = arith.constant 0 : i32
    %c0_i32_1 = arith.constant 0 : i32
    return %c0_i32, %c0_i32_0 : i32, i32
  }
  func.func @transform_6(%arg0: i32) -> (i32, i32) {
    %c0_i32 = arith.constant 0 : i32
    %c0_i32_0 = arith.constant 0 : i32
    %c0_i32_1 = arith.constant 0 : i32
    return %c0_i32, %c0_i32_0 : i32, i32
  }
  func.func @transform_7(%arg0: i32) -> (i32, i32) {
    %c0_i32 = arith.constant 0 : i32
    %c0_i32_0 = arith.constant 0 : i32
    %c0_i32_1 = arith.constant 0 : i32
    return %c0_i32, %c0_i32_0 : i32, i32
  }
  func.func @transform_8(%arg0: i32) -> (i32, i32) {
    %c0_i32 = arith.constant 0 : i32
    %c0_i32_0 = arith.constant 0 : i32
    %c0_i32_1 = arith.constant 0 : i32
    return %c0_i32, %c0_i32_0 : i32, i32
  }
  func.func @transform_9(%arg0: i32) -> (i32, i32) {
    %c0_i32 = arith.constant 0 : i32
    %c0_i32_0 = arith.constant 0 : i32
    %c0_i32_1 = arith.constant 0 : i32
    return %c0_i32, %c0_i32_0 : i32, i32
  }
  func.func @transform_10(%arg0: i32) -> (i32, i32) {
    %c0_i32 = arith.constant 0 : i32
    %c0_i32_0 = arith.constant 0 : i32
    %c0_i32_1 = arith.constant 0 : i32
    return %c0_i32, %c0_i32_0 : i32, i32
  }
  func.func @transform_11(%arg0: i32) -> (i32, i32) {
    %c0_i32 = arith.constant 0 : i32
    %c0_i32_0 = arith.constant 0 : i32
    %c0_i32_1 = arith.constant 0 : i32
    return %c0_i32, %c0_i32_0 : i32, i32
  }
  func.func @transform_12(%arg0: i32) -> (i32, i32, i32) {
    %c0_i32 = arith.constant 0 : i32
    %c0_i32_0 = arith.constant 0 : i32
    %c0_i32_1 = arith.constant 0 : i32
    return %arg0, %c0_i32, %c0_i32_0 : i32, i32, i32
  }
}

</mosaic_0001>

<bundles_post_ra>
// kernel: generator_forward.4
= control target key start
LH: loop header
LB: loop body
LE: loop exit
PB: predicated region body
PF: predicated region fallthrough
CT: control target
= control target key end

     0   :  { %vm94_vm0 = vcmask 1040384   ;;  %vm95_vm1 = vcmask 1041408   ;;  %v431_v1 = vmov 65535   ;;  %vm69_vm2 = vcmask 285696   ;;  %s641_s1 = inlined_call_operand.vmem [shape: bf16[35,128], index: 1, kind: input, shape index: {}]   ;;  %s642_s2 = inlined_call_operand.vmem [shape: f32[1,128], index: 2, kind: input, shape index: {}]   ;;  %s643_s0 = inlined_call_operand.vmem [shape: f32[128,35], index: 0, kind: input, shape index: {}]   ;;  %s644_s3 = inlined_call_operand.vmem [shape: bf16[128,128], index: 3, kind: input, shape index: {}]   ;;  %s645_s4 = inlined_call_operand.vmem [shape: f32[1,128], index: 4, kind: input, shape index: {}]   ;;  %s646_s5 = inlined_call_operand.vmem [shape: f32[128,128], index: 5, kind: output, shape index: {}]  }
   0x1   :  { %v41_v0 = vld [vmem:[%s641_s1 + $0x10] sm:$0x3]  ;;  %v96_v2 = vsel %vm94_vm0, 4294967295, %v431_v1  ;;  %v408_v7 = vld [vmem:[%s641_s1 + $0x8] sm:$0xff]  ;;  %v407_v8 = vld [vmem:[%s641_s1] sm:$0xff] }
   0x2   :  { %v63_v3 = vunpack.c.l.b16 %v41_v0  ;;  %v97_v4 = vsel %vm95_vm1, %v96_v2, 0  ;;  %v21_v9 = vld [vmem:[%s643_s0] sm:$0xff]  ;;  %v22_v10 = vld [vmem:[%s643_s0 + $0x8] sm:$0xff]  ;;  %v23_v12 = vld [vmem:[%s643_s0 + $0x10] sm:$0xff] }
   0x3   :  { %v42_v11 = vpack.c.bf16 %v22_v10, %v21_v9  ;;  %v24_v13 = vld [vmem:[%s643_s0 + $0x18] sm:$0xff]  ;;  %v25_v15 = vld [vmem:[%s643_s0 + $0x20] sm:$0xff]  ;;  %v26_v16 = vld [vmem:[%s643_s0 + $0x28] sm:$0xff] }
   0x4   :  { %v66_v5 = vpack.c.b16 %v63_v3, %v63_v3  ;;  %v43_v14 = vpack.c.bf16 %v24_v13, %v23_v12  ;;  %v44_v17 = vpack.c.bf16 %v26_v16, %v25_v15  ;;  %v31_v18 = vld [vmem:[%s643_s0 + $0x50] sm:$0xff]  ;;  %v32_v19 = vld [vmem:[%s643_s0 + $0x58] sm:$0xff]  ;;  %v414_v23 = vld [vmem:[%s644_s3 + $0x28] sm:$0xff] }
   0x5   :  { %v47_v20 = vpack.c.bf16 %v32_v19, %v31_v18  ;;  %v416_v21 = vld [vmem:[%s644_s3 + $0x38] sm:$0xff]  ;;  %v415_v22 = vld [vmem:[%s644_s3 + $0x30] sm:$0xff]  ;;  %v33_v26 = vld [vmem:[%s643_s0 + $0x60] sm:$0xff] }
   0x6   :  { %v99_v6 = vand.u32 %v97_v4, %v66_v5  ;;  %258 = vmatpush.bf16.msra.mxu1 %v416_v21  ;;  %420 = vmatpush.bf16.msra.mxu2 %v416_v21  ;;  %v27_v24 = vld [vmem:[%s643_s0 + $0x30] sm:$0xff]  ;;  %v28_v25 = vld [vmem:[%s643_s0 + $0x38] sm:$0xff]  ;;  %v34_v27 = vld [vmem:[%s643_s0 + $0x68] sm:$0xff] }
   0x7   :  { %v413_v28 = vld [vmem:[%s644_s3 + $0x20] sm:$0xff]  ;;  %v45_v29 = vpack.c.bf16 %v28_v25, %v27_v24  ;;  %v48_v30 = vpack.c.bf16 %v34_v27, %v33_v26  ;;  %v30_v32 = vld [vmem:[%s643_s0 + $0x48] sm:$0xff]  ;;  %v35_v33 = vld [vmem:[%s643_s0 + $0x70] sm:$0xff] }
   0x8   :  { %106 = vmatpush.bf16.msra.mxu0 %v99_v6  ;;  %417 = vmatpush.bf16.msra.mxu3 %v99_v6  ;;  %v29_v31 = vld [vmem:[%s643_s0 + $0x40] sm:$0xff]  ;;  %v36_v34 = vld [vmem:[%s643_s0 + $0x78] sm:$0xff]  ;;  %v411_v38 = vld [vmem:[%s644_s3 + $0x10] sm:$0xff] }
   0x9   :  { %v46_v35 = vpack.c.bf16 %v30_v32, %v29_v31  ;;  %v49_v36 = vpack.c.bf16 %v36_v34, %v35_v33  ;;  %v412_v37 = vld [vmem:[%s644_s3 + $0x18] sm:$0xff]  ;;  %v410_v39 = vld [vmem:[%s644_s3 + $0x8] sm:$0xff]  ;;  %v409_v40 = vld [vmem:[%s644_s3] sm:$0xff] }
   0xa   :  { %259 = vmatpush.bf16.msra.mxu1 %v415_v22  ;;  %421 = vmatpush.bf16.msra.mxu2 %v415_v22  ;;  %v554_v42 = vld [vmem:[%s642_s2] ss:$0 sm:$0xff] }
   0xc   :  { %107 = vmatpush.bf16.msra.mxu0 %v408_v7  ;;  %418 = vmatpush.bf16.msra.mxu3 %v408_v7 }
   0xe   :  { %260 = vmatpush.bf16.msra.mxu1 %v414_v23  ;;  %422 = vmatpush.bf16.msra.mxu2 %v414_v23 }
  0x10   :  { %108 = vmatpush.bf16.msra.mxu0 %v407_v8  ;;  %419 = vmatpush.bf16.msra.mxu3 %v407_v8 }
  0x12   :  { %261 = vmatpush.bf16.msra.mxu1 %v413_v28  ;;  %423 = vmatpush.bf16.msra.mxu2 %v413_v28 }
  0x13   :  { %367 = vmatmul.msk.bf16.vlgmr.msra.gmra.mxu0 %vm69_vm2, %v42_v11  ;;  %372 = vmatmul.msk.bf16.vlgmr.msra.gmra.mxu3 %vm69_vm2, %v47_v20 }
  0x16   :  { %262 = vmatpush.bf16.msra.mxu1 %v412_v37  ;;  %424 = vmatpush.bf16.msra.mxu2 %v412_v37 }
  0x1a   :  { %263 = vmatpush.bf16.msra.mxu1 %v411_v38  ;;  %425 = vmatpush.bf16.msra.mxu2 %v411_v38 }
  0x1e   :  { %264 = vmatpush.bf16.msra.mxu1 %v410_v39  ;;  %426 = vmatpush.bf16.msra.mxu2 %v410_v39 }
  0x22   :  { %265 = vmatpush.bf16.msra.mxu1 %v409_v40  ;;  %427 = vmatpush.bf16.msra.mxu2 %v409_v40 }
  0x23   :  { %368 = vmatmul.msk.bf16.gmra.mxu0 %vm69_vm2, %v43_v14  ;;  %373 = vmatmul.msk.bf16.gmra.mxu3 %vm69_vm2, %v48_v30 }
  0x33   :  { %369 = vmatmul.msk.bf16.gmra.mxu0 %vm69_vm2, %v44_v17  ;;  %374 = vmatmul.msk.bf16.gmra.mxu3 %vm69_vm2, %v49_v36 }
  0x43   :  { %370 = vmatmul.msk.bf16.gmra.mxu0 %vm69_vm2, %v45_v29 }
  0x53   :  { %371 = vmatmul.msk.bf16.gmra.mxu0 %vm69_vm2, %v46_v35 }
  0x90   :  { %v110_v41 = vpop.f32.mrf.mxu0 }
  0x91   :  { %v111_v43 = vadd.f32 %v554_v42, %v110_v41 }
  0x93   :  { %v150_v45 = vmul.f32 0.01, %v111_v43 }
  0x95   :  { %v166_v48 = vmax.f32 %v111_v43, %v150_v45 }
  0x96   :  { %v135_v13 = vpop.f32.mrf.mxu3 }
  0x97   :  { %v136_v26 = vadd.f32 %v554_v42, %v135_v13 }
  0x98   :  { %v112_v44 = vpop.f32.mrf.mxu0 }
  0x99   :  { %v113_v46 = vadd.f32 %v554_v42, %v112_v44  ;;  %v160_v28 = vmul.f32 0.01, %v136_v26 }
  0x9b   :  { %v151_v47 = vmul.f32 0.01, %v113_v46  ;;  %v176_v30 = vmax.f32 %v136_v26, %v160_v28 }
  0x9d   :  { %v167_v49 = vmax.f32 %v113_v46, %v151_v47 }
  0x9e   :  { %v137_v18 = vpop.f32.mrf.mxu3 }
  0x9f   :  { %v198_v50 = vpack.c.bf16 %v167_v49, %v166_v48  ;;  %v138_v27 = vadd.f32 %v554_v42, %v137_v18 }
  0xa0   :  { %v115_v51 = vpop.f32.mrf.mxu0 }
  0xa1   :  { %266 = vmatmul.bf16.vlgmr.msra.gmra.mxu1 %v198_v50  ;;  %v116_v52 = vadd.f32 %v554_v42, %v115_v51  ;;  %v161_v29 = vmul.f32 0.01, %v138_v27  ;;  %v575_v51 = vld [vmem:[%s645_s4] ss:$0 sm:$0xff] }
  0xa3   :  { %v152_v54 = vmul.f32 0.01, %v116_v52  ;;  %v177_v31 = vmax.f32 %v138_v27, %v161_v29 }
  0xa5   :  { %v168_v57 = vmax.f32 %v116_v52, %v152_v54  ;;  %v203_v33 = vpack.c.bf16 %v177_v31, %v176_v30 }
  0xa6   :  { %v140_v25 = vpop.f32.mrf.mxu3 }
  0xa7   :  { %v141_v34 = vadd.f32 %v554_v42, %v140_v25 }
  0xa8   :  { %v117_v53 = vpop.f32.mrf.mxu0 }
  0xa9   :  { %v118_v55 = vadd.f32 %v554_v42, %v117_v53  ;;  %v162_v37 = vmul.f32 0.01, %v141_v34 }
  0xab   :  { %v153_v56 = vmul.f32 0.01, %v118_v55  ;;  %v178_v39 = vmax.f32 %v141_v34, %v162_v37 }
  0xad   :  { %v169_v58 = vmax.f32 %v118_v55, %v153_v56 }
  0xae   :  { %v142_v32 = vpop.f32.mrf.mxu3 }
  0xaf   :  { %v199_v59 = vpack.c.bf16 %v169_v58, %v168_v57  ;;  %v143_v35 = vadd.f32 %v554_v42, %v142_v32 }
  0xb0   :  { %v120_v60 = vpop.f32.mrf.mxu0 }
  0xb1   :  { %271 = vmatmul.bf16.gmra.mxu1 %v199_v59  ;;  %v121_v61 = vadd.f32 %v554_v42, %v120_v60  ;;  %v163_v38 = vmul.f32 0.01, %v143_v35 }
  0xb3   :  { %v154_v63 = vmul.f32 0.01, %v121_v61  ;;  %v179_v40 = vmax.f32 %v143_v35, %v163_v38 }
  0xb5   :  { %v170_v2 = vmax.f32 %v121_v61, %v154_v63  ;;  %v204_v41 = vpack.c.bf16 %v179_v40, %v178_v39 }
  0xb6   :  { %v145_v36 = vpop.f32.mrf.mxu3 }
  0xb7   :  { %v146_v44 = vadd.f32 %v554_v42, %v145_v36 }
  0xb8   :  { %v122_v62 = vpop.f32.mrf.mxu0 }
  0xb9   :  { %v123_v0 = vadd.f32 %v554_v42, %v122_v62  ;;  %v164_v46 = vmul.f32 0.01, %v146_v44 }
  0xbb   :  { %v155_v1 = vmul.f32 0.01, %v123_v0  ;;  %v180_v48 = vmax.f32 %v146_v44, %v164_v46 }
  0xbd   :  { %v171_v3 = vmax.f32 %v123_v0, %v155_v1 }
  0xbe   :  { %v147_v43 = vpop.f32.mrf.mxu3 }
  0xbf   :  { %v200_v4 = vpack.c.bf16 %v171_v3, %v170_v2  ;;  %v148_v45 = vadd.f32 %v554_v42, %v147_v43 }
  0xc0   :  { %v125_v5 = vpop.f32.mrf.mxu0 }
  0xc1   :  { %276 = vmatmul.bf16.gmra.mxu1 %v200_v4  ;;  %v126_v6 = vadd.f32 %v554_v42, %v125_v5  ;;  %v165_v47 = vmul.f32 0.01, %v148_v45 }
  0xc3   :  { %v156_v8 = vmul.f32 0.01, %v126_v6  ;;  %v181_v49 = vmax.f32 %v148_v45, %v165_v47 }
  0xc5   :  { %v172_v11 = vmax.f32 %v126_v6, %v156_v8  ;;  %v205_v50 = vpack.c.bf16 %v181_v49, %v180_v48 }
  0xc8   :  { %v127_v7 = vpop.f32.mrf.mxu0 }
  0xc9   :  { %v128_v9 = vadd.f32 %v554_v42, %v127_v7 }
  0xcb   :  { %v157_v10 = vmul.f32 0.01, %v128_v9 }
  0xcd   :  { %v173_v12 = vmax.f32 %v128_v9, %v157_v10 }
  0xcf   :  { %v201_v14 = vpack.c.bf16 %v173_v12, %v172_v11 }
  0xd0   :  { %v130_v15 = vpop.f32.mrf.mxu0 }
  0xd1   :  { %281 = vmatmul.bf16.gmra.mxu1 %v201_v14  ;;  %v131_v16 = vadd.f32 %v554_v42, %v130_v15 }
  0xd3   :  { %v158_v19 = vmul.f32 0.01, %v131_v16 }
  0xd5   :  { %v174_v22 = vmax.f32 %v131_v16, %v158_v19 }
  0xd8   :  { %v132_v17 = vpop.f32.mrf.mxu0 }
  0xd9   :  { %v133_v20 = vadd.f32 %v554_v42, %v132_v17 }
  0xdb   :  { %v159_v21 = vmul.f32 0.01, %v133_v20 }
  0xdd   :  { %v175_v23 = vmax.f32 %v133_v20, %v159_v21 }
  0xdf   :  { %v202_v24 = vpack.c.bf16 %v175_v23, %v174_v22 }
  0xe1   :  { %286 = vmatmul.bf16.vlgmr.msra.gmra.mxu2 %v202_v24 }
  0xf1   :  { %291 = vmatmul.bf16.gmra.mxu2 %v203_v33 }
 0x101   :  { %296 = vmatmul.bf16.gmra.mxu2 %v204_v41 }
 0x111   :  { %301 = vmatmul.bf16.gmra.mxu2 %v205_v50 }
 0x11e   :  { %v267_v52 = vpop.f32.mrf.mxu1 }
 0x11f   :  { %v268_v53 = vadd.f32 %v575_v51, %v267_v52 }
 0x121   :  { %v307_v54 = vmul.f32 0.01, %v268_v53 }
 0x123   :  { %v323_v55 = vmax.f32 %v268_v53, %v307_v54 }
 0x125   :  { %339 = vst [vmem:[%s646_s5] sm:$0xff] %v323_v55 }
 0x126   :  { %v269_v42 = vpop.f32.mrf.mxu1 }
 0x127   :  { %v270_v56 = vadd.f32 %v575_v51, %v269_v42 }
 0x129   :  { %v308_v57 = vmul.f32 0.01, %v270_v56 }
 0x12b   :  { %v324_v58 = vmax.f32 %v270_v56, %v308_v57 }
 0x12d   :  { %340 = vst [vmem:[%s646_s5 + $0x8] sm:$0xff] %v324_v58 }
 0x12e   :  { %v272_v59 = vpop.f32.mrf.mxu1 }
 0x12f   :  { %v273_v60 = vadd.f32 %v575_v51, %v272_v59 }
 0x131   :  { %v309_v61 = vmul.f32 0.01, %v273_v60 }
 0x133   :  { %v325_v62 = vmax.f32 %v273_v60, %v309_v61 }
 0x135   :  { %341 = vst [vmem:[%s646_s5 + $0x10] sm:$0xff] %v325_v62 }
 0x136   :  { %v274_v63 = vpop.f32.mrf.mxu1 }
 0x137   :  { %v275_v0 = vadd.f32 %v575_v51, %v274_v63 }
 0x139   :  { %v310_v1 = vmul.f32 0.01, %v275_v0 }
 0x13b   :  { %v326_v2 = vmax.f32 %v275_v0, %v310_v1 }
 0x13d   :  { %342 = vst [vmem:[%s646_s5 + $0x18] sm:$0xff] %v326_v2 }
 0x13e   :  { %v277_v3 = vpop.f32.mrf.mxu1 }
 0x13f   :  { %v278_v4 = vadd.f32 %v575_v51, %v277_v3 }
 0x141   :  { %v311_v5 = vmul.f32 0.01, %v278_v4 }
 0x143   :  { %v327_v6 = vmax.f32 %v278_v4, %v311_v5 }
 0x145   :  { %343 = vst [vmem:[%s646_s5 + $0x20] sm:$0xff] %v327_v6 }
 0x146   :  { %v279_v7 = vpop.f32.mrf.mxu1 }
 0x147   :  { %v280_v8 = vadd.f32 %v575_v51, %v279_v7 }
 0x149   :  { %v312_v9 = vmul.f32 0.01, %v280_v8 }
 0x14b   :  { %v328_v10 = vmax.f32 %v280_v8, %v312_v9 }
 0x14d   :  { %344 = vst [vmem:[%s646_s5 + $0x28] sm:$0xff] %v328_v10 }
 0x14e   :  { %v282_v11 = vpop.f32.mrf.mxu1 }
 0x14f   :  { %v283_v12 = vadd.f32 %v575_v51, %v282_v11 }
 0x151   :  { %v313_v13 = vmul.f32 0.01, %v283_v12 }
 0x153   :  { %v329_v14 = vmax.f32 %v283_v12, %v313_v13 }
 0x155   :  { %345 = vst [vmem:[%s646_s5 + $0x30] sm:$0xff] %v329_v14 }
 0x156   :  { %v284_v15 = vpop.f32.mrf.mxu1 }
 0x157   :  { %v285_v16 = vadd.f32 %v575_v51, %v284_v15 }
 0x159   :  { %v314_v17 = vmul.f32 0.01, %v285_v16 }
 0x15b   :  { %v330_v18 = vmax.f32 %v285_v16, %v314_v17 }
 0x15d   :  { %346 = vst [vmem:[%s646_s5 + $0x38] sm:$0xff] %v330_v18 }
 0x164   :  { %v287_v19 = vpop.f32.mrf.mxu2 }
 0x165   :  { %v288_v20 = vadd.f32 %v575_v51, %v287_v19 }
 0x167   :  { %v315_v21 = vmul.f32 0.01, %v288_v20 }
 0x169   :  { %v331_v22 = vmax.f32 %v288_v20, %v315_v21 }
 0x16b   :  { %347 = vst [vmem:[%s646_s5 + $0x40] sm:$0xff] %v331_v22 }
 0x16c   :  { %v289_v23 = vpop.f32.mrf.mxu2 }
 0x16d   :  { %v290_v24 = vadd.f32 %v575_v51, %v289_v23 }
 0x16f   :  { %v316_v25 = vmul.f32 0.01, %v290_v24 }
 0x171   :  { %v332_v26 = vmax.f32 %v290_v24, %v316_v25 }
 0x173   :  { %348 = vst [vmem:[%s646_s5 + $0x48] sm:$0xff] %v332_v26 }
 0x174   :  { %v292_v27 = vpop.f32.mrf.mxu2 }
 0x175   :  { %v293_v28 = vadd.f32 %v575_v51, %v292_v27 }
 0x177   :  { %v317_v29 = vmul.f32 0.01, %v293_v28 }
 0x179   :  { %v333_v30 = vmax.f32 %v293_v28, %v317_v29 }
 0x17b   :  { %349 = vst [vmem:[%s646_s5 + $0x50] sm:$0xff] %v333_v30 }
 0x17c   :  { %v294_v31 = vpop.f32.mrf.mxu2 }
 0x17d   :  { %v295_v32 = vadd.f32 %v575_v51, %v294_v31 }
 0x17f   :  { %v318_v33 = vmul.f32 0.01, %v295_v32 }
 0x181   :  { %v334_v34 = vmax.f32 %v295_v32, %v318_v33 }
 0x183   :  { %350 = vst [vmem:[%s646_s5 + $0x58] sm:$0xff] %v334_v34 }
 0x184   :  { %v297_v35 = vpop.f32.mrf.mxu2 }
 0x185   :  { %v298_v36 = vadd.f32 %v575_v51, %v297_v35 }
 0x187   :  { %v319_v37 = vmul.f32 0.01, %v298_v36 }
 0x189   :  { %v335_v38 = vmax.f32 %v298_v36, %v319_v37 }
 0x18b   :  { %351 = vst [vmem:[%s646_s5 + $0x60] sm:$0xff] %v335_v38 }
 0x18c   :  { %v299_v39 = vpop.f32.mrf.mxu2 }
 0x18d   :  { %v300_v40 = vadd.f32 %v575_v51, %v299_v39 }
 0x18f   :  { %v320_v41 = vmul.f32 0.01, %v300_v40 }
 0x191   :  { %v336_v43 = vmax.f32 %v300_v40, %v320_v41 }
 0x193   :  { %352 = vst [vmem:[%s646_s5 + $0x68] sm:$0xff] %v336_v43 }
 0x194   :  { %v302_v44 = vpop.f32.mrf.mxu2 }
 0x195   :  { %v303_v45 = vadd.f32 %v575_v51, %v302_v44 }
 0x197   :  { %v321_v46 = vmul.f32 0.01, %v303_v45 }
 0x199   :  { %v337_v47 = vmax.f32 %v303_v45, %v321_v46 }
 0x19b   :  { %353 = vst [vmem:[%s646_s5 + $0x70] sm:$0xff] %v337_v47 }
 0x19c   :  { %v304_v48 = vpop.f32.mrf.mxu2 }
 0x19d   :  { %v305_v49 = vadd.f32 %v575_v51, %v304_v48 }
 0x19f   :  { %v322_v50 = vmul.f32 0.01, %v305_v49 }
 0x1a1   :  { %v338_v52 = vmax.f32 %v305_v49, %v322_v50 }
 0x1a3   :  { %354 = vst [vmem:[%s646_s5 + $0x78] sm:$0xff] %v338_v52 }

// kernel: generator_forward.5
= control target key start
LH: loop header
LB: loop body
LE: loop exit
PB: predicated region body
PF: predicated region fallthrough
CT: control target
= control target key end

     0   :  { %s7140_s0 = inlined_call_operand.vmem [shape: f32[2,64,3], index: 0, kind: input, shape index: {}]   ;;  %s7141_s1 = inlined_call_operand.vmem [shape: f32[2,64,128], index: 1, kind: input, shape index: {}]   ;;  %s7142_s2 = inlined_call_operand.vmem [shape: bf16[3,32], index: 2, kind: input, shape index: {}]   ;;  %s7143_s3 = inlined_call_operand.hbm [shape: f32[1,32], index: 3, kind: input, shape index: {}]   ;;  %s7144_s4 = inlined_call_operand.hbm [shape: bf16[32,64], index: 4, kind: input, shape index: {}]   ;;  %s7145_s5 = inlined_call_operand.hbm [shape: f32[1,64], index: 5, kind: input, shape index: {}]   ;;  %s7146_s6 = inlined_call_operand.hbm [shape: bf16[3,64], index: 6, kind: input, shape index: {}]   ;;  %s7147_s7 = inlined_call_operand.hbm [shape: bf16[3,64], index: 7, kind: input, shape index: {}]   ;;  %s7148_s8 = inlined_call_operand.hbm [shape: f32[1,64], index: 8, kind: input, shape index: {}]   ;;  %s7149_s9 = inlined_call_operand.vmem [shape: bf16[5,64,64], index: 9, kind: input, shape index: {}]   ;;  %s7150_s10 = inlined_call_operand.vmem [shape: f32[1,64], index: 10, kind: input, shape index: {}]   ;;  %s7151_s11 = inlined_call_operand.vmem [shape: bf16[128,64], index: 11, kind: input, shape index: {}]   ;;  %s7152_s12 = inlined_call_operand.vmem [shape: f32[1,64], index: 12, kind: input, shape index: {}]   ;;  %s7153_s13 = inlined_call_operand.vmem [shape: bf16[128,64], index: 13, kind: input, shape index: {}]   ;;  %s7154_s14 = inlined_call_operand.hbm [shape: f32[1,64], index: 14, kind: input, shape index: {}]   ;;  %s7155_s15 = inlined_call_operand.vmem [shape: f32[2,64,64], index: 15, kind: output, shape index: {}]  }
   0x1   :  { %7249 = sst [smem:[#allocation108_spill]] %s7144_s4 }
   0x2   :  { %7250 = sst [smem:[#allocation109_spill]] %s7146_s6 }
   0x3   :  { %7251 = sst [smem:[#allocation110_spill]] %s7148_s8 }
   0x4   :  { %7252 = sst [smem:[#allocation111_spill]] %s7155_s15 }
   0x5   :  { %20 = vsyncpa [#allocation3], 0 }
   0x6   :  { %21 = vsyncpa [#allocation5], 0 }
   0x7   :  { %22 = vsyncpa [#allocation8], 0 }
   0x8   :  { %23 = vsyncpa [#allocation11], 0  ;;  %s4637_s18 = smov 0  }
   0x9 LB: > { %7253 = sst [smem:[#allocation17_spill]] %s4543_s18  ;;  %s4646_s22 = sadd.s32 4294967295, %s4543_s18   ;;  %s4543_s18 = sphi %s4637_s18, %s29_s18  }
   0xa   : > { %s7254_s4 = sld [smem:[#allocation108_spill]]  ;;  %p3681_p0 = scmp.ge.s32.totalorder %s4543_s18, 1 }
   0xb   : > { %p385_p1 = scmp.lt.s32.totalorder %s4543_s18, 3  ;;  %p4162_p2 = scmp.eq.s32.totalorder %s4646_s22, 0 }
   0xc   : > { %s4545_s24 = smov [#allocation4]   ;;  %s7256_s6 = sld [smem:[#allocation109_spill]] }
   0xd   : > { %p4651_p3 = pnand %p3681_p0, %p385_p1  ;;  %s413_s25 = sshll.u32 %s4545_s24, 4  ;;  %s414_s25 = int_to_ptr.vmem [resolvable:$true] %s413_s25 }
   0xe   : > { %s4546_s30 = smov [#allocation7]   ;;  %s7258_s8 = sld [smem:[#allocation110_spill]] }
   0xf   : > { %p4140_p4 = pneg %p4651_p3  ;;  %s440_s16 = sshll.u32 %s4546_s30, 4  ;;  %s441_s16 = int_to_ptr.vmem [resolvable:$true] %s440_s16 }
  0x10   : > { %s411_s21 = sshll.u32 %s7254_s4, 4  ;;  %s4547_s24 = smov 64   ;;  %s412_s21 = int_to_ptr.hbm [resolvable:$true] %s411_s21 }
  0x11   : > { %p4662_p5 = pnand %p4162_p2, %p4140_p4  ;;  %s4548_s26 = smov 4  }
  0x12   : > { %s438_s28 = sshll.u32 %s7256_s6, 4  ;;  %s4549_s27 = smov [#allocation10]   ;;  %s439_s28 = int_to_ptr.hbm [resolvable:$true] %s438_s28 }
  0x13   : > { %4146 = dma.hbm_to_vmem [thread:$0]  (!%p4662_p5), %s412_s21, 256, %s414_s25, [#allocation5], %s4547_s24, %s4547_s24, %s4548_s26  }
  0x14   : > { %s462_s20 = sshll.u32 %s7258_s8, 4  ;;  %s464_s4 = sshll.u32 %s4549_s27, 4  ;;  %s463_s20 = int_to_ptr.hbm [resolvable:$true] %s462_s20  ;;  %s465_s4 = int_to_ptr.vmem [resolvable:$true] %s464_s4 }
  0x15   : > { %4152 = dma.hbm_to_vmem [thread:$0]  (!%p4662_p5), %s439_s28, 32, %s441_s16, [#allocation8]  }
  0x16   : > { %s400_s30 = sshll.u32 %s7143_s3, 4  ;;  %s426_s8 = sshll.u32 %s7145_s5, 4  ;;  %s401_s30 = int_to_ptr.hbm [resolvable:$true] %s400_s30  ;;  %s427_s8 = int_to_ptr.hbm [resolvable:$true] %s426_s8 }
  0x17   : > { %4158 = dma.hbm_to_vmem [thread:$0]  (!%p4662_p5), %s463_s20, 16, %s465_s4, [#allocation11]  }
  0x18   : > { %s4550_s15 = smov [#allocation2]   ;;  %s4551_s25 = smov [#allocation6]  }
  0x19   : > { %s402_s21 = sshll.u32 %s4550_s15, 4  ;;  %s428_s6 = sshll.u32 %s4551_s25, 4  ;;  %s403_s21 = int_to_ptr.vmem [resolvable:$true] %s402_s21  ;;  %s429_s6 = int_to_ptr.vmem [resolvable:$true] %s428_s6 }
  0x1a   : > { %4143 = dma.hbm_to_vmem [thread:$0]  (!%p4662_p5), %s401_s30, 16, %s403_s21, [#allocation3]  }
  0x1b   : > { %s450_s16 = sshll.u32 %s7147_s7, 4  ;;  %s489_s24 = sshll.u32 %s7154_s14, 4  ;;  %s451_s16 = int_to_ptr.hbm [resolvable:$true] %s450_s16  ;;  %s490_s24 = int_to_ptr.hbm [resolvable:$true] %s489_s24 }
  0x1c   : > { %4149 = dma.hbm_to_vmem [thread:$0]  (!%p4662_p5), %s427_s8, 16, %s429_s6, [#allocation5]  }
  0x1d   : > { %s4552_s15 = smov [#allocation9]   ;;  %s4553_s27 = smov [#allocation12]  }
  0x1e   : > { %s452_s26 = sshll.u32 %s4552_s15, 4  ;;  %s491_s30 = sshll.u32 %s4553_s27, 4  ;;  %s453_s26 = int_to_ptr.vmem [resolvable:$true] %s452_s26  ;;  %s492_s30 = int_to_ptr.vmem [resolvable:$true] %s491_s30 }
  0x1f   : > { %4155 = dma.hbm_to_vmem [thread:$0]  (!%p4662_p5), %s451_s16, 32, %s453_s26, [#allocation8]  }
  0x20   : > { %4161 = dma.hbm_to_vmem [thread:$0]  (!%p4662_p5), %s490_s24, 16, %s492_s30, [#allocation11]  }
  0x21   : > { %520 = sbr.rel (%p4651_p3) target bundleno = 2560 (0xa00), region = 80 }
  0x26   : > { %4526 = dma.done.wait (%p4162_p2), [#allocation3], 16  }
  0x27   : > { %4528 = vsyncadd (%p4162_p2), [#allocation3], 4294967280 }
  0x28   : > { %4530 = dma.done.wait (%p4162_p2), [#allocation5], 272  }
  0x29   : > { %4532 = vsyncadd (%p4162_p2), [#allocation5], 4294967024 }
  0x2a   : > { %4534 = dma.done.wait (%p4162_p2), [#allocation8], 64  }
  0x2b   : > { %4536 = vsyncadd (%p4162_p2), [#allocation8], 4294967232 }
  0x2c   : > { %4538 = dma.done.wait (%p4162_p2), [#allocation11], 32  }
  0x2d   : > { %4540 = vsyncadd (%p4162_p2), [#allocation11], 4294967264  ;;  %p604_p6 = scmp.lt.s32.totalorder %s4646_s22, 1  ;;  %vm628_vm0 = vcmask 23552   ;;  %v694_v26 = vlaneseq  ;;  %vm754_vm5 = vcmask 523264   ;;  %s7497_s15 = sld [smem:[#allocation111_spill]] }
  0x2f   : > { %s7500_s22 = smov (!%p604_p6, %s4646_s22), 1  ;;  %v4810_v27 = vshrl.u32 %v694_v26, 7  ;;  %v4817_v30 = vand.u32 127, %v694_v26 }
  0x30   : > { %s4715_s8 = sshll.u32 %s7500_s22, 6 }
  0x31   : > { %s4721_s17 = scalar_lea.vmem %s7140_s0, %s4715_s8  ;;  %v4815_v29 = vadd.s32 8, %v4810_v27  ;;  %v4820_v31 = vadd.s32 16, %v4810_v27  ;;  %v4825_v32 = vadd.s32 24, %v4810_v27  ;;  %vm705_vm2 = vcmp.eq.s32.totalorder %v4810_v27, %v4817_v30  ;;  %s7008_s21 = scalar_lea.vmem %s7141_s1, %s4715_s8 }
  0x32   : > { %v4724_v0 = vld [vmem:[%s4721_s17 + $0x38] sm:$0xff]  ;;  %v4730_v1 = vld [vmem:[%s4721_s17 + $0x30] sm:$0xff]  ;;  %v4734_v2 = vld [vmem:[%s4721_s17 + $0x28] sm:$0xff]  ;;  %v4832_v33 = vadd.s32 32, %v4810_v27  ;;  %v4840_v36 = vadd.s32 40, %v4810_v27  ;;  %v4852_v40 = vadd.s32 48, %v4810_v27 }
  0x33   : > { %3704 = vmatpush.xpose.msk.msra.mxu0 %vm628_vm0, %v4724_v0  ;;  %1408 = vmatpush.msra.mxu1 %v4724_v0  ;;  %v4740_v3 = vld [vmem:[%s4721_s17 + $0x20] sm:$0xff]  ;;  %v4744_v4 = vld [vmem:[%s4721_s17 + $0x18] sm:$0xff]  ;;  %v4750_v5 = vld [vmem:[%s4721_s17 + $0x10] sm:$0xff]  ;;  %v719_v15 = vmul.f32 %v4734_v2, %v4734_v2  ;;  %v720_v20 = vmul.f32 %v4730_v1, %v4730_v1  ;;  %vm706_vm1 = vcmp.eq.s32.totalorder %v4815_v29, %v4817_v30  ;;  %v4876_v51 = vadd.s32 56, %v4810_v27  ;;  %s618_s26 = scalar_lea.vmem %s7497_s15, %s4715_s8 }
  0x34   : > { %v4754_v6 = vld [vmem:[%s4721_s17 + $0x8] sm:$0xff]  ;;  %v4760_v7 = vld [vmem:[%s4721_s17] sm:$0xff]  ;;  %v716_v8 = vmul.f32 %v4750_v5, %v4750_v5  ;;  %v718_v9 = vmul.f32 %v4740_v3, %v4740_v3  ;;  %v717_v14 = vmul.f32 %v4744_v4, %v4744_v4  ;;  %vm707_vm3 = vcmp.eq.s32.totalorder %v4820_v31, %v4817_v30 }
  0x35   : > { %1409 = vmatpush.msra.mxu1 %v4730_v1  ;;  %v714_v10 = vmul.f32 %v4760_v7, %v4760_v7  ;;  %v715_v16 = vmul.f32 %v4754_v6, %v4754_v6  ;;  %v737_v18 = vsel %vm628_vm0, %v719_v15, 0.0  ;;  %v740_v21 = vsel %vm628_vm0, %v720_v20, 0.0 }
  0x36   : > { %v728_v11 = vsel %vm628_vm0, %v716_v8, 0.0  ;;  %v734_v12 = vsel %vm628_vm0, %v718_v9, 0.0  ;;  %v731_v17 = vsel %vm628_vm0, %v717_v14, 0.0  ;;  %vm708_vm4 = vcmp.eq.s32.totalorder %v4825_v32, %v4817_v30 }
  0x37   : > { %3705 = vmatpush.xpose.msk.msra.mxu0 %vm628_vm0, %v4730_v1  ;;  %1410 = vmatpush.msra.mxu1 %v4734_v2  ;;  %v722_v13 = vsel %vm628_vm0, %v714_v10, 0.0  ;;  %v725_v19 = vsel %vm628_vm0, %v715_v16, 0.0  ;;  %vm709_vm6 = vcmp.eq.s32.totalorder %v4832_v33, %v4817_v30  ;;  %vm710_vm7 = vcmp.eq.s32.totalorder %v4840_v36, %v4817_v30 }
  0x38   : > { %729 = vadd.xlane.f32.xlu1 %v728_v11  ;;  %735 = vadd.xlane.f32.xlu2 %v734_v12  ;;  %vm711_vm8 = vcmp.eq.s32.totalorder %v4852_v40, %v4817_v30  ;;  %vm712_vm9 = vcmp.eq.s32.totalorder %v4876_v51, %v4817_v30  ;;  %v721_v31 = vmul.f32 %v4724_v0, %v4724_v0  ;;  %v4958_v33 = vcvt.s32.f32 %v4817_v30 }
  0x39   : > { %1411 = vmatpush.msra.mxu1 %v4740_v3  ;;  %723 = vadd.xlane.f32.xlu0 %v722_v13 }
  0x3b   : > { %3706 = vmatpush.xpose.msk.msra.mxu0 %vm628_vm0, %v4734_v2  ;;  %1412 = vmatpush.msra.mxu1 %v4744_v4 }
  0x3d   : > { %1413 = vmatpush.msra.mxu1 %v4750_v5 }
  0x3f   : > { %3707 = vmatpush.xpose.msk.msra.mxu0 %vm628_vm0, %v4740_v3  ;;  %1414 = vmatpush.msra.mxu1 %v4754_v6 }
  0x40   : > { %732 = vadd.xlane.f32.xlu1 %v731_v17  ;;  %738 = vadd.xlane.f32.xlu2 %v737_v18 }
  0x41   : > { %1415 = vmatpush.msra.mxu1 %v4760_v7  ;;  %726 = vadd.xlane.f32.xlu0 %v725_v19 }
  0x43   : > { %3708 = vmatpush.xpose.msk.msra.mxu0 %vm628_vm0, %v4744_v4 }
  0x47   : > { %3709 = vmatpush.xpose.msk.msra.mxu0 %vm628_vm0, %v4750_v5 }
  0x48   : > { %741 = vadd.xlane.f32.xlu1 %v740_v21 }
  0x4b   : > { %3710 = vmatpush.xpose.msk.msra.mxu0 %vm628_vm0, %v4754_v6 }
  0x4f   : > { %3711 = vmatpush.xpose.msk.msra.mxu0 %vm628_vm0, %v4760_v7 }
  0x52   : > { %3712 = vmatmul.msk.f32.vlgmr.msra.gmra.mxu0 %vm628_vm0, %v4760_v7 }
  0x5a   : > { %3713 = vmatmul.msk.f32.gmra.mxu0 %vm628_vm0, %v4754_v6 }
  0x62   : > { %3714 = vmatmul.msk.f32.gmra.mxu0 %vm628_vm0, %v4750_v5 }
  0x6a   : > { %3715 = vmatmul.msk.f32.gmra.mxu0 %vm628_vm0, %v4744_v4 }
  0x72   : > { %3716 = vmatmul.msk.f32.gmra.mxu0 %vm628_vm0, %v4740_v3 }
  0x7a   : > { %3717 = vmatmul.msk.f32.gmra.mxu0 %vm628_vm0, %v4734_v2 }
  0x82   : > { %3718 = vmatmul.msk.f32.gmra.mxu0 %vm628_vm0, %v4730_v1 }
  0x8a   : > { %3719 = vmatmul.msk.f32.gmra.mxu0 %vm628_vm0, %v4724_v0 }
  0xab   : > { %v736_v10 = vpop.xlane.xlu2 %735  ;;  %v730_v11 = vpop.xlane.xlu1 %729 }
  0xac   : > { %v724_v8 = vpop.xlane.xlu0 %723 }
  0xb3   : > { %v739_v19 = vpop.xlane.xlu2 %738 }
  0xb4   : > { %v727_v16 = vpop.xlane.xlu0 %726 }
  0xcf   : > { %v670_v22 = vpop.f32.mrf.mxu0 }
  0xd0   : > { %v746_v37 = vsel %vm705_vm2, %v670_v22, 0.0  ;;  %v784_v17 = vmul.f32 2.0, %v670_v22 }
  0xd1   : > { %v755_v42 = vsel %vm754_vm5, %v746_v37, 0.0  ;;  %v733_v37 = vpop.xlane.xlu1 %732 }
  0xd7   : > { %v673_v23 = vpop.f32.mrf.mxu0 }
  0xd8   : > { %v747_v35 = vsel %vm706_vm1, %v673_v23, 0.0  ;;  %v785_v20 = vmul.f32 2.0, %v673_v23 }
  0xd9   : > { %v756_v39 = vsel %vm754_vm5, %v747_v35, 0.0  ;;  %v742_v36 = vpop.xlane.xlu1 %741 }
  0xda   : > { %v757_v44 = vadd.f32 %v756_v39, %v755_v42 }
  0xdf   : > { %v676_v24 = vpop.f32.mrf.mxu0 }
  0xe0   : > { %v748_v38 = vsel %vm707_vm3, %v676_v24, 0.0  ;;  %v786_v21 = vmul.f32 2.0, %v676_v24 }
  0xe1   : > { %v758_v43 = vsel %vm754_vm5, %v748_v38, 0.0 }
  0xe2   : > { %v759_v48 = vadd.f32 %v758_v43, %v757_v44 }
  0xe7   : > { %v4808_v25 = vpop.f32.mrf.mxu0 }
  0xe8   : > { %v749_v41 = vsel %vm708_vm4, %v4808_v25, 0.0  ;;  %v787_v44 = vmul.f32 2.0, %v4808_v25 }
  0xe9   : > { %v760_v46 = vsel %vm754_vm5, %v749_v41, 0.0 }
  0xea   : > { %v761_v52 = vadd.f32 %v760_v46, %v759_v48 }
  0xef   : > { %v4812_v28 = vpop.f32.mrf.mxu0 }
  0xf0   : > { %v750_v45 = vsel %vm709_vm6, %v4812_v28, 0.0 }
  0xf1   : > { %v762_v50 = vsel %vm754_vm5, %v750_v45, 0.0 }
  0xf2   : > { %v763_v55 = vadd.f32 %v762_v50, %v761_v52  ;;  %v743_v52 = vsel %vm628_vm0, %v721_v31, 0.0 }
  0xf7   : > { %v685_v34 = vpop.f32.mrf.mxu0 }
  0xf8   : > { %v751_v49 = vsel %vm710_vm7, %v685_v34, 0.0  ;;  %v789_v23 = vmul.f32 2.0, %v685_v34 }
  0xf9   : > { %v764_v54 = vsel %vm754_vm5, %v751_v49, 0.0 }
  0xfa   : > { %v765_v57 = vadd.f32 %v764_v54, %v763_v55 }
  0xff   : > { %v4867_v47 = vpop.f32.mrf.mxu0 }
 0x100   : > { %v752_v53 = vsel %vm711_vm8, %v4867_v47, 0.0 }
 0x101   : > { %v766_v56 = vsel %vm754_vm5, %v752_v53, 0.0  ;;  %v788_v53 = vmul.f32 2.0, %v4812_v28  ;;  %v790_v28 = vmul.f32 2.0, %v4867_v47 }
 0x102   : > { %v767_v59 = vadd.f32 %v766_v56, %v765_v57 }
 0x107   : > { %v4886_v58 = vpop.f32.mrf.mxu0 }
 0x108   : > { %v753_v60 = vsel %vm712_vm9, %v4886_v58, 0.0 }
 0x109   : > { %v768_v61 = vsel %vm754_vm5, %v753_v60, 0.0 }
 0x10a   : > { %v769_v62 = vadd.f32 %v768_v61, %v767_v59 }
 0x10c   : > { %v770_v63 = vrot.slane %v769_v62, 4 }
 0x10e   : > { %v771_v9 = vadd.f32 %v770_v63, %v769_v62 }
 0x110   : > { %v772_v12 = vrot.slane %v771_v9, 2 }
 0x112   : > { %v773_v13 = vadd.f32 %v772_v12, %v771_v9 }
 0x114   : > { %v774_v14 = vrot.slane %v773_v13, 1 }
 0x116   : > { %v4893_v15 = vadd.f32 %v774_v14, %v773_v13 }
 0x118   : > { %v776_v18 = vadd.f32 %v4893_v15, %v724_v8  ;;  %v777_v26 = vadd.f32 %v4893_v15, %v727_v16  ;;  %v778_v35 = vadd.f32 %v4893_v15, %v730_v11  ;;  %v779_v39 = vadd.f32 %v4893_v15, %v733_v37 }
 0x119   : > { %v781_v41 = vadd.f32 %v4893_v15, %v739_v19  ;;  %v780_v29 = vadd.f32 %v4893_v15, %v736_v10  ;;  %v782_v57 = vadd.f32 %v4893_v15, %v742_v36  ;;  %v791_v16 = vmul.f32 2.0, %v4886_v58 }
 0x11a   : > { %v792_v38 = vsub.f32 %v776_v18, %v784_v17  ;;  %v793_v42 = vsub.f32 %v777_v26, %v785_v20  ;;  %v794_v43 = vsub.f32 %v778_v35, %v786_v21  ;;  %v795_v34 = vsub.f32 %v779_v39, %v787_v44 }
 0x11b   : > { %v797_v48 = vsub.f32 %v781_v41, %v789_v23  ;;  %v796_v54 = vsub.f32 %v780_v29, %v788_v53  ;;  %v798_v60 = vsub.f32 %v782_v57, %v790_v28 }
 0x11c   : > { %v4904_v22 = vsel %vm705_vm2, inf, %v792_v38  ;;  %v4909_v24 = vsel %vm707_vm3, inf, %v794_v43  ;;  %v4914_v45 = vsel %vm706_vm1, inf, %v793_v42  ;;  %v4933_v50 = vsel %vm708_vm4, inf, %v795_v34 }
 0x11d   : > { %v808_v46 = vsel %vm754_vm5, %v4904_v22, inf  ;;  %v814_v25 = vsel %vm754_vm5, %v4909_v24, inf  ;;  %v811_v27 = vsel %vm754_vm5, %v4914_v45, inf  ;;  %v4928_v49 = vsel %vm710_vm7, inf, %v797_v48 }
 0x11e   : > { %809 = vmin.xlane.f32.xlu0 %v808_v46  ;;  %815 = vmin.xlane.f32.xlu1 %v814_v25  ;;  %v823_v55 = vsel %vm754_vm5, %v4928_v49, inf  ;;  %v817_v56 = vsel %vm754_vm5, %v4933_v50, inf  ;;  %v4945_v32 = vsel %vm709_vm6, inf, %v796_v54  ;;  %v4953_v61 = vsel %vm711_vm8, inf, %v798_v60 }
 0x11f   : > { %812 = vmin.xlane.f32.xlu2 %v811_v27  ;;  %v820_v59 = vsel %vm754_vm5, %v4945_v32, inf  ;;  %v826_v62 = vsel %vm754_vm5, %v4953_v61, inf  ;;  %v4554_v46 = vmov 0.0   ;;  %v4555_v60 = vmov 65535  }
 0x126   : > { %744 = vadd.xlane.f32.xlu0 %v743_v52  ;;  %824 = vmin.xlane.f32.xlu1 %v823_v55 }
 0x127   : > { %818 = vmin.xlane.f32.xlu2 %v817_v56 }
 0x12e   : > { %821 = vmin.xlane.f32.xlu0 %v820_v59  ;;  %v2148_v59 = vld [vmem:[#allocation7] sm:$0x3] }
 0x136   : > { %827 = vmin.xlane.f32.xlu0 %v826_v62 }
 0x191   : > { %v810_v63 = vpop.xlane.xlu0 %809  ;;  %v816_v8 = vpop.xlane.xlu1 %815 }
 0x192   : > { %v813_v47 = vpop.xlane.xlu2 %812  ;;  %vm832_vm10 = vcmp.le.f32.partialorder %v4904_v22, %v810_v63  ;;  %vm834_vm11 = vcmp.le.f32.partialorder %v4909_v24, %v816_v8  ;;  %v2201_v63 = vld [vmem:[#allocation9] sm:$0x3] }
 0x193   : > { %vm833_vm12 = vcmp.le.f32.partialorder %v4914_v45, %v813_v47  ;;  %v840_v40 = vsel %vm832_vm10, %v4958_v33, 64.0  ;;  %v842_v10 = vsel %vm834_vm11, %v4958_v33, 64.0  ;;  %vm1663_vm10 = vcmask 1041408  }
 0x194   : > { %v841_v9 = vsel %vm833_vm12, %v4958_v33, 64.0  ;;  %v848_v11 = vsel %vm754_vm5, %v840_v40, inf  ;;  %v854_v13 = vsel %vm754_vm5, %v842_v10, inf }
 0x195   : > { %v851_v12 = vsel %vm754_vm5, %v841_v9, inf  ;;  %849 = vmin.xlane.f32.xlu2 %v848_v11  ;;  %855 = vmin.xlane.f32.xlu0 %v854_v13  ;;  %v2149_v11 = vpack.c.bf16 %v4754_v6, %v4760_v7 }
 0x196   : > { %852 = vmin.xlane.f32.xlu1 %v851_v12 }
 0x199   : > { %v745_v14 = vpop.xlane.xlu0 %744  ;;  %v825_v17 = vpop.xlane.xlu1 %824 }
 0x19a   : > { %v819_v18 = vpop.xlane.xlu2 %818  ;;  %v783_v19 = vadd.f32 %v4893_v15, %v745_v14  ;;  %vm837_vm13 = vcmp.le.f32.partialorder %v4928_v49, %v825_v17  ;;  %v2150_v17 = vpack.c.bf16 %v4744_v4, %v4750_v5 }
 0x19b   : > { %vm835_vm14 = vcmp.le.f32.partialorder %v4933_v50, %v819_v18  ;;  %v845_v26 = vsel %vm837_vm13, %v4958_v33, 64.0 }
 0x19c   : > { %v799_v20 = vsub.f32 %v783_v19, %v791_v16  ;;  %v843_v21 = vsel %vm835_vm14, %v4958_v33, 64.0  ;;  %v863_v37 = vsel %vm754_vm5, %v845_v26, inf  ;;  %v2151_v19 = vpack.c.bf16 %v4734_v2, %v4740_v3 }
 0x19d   : > { %v857_v35 = vsel %vm754_vm5, %v843_v21, inf  ;;  %864 = vmin.xlane.f32.xlu0 %v863_v37  ;;  %v1577_v21 = vld [vmem:[%s7142_s2] sm:$0x3] }
 0x19e   : > { %858 = vmin.xlane.f32.xlu1 %v857_v35  ;;  %v4980_v58 = vsel %vm712_vm9, inf, %v799_v20  ;;  %vm1662_vm9 = vcmask 1040384   ;;  %v2152_v20 = vpack.c.bf16 %v4724_v0, %v4730_v1 }
 0x19f   : > { %v829_v15 = vsel %vm754_vm5, %v4980_v58, inf  ;;  %v1664_v62 = vsel %vm1662_vm9, 4294967295, %v4555_v60 }
 0x1a0   : > { %830 = vmin.xlane.f32.xlu2 %v829_v15  ;;  %v1665_v47 = vsel %vm1663_vm10, %v1664_v62, 0 }
 0x1a1   : > { %v822_v38 = vpop.xlane.xlu0 %821  ;;  %v2170_v9 = vand.u32 %v2148_v59, %v1665_v47  ;;  %v2203_v10 = vand.u32 %v2201_v63, %v1665_v47  ;;  %v1667_v26 = vand.u32 %v1665_v47, %v1577_v21 }
 0x1a2   : > { %vm836_vm15 = vcmp.le.f32.partialorder %v4945_v32, %v822_v38 }
 0x1a3   : > { %v844_v39 = vsel %vm836_vm15, %v4958_v33, 64.0  ;;  %2179 = vmatpush.bf16.msrb.mxu0 %v2170_v9  ;;  %1676 = vmatpush.bf16.msra.mxu2 %v1667_v26 }
 0x1a4   : > { %v860_v41 = vsel %vm754_vm5, %v844_v39, inf  ;;  %4111 = vmatpush.bf16.msra.mxu3 %v1667_v26 }
 0x1a6   : > { %3848 = vmatmul.msk.bf16.vlgmr.msrb.gmra.mxu0 %vm628_vm0, %v2149_v11 }
 0x1a7   : > { %2212 = vmatpush.bf16.msra.mxu0 %v2203_v10 }
 0x1a8   : > { %861 = vmin.xlane.f32.xlu2 %v860_v41 }
 0x1a9   : > { %v828_v42 = vpop.xlane.xlu0 %827 }
 0x1aa   : > { %vm838_vm1 = vcmp.le.f32.partialorder %v4953_v61, %v828_v42 }
 0x1ab   : > { %v846_v43 = vsel %vm838_vm1, %v4958_v33, 64.0 }
 0x1ac   : > { %v866_v30 = vsel %vm754_vm5, %v846_v43, inf }
 0x1b0   : > { %867 = vmin.xlane.f32.xlu2 %v866_v30 }
 0x1b6   : > { %3849 = vmatmul.msk.bf16.gmra.mxu0 %vm628_vm0, %v2150_v17 }
 0x1c6   : > { %3850 = vmatmul.msk.bf16.gmra.mxu0 %vm628_vm0, %v2151_v19 }
 0x1d6   : > { %3851 = vmatmul.msk.bf16.gmra.mxu0 %vm628_vm0, %v2152_v20 }
 0x208   : > { %v850_v51 = vpop.xlane.xlu2 %849  ;;  %v856_v23 = vpop.xlane.xlu0 %855 }
 0x209   : > { %v853_v44 = vpop.xlane.xlu1 %852  ;;  %vm872_vm2 = vcmp.eq.f32.partialorder %v4958_v33, %v850_v51  ;;  %vm874_vm4 = vcmp.eq.f32.partialorder %v4958_v33, %v856_v23 }
 0x20a   : > { %vm873_vm3 = vcmp.eq.f32.partialorder %v4958_v33, %v853_v44  ;;  %v3720_v25 = vsel %vm872_vm2, 1.0, %v4554_v46  ;;  %v4994_v27 = vsel %vm872_vm2, inf, %v4904_v22  ;;  %v5005_v48 = vsel %vm874_vm4, inf, %v4909_v24 }
 0x20b   : > { %v5000_v34 = vsel %vm873_vm3, inf, %v4914_v45  ;;  %3760 = vmatmul.msk.f32.vlgmr.msra.gmra.mxu1 %vm754_vm5, %v3720_v25  ;;  %v904_v22 = vsel %vm754_vm5, %v4994_v27, inf  ;;  %v910_v29 = vsel %vm754_vm5, %v5005_v48, inf  ;;  %v3721_v24 = vsel %vm873_vm3, 1.0, %v4554_v46 }
 0x20c   : > { %v907_v31 = vsel %vm754_vm5, %v5000_v34, inf  ;;  %905 = vmin.xlane.f32.xlu1 %v904_v22  ;;  %911 = vmin.xlane.f32.xlu2 %v910_v29 }
 0x20d   : > { %908 = vmin.xlane.f32.xlu0 %v907_v31 }
 0x210   : > { %v865_v52 = vpop.xlane.xlu0 %864 }
 0x211   : > { %v859_v45 = vpop.xlane.xlu1 %858  ;;  %vm877_vm7 = vcmp.eq.f32.partialorder %v4958_v33, %v865_v52 }
 0x212   : > { %vm875_vm6 = vcmp.eq.f32.partialorder %v4958_v33, %v859_v45  ;;  %v5027_v54 = vsel %vm877_vm7, inf, %v4928_v49  ;;  %v3722_v49 = vsel %vm874_vm4, 1.0, %v4554_v46  ;;  %v3725_v18 = vsel %vm877_vm7, 1.0, %v4554_v46 }
 0x213   : > { %v5022_v53 = vsel %vm875_vm6, inf, %v4933_v50  ;;  %3761 = vmatmul.msk.f32.gmra.mxu1 %vm754_vm5, %v3721_v24  ;;  %v831_v55 = vpop.xlane.xlu2 %830  ;;  %v919_v36 = vsel %vm754_vm5, %v5027_v54, inf  ;;  %v3723_v12 = vsel %vm875_vm6, 1.0, %v4554_v46 }
 0x214   : > { %vm839_vm8 = vcmp.le.f32.partialorder %v4980_v58, %v831_v55  ;;  %v913_v56 = vsel %vm754_vm5, %v5022_v53, inf  ;;  %920 = vmin.xlane.f32.xlu2 %v919_v36 }
 0x215   : > { %914 = vmin.xlane.f32.xlu0 %v913_v56  ;;  %v847_v50 = vsel %vm839_vm8, %v4958_v33, 64.0 }
 0x216   : > { %v869_v57 = vsel %vm754_vm5, %v847_v50, inf }
 0x217   : > { %870 = vmin.xlane.f32.xlu1 %v869_v57 }
 0x21b   : > { %v862_v28 = vpop.xlane.xlu2 %861  ;;  %3762 = vmatmul.msk.f32.gmra.mxu1 %vm754_vm5, %v3722_v49 }
 0x21c   : > { %vm876_vm11 = vcmp.eq.f32.partialorder %v4958_v33, %v862_v28 }
 0x21d   : > { %v5045_v8 = vsel %vm876_vm11, inf, %v4945_v32  ;;  %v3724_v16 = vsel %vm876_vm11, 1.0, %v4554_v46 }
 0x21e   : > { %v916_v40 = vsel %vm754_vm5, %v5045_v8, inf }
 0x21f   : > { %917 = vmin.xlane.f32.xlu1 %v916_v40 }
 0x223   : > { %v868_v13 = vpop.xlane.xlu2 %867  ;;  %3763 = vmatmul.msk.f32.gmra.mxu1 %vm754_vm5, %v3723_v12 }
 0x224   : > { %vm878_vm12 = vcmp.eq.f32.partialorder %v4958_v33, %v868_v13 }
 0x225   : > { %v5058_v32 = vsel %vm878_vm12, inf, %v4953_v61  ;;  %v3726_v61 = vsel %vm878_vm12, 1.0, %v4554_v46 }
 0x226   : > { %v922_v14 = vsel %vm754_vm5, %v5058_v32, inf }
 0x227   : > { %923 = vmin.xlane.f32.xlu1 %v922_v14 }
 0x22b   : > { %3764 = vmatmul.msk.f32.gmra.mxu1 %vm754_vm5, %v3724_v16 }
 0x233   : > { %3765 = vmatmul.msk.f32.gmra.mxu1 %vm754_vm5, %v3725_v18 }
 0x23b   : > { %3766 = vmatmul.msk.f32.gmra.mxu1 %vm754_vm5, %v3726_v61 }
 0x27f   : > { %v906_v35 = vpop.xlane.xlu1 %905  ;;  %v912_v15 = vpop.xlane.xlu2 %911 }
 0x280   : > { %v909_v37 = vpop.xlane.xlu0 %908  ;;  %vm928_vm13 = vcmp.le.f32.partialorder %v4994_v27, %v906_v35  ;;  %vm930_vm15 = vcmp.le.f32.partialorder %v5005_v48, %v912_v15 }
 0x281   : > { %vm929_vm14 = vcmp.le.f32.partialorder %v5000_v34, %v909_v37  ;;  %v936_v38 = vsel %vm928_vm13, %v4958_v33, 64.0  ;;  %v938_v42 = vsel %vm930_vm15, %v4958_v33, 64.0 }
 0x282   : > { %v937_v39 = vsel %vm929_vm14, %v4958_v33, 64.0  ;;  %v944_v41 = vsel %vm754_vm5, %v936_v38, inf  ;;  %v950_v30 = vsel %vm754_vm5, %v938_v42, inf }
 0x283   : > { %v947_v43 = vsel %vm754_vm5, %v937_v39, inf  ;;  %945 = vmin.xlane.f32.xlu0 %v944_v41  ;;  %951 = vmin.xlane.f32.xlu1 %v950_v30 }
 0x284   : > { %948 = vmin.xlane.f32.xlu2 %v947_v43 }
 0x287   : > { %v921_v23 = vpop.xlane.xlu2 %920 }
 0x288   : > { %v915_v51 = vpop.xlane.xlu0 %914  ;;  %v1417_v44 = vpop.f32.mrf.mxu1  ;;  %vm933_vm2 = vcmp.le.f32.partialorder %v5027_v54, %v921_v23 }
 0x289   : > { %vm931_vm1 = vcmp.le.f32.partialorder %v5022_v53, %v915_v51  ;;  %v941_v22 = vsel %vm933_vm2, %v4958_v33, 64.0  ;;  %v1537_v36 = vsub.f32 %v1417_v44, %v4760_v7 }
 0x28a   : > { %v871_v25 = vpop.xlane.xlu1 %870  ;;  %v939_v31 = vsel %vm931_vm1, %v4958_v33, 64.0  ;;  %v959_v24 = vsel %vm754_vm5, %v941_v22, inf }
 0x28b   : > { %vm879_vm3 = vcmp.eq.f32.partialorder %v4958_v33, %v871_v25  ;;  %v953_v29 = vsel %vm754_vm5, %v939_v31, inf  ;;  %960 = vmin.xlane.f32.xlu1 %v959_v24 }
 0x28c   : > { %v3727_v45 = vsel %vm879_vm3, 1.0, %v4554_v46  ;;  %v5101_v52 = vsel %vm879_vm3, inf, %v4980_v58  ;;  %954 = vmin.xlane.f32.xlu2 %v953_v29 }
 0x28d   : > { %3767 = vmatmul.msk.f32.gmra.mxu1 %vm754_vm5, %v3727_v45  ;;  %v925_v55 = vsel %vm754_vm5, %v5101_v52, inf }
 0x28e   : > { %926 = vmin.xlane.f32.xlu0 %v925_v55 }
 0x290   : > { %v1420_v56 = vpop.f32.mrf.mxu1 }
 0x291   : > { %v1538_v50 = vsub.f32 %v1420_v56, %v4754_v6 }
 0x292   : > { %v918_v57 = vpop.xlane.xlu1 %917 }
 0x293   : > { %v1578_v49 = vpack.c.bf16 %v1538_v50, %v1537_v36  ;;  %vm932_vm4 = vcmp.le.f32.partialorder %v5045_v8, %v918_v57 }
 0x294   : > { %v940_v58 = vsel %vm932_vm4, %v4958_v33, 64.0 }
 0x295   : > { %3800 = vmatmul.msk.bf16.vlgmr.msra.gmra.mxu2 %vm628_vm0, %v1578_v49  ;;  %3852 = vmatmul.msk.bf16.vlgmr.msra.gmra.mxu0 %vm628_vm0, %v1578_v49  ;;  %v956_v28 = vsel %vm754_vm5, %v940_v58, inf }
 0x296   : > { %957 = vmin.xlane.f32.xlu0 %v956_v28 }
 0x298   : > { %v1423_v59 = vpop.f32.mrf.mxu1 }
 0x299   : > { %v1539_v40 = vsub.f32 %v1423_v59, %v4750_v5 }
 0x29a   : > { %v924_v60 = vpop.xlane.xlu1 %923 }
 0x29b   : > { %vm934_vm6 = vcmp.le.f32.partialorder %v5058_v32, %v924_v60 }
 0x29c   : > { %v942_v62 = vsel %vm934_vm6, %v4958_v33, 64.0 }
 0x29d   : > { %v962_v63 = vsel %vm754_vm5, %v942_v62, inf }
 0x29e   : > { %963 = vmin.xlane.f32.xlu0 %v962_v63 }
 0x2a0   : > { %v1426_v47 = vpop.f32.mrf.mxu1 }
 0x2a1   : > { %v1540_v9 = vsub.f32 %v1426_v47, %v4744_v4 }
 0x2a3   : > { %v1579_v10 = vpack.c.bf16 %v1540_v9, %v1539_v40 }
 0x2a5   : > { %3801 = vmatmul.msk.bf16.gmra.mxu2 %vm628_vm0, %v1579_v10  ;;  %3853 = vmatmul.msk.bf16.gmra.mxu0 %vm628_vm0, %v1579_v10 }
 0x2a8   : > { %v1429_v11 = vpop.f32.mrf.mxu1 }
 0x2a9   : > { %v1541_v13 = vsub.f32 %v1429_v11, %v4740_v3 }
 0x2b0   : > { %v1432_v12 = vpop.f32.mrf.mxu1 }
 0x2b1   : > { %v1542_v14 = vsub.f32 %v1432_v12, %v4734_v2 }
 0x2b3   : > { %v1580_v16 = vpack.c.bf16 %v1542_v14, %v1541_v13 }
 0x2b5   : > { %3802 = vmatmul.msk.bf16.gmra.mxu2 %vm628_vm0, %v1580_v16  ;;  %3854 = vmatmul.msk.bf16.gmra.mxu0 %vm628_vm0, %v1580_v16 }
 0x2b8   : > { %v1435_v41 = vpop.f32.mrf.mxu1 }
 0x2b9   : > { %v1543_v25 = vsub.f32 %v1435_v41, %v4730_v1 }
 0x2f6   : > { %v946_v18 = vpop.xlane.xlu0 %945  ;;  %v952_v61 = vpop.xlane.xlu1 %951 }
 0x2f7   : > { %v949_v17 = vpop.xlane.xlu2 %948  ;;  %vm968_vm8 = vcmp.eq.f32.partialorder %v4958_v33, %v946_v18  ;;  %vm970_vm9 = vcmp.eq.f32.partialorder %v4958_v33, %v952_v61 }
 0x2f8   : > { %vm969_vm7 = vcmp.eq.f32.partialorder %v4958_v33, %v949_v17  ;;  %v3728_v20 = vsel %vm968_vm8, 1.0, %v4554_v46  ;;  %v5137_v21 = vsel %vm970_vm9, inf, %v5005_v48  ;;  %v5140_v26 = vsel %vm968_vm8, inf, %v4994_v27 }
 0x2f9   : > { %v5131_v19 = vsel %vm969_vm7, inf, %v5000_v34  ;;  %3768 = vmatmul.msk.f32.gmra.mxu1 %vm754_vm5, %v3728_v20  ;;  %v1006_v37 = vsel %vm754_vm5, %v5137_v21, inf  ;;  %v1000_v34 = vsel %vm754_vm5, %v5140_v26, inf  ;;  %v3729_v27 = vsel %vm969_vm7, 1.0, %v4554_v46 }
 0x2fa   : > { %v1003_v35 = vsel %vm754_vm5, %v5131_v19, inf  ;;  %1007 = vmin.xlane.f32.xlu0 %v1006_v37  ;;  %1001 = vmin.xlane.f32.xlu2 %v1000_v34 }
 0x2fb   : > { %1004 = vmin.xlane.f32.xlu1 %v1003_v35 }
 0x2fe   : > { %v961_v48 = vpop.xlane.xlu1 %960 }
 0x2ff   : > { %v955_v15 = vpop.xlane.xlu2 %954  ;;  %vm973_vm11 = vcmp.eq.f32.partialorder %v4958_v33, %v961_v48 }
 0x300   : > { %vm971_vm10 = vcmp.eq.f32.partialorder %v4958_v33, %v955_v15  ;;  %v5162_v42 = vsel %vm973_vm11, inf, %v5027_v54  ;;  %v3730_v54 = vsel %vm970_vm9, 1.0, %v4554_v46  ;;  %v3733_v36 = vsel %vm973_vm11, 1.0, %v4554_v46 }
 0x301   : > { %v5157_v38 = vsel %vm971_vm10, inf, %v5022_v53  ;;  %v927_v39 = vpop.xlane.xlu0 %926  ;;  %3769 = vmatmul.msk.f32.gmra.mxu1 %vm754_vm5, %v3729_v27  ;;  %v1015_v30 = vsel %vm754_vm5, %v5162_v42, inf  ;;  %v3731_v24 = vsel %vm971_vm10, 1.0, %v4554_v46 }
 0x302   : > { %vm935_vm12 = vcmp.le.f32.partialorder %v5101_v52, %v927_v39  ;;  %v1009_v43 = vsel %vm754_vm5, %v5157_v38, inf  ;;  %1016 = vmin.xlane.f32.xlu0 %v1015_v30 }
 0x303   : > { %1010 = vmin.xlane.f32.xlu1 %v1009_v43  ;;  %v943_v53 = vsel %vm935_vm12, %v4958_v33, 64.0 }
 0x304   : > { %v965_v51 = vsel %vm754_vm5, %v943_v53, inf }
 0x305   : > { %966 = vmin.xlane.f32.xlu2 %v965_v51 }
 0x309   : > { %v958_v44 = vpop.xlane.xlu0 %957  ;;  %3770 = vmatmul.msk.f32.gmra.mxu1 %vm754_vm5, %v3730_v54 }
 0x30a   : > { %vm972_vm13 = vcmp.eq.f32.partialorder %v4958_v33, %v958_v44  ;;  %v1438_v23 = vpop.f32.mrf.mxu1 }
 0x30b   : > { %v5181_v31 = vsel %vm972_vm13, inf, %v5045_v8  ;;  %v1544_v22 = vsub.f32 %v1438_v23, %v4724_v0  ;;  %v3732_v56 = vsel %vm972_vm13, 1.0, %v4554_v46 }
 0x30c   : > { %v1012_v29 = vsel %vm754_vm5, %v5181_v31, inf }
 0x30d   : > { %v1581_v45 = vpack.c.bf16 %v1544_v22, %v1543_v25  ;;  %1013 = vmin.xlane.f32.xlu2 %v1012_v29 }
 0x30f   : > { %3803 = vmatmul.msk.bf16.gmra.mxu2 %vm628_vm0, %v1581_v45  ;;  %3855 = vmatmul.msk.bf16.gmra.mxu0 %vm628_vm0, %v1581_v45 }
 0x311   : > { %v964_v55 = vpop.xlane.xlu0 %963  ;;  %3771 = vmatmul.msk.f32.gmra.mxu1 %vm754_vm5, %v3731_v24 }
 0x312   : > { %vm974_vm14 = vcmp.eq.f32.partialorder %v4958_v33, %v964_v55 }
 0x313   : > { %v5194_v0 = vsel %vm974_vm14, inf, %v5058_v32  ;;  %v3734_v50 = vsel %vm974_vm14, 1.0, %v4554_v46 }
 0x314   : > { %v1018_v8 = vsel %vm754_vm5, %v5194_v0, inf }
 0x315   : > { %1019 = vmin.xlane.f32.xlu2 %v1018_v8 }
 0x319   : > { %3772 = vmatmul.msk.f32.gmra.mxu1 %vm754_vm5, %v3732_v56 }
 0x321   : > { %3773 = vmatmul.msk.f32.gmra.mxu1 %vm754_vm5, %v3733_v36 }
 0x329   : > { %3774 = vmatmul.msk.f32.gmra.mxu1 %vm754_vm5, %v3734_v50 }
 0x36d   : > { %v1002_v57 = vpop.xlane.xlu2 %1001  ;;  %v1008_v49 = vpop.xlane.xlu0 %1007 }
 0x36e   : > { %v1005_v32 = vpop.xlane.xlu1 %1004  ;;  %vm1024_vm1 = vcmp.le.f32.partialorder %v5140_v26, %v1002_v57  ;;  %vm1026_vm2 = vcmp.le.f32.partialorder %v5137_v21, %v1008_v49 }
 0x36f   : > { %vm1025_vm15 = vcmp.le.f32.partialorder %v5131_v19, %v1005_v32  ;;  %v1032_v59 = vsel %vm1024_vm1, %v4958_v33, 64.0  ;;  %v1034_v60 = vsel %vm1026_vm2, %v4958_v33, 64.0 }
 0x370   : > { %v1033_v58 = vsel %vm1025_vm15, %v4958_v33, 64.0  ;;  %v1040_v62 = vsel %vm754_vm5, %v1032_v59, inf  ;;  %v1046_v63 = vsel %vm754_vm5, %v1034_v60, inf  ;;  %v5303_v60 = vld [vmem:[%s4721_s17 + $0x38] sm:$0xff] }
 0x371   : > { %v1043_v28 = vsel %vm754_vm5, %v1033_v58, inf  ;;  %1041 = vmin.xlane.f32.xlu1 %v1040_v62  ;;  %1047 = vmin.xlane.f32.xlu2 %v1046_v63 }
 0x372   : > { %1044 = vmin.xlane.f32.xlu0 %v1043_v28 }
 0x375   : > { %v1017_v40 = vpop.xlane.xlu0 %1016 }
 0x376   : > { %v1011_v47 = vpop.xlane.xlu1 %1010  ;;  %v1441_v9 = vpop.f32.mrf.mxu1  ;;  %vm1029_vm4 = vcmp.le.f32.partialorder %v5162_v42, %v1017_v40 }
 0x377   : > { %vm1027_vm3 = vcmp.le.f32.partialorder %v5157_v38, %v1011_v47  ;;  %v1037_v13 = vsel %vm1029_vm4, %v4958_v33, 64.0  ;;  %v1545_v20 = vsub.f32 %v1441_v9, %v4760_v7 }
 0x378   : > { %v967_v10 = vpop.xlane.xlu2 %966  ;;  %v1035_v11 = vsel %vm1027_vm3, %v4958_v33, 64.0  ;;  %v1055_v17 = vsel %vm754_vm5, %v1037_v13, inf }
 0x379   : > { %vm975_vm6 = vcmp.eq.f32.partialorder %v4958_v33, %v967_v10  ;;  %v1049_v12 = vsel %vm754_vm5, %v1035_v11, inf  ;;  %1056 = vmin.xlane.f32.xlu2 %v1055_v17 }
 0x37a   : > { %v3735_v14 = vsel %vm975_vm6, 1.0, %v4554_v46  ;;  %v5225_v16 = vsel %vm975_vm6, inf, %v5101_v52  ;;  %1050 = vmin.xlane.f32.xlu0 %v1049_v12 }
 0x37b   : > { %3775 = vmatmul.msk.f32.gmra.mxu1 %vm754_vm5, %v3735_v14  ;;  %v1021_v18 = vsel %vm754_vm5, %v5225_v16, inf }
 0x37c   : > { %1022 = vmin.xlane.f32.xlu1 %v1021_v18 }
 0x37e   : > { %v1444_v61 = vpop.f32.mrf.mxu1 }
 0x37f   : > { %v1546_v35 = vsub.f32 %v1444_v61, %v4754_v6 }
 0x380   : > { %v1014_v37 = vpop.xlane.xlu2 %1013 }
 0x381   : > { %vm1028_vm7 = vcmp.le.f32.partialorder %v5181_v31, %v1014_v37  ;;  %v1582_v52 = vpack.c.bf16 %v1546_v35, %v1545_v20 }
 0x382   : > { %v1036_v34 = vsel %vm1028_vm7, %v4958_v33, 64.0 }
 0x383   : > { %v1052_v15 = vsel %vm754_vm5, %v1036_v34, inf  ;;  %3804 = vmatmul.msk.bf16.gmra.mxu2 %vm628_vm0, %v1582_v52  ;;  %3856 = vmatmul.msk.bf16.gmra.mxu0 %vm628_vm0, %v1582_v52  ;;  %v5343_v52 = vpop.f32.mrf.mxu0 }
 0x384   : > { %1053 = vmin.xlane.f32.xlu1 %v1052_v15 }
 0x386   : > { %v1447_v48 = vpop.f32.mrf.mxu1 }
 0x387   : > { %v1547_v41 = vsub.f32 %v1447_v48, %v4750_v5 }
 0x388   : > { %v1020_v27 = vpop.xlane.xlu2 %1019 }
 0x389   : > { %vm1030_vm8 = vcmp.le.f32.partialorder %v5194_v0, %v1020_v27 }
 0x38a   : > { %v1038_v7 = vsel %vm1030_vm8, %v4958_v33, 64.0 }
 0x38b   : > { %v1058_v6 = vsel %vm754_vm5, %v1038_v7, inf }
 0x38c   : > { %1059 = vmin.xlane.f32.xlu1 %v1058_v6 }
 0x38e   : > { %v1450_v39 = vpop.f32.mrf.mxu1 }
 0x38f   : > { %v1548_v43 = vsub.f32 %v1450_v39, %v4744_v4 }
 0x391   : > { %v1583_v30 = vpack.c.bf16 %v1548_v43, %v1547_v41 }
 0x393   : > { %3805 = vmatmul.msk.bf16.gmra.mxu2 %vm628_vm0, %v1583_v30  ;;  %3857 = vmatmul.msk.bf16.gmra.mxu0 %vm628_vm0, %v1583_v30 }
 0x396   : > { %v1453_v53 = vpop.f32.mrf.mxu1 }
 0x397   : > { %v1549_v54 = vsub.f32 %v1453_v53, %v4740_v3 }
 0x39e   : > { %v1456_v51 = vpop.f32.mrf.mxu1 }
 0x39f   : > { %v1550_v44 = vsub.f32 %v1456_v51, %v4734_v2 }
 0x3a1   : > { %v1584_v23 = vpack.c.bf16 %v1550_v44, %v1549_v54  ;;  %v5360_v54 = vpop.f32.mrf.mxu0 }
 0x3a3   : > { %3806 = vmatmul.msk.bf16.gmra.mxu2 %vm628_vm0, %v1584_v23  ;;  %3858 = vmatmul.msk.bf16.gmra.mxu0 %vm628_vm0, %v1584_v23  ;;  %v5363_v23 = vld [vmem:[%s4721_s17] sm:$0xff] }
 0x3a6   : > { %v1459_v56 = vpop.f32.mrf.mxu1 }
 0x3a7   : > { %v1551_v59 = vsub.f32 %v1459_v56, %v4730_v1 }
 0x3e4   : > { %v1042_v5 = vpop.xlane.xlu1 %1041  ;;  %v1048_v22 = vpop.xlane.xlu2 %1047 }
 0x3e5   : > { %v1045_v25 = vpop.xlane.xlu0 %1044  ;;  %vm1064_vm10 = vcmp.eq.f32.partialorder %v4958_v33, %v1042_v5  ;;  %vm1066_vm11 = vcmp.eq.f32.partialorder %v4958_v33, %v1048_v22  ;;  %v5367_v5 = vld [vmem:[%s4721_s17 + $0x8] sm:$0xff] }
 0x3e6   : > { %vm1065_vm9 = vcmp.eq.f32.partialorder %v4958_v33, %v1045_v25  ;;  %v3736_v2 = vsel %vm1064_vm10, 1.0, %v4554_v46  ;;  %v5259_v4 = vsel %vm1064_vm10, inf, %v5140_v26  ;;  %v5264_v29 = vsel %vm1066_vm11, inf, %v5137_v21 }
 0x3e7   : > { %v5255_v3 = vsel %vm1065_vm9, inf, %v5131_v19  ;;  %3776 = vmatmul.msk.f32.gmra.mxu1 %vm754_vm5, %v3736_v2  ;;  %v1096_v45 = vsel %vm754_vm5, %v5259_v4, inf  ;;  %v1102_v24 = vsel %vm754_vm5, %v5264_v29, inf  ;;  %v3737_v36 = vsel %vm1065_vm9, 1.0, %v4554_v46 }
 0x3e8   : > { %v1099_v19 = vsel %vm754_vm5, %v5255_v3, inf  ;;  %1097 = vmin.xlane.f32.xlu0 %v1096_v45  ;;  %1103 = vmin.xlane.f32.xlu1 %v1102_v24 }
 0x3e9   : > { %1100 = vmin.xlane.f32.xlu2 %v1099_v19  ;;  %v5375_v19 = vpop.f32.mrf.mxu0 }
 0x3ec   : > { %v1057_v55 = vpop.xlane.xlu2 %1056 }
 0x3ed   : > { %v1051_v26 = vpop.xlane.xlu0 %1050  ;;  %vm1069_vm13 = vcmp.eq.f32.partialorder %v4958_v33, %v1057_v55 }
 0x3ee   : > { %vm1067_vm12 = vcmp.eq.f32.partialorder %v4958_v33, %v1051_v26  ;;  %v5286_v50 = vsel %vm1069_vm13, inf, %v5162_v42  ;;  %v3738_v42 = vsel %vm1066_vm11, 1.0, %v4554_v46  ;;  %v3741_v12 = vsel %vm1069_vm13, 1.0, %v4554_v46 }
 0x3ef   : > { %v5278_v21 = vsel %vm1067_vm12, inf, %v5157_v38  ;;  %v1023_v8 = vpop.xlane.xlu1 %1022  ;;  %3777 = vmatmul.msk.f32.gmra.mxu1 %vm754_vm5, %v3737_v36  ;;  %v1111_v38 = vsel %vm754_vm5, %v5286_v50, inf  ;;  %v3739_v1 = vsel %vm1067_vm12, 1.0, %v4554_v46 }
 0x3f0   : > { %vm1031_vm14 = vcmp.le.f32.partialorder %v5225_v16, %v1023_v8  ;;  %v1105_v32 = vsel %vm754_vm5, %v5278_v21, inf  ;;  %1112 = vmin.xlane.f32.xlu1 %v1111_v38  ;;  %v5383_v38 = vld [vmem:[%s4721_s17 + $0x10] sm:$0xff] }
 0x3f1   : > { %v1039_v57 = vsel %vm1031_vm14, %v4958_v33, 64.0  ;;  %1106 = vmin.xlane.f32.xlu2 %v1105_v32  ;;  %v5380_v32 = vpop.f32.mrf.mxu0 }
 0x3f2   : > { %v1061_v49 = vsel %vm754_vm5, %v1039_v57, inf }
 0x3f3   : > { %1062 = vmin.xlane.f32.xlu0 %v1061_v49  ;;  %v5387_v49 = vld [vmem:[%s4721_s17 + $0x18] sm:$0xff] }
 0x3f7   : > { %v1054_v58 = vpop.xlane.xlu1 %1053  ;;  %3778 = vmatmul.msk.f32.gmra.mxu1 %vm754_vm5, %v3738_v42 }
 0x3f8   : > { %v1462_v28 = vpop.f32.mrf.mxu1  ;;  %vm1068_vm15 = vcmp.eq.f32.partialorder %v4958_v33, %v1054_v58 }
 0x3f9   : > { %v1552_v62 = vsub.f32 %v1462_v28, %v5303_v60  ;;  %v5309_v63 = vsel %vm1068_vm15, inf, %v5181_v31  ;;  %v3740_v11 = vsel %vm1068_vm15, 1.0, %v4554_v46 }
 0x3fa   : > { %v1108_v40 = vsel %vm754_vm5, %v5309_v63, inf }
 0x3fb   : > { %v1585_v47 = vpack.c.bf16 %v1552_v62, %v1551_v59  ;;  %1109 = vmin.xlane.f32.xlu0 %v1108_v40  ;;  %v5392_v59 = vpop.f32.mrf.mxu0 }
 0x3fd   : > { %3807 = vmatmul.msk.bf16.gmra.mxu2 %vm628_vm0, %v1585_v47  ;;  %3859 = vmatmul.msk.bf16.gmra.mxu0 %vm628_vm0, %v1585_v47  ;;  %v5395_v47 = vld [vmem:[%s4721_s17 + $0x20] sm:$0xff] }
 0x3ff   : > { %v1060_v9 = vpop.xlane.xlu1 %1059  ;;  %3779 = vmatmul.msk.f32.gmra.mxu1 %vm754_vm5, %v3739_v1  ;;  %v5399_v1 = vld [vmem:[%s4721_s17 + $0x28] sm:$0xff] }
 0x400   : > { %vm1070_vm1 = vcmp.eq.f32.partialorder %v4958_v33, %v1060_v9 }
 0x401   : > { %v5321_v31 = vsel %vm1070_vm1, inf, %v5194_v0  ;;  %v3742_v13 = vsel %vm1070_vm1, 1.0, %v4554_v46 }
 0x402   : > { %v1114_v10 = vsel %vm754_vm5, %v5321_v31, inf }
 0x403   : > { %1115 = vmin.xlane.f32.xlu0 %v1114_v10 }
 0x407   : > { %3780 = vmatmul.msk.f32.gmra.mxu1 %vm754_vm5, %v3740_v11  ;;  %v5402_v11 = vpop.f32.mrf.mxu0 }
 0x40f   : > { %3781 = vmatmul.msk.f32.gmra.mxu1 %vm754_vm5, %v3741_v12 }
 0x417   : > { %3782 = vmatmul.msk.f32.gmra.mxu1 %vm754_vm5, %v3742_v13 }
 0x45b   : > { %v1104_v0 = vpop.xlane.xlu1 %1103  ;;  %v1098_v14 = vpop.xlane.xlu0 %1097 }
 0x45c   : > { %vm1122_vm2 = vcmp.le.f32.partialorder %v5264_v29, %v1104_v0  ;;  %v1101_v17 = vpop.xlane.xlu2 %1100  ;;  %vm1120_vm3 = vcmp.le.f32.partialorder %v5259_v4, %v1098_v14 }
 0x45d   : > { %vm1121_vm4 = vcmp.le.f32.partialorder %v5255_v3, %v1101_v17  ;;  %v1130_v18 = vsel %vm1122_vm2, %v4958_v33, 64.0  ;;  %v1128_v61 = vsel %vm1120_vm3, %v4958_v33, 64.0 }
 0x45e   : > { %v1142_v20 = vsel %vm754_vm5, %v1130_v18, inf  ;;  %v1129_v35 = vsel %vm1121_vm4, %v4958_v33, 64.0  ;;  %v1136_v37 = vsel %vm754_vm5, %v1128_v61, inf }
 0x45f   : > { %1143 = vmin.xlane.f32.xlu0 %v1142_v20  ;;  %v1139_v34 = vsel %vm754_vm5, %v1129_v35, inf  ;;  %1137 = vmin.xlane.f32.xlu2 %v1136_v37 }
 0x460   : > { %1140 = vmin.xlane.f32.xlu1 %v1139_v34 }
 0x463   : > { %v1113_v15 = vpop.xlane.xlu1 %1112 }
 0x464   : > { %vm1125_vm6 = vcmp.le.f32.partialorder %v5286_v50, %v1113_v15  ;;  %v1107_v48 = vpop.xlane.xlu2 %1106  ;;  %v1465_v27 = vpop.f32.mrf.mxu1 }
 0x465   : > { %vm1123_vm7 = vcmp.le.f32.partialorder %v5278_v21, %v1107_v48  ;;  %v1133_v6 = vsel %vm1125_vm6, %v4958_v33, 64.0  ;;  %v1553_v25 = vsub.f32 %v1465_v27, %v5363_v23 }
 0x466   : > { %v1063_v7 = vpop.xlane.xlu0 %1062  ;;  %v1151_v39 = vsel %vm754_vm5, %v1133_v6, inf  ;;  %v1131_v41 = vsel %vm1123_vm7, %v4958_v33, 64.0 }
 0x467   : > { %vm1071_vm8 = vcmp.eq.f32.partialorder %v4958_v33, %v1063_v7  ;;  %1152 = vmin.xlane.f32.xlu0 %v1151_v39  ;;  %v1145_v53 = vsel %vm754_vm5, %v1131_v41, inf  ;;  %v5446_v41 = vpop.f32.mrf.mxu0 }
 0x468   : > { %v3743_v43 = vsel %vm1071_vm8, 1.0, %v4554_v46  ;;  %v5354_v30 = vsel %vm1071_vm8, inf, %v5225_v16  ;;  %1146 = vmin.xlane.f32.xlu1 %v1145_v53 }
 0x469   : > { %3783 = vmatmul.msk.f32.gmra.mxu1 %vm754_vm5, %v3743_v43  ;;  %v1117_v51 = vsel %vm754_vm5, %v5354_v30, inf }
 0x46a   : > { %1118 = vmin.xlane.f32.xlu2 %v1117_v51  ;;  %v5453_v51 = vld [vmem:[%s4721_s17 + $0x30] sm:$0xff] }
 0x46c   : > { %v1468_v44 = vpop.f32.mrf.mxu1 }
 0x46d   : > { %v1554_v16 = vsub.f32 %v1468_v44, %v5367_v5 }
 0x46e   : > { %v1110_v22 = vpop.xlane.xlu0 %1109 }
 0x46f   : > { %vm1124_vm9 = vcmp.le.f32.partialorder %v5309_v63, %v1110_v22  ;;  %v1586_v2 = vpack.c.bf16 %v1554_v16, %v1553_v25 }
 0x470   : > { %v1132_v45 = vsel %vm1124_vm9, %v4958_v33, 64.0 }
 0x471   : > { %v1148_v24 = vsel %vm754_vm5, %v1132_v45, inf  ;;  %3808 = vmatmul.msk.bf16.gmra.mxu2 %vm628_vm0, %v1586_v2  ;;  %3860 = vmatmul.msk.bf16.gmra.mxu0 %vm628_vm0, %v1586_v2  ;;  %v5465_v45 = vpop.f32.mrf.mxu0 }
 0x472   : > { %1149 = vmin.xlane.f32.xlu2 %v1148_v24 }
 0x474   : > { %v1471_v26 = vpop.f32.mrf.mxu1 }
 0x475   : > { %v1555_v57 = vsub.f32 %v1471_v26, %v5383_v38 }
 0x476   : > { %v1116_v55 = vpop.xlane.xlu0 %1115 }
 0x477   : > { %vm1126_vm10 = vcmp.le.f32.partialorder %v5321_v31, %v1116_v55 }
 0x478   : > { %v1134_v8 = vsel %vm1126_vm10, %v4958_v33, 64.0 }
 0x479   : > { %v1154_v56 = vsel %vm754_vm5, %v1134_v8, inf }
 0x47a   : > { %1155 = vmin.xlane.f32.xlu2 %v1154_v56 }
 0x47c   : > { %v1474_v36 = vpop.f32.mrf.mxu1 }
 0x47d   : > { %v1556_v42 = vsub.f32 %v1474_v36, %v5387_v49 }
 0x47f   : > { %v1587_v58 = vpack.c.bf16 %v1556_v42, %v1555_v57 }
 0x481   : > { %3809 = vmatmul.msk.bf16.gmra.mxu2 %vm628_vm0, %v1587_v58  ;;  %3861 = vmatmul.msk.bf16.gmra.mxu0 %vm628_vm0, %v1587_v58 }
 0x484   : > { %v1477_v28 = vpop.f32.mrf.mxu1 }
 0x485   : > { %v1557_v40 = vsub.f32 %v1477_v28, %v5395_v47 }
 0x48c   : > { %v1480_v62 = vpop.f32.mrf.mxu1 }
 0x48d   : > { %v1558_v9 = vsub.f32 %v1480_v62, %v5399_v1 }
 0x48f   : > { %v1588_v10 = vpack.c.bf16 %v1558_v9, %v1557_v40 }
 0x491   : > { %3810 = vmatmul.msk.bf16.gmra.mxu2 %vm628_vm0, %v1588_v10  ;;  %3862 = vmatmul.msk.bf16.gmra.mxu0 %vm628_vm0, %v1588_v10 }
 0x494   : > { %v1483_v48 = vpop.f32.mrf.mxu1 }
 0x495   : > { %v1559_v44 = vsub.f32 %v1483_v48, %v5453_v51 }
 0x4d2   : > { %v1138_v12 = vpop.xlane.xlu2 %1137  ;;  %v1144_v13 = vpop.xlane.xlu0 %1143 }
 0x4d3   : > { %v1141_v0 = vpop.xlane.xlu1 %1140  ;;  %vm1160_vm11 = vcmp.eq.f32.partialorder %v4958_v33, %v1138_v12  ;;  %vm1162_vm12 = vcmp.eq.f32.partialorder %v4958_v33, %v1144_v13  ;;  %v5497_v12 = vpop.f32.mrf.mxu0 }
 0x4d4   : > { %vm1161_vm13 = vcmp.eq.f32.partialorder %v4958_v33, %v1141_v0  ;;  %v3744_v14 = vsel %vm1160_vm11, 1.0, %v4554_v46  ;;  %v5411_v17 = vsel %vm1160_vm11, inf, %v5259_v4  ;;  %v1186_v20 = vsel %vm1162_vm12, inf, %v5264_v29  ;;  %v5499_v13 = vpop.f32.mrf.mxu2 }
 0x4d5   : > { %3784 = vmatmul.msk.f32.gmra.mxu1 %vm754_vm5, %v3744_v14  ;;  %v5415_v18 = vsel %vm1161_vm13, inf, %v5255_v3  ;;  %v1192_v61 = vsel %vm754_vm5, %v5411_v17, inf  ;;  %v1198_v37 = vsel %vm754_vm5, %v1186_v20, inf  ;;  %v3745_v3 = vsel %vm1161_vm13, 1.0, %v4554_v46 }
 0x4d6   : > { %v1195_v35 = vsel %vm754_vm5, %v5415_v18, inf  ;;  %1193 = vmin.xlane.f32.xlu1 %v1192_v61  ;;  %1199 = vmin.xlane.f32.xlu2 %v1198_v37 }
 0x4d7   : > { %1196 = vmin.xlane.f32.xlu0 %v1195_v35 }
 0x4da   : > { %v1153_v4 = vpop.xlane.xlu0 %1152 }
 0x4db   : > { %v1147_v34 = vpop.xlane.xlu1 %1146  ;;  %vm1165_vm14 = vcmp.eq.f32.partialorder %v4958_v33, %v1153_v4 }
 0x4dc   : > { %vm1163_vm15 = vcmp.eq.f32.partialorder %v4958_v33, %v1147_v34  ;;  %v5431_v29 = vsel %vm1165_vm14, inf, %v5286_v50  ;;  %v3749_v56 = vsel %vm1165_vm14, 1.0, %v4554_v46 }
 0x4dd   : > { %v1119_v15 = vpop.xlane.xlu2 %1118  ;;  %3785 = vmatmul.msk.f32.gmra.mxu1 %vm754_vm5, %v3745_v3  ;;  %v5438_v27 = vsel %vm1163_vm15, inf, %v5278_v21  ;;  %v1207_v7 = vsel %vm754_vm5, %v5431_v29, inf  ;;  %v3746_v21 = vsel %vm1162_vm12, 1.0, %v4554_v46  ;;  %v3747_v24 = vsel %vm1163_vm15, 1.0, %v4554_v46 }
 0x4de   : > { %vm1127_vm1 = vcmp.le.f32.partialorder %v5354_v30, %v1119_v15  ;;  %v1201_v6 = vsel %vm754_vm5, %v5438_v27, inf  ;;  %1208 = vmin.xlane.f32.xlu2 %v1207_v7  ;;  %v5512_v15 = vpop.f32.mrf.mxu0 }
 0x4df   : > { %v1135_v50 = vsel %vm1127_vm1, %v4958_v33, 64.0  ;;  %1202 = vmin.xlane.f32.xlu0 %v1201_v6 }
 0x4e0   : > { %v1157_v39 = vsel %vm754_vm5, %v1135_v50, inf }
 0x4e1   : > { %1158 = vmin.xlane.f32.xlu1 %v1157_v39 }
 0x4e5   : > { %v1150_v43 = vpop.xlane.xlu2 %1149  ;;  %3786 = vmatmul.msk.f32.gmra.mxu1 %vm754_vm5, %v3746_v21 }
 0x4e6   : > { %v1486_v53 = vpop.f32.mrf.mxu1  ;;  %vm1164_vm2 = vcmp.eq.f32.partialorder %v4958_v33, %v1150_v43  ;;  %v5523_v21 = vpop.f32.mrf.mxu0 }
 0x4e7   : > { %v1560_v25 = vsub.f32 %v1486_v53, %v5303_v60  ;;  %v5461_v16 = vsel %vm1164_vm2, inf, %v5309_v63  ;;  %v3748_v8 = vsel %vm1164_vm2, 1.0, %v4554_v46 }
 0x4e8   : > { %v1204_v2 = vsel %vm754_vm5, %v5461_v16, inf }
 0x4e9   : > { %v1589_v22 = vpack.c.bf16 %v1560_v25, %v1559_v44  ;;  %1205 = vmin.xlane.f32.xlu1 %v1204_v2 }
 0x4eb   : > { %3811 = vmatmul.msk.bf16.gmra.mxu2 %vm628_vm0, %v1589_v22  ;;  %3863 = vmatmul.msk.bf16.gmra.mxu0 %vm628_vm0, %v1589_v22 }
 0x4ed   : > { %v1156_v26 = vpop.xlane.xlu2 %1155  ;;  %3787 = vmatmul.msk.f32.gmra.mxu1 %vm754_vm5, %v3747_v24 }
 0x4ee   : > { %vm1166_vm3 = vcmp.eq.f32.partialorder %v4958_v33, %v1156_v26  ;;  %v5530_v2 = vpop.f32.mrf.mxu0 }
 0x4ef   : > { %v5475_v63 = vsel %vm1166_vm3, inf, %v5321_v31  ;;  %v3750_v36 = vsel %vm1166_vm3, 1.0, %v4554_v46 }
 0x4f0   : > { %v1210_v55 = vsel %vm754_vm5, %v5475_v63, inf }
 0x4f1   : > { %1211 = vmin.xlane.f32.xlu1 %v1210_v55 }
 0x4f5   : > { %3788 = vmatmul.msk.f32.gmra.mxu1 %vm754_vm5, %v3748_v8 }
 0x4fd   : > { %3789 = vmatmul.msk.f32.gmra.mxu1 %vm754_vm5, %v3749_v56  ;;  %v5538_v56 = vpop.f32.mrf.mxu0 }
 0x505   : > { %3790 = vmatmul.msk.f32.gmra.mxu1 %vm754_vm5, %v3750_v36 }
 0x549   : > { %v1194_v31 = vpop.xlane.xlu1 %1193  ;;  %v1200_v57 = vpop.xlane.xlu2 %1199 }
 0x54a   : > { %vm1216_vm4 = vcmp.le.f32.partialorder %v5411_v17, %v1194_v31  ;;  %v1197_v42 = vpop.xlane.xlu0 %1196  ;;  %vm1218_vm6 = vcmp.le.f32.partialorder %v1186_v20, %v1200_v57 }
 0x54b   : > { %vm1217_vm7 = vcmp.le.f32.partialorder %v5415_v18, %v1197_v42  ;;  %v1224_v58 = vsel %vm1216_vm4, %v4958_v33, 64.0  ;;  %v1226_v62 = vsel %vm1218_vm6, %v4958_v33, 64.0 }
 0x54c   : > { %v1232_v28 = vsel %vm754_vm5, %v1224_v58, inf  ;;  %v1225_v40 = vsel %vm1217_vm7, %v4958_v33, 64.0  ;;  %v1238_v9 = vsel %vm754_vm5, %v1226_v62, inf }
 0x54d   : > { %1233 = vmin.xlane.f32.xlu0 %v1232_v28  ;;  %v1235_v10 = vsel %vm754_vm5, %v1225_v40, inf  ;;  %1239 = vmin.xlane.f32.xlu1 %v1238_v9  ;;  %v5544_v28 = vpop.f32.mrf.mxu0 }
 0x54e   : > { %1236 = vmin.xlane.f32.xlu2 %v1235_v10 }
 0x551   : > { %v1209_v0 = vpop.xlane.xlu2 %1208 }
 0x552   : > { %v1203_v14 = vpop.xlane.xlu0 %1202  ;;  %vm1221_vm8 = vcmp.le.f32.partialorder %v5431_v29, %v1209_v0  ;;  %v1489_v17 = vpop.f32.mrf.mxu1 }
 0x553   : > { %vm1219_vm9 = vcmp.le.f32.partialorder %v5438_v27, %v1203_v14  ;;  %v1229_v61 = vsel %vm1221_vm8, %v4958_v33, 64.0  ;;  %v5514_v29 = vpop.f32.mrf.mxu2  ;;  %v1561_v27 = vsub.f32 %v1489_v17, %v5363_v23  ;;  %vm1898_vm8 = vcmask 261120  }
 0x554   : > { %v1159_v18 = vpop.xlane.xlu1 %1158  ;;  %v1227_v20 = vsel %vm1219_vm9, %v4958_v33, 64.0  ;;  %v1247_v37 = vsel %vm754_vm5, %v1229_v61, inf }
 0x555   : > { %vm1167_vm10 = vcmp.eq.f32.partialorder %v4958_v33, %v1159_v18  ;;  %v1241_v4 = vsel %vm754_vm5, %v1227_v20, inf  ;;  %1248 = vmin.xlane.f32.xlu1 %v1247_v37 }
 0x556   : > { %v3751_v35 = vsel %vm1167_vm10, 1.0, %v4554_v46  ;;  %v1191_v34 = vsel %vm1167_vm10, inf, %v5354_v30  ;;  %1242 = vmin.xlane.f32.xlu2 %v1241_v4 }
 0x557   : > { %v1213_v3 = vsel %vm754_vm5, %v1191_v34, inf  ;;  %3791 = vmatmul.msk.f32.gmra.mxu1 %vm754_vm5, %v3751_v35  ;;  %v5558_v35 = vpop.f32.mrf.mxu0 }
 0x558   : > { %1214 = vmin.xlane.f32.xlu0 %v1213_v3 }
 0x55a   : > { %v1492_v48 = vpop.f32.mrf.mxu1 }
 0x55b   : > { %v1562_v7 = vsub.f32 %v1492_v48, %v5367_v5  ;;  %v5525_v43 = vpop.f32.mrf.mxu2 }
 0x55c   : > { %v1206_v6 = vpop.xlane.xlu1 %1205 }
 0x55d   : > { %vm1220_vm11 = vcmp.le.f32.partialorder %v5461_v16, %v1206_v6  ;;  %v1590_v30 = vpack.c.bf16 %v1562_v7, %v1561_v27 }
 0x55e   : > { %v1228_v50 = vsel %vm1220_vm11, %v4958_v33, 64.0 }
 0x55f   : > { %v1244_v39 = vsel %vm754_vm5, %v1228_v50, inf  ;;  %3812 = vmatmul.msk.bf16.gmra.mxu2 %vm628_vm0, %v1590_v30  ;;  %3864 = vmatmul.msk.bf16.gmra.mxu0 %vm628_vm0, %v1590_v30  ;;  %v5568_v6 = vpop.f32.mrf.mxu0 }
 0x560   : > { %1245 = vmin.xlane.f32.xlu0 %v1244_v39 }
 0x562   : > { %v1495_v53 = vpop.f32.mrf.mxu1 }
 0x563   : > { %v5532_v24 = vpop.f32.mrf.mxu2  ;;  %v1563_v26 = vsub.f32 %v1495_v53, %v5383_v38 }
 0x564   : > { %v1212_v44 = vpop.xlane.xlu1 %1211 }
 0x565   : > { %vm1222_vm12 = vcmp.le.f32.partialorder %v5475_v63, %v1212_v44 }
 0x566   : > { %v1230_v25 = vsel %vm1222_vm12, %v4958_v33, 64.0 }
 0x567   : > { %v1250_v16 = vsel %vm754_vm5, %v1230_v25, inf }
 0x568   : > { %1251 = vmin.xlane.f32.xlu2 %v1250_v16 }
 0x56a   : > { %v1498_v22 = vpop.f32.mrf.mxu1 }
 0x56b   : > { %v1564_v55 = vsub.f32 %v1498_v22, %v5387_v49  ;;  %v5540_v36 = vpop.f32.mrf.mxu2 }
 0x56d   : > { %v1591_v8 = vpack.c.bf16 %v1564_v55, %v1563_v26  ;;  %v5585_v26 = vpop.f32.mrf.mxu0 }
 0x56f   : > { %3813 = vmatmul.msk.bf16.gmra.mxu2 %vm628_vm0, %v1591_v8  ;;  %3865 = vmatmul.msk.bf16.gmra.mxu0 %vm628_vm0, %v1591_v8 }
 0x572   : > { %v1501_v63 = vpop.f32.mrf.mxu1 }
 0x573   : > { %v1565_v57 = vsub.f32 %v1501_v63, %v5395_v47  ;;  %v5546_v62 = vpop.f32.mrf.mxu2 }
 0x57a   : > { %v1504_v31 = vpop.f32.mrf.mxu1 }
 0x57b   : > { %v1566_v42 = vsub.f32 %v1504_v31, %v5399_v1  ;;  %v5560_v37 = vpop.f32.mrf.mxu2 }
 0x57d   : > { %v1592_v58 = vpack.c.bf16 %v1566_v42, %v1565_v57  ;;  %v5592_v57 = vpop.f32.mrf.mxu0 }
 0x57f   : > { %3814 = vmatmul.msk.bf16.gmra.mxu2 %vm628_vm0, %v1592_v58  ;;  %3866 = vmatmul.msk.bf16.gmra.mxu0 %vm628_vm0, %v1592_v58 }
 0x582   : > { %v1507_v17 = vpop.f32.mrf.mxu1 }
 0x583   : > { %v5570_v30 = vpop.f32.mrf.mxu2 }
 0x58b   : > { %v5587_v55 = vpop.f32.mrf.mxu2 }
 0x593   : > { %v5594_v58 = vpop.f32.mrf.mxu2 }
 0x5c0   : > { %v1234_v40 = vpop.xlane.xlu0 %1233  ;;  %v1240_v18 = vpop.xlane.xlu1 %1239 }
 0x5c1   : > { %vm1256_vm13 = vcmp.eq.f32.partialorder %v4958_v33, %v1234_v40  ;;  %v1237_v10 = vpop.xlane.xlu2 %1236  ;;  %vm1258_vm1 = vcmp.eq.f32.partialorder %v4958_v33, %v1240_v18 }
 0x5c2   : > { %v3752_v9 = vsel %vm1256_vm13, 1.0, %v4554_v46  ;;  %vm1257_vm14 = vcmp.eq.f32.partialorder %v4958_v33, %v1237_v10  ;;  %v3754_v4 = vsel %vm1258_vm1, 1.0, %v4554_v46 }
 0x5c3   : > { %3792 = vmatmul.msk.f32.gmra.mxu1 %vm754_vm5, %v3752_v9  ;;  %v3753_v0 = vsel %vm1257_vm14, 1.0, %v4554_v46 }
 0x5c8   : > { %v1249_v44 = vpop.xlane.xlu1 %1248 }
 0x5c9   : > { %v1243_v3 = vpop.xlane.xlu2 %1242  ;;  %vm1261_vm4 = vcmp.eq.f32.partialorder %v4958_v33, %v1249_v44 }
 0x5ca   : > { %vm1259_vm2 = vcmp.eq.f32.partialorder %v4958_v33, %v1243_v3  ;;  %v3757_v25 = vsel %vm1261_vm4, 1.0, %v4554_v46 }
 0x5cb   : > { %v1215_v14 = vpop.xlane.xlu0 %1214  ;;  %3793 = vmatmul.msk.f32.gmra.mxu1 %vm754_vm5, %v3753_v0  ;;  %v3755_v50 = vsel %vm1259_vm2, 1.0, %v4554_v46  ;;  %v5600_v0 = vpop.f32.mrf.mxu0 }
 0x5cc   : > { %vm1223_vm15 = vcmp.le.f32.partialorder %v1191_v34, %v1215_v14  ;;  %v1567_v34 = vsub.f32 %v1507_v17, %v5453_v51  ;;  %v5602_v14 = vpop.f32.mrf.mxu2 }
 0x5cd   : > { %v1231_v61 = vsel %vm1223_vm15, %v4958_v33, 64.0 }
 0x5ce   : > { %v1253_v20 = vsel %vm754_vm5, %v1231_v61, inf }
 0x5cf   : > { %1254 = vmin.xlane.f32.xlu0 %v1253_v20 }
 0x5d3   : > { %3794 = vmatmul.msk.f32.gmra.mxu1 %vm754_vm5, %v3754_v4  ;;  %v1246_v39 = vpop.xlane.xlu0 %1245  ;;  %v5604_v18 = vpop.f32.mrf.mxu0 }
 0x5d4   : > { %v1510_v48 = vpop.f32.mrf.mxu1  ;;  %vm1260_vm3 = vcmp.eq.f32.partialorder %v4958_v33, %v1246_v39  ;;  %v5608_v20 = vpop.f32.mrf.mxu2 }
 0x5d5   : > { %v1568_v27 = vsub.f32 %v1510_v48, %v5303_v60  ;;  %v3756_v53 = vsel %vm1260_vm3, 1.0, %v4554_v46 }
 0x5d7   : > { %v1593_v7 = vpack.c.bf16 %v1568_v27, %v1567_v34 }
 0x5d9   : > { %3815 = vmatmul.msk.bf16.gmra.mxu2 %vm628_vm0, %v1593_v7  ;;  %3867 = vmatmul.msk.bf16.gmra.mxu0 %vm628_vm0, %v1593_v7 }
 0x5db   : > { %3795 = vmatmul.msk.f32.gmra.mxu1 %vm754_vm5, %v3755_v50  ;;  %v1252_v16 = vpop.xlane.xlu2 %1251  ;;  %v5612_v3 = vpop.f32.mrf.mxu0 }
 0x5dc   : > { %vm1262_vm6 = vcmp.eq.f32.partialorder %v4958_v33, %v1252_v16  ;;  %v5624_v16 = vld [vmem:[#allocation2] ss:$0 sm:$0xff] }
 0x5dd   : > { %v3758_v22 = vsel %vm1262_vm6, 1.0, %v4554_v46 }
 0x5e3   : > { %3796 = vmatmul.msk.f32.gmra.mxu1 %vm754_vm5, %v3756_v53  ;;  %v5616_v50 = vpop.f32.mrf.mxu0 }
 0x5eb   : > { %3797 = vmatmul.msk.f32.gmra.mxu1 %vm754_vm5, %v3757_v25  ;;  %v5620_v39 = vpop.f32.mrf.mxu0 }
 0x5f3   : > { %3798 = vmatmul.msk.f32.gmra.mxu1 %vm754_vm5, %v3758_v22  ;;  %v1681_v22 = vadd.f32 %v5624_v16, %v5514_v29 }
 0x640   : > { %v1513_v8 = vpop.f32.mrf.mxu1 }
 0x641   : > { %v1569_v40 = vsub.f32 %v1513_v8, %v5363_v23  ;;  %v1679_v8 = vadd.f32 %v5624_v16, %v5499_v13  ;;  %v1691_v13 = vadd.f32 %v5624_v16, %v5546_v62 }
 0x642   : > { %v1255_v63 = vpop.xlane.xlu0 %1254 }
 0x643   : > { %vm1263_vm7 = vcmp.eq.f32.partialorder %v4958_v33, %v1255_v63  ;;  %v1779_v63 = vmul.f32 0.01, %v1681_v22 }
 0x644   : > { %v3759_v31 = vsel %vm1263_vm7, 1.0, %v4554_v46  ;;  %v4074_v46 = vld [vmem:[#allocation4 + $0x8] sm:$0xff] }
 0x645   : > { %3799 = vmatmul.msk.f32.gmra.mxu1 %vm754_vm5, %v3759_v31  ;;  %1965 = vmatpush.bf16.msrb.mxu3 %v4074_v46  ;;  %v1778_v31 = vmul.f32 0.01, %v1679_v8 }
 0x648   : > { %v1516_v42 = vpop.f32.mrf.mxu1 }
 0x649   : > { %v1570_v9 = vsub.f32 %v1516_v42, %v5367_v5  ;;  %v1818_v42 = vmax.f32 %v1679_v8, %v1778_v31 }
 0x64b   : > { %v1594_v10 = vpack.c.bf16 %v1570_v9, %v1569_v40  ;;  %v1686_v40 = vadd.f32 %v5624_v16, %v5532_v24  ;;  %v1684_v9 = vadd.f32 %v5624_v16, %v5525_v43  ;;  %v1696_v43 = vadd.f32 %v5624_v16, %v5570_v30 }
 0x64d   : > { %3816 = vmatmul.msk.bf16.gmra.mxu2 %vm628_vm0, %v1594_v10  ;;  %3868 = vmatmul.msk.bf16.gmra.mxu0 %vm628_vm0, %v1594_v10  ;;  %v1781_v10 = vmul.f32 0.01, %v1686_v40 }
 0x64f   : > { %v1821_v29 = vmax.f32 %v1686_v40, %v1781_v10 }
 0x650   : > { %v1519_v33 = vpop.f32.mrf.mxu1 }
 0x651   : > { %v1571_v61 = vsub.f32 %v1519_v33, %v5383_v38  ;;  %v4073_v38 = vld [vmem:[#allocation4] sm:$0xff]  ;;  %v1780_v33 = vmul.f32 0.01, %v1684_v9 }
 0x652   : > { %1966 = vmatpush.bf16.msrb.mxu3 %v4073_v38 }
 0x653   : > { %v1820_v46 = vmax.f32 %v1684_v9, %v1780_v33 }
 0x658   : > { %v1522_v17 = vpop.f32.mrf.mxu1 }
 0x659   : > { %v1572_v23 = vsub.f32 %v1522_v17, %v5387_v49  ;;  %v1863_v17 = vpack.c.bf16 %v1821_v29, %v1820_v46 }
 0x65b   : > { %v1595_v5 = vpack.c.bf16 %v1572_v23, %v1571_v61  ;;  %v1689_v61 = vadd.f32 %v5624_v16, %v5540_v36  ;;  %v1783_v23 = vmul.f32 0.01, %v1691_v13 }
 0x65d   : > { %3817 = vmatmul.msk.bf16.gmra.mxu2 %vm628_vm0, %v1595_v5  ;;  %3869 = vmatmul.msk.bf16.gmra.mxu0 %vm628_vm0, %v1595_v5  ;;  %v1782_v5 = vmul.f32 0.01, %v1689_v61 }
 0x65f   : > { %v1822_v24 = vmax.f32 %v1689_v61, %v1782_v5 }
 0x660   : > { %v1525_v4 = vpop.f32.mrf.mxu1 }
 0x661   : > { %v1573_v34 = vsub.f32 %v1525_v4, %v5395_v47  ;;  %v1823_v4 = vmax.f32 %v1691_v13, %v1783_v23 }
 0x668   : > { %v1528_v48 = vpop.f32.mrf.mxu1 }
 0x669   : > { %v1574_v27 = vsub.f32 %v1528_v48, %v5399_v1  ;;  %v5626_v1 = vpop.f32.mrf.mxu0  ;;  %v1864_v48 = vpack.c.bf16 %v1823_v4, %v1822_v24 }
 0x66b   : > { %v1596_v7 = vpack.c.bf16 %v1574_v27, %v1573_v34  ;;  %v1694_v34 = vadd.f32 %v5624_v16, %v5560_v37  ;;  %v1708_v27 = vpop.f32.mrf.mxu2 }
 0x66c   : > { %v1709_v46 = vadd.f32 %v5624_v16, %v1708_v27 }
 0x66d   : > { %3818 = vmatmul.msk.bf16.vlgmr.msra.gmra.mxu3 %vm628_vm0, %v1596_v7  ;;  %3870 = vmatmul.msk.bf16.gmra.mxu0 %vm628_vm0, %v1596_v7  ;;  %v1785_v7 = vmul.f32 0.01, %v1696_v43  ;;  %v1784_v38 = vmul.f32 0.01, %v1694_v34 }
 0x66e   : > { %v1790_v13 = vmul.f32 0.01, %v1709_v46 }
 0x66f   : > { %v1825_v62 = vmax.f32 %v1696_v43, %v1785_v7 }
 0x670   : > { %v1531_v49 = vpop.f32.mrf.mxu1 }
 0x671   : > { %v1575_v44 = vsub.f32 %v1531_v49, %v5453_v51  ;;  %v1819_v51 = vmax.f32 %v1681_v22, %v1779_v63  ;;  %v1824_v49 = vmax.f32 %v1694_v34, %v1784_v38 }
 0x673   : > { %v1710_v36 = vpop.f32.mrf.mxu2 }
 0x674   : > { %v1711_v33 = vadd.f32 %v5624_v16, %v1710_v36 }
 0x67b   : > { %v1713_v30 = vpop.f32.mrf.mxu2 }
 0x683   : > { %v1715_v31 = vpop.f32.mrf.mxu2 }
 0x684   : > { %v1716_v24 = vadd.f32 %v5624_v16, %v1715_v31 }
 0x686   : > { %v1793_v43 = vmul.f32 0.01, %v1716_v24 }
 0x688   : > { %v1833_v7 = vmax.f32 %v1716_v24, %v1793_v43 }
 0x68b   : > { %v1718_v40 = vpop.f32.mrf.mxu2 }
 0x693   : > { %v1720_v29 = vpop.f32.mrf.mxu2 }
 0x694   : > { %v1721_v36 = vadd.f32 %v5624_v16, %v1720_v29 }
 0x69b   : > { %v1723_v23 = vpop.f32.mrf.mxu2 }
 0x6a3   : > { %v1725_v34 = vpop.f32.mrf.mxu2 }
 0x6c2   : > { %v1534_v53 = vpop.f32.mrf.mxu1 }
 0x6c3   : > { %v1576_v25 = vsub.f32 %v1534_v53, %v5303_v60  ;;  %v1862_v60 = vpack.c.bf16 %v1819_v51, %v1818_v42  ;;  %v1865_v53 = vpack.c.bf16 %v1825_v62, %v1824_v49  ;;  %v1706_v51 = vadd.f32 %v5624_v16, %v5608_v20 }
 0x6c4   : > { %v1704_v42 = vadd.f32 %v5624_v16, %v5602_v14  ;;  %v4078_v14 = vld [vmem:[%s7149_s9 + $0x18] sm:$0xff]  ;;  %v1830_v20 = vmax.f32 %v1709_v46, %v1790_v13 }
 0x6c5   : > { %v1597_v47 = vpack.c.bf16 %v1576_v25, %v1575_v44  ;;  %v1701_v44 = vadd.f32 %v5624_v16, %v5594_v58  ;;  %v1699_v25 = vadd.f32 %v5624_v16, %v5587_v55  ;;  %2868 = vmatpush.bf16.msra.mxu3 %v4078_v14 }
 0x6c6   : > { %v1788_v58 = vmul.f32 0.01, %v1704_v42 }
 0x6c7   : > { %3819 = vmatmul.msk.bf16.gmra.mxu3 %vm628_vm0, %v1597_v47  ;;  %3871 = vmatmul.msk.bf16.gmra.mxu0 %vm628_vm0, %v1597_v47  ;;  %v1787_v47 = vmul.f32 0.01, %v1701_v44  ;;  %v1786_v22 = vmul.f32 0.01, %v1699_v25 }
 0x6c8   : > { %v1828_v55 = vmax.f32 %v1704_v42, %v1788_v58 }
 0x6c9   : > { %v1827_v8 = vmax.f32 %v1701_v44, %v1787_v47  ;;  %v1826_v37 = vmax.f32 %v1699_v25, %v1786_v22  ;;  %v1719_v25 = vadd.f32 %v5624_v16, %v1718_v40  ;;  %v1795_v47 = vmul.f32 0.01, %v1721_v36 }
 0x6cb   : > { %v1866_v63 = vpack.c.bf16 %v1827_v8, %v1826_v37  ;;  %v1794_v22 = vmul.f32 0.01, %v1719_v25  ;;  %v1835_v8 = vmax.f32 %v1721_v36, %v1795_v47  ;;  %v4082_v37 = vld [vmem:[%s7149_s9 + $0x38] sm:$0xff] }
 0x6cc   : > { %2803 = vmatpush.bf16.msrb.mxu2 %v4082_v37 }
 0x6d7   : > { %3828 = vmatmul.msk.bf16.vlgmr.msrb.gmra.mxu3 %vm1898_vm8, %v1862_v60  ;;  %v1789_v60 = vmul.f32 0.01, %v1706_v51 }
 0x6d9   : > { %v1829_v9 = vmax.f32 %v1706_v51, %v1789_v60  ;;  %v1834_v51 = vmax.f32 %v1719_v25, %v1794_v22 }
 0x6db   : > { %v1867_v10 = vpack.c.bf16 %v1829_v9, %v1828_v55  ;;  %v1870_v9 = vpack.c.bf16 %v1835_v8, %v1834_v51 }
 0x6e7   : > { %3829 = vmatmul.msk.bf16.gmra.mxu3 %vm1898_vm8, %v1863_v17  ;;  %v1791_v17 = vmul.f32 0.01, %v1711_v33 }
 0x6e9   : > { %v1831_v61 = vmax.f32 %v1711_v33, %v1791_v17  ;;  %v1724_v17 = vadd.f32 %v5624_v16, %v1723_v23  ;;  %v4086_v23 = vld [vmem:[%s7149_s9 + $0x58] sm:$0xff] }
 0x6ea   : > { %2962 = vmatpush.bf16.msrb.mxu1 %v4086_v23  ;;  %v4081_v23 = vld [vmem:[%s7149_s9 + $0x30] sm:$0xff] }
 0x6eb   : > { %v1868_v5 = vpack.c.bf16 %v1831_v61, %v1830_v20  ;;  %v1796_v61 = vmul.f32 0.01, %v1724_v17  ;;  %2804 = vmatpush.bf16.msrb.mxu2 %v4081_v23 }
 0x6f0   : > { %v5666_v4 = vpop.f32.mrf.mxu3 }
 0x6f7   : > { %3830 = vmatmul.msk.bf16.gmra.mxu3 %vm1898_vm8, %v1864_v48  ;;  %v1714_v48 = vadd.f32 %v5624_v16, %v1713_v30 }
 0x6f8   : > { %v5670_v38 = vpop.f32.mrf.mxu3 }
 0x6f9   : > { %v1792_v27 = vmul.f32 0.01, %v1714_v48 }
 0x6fb   : > { %v1832_v62 = vmax.f32 %v1714_v48, %v1792_v27 }
 0x6fd   : > { %v1869_v49 = vpack.c.bf16 %v1833_v7, %v1832_v62 }
 0x707   : > { %3831 = vmatmul.msk.bf16.gmra.mxu3 %vm1898_vm8, %v1865_v53  ;;  %v1728_v53 = vpop.f32.mrf.mxu2 }
 0x717   : > { %3832 = vmatmul.msk.bf16.gmra.mxu3 %vm1898_vm8, %v1866_v63  ;;  %v1730_v63 = vpop.f32.mrf.mxu2 }
 0x718   : > { %v1731_v43 = vadd.f32 %v5624_v16, %v1730_v63 }
 0x71a   : > { %v1799_v62 = vmul.f32 0.01, %v1731_v43 }
 0x71c   : > { %v1839_v36 = vmax.f32 %v1731_v43, %v1799_v62  ;;  %v5714_v43 = vpop.f32.mrf.mxu0 }
 0x71f   : > { %v1733_v29 = vpop.f32.mrf.mxu2 }
 0x727   : > { %3833 = vmatmul.msk.bf16.gmra.mxu3 %vm1898_vm8, %v1867_v10  ;;  %v1726_v10 = vadd.f32 %v5624_v16, %v1725_v34  ;;  %v1735_v24 = vpop.f32.mrf.mxu2  ;;  %v1729_v34 = vadd.f32 %v5624_v16, %v1728_v53  ;;  %v1734_v53 = vadd.f32 %v5624_v16, %v1733_v29 }
 0x729   : > { %v1797_v13 = vmul.f32 0.01, %v1726_v10  ;;  %v1800_v63 = vmul.f32 0.01, %v1734_v53 }
 0x72b   : > { %v1837_v14 = vmax.f32 %v1726_v10, %v1797_v13 }
 0x72f   : > { %v1738_v7 = vpop.f32.mrf.mxu2 }
 0x730   : > { %v1739_v29 = vadd.f32 %v5624_v16, %v1738_v7 }
 0x732   : > { %v1802_v13 = vmul.f32 0.01, %v1739_v29 }
 0x737   : > { %3834 = vmatmul.msk.bf16.gmra.mxu3 %vm1898_vm8, %v1868_v5  ;;  %v1836_v5 = vmax.f32 %v1724_v17, %v1796_v61  ;;  %v1740_v22 = vpop.f32.mrf.mxu2 }
 0x739   : > { %v1871_v48 = vpack.c.bf16 %v1837_v14, %v1836_v5  ;;  %v5710_v14 = vld [vmem:[#allocation6] ss:$0 sm:$0xff] }
 0x747   : > { %3835 = vmatmul.msk.bf16.gmra.mxu3 %vm1898_vm8, %v1869_v49  ;;  %v1798_v49 = vmul.f32 0.01, %v1729_v34 }
 0x749   : > { %v1838_v25 = vmax.f32 %v1729_v34, %v1798_v49 }
 0x74a   : > { %v1773_v44 = vpop.f32.mrf.mxu3 }
 0x74b   : > { %v1774_v30 = vadd.f32 %v5624_v16, %v1773_v44  ;;  %v1872_v47 = vpack.c.bf16 %v1839_v36, %v1838_v25 }
 0x74d   : > { %v1816_v42 = vmul.f32 0.01, %v1774_v30 }
 0x74f   : > { %v1856_v55 = vmax.f32 %v1774_v30, %v1816_v42  ;;  %v1736_v30 = vadd.f32 %v5624_v16, %v1735_v24  ;;  %v1842_v24 = vmax.f32 %v1739_v29, %v1802_v13 }
 0x751   : > { %v1801_v37 = vmul.f32 0.01, %v1736_v30 }
 0x752   : > { %v1775_v31 = vpop.f32.mrf.mxu3 }
 0x753   : > { %v1776_v60 = vadd.f32 %v5624_v16, %v1775_v31  ;;  %v1743_v31 = vpop.f32.mrf.mxu2  ;;  %v1841_v51 = vmax.f32 %v1736_v30, %v1801_v37 }
 0x754   : > { %v1744_v25 = vadd.f32 %v5624_v16, %v1743_v31 }
 0x755   : > { %v1817_v58 = vmul.f32 0.01, %v1776_v60 }
 0x757   : > { %v1857_v40 = vmax.f32 %v1776_v60, %v1817_v58  ;;  %3836 = vmatmul.msk.bf16.gmra.mxu3 %vm1898_vm8, %v1870_v9  ;;  %v4077_v60 = vld [vmem:[%s7149_s9 + $0x10] sm:$0xff]  ;;  %v1840_v58 = vmax.f32 %v1734_v53, %v1800_v63  ;;  %v5727_v63 = vpop.f32.mrf.mxu0 }
 0x758   : > { %2869 = vmatpush.bf16.msra.mxu3 %v4077_v60 }
 0x759   : > { %v5682_v33 = vpack.c.bf16 %v1857_v40, %v1856_v55  ;;  %v1873_v9 = vpack.c.bf16 %v1841_v51, %v1840_v58  ;;  %v1741_v55 = vadd.f32 %v5624_v16, %v1740_v22  ;;  %v1804_v51 = vmul.f32 0.01, %v1744_v25 }
 0x75a   : > { %v1968_v46 = vpop.f32.mrf.mxu3 }
 0x75b   : > { %v1745_v40 = vpop.f32.mrf.mxu2  ;;  %v1803_v17 = vmul.f32 0.01, %v1741_v55  ;;  %v1969_v62 = vadd.f32 %v5710_v14, %v1968_v46  ;;  %v1844_v29 = vmax.f32 %v1744_v25, %v1804_v51 }
 0x75c   : > { %v1746_v49 = vadd.f32 %v5624_v16, %v1745_v40 }
 0x75d   : > { %v1843_v61 = vmax.f32 %v1741_v55, %v1803_v17  ;;  %v2068_v36 = vmul.f32 0.01, %v1969_v62 }
 0x75e   : > { %v1805_v22 = vmul.f32 0.01, %v1746_v49 }
 0x75f   : > { %v1874_v34 = vpack.c.bf16 %v1843_v61, %v1842_v24  ;;  %v5724_v30 = vmax.f32 %v1969_v62, %v2068_v36  ;;  %v5749_v36 = vpop.f32.mrf.mxu0 }
 0x760   : > { %v1845_v58 = vmax.f32 %v1746_v49, %v1805_v22 }
 0x761   : > { %7259 = vst [vmem:[#allocation18_spill] sm:$0xff] %v5724_v30 }
 0x762   : > { %v1970_v20 = vpop.f32.mrf.mxu3  ;;  %v1875_v13 = vpack.c.bf16 %v1845_v58, %v1844_v29 }
 0x763   : > { %v1971_v46 = vadd.f32 %v5710_v14, %v1970_v20 }
 0x765   : > { %v2069_v31 = vmul.f32 0.01, %v1971_v46 }
 0x767   : > { %3837 = vmatmul.msk.bf16.gmra.mxu3 %vm1898_vm8, %v1871_v48  ;;  %v1748_v48 = vpop.f32.mrf.mxu2  ;;  %v5742_v61 = vmax.f32 %v1971_v46, %v2069_v31 }
 0x768   : > { %v1749_v46 = vadd.f32 %v5624_v16, %v1748_v48 }
 0x769   : > { %7261 = vst [vmem:[#allocation20_spill] sm:$0xff] %v5742_v61  ;;  %v5754_v23 = vsel %vm754_vm5, %v5742_v61, -inf }
 0x76a   : > { %v5687_v27 = vpop.f32.mrf.mxu3  ;;  %7263 = vst [vmem:[#allocation22_spill] sm:$0xff] %v5754_v23 }
 0x76b   : > { %v1974_v24 = vadd.f32 %v5710_v14, %v5687_v27 }
 0x76d   : > { %v2070_v25 = vmul.f32 0.01, %v1974_v24 }
 0x76f   : > { %v1750_v37 = vpop.f32.mrf.mxu2  ;;  %v5764_v58 = vmax.f32 %v1974_v24, %v2070_v25 }
 0x771   : > { %7265 = vst [vmem:[#allocation24_spill] sm:$0xff] %v5764_v58 }
 0x772   : > { %v5693_v44 = vpop.f32.mrf.mxu3 }
 0x777   : > { %3838 = vmatmul.msk.bf16.gmra.mxu3 %vm1898_vm8, %v1872_v47  ;;  %v1753_v62 = vpop.f32.mrf.mxu2 }
 0x77a   : > { %v5697_v8 = vpop.f32.mrf.mxu3 }
 0x782   : > { %v5700_v42 = vpop.f32.mrf.mxu3 }
 0x787   : > { %3839 = vmatmul.msk.bf16.gmra.mxu3 %vm1898_vm8, %v1873_v9  ;;  %v5733_v9 = vsel %vm754_vm5, %v5724_v30, -inf }
 0x78a   : > { %v5707_v10 = vpop.f32.mrf.mxu3 }
 0x792   : > { %v5712_v5 = vpop.f32.mrf.mxu3 }
 0x797   : > { %3840 = vmatmul.msk.bf16.gmra.mxu3 %vm1898_vm8, %v1874_v34 }
 0x79a   : > { %v1988_v7 = vpop.f32.mrf.mxu3 }
 0x79b   : > { %v1989_v47 = vadd.f32 %v5710_v14, %v1988_v7  ;;  %v1751_v7 = vadd.f32 %v5624_v16, %v1750_v37  ;;  %v1976_v37 = vadd.f32 %v5710_v14, %v5693_v44  ;;  %v5780_v44 = vpop.f32.mrf.mxu0 }
 0x79d   : > { %v2076_v53 = vmul.f32 0.01, %v1989_v47  ;;  %v1807_v51 = vmul.f32 0.01, %v1751_v7  ;;  %v2071_v27 = vmul.f32 0.01, %v1976_v37 }
 0x79f   : > { %v5729_v60 = vmax.f32 %v1989_v47, %v2076_v53 }
 0x7a1   : > { %7260 = vst [vmem:[#allocation19_spill] sm:$0xff] %v5729_v60  ;;  %v5737_v55 = vsel %vm754_vm5, %v5729_v60, -inf }
 0x7a2   : > { %v1990_v40 = vpop.f32.mrf.mxu3 }
 0x7a3   : > { %v1991_v17 = vadd.f32 %v5710_v14, %v1990_v40  ;;  %v1806_v40 = vmul.f32 0.01, %v1749_v46 }
 0x7a5   : > { %v2077_v34 = vmul.f32 0.01, %v1991_v17 }
 0x7a7   : > { %v5746_v49 = vmax.f32 %v1991_v17, %v2077_v34  ;;  %3841 = vmatmul.msk.bf16.gmra.mxu3 %vm1898_vm8, %v1875_v13  ;;  %v1755_v17 = vpop.f32.mrf.mxu2  ;;  %v1847_v13 = vmax.f32 %v1751_v7, %v1807_v51  ;;  %v5772_v34 = vsel %vm754_vm5, %v5764_v58, -inf  ;;  %v5783_v7 = vmax.f32 %v1976_v37, %v2071_v27 }
 0x7a8   : > { %v1979_v51 = vadd.f32 %v5710_v14, %v5697_v8  ;;  %v1756_v24 = vadd.f32 %v5624_v16, %v1755_v17 }
 0x7a9   : > { %7262 = vst [vmem:[#allocation21_spill] sm:$0xff] %v5746_v49  ;;  %v5758_v47 = vsel %vm754_vm5, %v5746_v49, -inf  ;;  %v5793_v49 = vsel %vm754_vm5, %v5783_v7, -inf }
 0x7aa   : > { %7264 = vst [vmem:[#allocation23_spill] sm:$0xff] %v5758_v47  ;;  %v1993_v22 = vpop.f32.mrf.mxu3  ;;  %v1809_v17 = vmul.f32 0.01, %v1756_v24 }
 0x7ab   : > { %v1994_v53 = vadd.f32 %v5710_v14, %v1993_v22  ;;  %v1846_v22 = vmax.f32 %v1749_v46, %v1806_v40  ;;  %7267 = vst [vmem:[#allocation26_spill] sm:$0xff] %v5783_v7  ;;  %v2072_v46 = vmul.f32 0.01, %v1979_v51 }
 0x7ac   : > { %7269 = vst [vmem:[#allocation28_spill] sm:$0xff] %v5793_v49  ;;  %v1849_v7 = vmax.f32 %v1756_v24, %v1809_v17 }
 0x7ad   : > { %v2078_v31 = vmul.f32 0.01, %v1994_v53 }
 0x7af   : > { %v5768_v29 = vmax.f32 %v1994_v53, %v2078_v31  ;;  %v1876_v31 = vpack.c.bf16 %v1847_v13, %v1846_v22  ;;  %v5803_v13 = vpop.f32.mrf.mxu0  ;;  %v1981_v22 = vadd.f32 %v5710_v14, %v5700_v42  ;;  %v4085_v42 = vld [vmem:[%s7149_s9 + $0x50] sm:$0xff] }
 0x7b0   : > { %2963 = vmatpush.bf16.msrb.mxu1 %v4085_v42 }
 0x7b1   : > { %7266 = vst [vmem:[#allocation25_spill] sm:$0xff] %v5768_v29  ;;  %v5776_v48 = vsel %vm754_vm5, %v5768_v29, -inf  ;;  %v1758_v29 = vpop.f32.mrf.mxu2 }
 0x7b2   : > { %v1995_v25 = vpop.f32.mrf.mxu3 }
 0x7b3   : > { %v1996_v53 = vadd.f32 %v5710_v14, %v1995_v25  ;;  %v5805_v25 = vmax.f32 %v1979_v51, %v2072_v46 }
 0x7b5   : > { %v2079_v20 = vmul.f32 0.01, %v1996_v53  ;;  %7271 = vst [vmem:[#allocation30_spill] sm:$0xff] %v5805_v25  ;;  %v5813_v8 = vsel %vm754_vm5, %v5805_v25, -inf }
 0x7b7   : > { %v5787_v58 = vmax.f32 %v1996_v53, %v2079_v20  ;;  %3842 = vmatmul.msk.bf16.gmra.mxu3 %vm1898_vm8, %v1876_v31  ;;  %v1754_v20 = vadd.f32 %v5624_v16, %v1753_v62  ;;  %v2073_v62 = vmul.f32 0.01, %v1981_v22 }
 0x7b9   : > { %7268 = vst [vmem:[#allocation27_spill] sm:$0xff] %v5787_v58  ;;  %v5797_v27 = vsel %vm754_vm5, %v5787_v58, -inf  ;;  %v1808_v31 = vmul.f32 0.01, %v1754_v20  ;;  %v1760_v61 = vpop.f32.mrf.mxu2 }
 0x7ba   : > { %7270 = vst [vmem:[#allocation29_spill] sm:$0xff] %v5797_v27  ;;  %v1998_v37 = vpop.f32.mrf.mxu3  ;;  %v5829_v27 = vpop.f32.mrf.mxu0  ;;  %v1761_v51 = vadd.f32 %v5624_v16, %v1760_v61 }
 0x7bb   : > { %v1999_v40 = vadd.f32 %v5710_v14, %v1998_v37 }
 0x7bc   : > { %v1811_v42 = vmul.f32 0.01, %v1761_v51 }
 0x7bd   : > { %v2080_v53 = vmul.f32 0.01, %v1999_v40 }
 0x7be   : > { %v1851_v60 = vmax.f32 %v1761_v51, %v1811_v42 }
 0x7bf   : > { %v5809_v58 = vmax.f32 %v1999_v40, %v2080_v53  ;;  %v1848_v40 = vmax.f32 %v1754_v20, %v1808_v31  ;;  %v5825_v53 = vmax.f32 %v1981_v22, %v2073_v62 }
 0x7c1   : > { %7272 = vst [vmem:[#allocation31_spill] sm:$0xff] %v5809_v58  ;;  %v5817_v37 = vsel %vm754_vm5, %v5809_v58, -inf  ;;  %v1877_v17 = vpack.c.bf16 %v1849_v7, %v1848_v40  ;;  %v1984_v58 = vadd.f32 %v5710_v14, %v5707_v10  ;;  %v5837_v20 = vsel %vm754_vm5, %v5825_v53, -inf }
 0x7c2   : > { %v2000_v46 = vpop.f32.mrf.mxu3  ;;  %7273 = vst [vmem:[#allocation32_spill] sm:$0xff] %v5825_v53  ;;  %v1986_v40 = vadd.f32 %v5710_v14, %v5712_v5 }
 0x7c3   : > { %v2001_v24 = vadd.f32 %v5710_v14, %v2000_v46  ;;  %7275 = vst [vmem:[#allocation34_spill] sm:$0xff] %v5837_v20  ;;  %v2074_v31 = vmul.f32 0.01, %v1984_v58  ;;  %v1763_v46 = vpop.f32.mrf.mxu2 }
 0x7c5   : > { %v2081_v25 = vmul.f32 0.01, %v2001_v24  ;;  %v5847_v61 = vmax.f32 %v1984_v58, %v2074_v31  ;;  %v4076_v31 = vld [vmem:[%s7149_s9 + $0x8] sm:$0xff] }
 0x7c6   : > { %2870 = vmatpush.bf16.msra.mxu3 %v4076_v31 }
 0x7c7   : > { %v5831_v49 = vmax.f32 %v2001_v24, %v2081_v25  ;;  %3843 = vmatmul.msk.bf16.gmra.mxu3 %vm1898_vm8, %v1877_v17  ;;  %v1759_v25 = vadd.f32 %v5624_v16, %v1758_v29  ;;  %7277 = vst [vmem:[#allocation36_spill] sm:$0xff] %v5847_v61  ;;  %v5851_v17 = vpop.f32.mrf.mxu0  ;;  %v5857_v10 = vsel %vm754_vm5, %v5847_v61, -inf  ;;  %v2075_v29 = vmul.f32 0.01, %v1986_v40 }
 0x7c9   : > { %7274 = vst [vmem:[#allocation33_spill] sm:$0xff] %v5831_v49  ;;  %v5841_v7 = vsel %vm754_vm5, %v5831_v49, -inf  ;;  %v1810_v49 = vmul.f32 0.01, %v1759_v25 }
 0x7ca   : > { %7276 = vst [vmem:[#allocation35_spill] sm:$0xff] %v5841_v7  ;;  %v2003_v22 = vpop.f32.mrf.mxu3 }
 0x7cb   : > { %v2004_v62 = vadd.f32 %v5710_v14, %v2003_v22  ;;  %v1765_v7 = vpop.f32.mrf.mxu2 }
 0x7cc   : > { %v1766_v58 = vadd.f32 %v5624_v16, %v1765_v7 }
 0x7cd   : > { %v2082_v24 = vmul.f32 0.01, %v2004_v62 }
 0x7cf   : > { %v5853_v53 = vmax.f32 %v2004_v62, %v2082_v24  ;;  %v1850_v62 = vmax.f32 %v1759_v25, %v1810_v49  ;;  %v5869_v24 = vmax.f32 %v1986_v40, %v2075_v29  ;;  %v1813_v29 = vmul.f32 0.01, %v1766_v58 }
 0x7d1   : > { %7278 = vst [vmem:[#allocation37_spill] sm:$0xff] %v5853_v53  ;;  %v5861_v22 = vsel %vm754_vm5, %v5853_v53, -inf  ;;  %v1878_v42 = vpack.c.bf16 %v1851_v60, %v1850_v62  ;;  %v5874_v53 = vpop.f32.mrf.mxu0  ;;  %v5879_v30 = vsel %vm754_vm5, %v5869_v24, -inf }
 0x7d2   : > { %v2005_v5 = vpop.f32.mrf.mxu3  ;;  %7279 = vst [vmem:[#allocation38_spill] sm:$0xff] %v5869_v24 }
 0x7d3   : > { %v2006_v51 = vadd.f32 %v5710_v14, %v2005_v5  ;;  %7281 = vst [vmem:[#allocation40_spill] sm:$0xff] %v5879_v30 }
 0x7d5   : > { %v2083_v61 = vmul.f32 0.01, %v2006_v51 }
 0x7d7   : > { %v5871_v20 = vmax.f32 %v2006_v51, %v2083_v61  ;;  %3844 = vmatmul.msk.bf16.gmra.mxu3 %vm1898_vm8, %v1878_v42  ;;  %v1764_v61 = vadd.f32 %v5624_v16, %v1763_v46  ;;  %v1853_v51 = vmax.f32 %v1766_v58, %v1813_v29  ;;  %v4080_v46 = vld [vmem:[%s7149_s9 + $0x28] sm:$0xff]  ;;  %v1771_v58 = vadd.f32 %v5624_v16, %v5670_v38 }
 0x7d8   : > { %2805 = vmatpush.bf16.msrb.mxu2 %v4080_v46  ;;  %v7286_v38 = vmax.f32 %v5772_v34, %v5776_v48  ;;  %v7289_v48 = vmax.f32 %v5813_v8, %v5817_v37  ;;  %v7292_v8 = vmax.f32 %v5857_v10, %v5861_v22 }
 0x7d9   : > { %7280 = vst [vmem:[#allocation39_spill] sm:$0xff] %v5871_v20  ;;  %v5883_v49 = vsel %vm754_vm5, %v5871_v20, -inf  ;;  %v1812_v31 = vmul.f32 0.01, %v1764_v61  ;;  %v5891_v62 = vpop.f32.mrf.mxu0  ;;  %v7284_v20 = vmax.f32 %v5733_v9, %v5737_v55  ;;  %v1769_v9 = vadd.f32 %v5624_v16, %v5666_v4 }
 0x7da   : > { %7282 = vst [vmem:[#allocation41_spill] sm:$0xff] %v5883_v49  ;;  %v2008_v25 = vpop.f32.mrf.mxu3 }
 0x7db   : > { %v2009_v40 = vadd.f32 %v5710_v14, %v2008_v25  ;;  %v1852_v25 = vmax.f32 %v1764_v61, %v1812_v31  ;;  %v1814_v49 = vmul.f32 0.01, %v1769_v9 }
 0x7dd   : > { %v2084_v5 = vmul.f32 0.01, %v2009_v40 }
 0x7df   : > { %v5889_v7 = vmax.f32 %v2009_v40, %v2084_v5  ;;  %v1879_v40 = vpack.c.bf16 %v1853_v51, %v1852_v25  ;;  %v1854_v25 = vmax.f32 %v1769_v9, %v1814_v49 }
 0x7e1   : > { %7283 = vst [vmem:[#allocation42_spill] sm:$0xff] %v5889_v7  ;;  %v2437_v42 = vsel %vm754_vm5, %v5889_v7, -inf  ;;  %v5908_v5 = vpop.f32.mrf.mxu0 }
 0x7e2   : > { %v5898_v60 = vmax.f32 %v7284_v20, %v2437_v42  ;;  %v5900_v24 = vpop.f32.mrf.mxu3  ;;  %v1815_v20 = vmul.f32 0.01, %v1771_v58 }
 0x7e4   : > { %v1855_v61 = vmax.f32 %v1771_v58, %v1815_v20 }
 0x7e6   : > { %v1880_v4 = vpack.c.bf16 %v1855_v61, %v1854_v25 }
 0x7e7   : > { %3845 = vmatmul.msk.bf16.gmra.mxu3 %vm1898_vm8, %v1879_v40 }
 0x7e9   : > { %v5924_v16 = vpop.f32.mrf.mxu0 }
 0x7ea   : > { %v2013_v29 = vpop.f32.mrf.mxu3 }
 0x7eb   : > { %v2014_v55 = vadd.f32 %v5710_v14, %v2013_v29 }
 0x7ed   : > { %v2086_v42 = vmul.f32 0.01, %v2014_v55 }
 0x7ef   : > { %v5913_v30 = vmax.f32 %v2014_v55, %v2086_v42 }
 0x7f1   : > { %7285 = vst [vmem:[#allocation43_spill] sm:$0xff] %v5913_v30  ;;  %v2455_v31 = vsel %vm754_vm5, %v5913_v30, -inf  ;;  %v5928_v55 = vpop.f32.mrf.mxu0 }
 0x7f2   : > { %v5920_v51 = vmax.f32 %v7286_v38, %v2455_v31  ;;  %v5922_v46 = vpop.f32.mrf.mxu3 }
 0x7f4   : > { %7287 = vst [vmem:[#allocation44_spill] sm:$0xff] %v5920_v51 }
 0x7f7   : > { %3846 = vmatmul.msk.bf16.gmra.mxu3 %vm1898_vm8, %v1880_v4 }
 0x7f9   : > { %v5943_v42 = vpop.f32.mrf.mxu0 }
 0x7fa   : > { %v2018_v40 = vpop.f32.mrf.mxu3 }
 0x7fb   : > { %v2019_v29 = vadd.f32 %v5710_v14, %v2018_v40 }
 0x7fd   : > { %v2088_v58 = vmul.f32 0.01, %v2019_v29 }
 0x7ff   : > { %v5930_v20 = vmax.f32 %v2019_v29, %v2088_v58 }
 0x801   : > { %7288 = vst [vmem:[#allocation45_spill] sm:$0xff] %v5930_v20  ;;  %v2473_v34 = vsel %vm754_vm5, %v5930_v20, -inf  ;;  %v5960_v29 = vpop.f32.mrf.mxu0 }
 0x802   : > { %v5937_v49 = vmax.f32 %v7289_v48, %v2473_v34  ;;  %v5939_v9 = vpop.f32.mrf.mxu3 }
 0x804   : > { %7290 = vst [vmem:[#allocation46_spill] sm:$0xff] %v5937_v49 }
 0x807   : > { %3847 = vmatmul.msk.bf16.gmra.mxu3 %vm1898_vm8, %v5682_v33  ;;  %v4084_v33 = vld [vmem:[%s7149_s9 + $0x48] sm:$0xff] }
 0x808   : > { %2964 = vmatpush.bf16.msrb.mxu1 %v4084_v33 }
 0x809   : > { %v5962_v34 = vpop.f32.mrf.mxu0 }
 0x80a   : > { %v2023_v61 = vpop.f32.mrf.mxu3 }
 0x80b   : > { %v2024_v31 = vadd.f32 %v5710_v14, %v2023_v61 }
 0x80d   : > { %v2090_v38 = vmul.f32 0.01, %v2024_v31 }
 0x80f   : > { %v5946_v25 = vmax.f32 %v2024_v31, %v2090_v38 }
 0x811   : > { %7291 = vst [vmem:[#allocation47_spill] sm:$0xff] %v5946_v25  ;;  %v2491_v4 = vsel %vm754_vm5, %v5946_v25, -inf }
 0x812   : > { %v5953_v37 = vmax.f32 %v7292_v8, %v2491_v4  ;;  %v5955_v40 = vpop.f32.mrf.mxu3  ;;  %v4075_v4 = vld [vmem:[%s7149_s9] sm:$0xff]  ;;  %v5978_v8 = vpop.f32.mrf.mxu0 }
 0x813   : > { %2871 = vmatpush.bf16.msra.mxu3 %v4075_v4  ;;  %7295 = vst [vmem:[#allocation50_spill] sm:$0xff] %v5978_v8 }
 0x81a   : > { %v2028_v58 = vpop.f32.mrf.mxu3 }
 0x81b   : > { %v2029_v48 = vadd.f32 %v5710_v14, %v2028_v58  ;;  %v4079_v58 = vld [vmem:[%s7149_s9 + $0x20] sm:$0xff] }
 0x81c   : > { %2806 = vmatpush.bf16.msrb.mxu2 %v4079_v58 }
 0x81d   : > { %v2092_v61 = vmul.f32 0.01, %v2029_v48 }
 0x81f   : > { %v5965_v31 = vmax.f32 %v2029_v48, %v2092_v61  ;;  %v5984_v61 = vpop.f32.mrf.mxu0 }
 0x821   : > { %7293 = vst [vmem:[#allocation48_spill] sm:$0xff] %v5965_v31  ;;  %v5969_v10 = vsel %vm754_vm5, %v5965_v31, -inf  ;;  %v4196_v31 = vld [vmem:[#allocation10] ss:$0 sm:$0xff] }
 0x822   : > { %7294 = vst [vmem:[#allocation49_spill] sm:$0xff] %v5969_v10  ;;  %v5973_v38 = vpop.f32.mrf.mxu3  ;;  %v6000_v58 = vadd.f32 %v4196_v31, %v5343_v52  ;;  %v6012_v4 = vadd.f32 %v4196_v31, %v5392_v59  ;;  %v6094_v47 = vadd.f32 %v4196_v31, %v5465_v45 }
 0x824   : > { %7314 = vst [vmem:[#allocation69_spill] sm:$0xff] %v6094_v47 }
 0x827   : > { %v5996_v30 = vpop.f32.mrf.mxu0 }
 0x82a   : > { %v2033_v33 = vpop.f32.mrf.mxu3 }
 0x82b   : > { %v2034_v48 = vadd.f32 %v5710_v14, %v2033_v33 }
 0x82d   : > { %v2094_v22 = vmul.f32 0.01, %v2034_v48 }
 0x82f   : > { %v5986_v25 = vmax.f32 %v2034_v48, %v2094_v22  ;;  %v6003_v22 = vadd.f32 %v4196_v31, %v5360_v54  ;;  %v6006_v48 = vadd.f32 %v4196_v31, %v5375_v19  ;;  %v6024_v54 = vadd.f32 %v5497_v12, %v6000_v58  ;;  %v6046_v12 = vpop.f32.mrf.mxu0 }
 0x831   : > { %7296 = vst [vmem:[#allocation51_spill] sm:$0xff] %v5986_v25  ;;  %v5990_v20 = vsel %vm754_vm5, %v5986_v25, -inf  ;;  %v6009_v25 = vadd.f32 %v4196_v31, %v5380_v32  ;;  %v6028_v19 = vadd.f32 %v5512_v15, %v6003_v22  ;;  %v6032_v32 = vadd.f32 %v5523_v21, %v6006_v48 }
 0x832   : > { %7297 = vst [vmem:[#allocation52_spill] sm:$0xff] %v5990_v20  ;;  %v5994_v8 = vpop.f32.mrf.mxu3  ;;  %v6015_v20 = vadd.f32 %v4196_v31, %v5402_v11  ;;  %v6040_v11 = vadd.f32 %v5538_v56, %v6012_v4  ;;  %v6061_v56 = vmul.f32 0.01, %v6024_v54  ;;  %v6084_v49 = vadd.f32 %v5592_v57, %v6003_v22 }
 0x833   : > { %7298 = vst [vmem:[#allocation53_spill] sm:$0xff] %v5994_v8  ;;  %v6036_v59 = vadd.f32 %v5530_v2, %v6009_v25  ;;  %v6102_v57 = vadd.f32 %v5604_v18, %v6009_v25  ;;  %v6145_v45 = vadd.f32 %v5727_v63, %v6003_v22 }
 0x834   : > { %7301 = vst [vmem:[#allocation56_spill] sm:$0xff] %v6032_v32  ;;  %v6073_v21 = vmul.f32 0.01, %v6040_v11 }
 0x835   : > { %7302 = vst [vmem:[#allocation57_spill] sm:$0xff] %v6036_v59 }
 0x836   : > { %7303 = vst [vmem:[#allocation58_spill] sm:$0xff] %v6040_v11  ;;  %v6137_v11 = vmul.f32 0.01, %v6102_v57 }
 0x837   : > { %7310 = vst [vmem:[#allocation65_spill] sm:$0xff] %v6073_v21 }
 0x838   : > { %7315 = vst [vmem:[#allocation70_spill] sm:$0xff] %v6102_v57 }
 0x839   : > { %7320 = vst [vmem:[#allocation75_spill] sm:$0xff] %v6137_v11  ;;  %v6217_v11 = vadd.f32 %v5908_v5, %v6003_v22  ;;  %v6236_v5 = vadd.f32 %v5626_v1, %v6094_v47 }
 0x83a   : > { %v2038_v7 = vpop.f32.mrf.mxu3 }
 0x83b   : > { %v2039_v33 = vadd.f32 %v5710_v14, %v2038_v7  ;;  %v6018_v7 = vadd.f32 %v4196_v31, %v5446_v41  ;;  %v6044_v41 = vadd.f32 %v5544_v28, %v6015_v20  ;;  %v6064_v28 = vmul.f32 0.01, %v6028_v19  ;;  %7330 = vst [vmem:[#allocation85_spill] sm:$0xff] %v6217_v11 }
 0x83c   : > { %v6129_v31 = vadd.f32 %v5616_v50, %v6015_v20  ;;  %v6149_v50 = vadd.f32 %v5749_v36, %v6006_v48  ;;  %7333 = vst [vmem:[#allocation88_spill] sm:$0xff] %v6236_v5 }
 0x83d   : > { %v2096_v51 = vmul.f32 0.01, %v2039_v33  ;;  %7299 = vst [vmem:[#allocation54_spill] sm:$0xff] %v6018_v7  ;;  %v6058_v2 = vadd.f32 %v5558_v35, %v6018_v7  ;;  %v6080_v35 = vadd.f32 %v5585_v26, %v6000_v58  ;;  %v6116_v26 = vmul.f32 0.01, %v6084_v49 }
 0x83e   : > { %7304 = vst [vmem:[#allocation59_spill] sm:$0xff] %v6044_v41 }
 0x83f   : > { %v6020_v52 = vmax.f32 %v2039_v33, %v2096_v51  ;;  %7307 = vst [vmem:[#allocation62_spill] sm:$0xff] %v6058_v2  ;;  %v6067_v33 = vmul.f32 0.01, %v6032_v32  ;;  %v6091_v8 = vmul.f32 0.01, %v6058_v2  ;;  %v6213_v32 = vadd.f32 %v5891_v62, %v6000_v58 }
 0x840   : > { %v6113_v23 = vmul.f32 0.01, %v6080_v35  ;;  %7318 = vst [vmem:[#allocation73_spill] sm:$0xff] %v6129_v31  ;;  %v6232_v62 = vadd.f32 %v5924_v16, %v6006_v48  ;;  %v6265_v16 = vadd.f32 %v5943_v42, %v6012_v4  ;;  %v6284_v42 = vadd.f32 %v5996_v30, %v6003_v22 }
 0x841   : > { %7300 = vst [vmem:[#allocation55_spill] sm:$0xff] %v6020_v52  ;;  %v6050_v15 = vsel %vm754_vm5, %v6020_v52, -inf  ;;  %v6070_v52 = vmul.f32 0.01, %v6036_v59  ;;  %v6193_v59 = vmul.f32 0.01, %v6149_v50 }
 0x842   : > { %7305 = vst [vmem:[#allocation60_spill] sm:$0xff] %v6050_v15  ;;  %v6054_v51 = vpop.f32.mrf.mxu3  ;;  %v6076_v15 = vmul.f32 0.01, %v6044_v41  ;;  %v2301_v41 = vpop.f32.mrf.mxu0  ;;  %v6254_v57 = vmul.f32 0.01, %v6213_v32 }
 0x843   : > { %7306 = vst [vmem:[#allocation61_spill] sm:$0xff] %v6054_v51  ;;  %v6088_v51 = vadd.f32 %v5600_v0, %v6006_v48  ;;  %v6123_v0 = vadd.f32 %v5612_v3, %v6012_v4  ;;  %v6141_v3 = vadd.f32 %v5714_v43, %v6000_v58  ;;  %v6161_v43 = vadd.f32 %v5803_v13, %v6012_v4 }
 0x844   : > { %7308 = vst [vmem:[#allocation63_spill] sm:$0xff] %v6067_v33  ;;  %v6180_v13 = vadd.f32 %v5829_v27, %v6015_v20 }
 0x845   : > { %7309 = vst [vmem:[#allocation64_spill] sm:$0xff] %v6070_v52  ;;  %v6119_v18 = vmul.f32 0.01, %v6088_v51  ;;  %v6187_v2 = vmul.f32 0.01, %v6141_v3 }
 0x846   : > { %7311 = vst [vmem:[#allocation66_spill] sm:$0xff] %v6076_v15  ;;  %v6133_v15 = vadd.f32 %v5620_v39, %v6018_v7  ;;  %v6153_v39 = vadd.f32 %v5568_v6, %v6094_v47  ;;  %v6170_v6 = vmul.f32 0.01, %v6123_v0  ;;  %v6190_v52 = vmul.f32 0.01, %v6145_v45 }
 0x847   : > { %7312 = vst [vmem:[#allocation67_spill] sm:$0xff] %v6088_v51  ;;  %v6199_v27 = vmul.f32 0.01, %v6161_v43  ;;  %v6228_v36 = vmul.f32 0.01, %v6180_v13  ;;  %v2011_v51 = vadd.f32 %v5710_v14, %v5900_v24  ;;  %v6261_v24 = vadd.f32 %v5928_v55, %v6009_v25 }
 0x848   : > { %7313 = vst [vmem:[#allocation68_spill] sm:$0xff] %v6091_v8  ;;  %v6280_v55 = vadd.f32 %v5984_v61, %v6000_v58  ;;  %v2031_v61 = vadd.f32 %v5710_v14, %v5973_v38  ;;  %v6321_v58 = vmul.f32 0.01, %v6284_v42 }
 0x849   : > { %7316 = vst [vmem:[#allocation71_spill] sm:$0xff] %v6119_v18  ;;  %v6257_v18 = vmul.f32 0.01, %v6217_v11  ;;  %v6306_v22 = vmul.f32 0.01, %v6261_v24 }
 0x84a   : > { %7317 = vst [vmem:[#allocation72_spill] sm:$0xff] %v6123_v0  ;;  %v2043_v10 = vpop.f32.mrf.mxu3  ;;  %v2304_v5 = vpop.f32.mrf.mxu0 }
 0x84b   : > { %7319 = vst [vmem:[#allocation74_spill] sm:$0xff] %v6133_v15  ;;  %v2044_v21 = vadd.f32 %v5710_v14, %v2043_v10  ;;  %v6157_v10 = vadd.f32 %v5780_v44, %v6009_v25  ;;  %v6173_v44 = vmul.f32 0.01, %v6129_v31 }
 0x84c   : > { %7321 = vst [vmem:[#allocation76_spill] sm:$0xff] %v6153_v39  ;;  %v6176_v39 = vmul.f32 0.01, %v6133_v15  ;;  %v6288_v15 = vadd.f32 %v6046_v12, %v6006_v48  ;;  %v6309_v48 = vmul.f32 0.01, %v6265_v16 }
 0x84d   : > { %7322 = vst [vmem:[#allocation77_spill] sm:$0xff] %v6161_v43  ;;  %v2098_v8 = vmul.f32 0.01, %v2044_v21  ;;  %v6196_v33 = vmul.f32 0.01, %v6157_v10  ;;  %v2016_v43 = vadd.f32 %v5710_v14, %v5922_v46  ;;  %v6297_v46 = vadd.f32 %v2301_v41, %v6009_v25 }
 0x84e   : > { %7323 = vst [vmem:[#allocation78_spill] sm:$0xff] %v6170_v6  ;;  %v6324_v30 = vmul.f32 0.01, %v6288_v15  ;;  %v2021_v25 = vadd.f32 %v5710_v14, %v5939_v9  ;;  %v6346_v9 = vadd.f32 %v5962_v34, %v6018_v7 }
 0x84f   : > { %7324 = vst [vmem:[#allocation79_spill] sm:$0xff] %v6173_v44  ;;  %v6182_v63 = vmax.f32 %v2044_v21, %v2098_v8  ;;  %v6203_v8 = vadd.f32 %v5851_v17, %v6018_v7  ;;  %v2087_v38 = vmul.f32 0.01, %v2016_v43  ;;  %v7383_v44 = vld [vmem:[#allocation51_spill] sm:$0xff] }
 0x850   : > { %7325 = vst [vmem:[#allocation80_spill] sm:$0xff] %v6176_v39  ;;  %v6270_v39 = vmul.f32 0.01, %v6232_v62 }
 0x851   : > { %7326 = vst [vmem:[#allocation81_spill] sm:$0xff] %v6180_v13  ;;  %v6207_v21 = vsel %vm754_vm5, %v6182_v63, -inf  ;;  %v6251_v1 = vmul.f32 0.01, %v6203_v8  ;;  %v6294_v13 = vadd.f32 %v5874_v53, %v6094_v47  ;;  %v6348_v11 = vmax.f32 %v2016_v43, %v2087_v38 }
 0x852   : > { %7327 = vst [vmem:[#allocation82_spill] sm:$0xff] %v6199_v27  ;;  %v6221_v17 = vpop.f32.mrf.mxu3  ;;  %v6274_v27 = vadd.f32 %v5960_v29, %v6015_v20  ;;  %v6318_v29 = vmul.f32 0.01, %v6280_v55 }
 0x853   : > { %7328 = vst [vmem:[#allocation83_spill] sm:$0xff] %v6203_v8 }
 0x854   : > { %7329 = vst [vmem:[#allocation84_spill] sm:$0xff] %v6213_v32  ;;  %v6314_v41 = vmul.f32 0.01, %v6274_v27 }
 0x855   : > { %7331 = vst [vmem:[#allocation86_spill] sm:$0xff] %v6228_v36  ;;  %v2085_v36 = vmul.f32 0.01, %v2011_v51 }
 0x856   : > { %7332 = vst [vmem:[#allocation87_spill] sm:$0xff] %v6232_v62  ;;  %v6338_v62 = vadd.f32 %v2304_v5, %v6012_v4  ;;  %v7353_v4 = vld [vmem:[#allocation49_spill] sm:$0xff] }
 0x857   : > { %7334 = vst [vmem:[#allocation89_spill] sm:$0xff] %v6251_v1  ;;  %v6326_v47 = vmax.f32 %v2011_v51, %v2085_v36  ;;  %v2093_v1 = vmul.f32 0.01, %v2031_v61  ;;  %v2026_v51 = vadd.f32 %v5710_v14, %v5955_v40  ;;  %v2089_v36 = vmul.f32 0.01, %v2021_v25 }
 0x858   : > { %7335 = vst [vmem:[#allocation90_spill] sm:$0xff] %v6254_v57  ;;  %v7354_v40 = vmax.f32 %v5898_v60, %v7353_v4  ;;  %v7362_v4 = vld [vmem:[#allocation48_spill] sm:$0xff] }
 0x859   : > { %7336 = vst [vmem:[#allocation91_spill] sm:$0xff] %v6257_v18  ;;  %v2306_v18 = vpop.f32.mrf.mxu0  ;;  %v2446_v5 = vsel %vm754_vm5, %v6326_v47, -inf  ;;  %v2133_v7 = vmax.f32 %v2031_v61, %v2093_v1  ;;  %v2464_v1 = vsel %vm754_vm5, %v6348_v11, -inf  ;;  %v7358_v61 = vld [vmem:[#allocation53_spill] sm:$0xff] }
 0x85a   : > { %7337 = vst [vmem:[#allocation92_spill] sm:$0xff] %v6261_v24  ;;  %v2048_v53 = vpop.f32.mrf.mxu3  ;;  %v6365_v38 = vadd.f32 %v2306_v18, %v6015_v20  ;;  %v7359_v20 = vld [vmem:[#allocation18_spill] sm:$0xff] }
 0x85b   : > { %7338 = vst [vmem:[#allocation93_spill] sm:$0xff] %v6265_v16  ;;  %v2049_v12 = vadd.f32 %v5710_v14, %v2048_v53  ;;  %v2036_v16 = vadd.f32 %v5710_v14, %v7358_v61 }
 0x85c   : > { %7339 = vst [vmem:[#allocation94_spill] sm:$0xff] %v6270_v39 }
 0x85d   : > { %7340 = vst [vmem:[#allocation95_spill] sm:$0xff] %v6274_v27  ;;  %v2100_v8 = vmul.f32 0.01, %v2049_v12  ;;  %v7355_v27 = vld [vmem:[#allocation22_spill] sm:$0xff] }
 0x85e   : > { %7341 = vst [vmem:[#allocation96_spill] sm:$0xff] %v6288_v15  ;;  %v7361_v15 = vld [vmem:[#allocation42_spill] sm:$0xff] }
 0x85f   : > { %7342 = vst [vmem:[#allocation97_spill] sm:$0xff] %v6294_v13  ;;  %v6329_v13 = vmul.f32 0.01, %v6297_v46  ;;  %v2140_v53 = vmax.f32 %v2049_v12, %v2100_v8  ;;  %v6362_v8 = vmul.f32 0.01, %v6338_v62 }
 0x860   : > { %7343 = vst [vmem:[#allocation98_spill] sm:$0xff] %v6297_v46  ;;  %v2091_v12 = vmul.f32 0.01, %v2026_v51  ;;  %v7360_v46 = vld [vmem:[#allocation19_spill] sm:$0xff] }
 0x861   : > { %7344 = vst [vmem:[#allocation99_spill] sm:$0xff] %v6306_v22  ;;  %v2441_v43 = vsel %vm754_vm5, %v2140_v53, -inf }
 0x862   : > { %7345 = vst [vmem:[#allocation100_spill] sm:$0xff] %v6309_v48  ;;  %v2442_v39 = vmax.f32 %v7354_v40, %v2441_v43  ;;  %v6382_v43 = vmax.f32 %v2021_v25, %v2089_v36  ;;  %v2046_v36 = vadd.f32 %v5710_v14, %v6221_v17 }
 0x863   : > { %7346 = vst [vmem:[#allocation101_spill] sm:$0xff] %v6314_v41  ;;  %v2050_v41 = vpop.f32.mrf.mxu3 }
 0x864   : > { %7347 = vst [vmem:[#allocation102_spill] sm:$0xff] %v6324_v30  ;;  %v2506_v18 = vsub.f32 %v7359_v20, %v2442_v39  ;;  %v2514_v30 = vsub.f32 %v7360_v46, %v2442_v39  ;;  %v2522_v60 = vsub.f32 %v7361_v15, %v2442_v39  ;;  %v2530_v40 = vsub.f32 %v7362_v4, %v2442_v39 }
 0x865   : > { %7348 = vst [vmem:[#allocation103_spill] sm:$0xff] %v6329_v13  ;;  %v2051_v13 = vadd.f32 %v5710_v14, %v2050_v41  ;;  %v2095_v41 = vmul.f32 0.01, %v2036_v16  ;;  %v6390_v15 = vmul.f32 0.01, %v6365_v38 }
 0x866   : > { %7349 = vst [vmem:[#allocation104_spill] sm:$0xff] %v6338_v62  ;;  %v2546_v22 = vmul.f32 1.442695, %v2506_v18  ;;  %v2562_v61 = vmul.f32 1.442695, %v2514_v30  ;;  %v7363_v62 = vld [vmem:[#allocation61_spill] sm:$0xff] }
 0x867   : > { %7350 = vst [vmem:[#allocation105_spill] sm:$0xff] %v6346_v9  ;;  %v7356_v9 = vld [vmem:[#allocation23_spill] sm:$0xff]  ;;  %v2578_v24 = vmul.f32 1.442695, %v2522_v60  ;;  %v2041_v20 = vadd.f32 %v5710_v14, %v7363_v62  ;;  %v2594_v46 = vmul.f32 1.442695, %v2530_v40  ;;  %v6404_v17 = vmax.f32 %v2036_v16, %v2095_v41 }
 0x868   : > { %7351 = vst [vmem:[#allocation106_spill] sm:$0xff] %v6362_v8  ;;  %v7357_v48 = vmax.f32 %v7355_v27, %v7356_v9  ;;  %v2448_v27 = vsel %vm754_vm5, %v2133_v7, -inf  ;;  %v2101_v9 = vmul.f32 0.01, %v2051_v13  ;;  %4202 = vpow2.f32 %v2546_v22  ;;  %v7368_v40 = vld [vmem:[#allocation20_spill] sm:$0xff]  ;;  %v7371_v16 = vld [vmem:[#allocation35_spill] sm:$0xff] }
 0x869   : > { %7352 = vst [vmem:[#allocation107_spill] sm:$0xff] %v6365_v38  ;;  %4204 = vpow2.f32 %v2562_v61  ;;  %v2097_v22 = vmul.f32 0.01, %v2041_v20  ;;  %v2099_v4 = vmul.f32 0.01, %v2046_v36 }
 0x86a   : > { %v2447_v34 = vmax.f32 %v7357_v48, %v2446_v5  ;;  %v2538_v48 = vsub.f32 %v2140_v53, %v2442_v39  ;;  %v6385_v5 = vmax.f32 %v2026_v51, %v2091_v12  ;;  %v2141_v8 = vmax.f32 %v2051_v13, %v2101_v9  ;;  %7364 = vst [vmem:[#allocation49_spill] sm:$0xff] %v6390_v15  ;;  %v7365_v39 = vld [vmem:[#allocation28_spill] sm:$0xff]  ;;  %v7366_v53 = vld [vmem:[#allocation29_spill] sm:$0xff] }
 0x86b   : > { %v7367_v51 = vmax.f32 %v7365_v39, %v7366_v53  ;;  %v2482_v13 = vsel %vm754_vm5, %v6382_v43, -inf  ;;  %4206 = vpow2.f32 %v2578_v24  ;;  %v2053_v60 = vpop.f32.mrf.mxu3 }
 0x86c   : > { %v2449_v25 = vmax.f32 %v2447_v34, %v2448_v27  ;;  %v2610_v30 = vmul.f32 1.442695, %v2538_v48  ;;  %v2450_v18 = vsel %vm754_vm5, %v2141_v8, -inf  ;;  %v2500_v62 = vsel %vm754_vm5, %v6385_v5, -inf  ;;  %v7369_v48 = vld [vmem:[#allocation21_spill] sm:$0xff] }
 0x86d   : > { %v6397_v12 = vmax.f32 %v7367_v51, %v2464_v1  ;;  %4208 = vpow2.f32 %v2594_v46  ;;  %v2054_v1 = vadd.f32 %v5710_v14, %v2053_v60 }
 0x86e   : > { %v2451_v34 = vmax.f32 %v2449_v25, %v2450_v18  ;;  %4210 = vpow2.f32 %v2610_v30  ;;  %v6410_v24 = vpop.eup %4202  ;;  %v7370_v25 = vld [vmem:[#allocation34_spill] sm:$0xff] }
 0x86f   : > { %v2102_v51 = vmul.f32 0.01, %v2054_v1  ;;  %v7372_v41 = vmax.f32 %v7370_v25, %v7371_v16  ;;  %v6417_v15 = vpop.eup %4204  ;;  %v7377_v16 = vld [vmem:[#allocation44_spill] sm:$0xff] }
 0x870   : > { %v2507_v27 = vsub.f32 %v7368_v40, %v2451_v34  ;;  %v2515_v9 = vsub.f32 %v7369_v48, %v2451_v34  ;;  %v2523_v61 = vsub.f32 %v6326_v47, %v2451_v34  ;;  %v2531_v39 = vsub.f32 %v2133_v7, %v2451_v34  ;;  %v7373_v40 = vld [vmem:[#allocation40_spill] sm:$0xff]  ;;  %v7374_v48 = vld [vmem:[#allocation41_spill] sm:$0xff] }
 0x871   : > { %v2539_v53 = vsub.f32 %v2141_v8, %v2451_v34  ;;  %v6415_v18 = vmax.f32 %v7372_v41, %v2482_v13  ;;  %v7375_v57 = vmax.f32 %v7373_v40, %v7374_v48  ;;  %v2626_v7 = vsel %vm754_vm5, %v6410_v24, 0.0  ;;  %v4083_v13 = vld [vmem:[%s7149_s9 + $0x40] sm:$0xff]  ;;  %v6429_v34 = vpop.eup %4206  ;;  %v7378_v41 = vld [vmem:[#allocation52_spill] sm:$0xff] }
 0x872   : > { %v2548_v46 = vmul.f32 1.442695, %v2507_v27  ;;  %v2564_v60 = vmul.f32 1.442695, %v2515_v9  ;;  %v2580_v38 = vmul.f32 1.442695, %v2523_v61  ;;  %v2142_v30 = vmax.f32 %v2054_v1, %v2102_v51  ;;  %2965 = vmatpush.bf16.msrb.mxu1 %v4083_v13 }
 0x873   : > { %v6422_v47 = vmax.f32 %v7375_v57, %v2500_v62  ;;  %v2596_v8 = vmul.f32 1.442695, %v2531_v39  ;;  %v2466_v27 = vsel %vm754_vm5, %v6404_v17, -inf  ;;  %v2627_v9 = vsel %vm754_vm5, %v6417_v15, 0.0  ;;  %v6435_v62 = vpop.eup %4208  ;;  %v7382_v13 = vld [vmem:[#allocation43_spill] sm:$0xff] }
 0x874   : > { %4212 = vpow2.f32 %v2548_v46  ;;  %v2612_v57 = vmul.f32 1.442695, %v2539_v53  ;;  %7376 = vst [vmem:[#allocation22_spill] sm:$0xff] %v6435_v62  ;;  %v6437_v61 = vmax.f32 %v2041_v20, %v2097_v22  ;;  %v2628_v39 = vadd.f32 %v2627_v9, %v2626_v7  ;;  %v2055_v53 = vpop.f32.mrf.mxu3  ;;  %v4211_v48 = vpop.eup %4210 }
 0x875   : > { %4214 = vpow2.f32 %v2564_v60  ;;  %v2459_v1 = vsel %vm754_vm5, %v2142_v30, -inf  ;;  %v6440_v51 = vmax.f32 %v2046_v36, %v2099_v4  ;;  %v2629_v25 = vsel %vm754_vm5, %v6429_v34, 0.0  ;;  %v7380_v36 = vld [vmem:[#allocation24_spill] sm:$0xff]  ;;  %v7381_v60 = vld [vmem:[#allocation25_spill] sm:$0xff] }
 0x876   : > { %4216 = vpow2.f32 %v2580_v38  ;;  %v7379_v40 = vmax.f32 %v7377_v16, %v7378_v41  ;;  %v2630_v32 = vadd.f32 %v2629_v25, %v2628_v39  ;;  %v2631_v20 = vsel %vm754_vm5, %v6435_v62, 0.0 }
 0x877   : > { %4218 = vpow2.f32 %v2596_v8  ;;  %v2056_v22 = vadd.f32 %v5710_v14, %v2055_v53  ;;  %v6458_v39 = vsel %vm754_vm5, %v6437_v61, -inf  ;;  %v2633_v8 = vsel %vm754_vm5, %v4211_v48, 0.0 }
 0x878   : > { %v2460_v46 = vmax.f32 %v7379_v40, %v2459_v1  ;;  %4220 = vpow2.f32 %v2612_v57  ;;  %v2632_v9 = vadd.f32 %v2631_v20, %v2630_v32 }
 0x879   : > { %v2103_v41 = vmul.f32 0.01, %v2056_v22 }
 0x87a   : > { %v2508_v4 = vsub.f32 %v7380_v36, %v2460_v46  ;;  %v2516_v7 = vsub.f32 %v7381_v60, %v2460_v46  ;;  %v2524_v38 = vsub.f32 %v7382_v13, %v2460_v46  ;;  %v2532_v16 = vsub.f32 %v7383_v44, %v2460_v46  ;;  %v6454_v40 = vpop.eup %4212 }
 0x87b   : > { %v2540_v1 = vsub.f32 %v2142_v30, %v2460_v46  ;;  %v6461_v53 = vpop.eup %4214  ;;  %v6465_v36 = vsel %vm754_vm5, %v6440_v51, -inf  ;;  %v2634_v32 = vadd.f32 %v2633_v8, %v2632_v9  ;;  %v2635_v44 = vsel %vm754_vm5, %v6454_v40, 0.0 }
 0x87c   : > { %v2550_v57 = vmul.f32 1.442695, %v2508_v4  ;;  %v2566_v25 = vmul.f32 1.442695, %v2516_v7  ;;  %v2582_v30 = vmul.f32 1.442695, %v2524_v38  ;;  %v6469_v46 = vpop.eup %4216  ;;  %v2143_v4 = vmax.f32 %v2056_v22, %v2103_v41 }
 0x87d   : > { %v2636_v20 = vsel %vm754_vm5, %v6461_v53, 0.0  ;;  %v2598_v60 = vmul.f32 1.442695, %v2532_v16  ;;  %v6473_v7 = vpop.eup %4218  ;;  %v2467_v13 = vmax.f32 %v6397_v12, %v2466_v27  ;;  %v2614_v31 = vmul.f32 1.442695, %v2540_v1  ;;  %v2058_v16 = vpop.f32.mrf.mxu3  ;;  %v7386_v38 = vld [vmem:[#allocation27_spill] sm:$0xff] }
 0x87e   : > { %4222 = vpow2.f32 %v2550_v57  ;;  %7384 = vst [vmem:[#allocation23_spill] sm:$0xff] %v6473_v7  ;;  %v2637_v62 = vadd.f32 %v2636_v20, %v2635_v44  ;;  %v6476_v9 = vpop.eup %4220  ;;  %v2638_v8 = vsel %vm754_vm5, %v6469_v46, 0.0  ;;  %v2468_v57 = vsel %vm754_vm5, %v2143_v4, -inf }
 0x87f   : > { %4224 = vrcp.f32 %v2634_v32  ;;  %v2469_v12 = vmax.f32 %v2467_v13, %v2468_v57  ;;  %v2640_v27 = vsel %vm754_vm5, %v6473_v7, 0.0  ;;  %v2642_v1 = vsel %vm754_vm5, %v6476_v9, 0.0 }
 0x880   : > { %4226 = vpow2.f32 %v2566_v25  ;;  %v2639_v41 = vadd.f32 %v2638_v8, %v2637_v62  ;;  %v2059_v32 = vadd.f32 %v5710_v14, %v2058_v16  ;;  %v7385_v25 = vld [vmem:[#allocation26_spill] sm:$0xff] }
 0x881   : > { %4228 = vpow2.f32 %v2582_v30  ;;  %v2509_v20 = vsub.f32 %v7385_v25, %v2469_v12  ;;  %v2517_v6 = vsub.f32 %v7386_v38, %v2469_v12  ;;  %v2525_v62 = vsub.f32 %v6348_v11, %v2469_v12 }
 0x882   : > { %4230 = vpow2.f32 %v2598_v60  ;;  %v2641_v44 = vadd.f32 %v2640_v27, %v2639_v41  ;;  %v2533_v30 = vsub.f32 %v6404_v17, %v2469_v12  ;;  %v2541_v13 = vsub.f32 %v2143_v4, %v2469_v12 }
 0x883   : > { %4232 = vpow2.f32 %v2614_v31  ;;  %v2104_v8 = vmul.f32 0.01, %v2059_v32  ;;  %v2552_v60 = vmul.f32 1.442695, %v2509_v20  ;;  %v2568_v31 = vmul.f32 1.442695, %v2517_v6 }
 0x884   : > { %v6492_v0 = vpop.eup %4222  ;;  %v2643_v22 = vadd.f32 %v2642_v1, %v2641_v44  ;;  %v2584_v41 = vmul.f32 1.442695, %v2525_v62  ;;  %v2600_v27 = vmul.f32 1.442695, %v2533_v30  ;;  %v2616_v25 = vmul.f32 1.442695, %v2541_v13 }
 0x885   : > { %v6496_v57 = vpop.eup %4224  ;;  %v2644_v14 = vsel %vm754_vm5, %v6492_v0, 0.0  ;;  %v2144_v4 = vmax.f32 %v2059_v32, %v2104_v8  ;;  %v7388_v6 = vmax.f32 %v6280_v55, %v6318_v29  ;;  %v6523_v30 = vld [vmem:[#allocation6] ss:$0 sm:$0xff]  ;;  %v7391_v8 = vld [vmem:[#allocation46_spill] sm:$0xff] }
 0x886   : > { %v6500_v16 = vpop.eup %4226  ;;  %v3097_v38 = vmul.f32 %v6496_v57, %v4211_v48  ;;  %4234 = vrcp.f32 %v2643_v22  ;;  %v2734_v12 = vmul.f32 %v6496_v57, %v6417_v15  ;;  %v2060_v22 = vpop.f32.mrf.mxu3 }
 0x887   : > { %v6503_v11 = vpop.eup %4228  ;;  %v2645_v17 = vsel %vm754_vm5, %v6500_v16, 0.0  ;;  %4236 = vpow2.f32 %v2552_v60  ;;  %v2477_v15 = vsel %vm754_vm5, %v2144_v4, -inf  ;;  %v2061_v55 = vadd.f32 %v6523_v30, %v2060_v22 }
 0x888   : > { %v6509_v1 = vpop.eup %4230  ;;  %v6514_v44 = vmul.f32 %v3097_v38, %v7388_v6  ;;  %v2646_v48 = vadd.f32 %v2645_v17, %v2644_v14  ;;  %v2647_v20 = vsel %vm754_vm5, %v6503_v11, 0.0  ;;  %4238 = vpow2.f32 %v2568_v31  ;;  %v7392_v14 = vld [vmem:[#allocation60_spill] sm:$0xff] }
 0x889   : > { %7387 = vst [vmem:[#allocation53_spill] sm:$0xff] %v6509_v1  ;;  %v6518_v62 = vpop.eup %4232  ;;  %v2649_v32 = vsel %vm754_vm5, %v6509_v1, 0.0  ;;  %4240 = vpow2.f32 %v2584_v41  ;;  %v7393_v60 = vmax.f32 %v7391_v8, %v7392_v14  ;;  %v2105_v17 = vmul.f32 0.01, %v2061_v55  ;;  %v7396_v41 = vld [vmem:[#allocation31_spill] sm:$0xff] }
 0x88a   : > { %7389 = vst [vmem:[#allocation18_spill] sm:$0xff] %v6514_v44  ;;  %v2648_v29 = vadd.f32 %v2647_v20, %v2646_v48  ;;  %v2651_v13 = vsel %vm754_vm5, %v6518_v62, 0.0  ;;  %4242 = vpow2.f32 %v2600_v27  ;;  %v7394_v31 = vmax.f32 %v6080_v35, %v6113_v23  ;;  %v7395_v20 = vld [vmem:[#allocation30_spill] sm:$0xff]  ;;  %v7398_v8 = vld [vmem:[#allocation55_spill] sm:$0xff] }
 0x88b   : > { %7390 = vst [vmem:[#allocation19_spill] sm:$0xff] %v6518_v62  ;;  %v2478_v38 = vmax.f32 %v7393_v60, %v2477_v15  ;;  %v6538_v1 = vmul.f32 %v6496_v57, %v6410_v24  ;;  %4244 = vpow2.f32 %v2616_v25  ;;  %v7397_v15 = vld [vmem:[#allocation45_spill] sm:$0xff]  ;;  %v2145_v23 = vmax.f32 %v2061_v55, %v2105_v17 }
 0x88c   : > { %v6534_v6 = vmul.f32 %v2734_v12, %v7394_v31  ;;  %v2650_v48 = vadd.f32 %v2649_v32, %v2648_v29  ;;  %v6542_v7 = vpop.eup %4234 }
 0x88d   : > { %v2510_v22 = vsub.f32 %v7395_v20, %v2478_v38  ;;  %v2518_v62 = vsub.f32 %v7396_v41, %v2478_v38  ;;  %v2526_v27 = vsub.f32 %v7397_v15, %v2478_v38  ;;  %v2534_v14 = vsub.f32 %v7398_v8, %v2478_v38  ;;  %v6546_v35 = vpop.eup %4236 }
 0x88e   : > { %v2542_v60 = vsub.f32 %v2144_v4, %v2478_v38  ;;  %v3098_v24 = vmul.f32 %v6542_v7, %v6476_v9  ;;  %v2652_v12 = vadd.f32 %v2651_v13, %v2650_v48  ;;  %v6550_v29 = vpop.eup %4238  ;;  %v2653_v31 = vsel %vm754_vm5, %v6546_v35, 0.0  ;;  %v2063_v13 = vpop.f32.mrf.mxu3 }
 0x88f   : > { %v2554_v32 = vmul.f32 1.442695, %v2510_v22  ;;  %v2570_v25 = vmul.f32 1.442695, %v2518_v62  ;;  %v2586_v20 = vmul.f32 1.442695, %v2526_v27  ;;  %v6555_v8 = vpop.eup %4240  ;;  %v7399_v4 = vmax.f32 %v6284_v42, %v6321_v58 }
 0x890   : > { %v2602_v41 = vmul.f32 1.442695, %v2534_v14  ;;  %v2486_v15 = vsel %vm754_vm5, %v2145_v23, -inf  ;;  %4246 = vrcp.f32 %v2652_v12  ;;  %v2654_v9 = vsel %vm754_vm5, %v6550_v29, 0.0  ;;  %v6564_v38 = vpop.eup %4242 }
 0x891   : > { %v6560_v55 = vmul.f32 %v3098_v24, %v7399_v4  ;;  %v2618_v62 = vmul.f32 1.442695, %v2542_v60  ;;  %v2655_v17 = vadd.f32 %v2654_v9, %v2653_v31  ;;  %v2656_v48 = vsel %vm754_vm5, %v6555_v8, 0.0  ;;  %v6571_v42 = vpop.eup %4244  ;;  %v4094_v9 = vld [vmem:[%s7149_s9 + $0x98] sm:$0xff] }
 0x892   : > { %4248 = vpow2.f32 %v2554_v32  ;;  %v7400_v22 = vmax.f32 %v6415_v18, %v6458_v39  ;;  %v2658_v14 = vsel %vm754_vm5, %v6564_v38, 0.0  ;;  %v2064_v60 = vadd.f32 %v6523_v30, %v2063_v13  ;;  %v7401_v32 = vld [vmem:[#allocation32_spill] sm:$0xff]  ;;  %v7402_v18 = vld [vmem:[#allocation33_spill] sm:$0xff]  ;;  %3166 = vmatpush.bf16.msrb.mxu3 %v4094_v9 }
 0x893   : > { %4250 = vpow2.f32 %v2570_v25  ;;  %v2657_v24 = vadd.f32 %v2656_v48, %v2655_v17  ;;  %v2660_v12 = vsel %vm754_vm5, %v6571_v42, 0.0  ;;  %v4090_v25 = vld [vmem:[%s7149_s9 + $0x78] sm:$0xff] }
 0x894   : > { %v2487_v27 = vmax.f32 %v7400_v22, %v2486_v15  ;;  %4252 = vpow2.f32 %v2586_v20  ;;  %3064 = vmatpush.bf16.msra.mxu2 %v4090_v25  ;;  %v2106_v44 = vmul.f32 0.01, %v2064_v60 }
 0x895   : > { %4254 = vpow2.f32 %v2602_v41  ;;  %v2659_v13 = vadd.f32 %v2658_v14, %v2657_v24 }
 0x896   : > { %v2511_v31 = vsub.f32 %v7401_v32, %v2487_v27  ;;  %v2519_v39 = vsub.f32 %v7402_v18, %v2487_v27  ;;  %v2527_v15 = vsub.f32 %v6382_v43, %v2487_v27  ;;  %v2535_v4 = vsub.f32 %v6437_v61, %v2487_v27  ;;  %v6590_v48 = vpop.eup %4246 }
 0x897   : > { %4256 = vpow2.f32 %v2618_v62  ;;  %v2543_v20 = vsub.f32 %v2145_v23, %v2487_v27  ;;  %v2735_v43 = vmul.f32 %v6542_v7, %v6461_v53  ;;  %v2661_v18 = vadd.f32 %v2660_v12, %v2659_v13 }
 0x898   : > { %v2556_v17 = vmul.f32 1.442695, %v2511_v31  ;;  %v2572_v41 = vmul.f32 1.442695, %v2519_v39  ;;  %v2588_v22 = vmul.f32 1.442695, %v2527_v15  ;;  %v6594_v61 = vpop.eup %4248  ;;  %v7403_v62 = vmax.f32 %v6084_v49, %v6116_v26 }
 0x899   : > { %v2604_v32 = vmul.f32 1.442695, %v2535_v4  ;;  %v2620_v58 = vmul.f32 1.442695, %v2543_v20  ;;  %v6596_v14 = vpop.eup %4250  ;;  %v2662_v23 = vsel %vm754_vm5, %v6594_v61, 0.0  ;;  %v2707_v53 = vmul.f32 %v6542_v7, %v6454_v40  ;;  %v2065_v40 = vpop.f32.mrf.mxu3 }
 0x89a   : > { %4258 = vpow2.f32 %v2556_v17  ;;  %v2743_v27 = vmul.f32 %v2735_v43, %v7403_v62  ;;  %v6605_v24 = vpop.eup %4252  ;;  %v2663_v12 = vsel %vm754_vm5, %v6596_v14, 0.0  ;;  %v2146_v31 = vmax.f32 %v2064_v60, %v2106_v44 }
 0x89b   : > { %4260 = vpow2.f32 %v2572_v41  ;;  %v7404_v39 = vmax.f32 %v6024_v54, %v6061_v56  ;;  %v6613_v4 = vpop.eup %4254  ;;  %v2664_v25 = vadd.f32 %v2663_v12, %v2662_v23  ;;  %v2665_v49 = vsel %vm754_vm5, %v6605_v24, 0.0  ;;  %v4089_v12 = vld [vmem:[%s7149_s9 + $0x70] sm:$0xff] }
 0x89c   : > { %4262 = vrcp.f32 %v2661_v18  ;;  %v2759_v26 = vpack.c.bf16 %v2743_v27, %v6534_v6  ;;  %v2667_v44 = vsel %vm754_vm5, %v6613_v4, 0.0  ;;  %v2495_v54 = vsel %vm754_vm5, %v2146_v31, -inf  ;;  %v7408_v18 = vld [vmem:[#allocation37_spill] sm:$0xff]  ;;  %v7409_v27 = vld [vmem:[#allocation47_spill] sm:$0xff]  ;;  %3065 = vmatpush.bf16.msra.mxu2 %v4089_v12 }
 0x89d   : > { %v2714_v15 = vmul.f32 %v6538_v1, %v7404_v39  ;;  %4264 = vpow2.f32 %v2588_v22  ;;  %v6618_v9 = vpop.eup %4256  ;;  %v7405_v56 = vmax.f32 %v6028_v19, %v6064_v28  ;;  %v2666_v60 = vadd.f32 %v2665_v49, %v2664_v25  ;;  %v4093_v39 = vld [vmem:[%s7149_s9 + $0x90] sm:$0xff] }
 0x89e   : > { %4266 = vpow2.f32 %v2604_v32  ;;  %v2669_v13 = vsel %vm754_vm5, %v6618_v9, 0.0  ;;  %v7406_v6 = vmax.f32 %v5953_v37, %v6207_v21  ;;  %3896 = vmatmul.msk.bf16.vlgmr.msrb.gmra.mxu2 %vm754_vm5, %v2759_v26  ;;  %v2893_v22 = vmul.f32 %v6496_v57, %v6429_v34  ;;  %v7407_v21 = vld [vmem:[#allocation36_spill] sm:$0xff]  ;;  %3167 = vmatpush.bf16.msrb.mxu3 %v4093_v39 }
 0x89f   : > { %v2715_v1 = vmul.f32 %v2707_v53, %v7405_v56  ;;  %4268 = vpow2.f32 %v2620_v58  ;;  %v2894_v19 = vmul.f32 %v6542_v7, %v6469_v46  ;;  %v2066_v28 = vadd.f32 %v6523_v30, %v2065_v40 }
 0x8a0   : > { %v2496_v20 = vmax.f32 %v7406_v6, %v2495_v54  ;;  %v6632_v17 = vpop.eup %4258  ;;  %v2668_v58 = vadd.f32 %v2667_v44, %v2666_v60  ;;  %v7410_v56 = vmax.f32 %v6141_v3, %v6187_v2 }
 0x8a1   : > { %v2730_v41 = vpack.c.bf16 %v2715_v1, %v2714_v15  ;;  %v6639_v32 = vpop.eup %4260  ;;  %v2671_v37 = vsel %vm754_vm5, %v6632_v17, 0.0  ;;  %v2107_v2 = vmul.f32 0.01, %v2066_v28 }
 0x8a2   : > { %v2512_v43 = vsub.f32 %v7407_v21, %v2496_v20  ;;  %v2520_v23 = vsub.f32 %v7408_v18, %v2496_v20  ;;  %v6645_v62 = vpop.eup %4262  ;;  %v2672_v34 = vsel %vm754_vm5, %v6639_v32, 0.0  ;;  %v2528_v53 = vsub.f32 %v7409_v27, %v2496_v20  ;;  %v7412_v27 = vld [vmem:[#allocation67_spill] sm:$0xff] }
 0x8a3   : > { %v2536_v46 = vsub.f32 %v6182_v63, %v2496_v20  ;;  %v2544_v30 = vsub.f32 %v2146_v31, %v2496_v20  ;;  %3916 = vmatmul.msk.bf16.vlgmr.msra.gmra.mxu3 %vm754_vm5, %v2730_v41  ;;  %v6658_v15 = vpop.eup %4264  ;;  %v2670_v25 = vadd.f32 %v2669_v13, %v2668_v58  ;;  %v2673_v49 = vadd.f32 %v2672_v34, %v2671_v37 }
 0x8a4   : > { %v2558_v26 = vmul.f32 1.442695, %v2512_v43  ;;  %v2574_v40 = vmul.f32 1.442695, %v2520_v23  ;;  %v6660_v44 = vpop.eup %4266  ;;  %v2674_v63 = vsel %vm754_vm5, %v6658_v15, 0.0  ;;  %v2901_v1 = vmul.f32 %v2893_v22, %v7410_v56 }
 0x8a5   : > { %v2590_v31 = vmul.f32 1.442695, %v2528_v53  ;;  %v2606_v54 = vmul.f32 1.442695, %v2536_v46  ;;  %v6667_v60 = vpop.eup %4268  ;;  %4270 = vrcp.f32 %v2670_v25  ;;  %v2675_v13 = vadd.f32 %v2674_v63, %v2673_v49  ;;  %v7415_v53 = vld [vmem:[#allocation70_spill] sm:$0xff]  ;;  %v7416_v46 = vld [vmem:[#allocation75_spill] sm:$0xff] }
 0x8a6   : > { %v2676_v6 = vsel %vm754_vm5, %v6660_v44, 0.0  ;;  %v2622_v20 = vmul.f32 1.442695, %v2544_v30  ;;  %v2678_v41 = vsel %vm754_vm5, %v6667_v60, 0.0  ;;  %4272 = vpow2.f32 %v2558_v26  ;;  %v4088_v49 = vld [vmem:[%s7149_s9 + $0x68] sm:$0xff] }
 0x8a7   : > { %v7411_v58 = vmax.f32 %v6145_v45, %v6190_v52  ;;  %v2677_v3 = vadd.f32 %v2676_v6, %v2675_v13  ;;  %4274 = vpow2.f32 %v2574_v40  ;;  %v2736_v22 = vmul.f32 %v6590_v48, %v6500_v16  ;;  %v7413_v52 = vld [vmem:[#allocation71_spill] sm:$0xff]  ;;  %v7423_v13 = vld [vmem:[#allocation64_spill] sm:$0xff]  ;;  %3066 = vmatpush.bf16.msra.mxu2 %v4088_v49 }
 0x8a8   : > { %v2737_v21 = vmul.f32 %v6645_v62, %v6550_v29  ;;  %4276 = vpow2.f32 %v2590_v31  ;;  %v2147_v18 = vmax.f32 %v2066_v28, %v2107_v2  ;;  %v2708_v23 = vmul.f32 %v6590_v48, %v6492_v0  ;;  %v7418_v28 = vld [vmem:[#allocation56_spill] sm:$0xff]  ;;  %v7419_v0 = vld [vmem:[#allocation63_spill] sm:$0xff] }
 0x8a9   : > { %v2902_v37 = vmul.f32 %v2894_v19, %v7411_v58  ;;  %v2679_v34 = vadd.f32 %v2678_v41, %v2677_v3  ;;  %4278 = vpow2.f32 %v2606_v54  ;;  %v7414_v45 = vmax.f32 %v7412_v27, %v7413_v52  ;;  %v4092_v26 = vld [vmem:[%s7149_s9 + $0x88] sm:$0xff] }
 0x8aa   : > { %v7417_v30 = vmax.f32 %v7415_v53, %v7416_v46  ;;  %4280 = vpow2.f32 %v2622_v20  ;;  %v2504_v16 = vsel %vm754_vm5, %v2147_v18, -inf  ;;  %v2709_v29 = vmul.f32 %v6645_v62, %v6546_v35  ;;  %v7426_v3 = vld [vmem:[#allocation39_spill] sm:$0xff]  ;;  %3168 = vmatpush.bf16.msrb.mxu3 %v4092_v26 }
 0x8ab   : > { %v2918_v43 = vpack.c.bf16 %v2902_v37, %v2901_v1  ;;  %v2744_v19 = vmul.f32 %v2736_v22, %v7414_v45  ;;  %v7420_v39 = vmax.f32 %v7418_v28, %v7419_v0  ;;  %v6701_v40 = vpop.eup %4270  ;;  %4282 = vrcp.f32 %v2679_v34  ;;  %v7422_v1 = vld [vmem:[#allocation57_spill] sm:$0xff]  ;;  %v7425_v37 = vld [vmem:[#allocation38_spill] sm:$0xff] }
 0x8ac   : > { %v2745_v12 = vmul.f32 %v2737_v21, %v7417_v30  ;;  %v7421_v63 = vmax.f32 %v6422_v47, %v6465_v36  ;;  %v2895_v54 = vmul.f32 %v6590_v48, %v6503_v11  ;;  %v6708_v56 = vpop.eup %4272  ;;  %v7424_v6 = vmax.f32 %v7422_v1, %v7423_v13 }
 0x8ad   : > { %3944 = vmatmul.msk.bf16.vlgmr.msrb.gmra.mxu1 %vm754_vm5, %v2918_v43  ;;  %v2716_v25 = vmul.f32 %v2708_v23, %v7420_v39  ;;  %v2896_v41 = vmul.f32 %v6645_v62, %v6555_v8  ;;  %v2738_v58 = vmul.f32 %v6701_v40, %v6596_v14  ;;  %v2710_v47 = vmul.f32 %v6701_v40, %v6594_v61  ;;  %v6719_v36 = vpop.eup %4274 }
 0x8ae   : > { %v2505_v31 = vmax.f32 %v7421_v63, %v2504_v16  ;;  %v2760_v35 = vpack.c.bf16 %v2745_v12, %v2744_v19  ;;  %v2717_v20 = vmul.f32 %v2709_v29, %v7424_v6  ;;  %v2680_v11 = vsel %vm754_vm5, %v6708_v56, 0.0  ;;  %v6726_v8 = vpop.eup %4276  ;;  %v7436_v6 = vld [vmem:[#allocation79_spill] sm:$0xff] }
 0x8af   : > { %v2681_v14 = vsel %vm754_vm5, %v6719_v36, 0.0  ;;  %v6731_v34 = vpop.eup %4278  ;;  %v2683_v52 = vsel %vm754_vm5, %v6726_v8, 0.0  ;;  %v7428_v0 = vmax.f32 %v6157_v10, %v6196_v33  ;;  %v7435_v10 = vld [vmem:[#allocation73_spill] sm:$0xff] }
 0x8b0   : > { %v2513_v2 = vsub.f32 %v7425_v37, %v2505_v31  ;;  %v2521_v22 = vsub.f32 %v7426_v3, %v2505_v31  ;;  %v2529_v21 = vsub.f32 %v6385_v5, %v2505_v31  ;;  %v2537_v61 = vsub.f32 %v6440_v51, %v2505_v31  ;;  %3897 = vmatmul.msk.bf16.gmra.mxu2 %vm754_vm5, %v2760_v35  ;;  %v6736_v5 = vpop.eup %4280  ;;  %v7432_v35 = vld [vmem:[#allocation58_spill] sm:$0xff] }
 0x8b1   : > { %v2545_v43 = vsub.f32 %v2147_v18, %v2505_v31  ;;  %v2731_v23 = vpack.c.bf16 %v2717_v20, %v2716_v25  ;;  %v2682_v27 = vadd.f32 %v2681_v14, %v2680_v11  ;;  %v2685_v53 = vsel %vm754_vm5, %v6731_v34, 0.0  ;;  %v6743_v12 = vpop.eup %4282  ;;  %v7438_v11 = vld [vmem:[#allocation59_spill] sm:$0xff]  ;;  %v7439_v37 = vld [vmem:[#allocation66_spill] sm:$0xff] }
 0x8b2   : > { %v2560_v45 = vmul.f32 1.442695, %v2513_v2  ;;  %v2576_v19 = vmul.f32 1.442695, %v2521_v22  ;;  %v2592_v46 = vmul.f32 1.442695, %v2529_v21  ;;  %v7427_v51 = vmax.f32 %v6149_v50, %v6193_v59 }
 0x8b3   : > { %v2608_v30 = vmul.f32 1.442695, %v2537_v61  ;;  %v2684_v16 = vadd.f32 %v2683_v52, %v2682_v27  ;;  %v2687_v29 = vsel %vm754_vm5, %v6736_v5, 0.0  ;;  %v2624_v28 = vmul.f32 1.442695, %v2545_v43  ;;  %3917 = vmatmul.msk.bf16.gmra.mxu3 %vm754_vm5, %v2731_v23  ;;  %v7429_v59 = vld [vmem:[#allocation72_spill] sm:$0xff] }
 0x8b4   : > { %v2903_v18 = vmul.f32 %v2895_v54, %v7427_v51  ;;  %4284 = vpow2.f32 %v2560_v45  ;;  %v2904_v39 = vmul.f32 %v2896_v41, %v7428_v0  ;;  %v2739_v25 = vmul.f32 %v6743_v12, %v6639_v32  ;;  %v7430_v50 = vld [vmem:[#allocation78_spill] sm:$0xff]  ;;  %v7433_v54 = vld [vmem:[#allocation65_spill] sm:$0xff] }
 0x8b5   : > { %4286 = vpow2.f32 %v2576_v19  ;;  %v7431_v49 = vmax.f32 %v7429_v59, %v7430_v50  ;;  %v2686_v63 = vadd.f32 %v2685_v53, %v2684_v16  ;;  %v2711_v31 = vmul.f32 %v6743_v12, %v6632_v17  ;;  %v7441_v22 = vld [vmem:[#allocation77_spill] sm:$0xff]  ;;  %v7442_v21 = vld [vmem:[#allocation82_spill] sm:$0xff] }
 0x8b6   : > { %4288 = vpow2.f32 %v2592_v46  ;;  %v7434_v1 = vmax.f32 %v7432_v35, %v7433_v54  ;;  %v2919_v33 = vpack.c.bf16 %v2904_v39, %v2903_v18  ;;  %v7437_v20 = vmax.f32 %v7435_v10, %v7436_v6  ;;  %v7444_v43 = vld [vmem:[#allocation22_spill] sm:$0xff]  ;;  %v7446_v19 = vld [vmem:[#allocation81_spill] sm:$0xff]  ;;  %v7454_v39 = vld [vmem:[#allocation91_spill] sm:$0xff] }
 0x8b7   : > { %v2746_v26 = vmul.f32 %v2738_v58, %v7431_v49  ;;  %4290 = vpow2.f32 %v2608_v30  ;;  %v2897_v41 = vmul.f32 %v6701_v40, %v6605_v24  ;;  %v2688_v58 = vadd.f32 %v2687_v29, %v2686_v63  ;;  %v7445_v24 = vld [vmem:[#allocation23_spill] sm:$0xff]  ;;  %v7449_v30 = vld [vmem:[#allocation53_spill] sm:$0xff]  ;;  %v7451_v16 = vld [vmem:[#allocation90_spill] sm:$0xff] }
 0x8b8   : > { %v6761_v13 = vmul.f32 %v2710_v47, %v7434_v1  ;;  %v2747_v32 = vmul.f32 %v2739_v25, %v7437_v20  ;;  %4292 = vpow2.f32 %v2624_v28  ;;  %v7440_v2 = vmax.f32 %v7438_v11, %v7439_v37  ;;  %v7453_v0 = vld [vmem:[#allocation85_spill] sm:$0xff]  ;;  %v7456_v35 = vld [vmem:[#allocation87_spill] sm:$0xff]  ;;  %v7457_v54 = vld [vmem:[#allocation94_spill] sm:$0xff] }
 0x8b9   : > { %v2898_v47 = vmul.f32 %v6743_v12, %v6658_v15  ;;  %v7443_v14 = vmax.f32 %v7441_v22, %v7442_v21  ;;  %v2995_v23 = vmul.f32 %v6496_v57, %v7444_v43  ;;  %v2996_v27 = vmul.f32 %v6542_v7, %v7445_v24  ;;  %v7447_v15 = vld [vmem:[#allocation86_spill] sm:$0xff]  ;;  %v7450_v7 = vld [vmem:[#allocation84_spill] sm:$0xff]  ;;  %v7459_v10 = vld [vmem:[#allocation19_spill] sm:$0xff] }
 0x8ba   : > { %v6771_v17 = vmul.f32 %v2711_v31, %v7440_v2  ;;  %v2761_v3 = vpack.c.bf16 %v2747_v32, %v2746_v26  ;;  %v6784_v52 = vpop.eup %4284  ;;  %4294 = vrcp.f32 %v2688_v58  ;;  %v7448_v53 = vmax.f32 %v7446_v19, %v7447_v15  ;;  %v2309_v26 = vpop.f32.mrf.mxu0  ;;  %v7461_v32 = vld [vmem:[#allocation104_spill] sm:$0xff]  ;;  %v4087_v11 = vld [vmem:[%s7149_s9 + $0x60] sm:$0xff] }
 0x8bb   : > { %v6778_v61 = vmul.f32 %v2897_v41, %v7443_v14  ;;  %v2997_v51 = vmul.f32 %v6590_v48, %v7449_v30  ;;  %v6795_v18 = vpop.eup %4286  ;;  %v2689_v57 = vsel %vm754_vm5, %v6784_v52, 0.0  ;;  %v7452_v29 = vmax.f32 %v7450_v7, %v7451_v16  ;;  %v4091_v37 = vld [vmem:[%s7149_s9 + $0x80] sm:$0xff]  ;;  %v7465_v14 = vld [vmem:[#allocation49_spill] sm:$0xff]  ;;  %3067 = vmatpush.bf16.msra.mxu2 %v4087_v11 }
 0x8bc   : > { %v2732_v45 = vpack.c.bf16 %v6771_v17, %v6761_v13  ;;  %v6791_v46 = vmul.f32 %v2898_v47, %v7448_v53  ;;  %v7455_v25 = vmax.f32 %v7453_v0, %v7454_v39  ;;  %v2998_v50 = vmul.f32 %v6645_v62, %v6564_v38  ;;  %v6811_v49 = vpop.eup %4288  ;;  %v7460_v38 = vld [vmem:[#allocation106_spill] sm:$0xff]  ;;  %v7463_v17 = vld [vmem:[#allocation99_spill] sm:$0xff]  ;;  %3169 = vmatpush.bf16.msrb.mxu3 %v4091_v37  ;;  %v7473_v39 = vld [vmem:[#allocation93_spill] sm:$0xff] }
 0x8bd   : > { %v6802_v28 = vmul.f32 %v2995_v23, %v7452_v29  ;;  %v2690_v63 = vsel %vm754_vm5, %v6795_v18, 0.0  ;;  %v7458_v1 = vmax.f32 %v7456_v35, %v7457_v54  ;;  %v3099_v6 = vmul.f32 %v6590_v48, %v7459_v10  ;;  %v6824_v20 = vpop.eup %4290  ;;  %3945 = vmatmul.msk.bf16.gmra.mxu1 %vm754_vm5, %v2919_v33  ;;  %v7462_v48 = vld [vmem:[#allocation92_spill] sm:$0xff]  ;;  %v7466_v33 = vld [vmem:[#allocation107_spill] sm:$0xff]  ;;  %v7468_v7 = vld [vmem:[#allocation102_spill] sm:$0xff] }
 0x8be   : > { %v6807_v59 = vmul.f32 %v2996_v27, %v7455_v25  ;;  %v2920_v31 = vpack.c.bf16 %v6791_v46, %v6778_v61  ;;  %v2430_v41 = vmax.f32 %v7461_v32, %v7460_v38  ;;  %v2691_v58 = vadd.f32 %v2690_v63, %v2689_v57  ;;  %v6842_v21 = vpop.eup %4292  ;;  %v7467_v57 = vld [vmem:[#allocation96_spill] sm:$0xff]  ;;  %v4110_v46 = vld [vmem:[%s7153_s13 + $0x38] sm:$0xff] }
 0x8bf   : > { %v6820_v13 = vmul.f32 %v2997_v51, %v7458_v1  ;;  %v7464_v47 = vmax.f32 %v7462_v48, %v7463_v17  ;;  %v2431_v43 = vmax.f32 %v7466_v33, %v7465_v14  ;;  %v2692_v23 = vsel %vm754_vm5, %v6811_v49, 0.0  ;;  %v7474_v25 = vld [vmem:[#allocation100_spill] sm:$0xff]  ;;  %3404 = vmatpush.bf16.msrb.mxu2 %v4110_v46 }
 0x8c0   : > { %v3020_v2 = vpack.c.bf16 %v6807_v59, %v6802_v28  ;;  %v3100_v24 = vmul.f32 %v6645_v62, %v6571_v42  ;;  %v2999_v27 = vmul.f32 %v6701_v40, %v6613_v4  ;;  %v2693_v19 = vadd.f32 %v2692_v23, %v2691_v58  ;;  %v4295_v30 = vpop.eup %4294  ;;  %v7470_v62 = vld [vmem:[#allocation98_spill] sm:$0xff]  ;;  %v7471_v4 = vld [vmem:[#allocation103_spill] sm:$0xff]  ;;  %3898 = vmatmul.msk.bf16.gmra.mxu2 %vm754_vm5, %v2761_v3  ;;  %v7477_v58 = vld [vmem:[#allocation80_spill] sm:$0xff] }
 0x8c1   : > { %v6840_v22 = vmul.f32 %v2998_v50, %v7464_v47  ;;  %v3101_v53 = vmul.f32 %v6701_v40, %v6618_v9  ;;  %v2694_v51 = vsel %vm754_vm5, %v6824_v20, 0.0  ;;  %v7469_v16 = vmax.f32 %v7467_v57, %v7468_v7  ;;  %v7480_v37 = vld [vmem:[#allocation68_spill] sm:$0xff]  ;;  %v7482_v47 = vld [vmem:[#allocation83_spill] sm:$0xff]  ;;  %v7483_v3 = vld [vmem:[#allocation89_spill] sm:$0xff] }
 0x8c2   : > { %v7472_v29 = vmax.f32 %v7470_v62, %v7471_v4  ;;  %v7475_v50 = vmax.f32 %v7473_v39, %v7474_v25  ;;  %v2695_v9 = vadd.f32 %v2694_v51, %v2693_v19  ;;  %v2740_v40 = vmul.f32 %v4295_v30, %v6719_v36  ;;  %v7476_v36 = vld [vmem:[#allocation74_spill] sm:$0xff]  ;;  %v7485_v23 = vld [vmem:[#allocation105_spill] sm:$0xff]  ;;  %v2311_v57 = vpop.f32.mrf.mxu0  ;;  %v7489_v62 = vld [vmem:[#allocation76_spill] sm:$0xff] }
 0x8c3   : > { %v3021_v15 = vpack.c.bf16 %v6840_v22, %v6820_v13  ;;  %v6861_v42 = vmul.f32 %v3099_v6, %v7469_v16  ;;  %v2712_v35 = vmul.f32 %v4295_v30, %v6708_v56  ;;  %v2899_v54 = vmul.f32 %v4295_v30, %v6726_v8  ;;  %v7479_v8 = vld [vmem:[#allocation62_spill] sm:$0xff]  ;;  %3918 = vmatmul.msk.bf16.gmra.mxu3 %vm754_vm5, %v2732_v45  ;;  %v7491_v25 = vld [vmem:[#allocation97_spill] sm:$0xff] }
 0x8c4   : > { %v6866_v0 = vmul.f32 %v3100_v24, %v7472_v29  ;;  %v6871_v63 = vmul.f32 %v2999_v27, %v7475_v50  ;;  %v2696_v1 = vsel %vm754_vm5, %v6842_v21, 0.0  ;;  %v3000_v6 = vmul.f32 %v6743_v12, %v6660_v44  ;;  %v7486_v27 = vld [vmem:[#allocation95_spill] sm:$0xff]  ;;  %v7487_v44 = vld [vmem:[#allocation101_spill] sm:$0xff]  ;;  %v7490_v29 = vld [vmem:[#allocation88_spill] sm:$0xff] }
 0x8c5   : > { %v3102_v38 = vmul.f32 %v6743_v12, %v6667_v60  ;;  %v2697_v32 = vadd.f32 %v2696_v1, %v2695_v9  ;;  %v7478_v56 = vmax.f32 %v7476_v36, %v7477_v58  ;;  %v7481_v48 = vmax.f32 %v7479_v8, %v7480_v37  ;;  %v4107_v28 = vld [vmem:[%s7153_s13 + $0x20] sm:$0xff]  ;;  %v4106_v59 = vld [vmem:[%s7153_s13 + $0x18] sm:$0xff]  ;;  %v4105_v13 = vld [vmem:[%s7153_s13 + $0x10] sm:$0xff] }
 0x8c6   : > { %v3123_v10 = vpack.c.bf16 %v6866_v0, %v6861_v42  ;;  %v7484_v14 = vmax.f32 %v7482_v47, %v7483_v3  ;;  %v2384_v24 = vmul.f32 0.01, %v7485_v23  ;;  %v7488_v19 = vmax.f32 %v7486_v27, %v7487_v44  ;;  %v4097_v22 = vld [vmem:[%s7151_s11 + $0x10] sm:$0xff]  ;;  %v4096_v42 = vld [vmem:[%s7151_s11 + $0x8] sm:$0xff]  ;;  %v4103_v0 = vld [vmem:[%s7153_s13] sm:$0xff] }
 0x8c7   : > { %v2748_v11 = vmul.f32 %v2740_v40, %v7478_v56  ;;  %v2720_v17 = vmul.f32 %v2712_v35, %v7481_v48  ;;  %v6900_v60 = vmul.f32 %v3101_v53, %v2430_v41  ;;  %v6902_v12 = vmul.f32 %v3102_v38, %v2431_v43  ;;  %v7492_v43 = vld [vmem:[#allocation69_spill] sm:$0xff]  ;;  %v7493_v53 = vld [vmem:[#allocation50_spill] sm:$0xff] }
 0x8c8   : > { %v2907_v33 = vmul.f32 %v2899_v54, %v7484_v14  ;;  %v6898_v51 = vmul.f32 %v3000_v6, %v7488_v19  ;;  %4296 = vrcp.f32 %v2697_v32  ;;  %v2361_v4 = vmul.f32 0.01, %v7489_v62  ;;  %v7494_v40 = vld [vmem:[#allocation54_spill] sm:$0xff] }
 0x8c9   : > { %v3124_v16 = vpack.c.bf16 %v6902_v12, %v6900_v60  ;;  %v2369_v39 = vmul.f32 0.01, %v7490_v29  ;;  %v2377_v50 = vmul.f32 0.01, %v7491_v25  ;;  %v2424_v41 = vmax.f32 %v7485_v23, %v2384_v24 }
 0x8ca   : > { %v3022_v7 = vpack.c.bf16 %v6898_v51, %v6871_v63  ;;  %v2345_v9 = vadd.f32 %v7493_v53, %v7492_v43  ;;  %v2352_v45 = vadd.f32 %v2309_v26, %v7494_v40  ;;  %v2353_v35 = vadd.f32 %v2311_v57, %v7492_v43  ;;  %v4095_v63 = vld [vmem:[%s7151_s11] sm:$0xff]  ;;  %v3228_v51 = vld [vmem:[%s7008_s21 + $0x8] sm:$0xff] }
 0x8cb   : > { %v3001_v54 = vmul.f32 %v4295_v30, %v6731_v34  ;;  %v3103_v1 = vmul.f32 %v4295_v30, %v6736_v5  ;;  %v2401_v38 = vmax.f32 %v7489_v62, %v2361_v4  ;;  %v2409_v32 = vmax.f32 %v7490_v29, %v2369_v39  ;;  %v4108_v62 = vld [vmem:[%s7153_s13 + $0x28] sm:$0xff] }
 0x8cc   : > { %v2417_v36 = vmax.f32 %v7491_v25, %v2377_v50  ;;  %v2385_v56 = vmul.f32 0.01, %v2345_v9  ;;  %v2392_v48 = vmul.f32 0.01, %v2352_v45  ;;  %v2393_v47 = vmul.f32 0.01, %v2353_v35 }
 0x8cd   : > { %v3009_v58 = vmul.f32 %v3001_v54, %v2424_v41  ;;  %3946 = vmatmul.msk.bf16.gmra.mxu1 %vm754_vm5, %v2920_v31  ;;  %v4102_v31 = vld [vmem:[%s7151_s11 + $0x38] sm:$0xff]  ;;  %v4100_v4 = vld [vmem:[%s7151_s11 + $0x28] sm:$0xff] }
 0x8ce   : > { %v4297_v6 = vpop.eup %4296  ;;  %v2425_v3 = vmax.f32 %v2345_v9, %v2385_v56  ;;  %v2432_v27 = vmax.f32 %v2352_v45, %v2392_v48  ;;  %3307 = vmatpush.bf16.msra.mxu1 %v4102_v31  ;;  %v3231_v9 = vld [vmem:[%s7008_s21 + $0x20] sm:$0xff]  ;;  %v3232_v40 = vld [vmem:[%s7008_s21 + $0x28] sm:$0xff] }
 0x8cf   : > { %v2741_v8 = vmul.f32 %v4297_v6, %v6795_v18  ;;  %v2713_v37 = vmul.f32 %v4297_v6, %v6784_v52  ;;  %v2900_v26 = vmul.f32 %v4297_v6, %v6811_v49  ;;  %v2433_v18 = vmax.f32 %v2353_v35, %v2393_v47 }
 0x8d0   : > { %v3002_v52 = vmul.f32 %v4297_v6, %v6824_v20  ;;  %v3104_v49 = vmul.f32 %v4297_v6, %v6842_v21  ;;  %v3111_v19 = vmul.f32 %v3103_v1, %v2432_v27  ;;  %v4109_v20 = vld [vmem:[%s7153_s13 + $0x30] sm:$0xff]  ;;  %v3253_v54 = vpack.c.bf16 %v3232_v40, %v3231_v9 }
 0x8d1   : > { %v2749_v34 = vmul.f32 %v2741_v8, %v2409_v32  ;;  %v2721_v5 = vmul.f32 %v2713_v37, %v2401_v38  ;;  %v2908_v30 = vmul.f32 %v2900_v26, %v2417_v36  ;;  %v4101_v21 = vld [vmem:[%s7151_s11 + $0x30] sm:$0xff]  ;;  %3405 = vmatpush.bf16.msrb.mxu2 %v4109_v20 }
 0x8d2   : > { %v3010_v44 = vmul.f32 %v3002_v52, %v2425_v3  ;;  %v3112_v61 = vmul.f32 %v3104_v49, %v2433_v18  ;;  %3308 = vmatpush.bf16.msra.mxu1 %v4101_v21  ;;  %v3233_v36 = vld [vmem:[%s7008_s21 + $0x30] sm:$0xff] }
 0x8d3   : > { %v2762_v14 = vpack.c.bf16 %v2749_v34, %v2748_v11  ;;  %v2733_v23 = vpack.c.bf16 %v2721_v5, %v2720_v17  ;;  %v2921_v24 = vpack.c.bf16 %v2908_v30, %v2907_v33  ;;  %v7495_v33 = vld [vmem:[#allocation18_spill] sm:$0xff] }
 0x8d4   : > { %v3023_v11 = vpack.c.bf16 %v3010_v44, %v3009_v58  ;;  %v3125_v17 = vpack.c.bf16 %v3112_v61, %v3111_v19  ;;  %v7496_v57 = vpack.c.bf16 %v6560_v55, %v7495_v33  ;;  %v4099_v55 = vld [vmem:[%s7151_s11 + $0x20] sm:$0xff]  ;;  %v3234_v58 = vld [vmem:[%s7008_s21 + $0x38] sm:$0xff] }
 0x8d5   : > { %3899 = vmatmul.msk.bf16.gmra.mxu2 %vm754_vm5, %v2762_v14  ;;  %3919 = vmatmul.msk.bf16.gmra.mxu3 %vm754_vm5, %v2733_v23  ;;  %v3254_v37 = vpack.c.bf16 %v3234_v58, %v3233_v36  ;;  %v7031_v61 = vld [vmem:[%s7150_s10] ss:$0 sm:$0xff] }
 0x8d6   : > { %3406 = vmatpush.bf16.msrb.mxu2 %v4108_v62  ;;  %3309 = vmatpush.bf16.msra.mxu1 %v4100_v4 }
 0x8da   : > { %3407 = vmatpush.bf16.msrb.mxu2 %v4107_v28  ;;  %3310 = vmatpush.bf16.msra.mxu1 %v4099_v55 }
 0x8dd   : > { %3947 = vmatmul.msk.bf16.gmra.mxu1 %vm754_vm5, %v2921_v24 }
 0x8de   : > { %3408 = vmatpush.bf16.msrb.mxu2 %v4106_v59 }
 0x8e2   : > { %3409 = vmatpush.bf16.msrb.mxu2 %v4105_v13 }
 0x8e5   : > { %3972 = vmatmul.msk.bf16.vlgmr.msra.gmra.mxu2 %vm754_vm5, %v3020_v2  ;;  %4000 = vmatmul.msk.bf16.vlgmr.msrb.gmra.mxu3 %vm754_vm5, %v7496_v57  ;;  %v4098_v2 = vld [vmem:[%s7151_s11 + $0x18] sm:$0xff] }
 0x8e6   : > { %3311 = vmatpush.bf16.msra.mxu1 %v4098_v2 }
 0x8ea   : > { %3312 = vmatpush.bf16.msra.mxu1 %v4097_v22 }
 0x8ee   : > { %3313 = vmatpush.bf16.msra.mxu1 %v4096_v42 }
 0x8f2   : > { %3314 = vmatpush.bf16.msra.mxu1 %v4095_v63 }
 0x8f5   : > { %3973 = vmatmul.msk.bf16.gmra.mxu2 %vm754_vm5, %v3021_v15  ;;  %4001 = vmatmul.msk.bf16.gmra.mxu3 %vm754_vm5, %v3123_v10  ;;  %v4104_v15 = vld [vmem:[%s7153_s13 + $0x8] sm:$0xff]  ;;  %v3227_v10 = vld [vmem:[%s7008_s21] sm:$0xff] }
 0x8f6   : > { %3410 = vmatpush.bf16.msrb.mxu2 %v4104_v15  ;;  %v3251_v60 = vpack.c.bf16 %v3228_v51, %v3227_v10 }
 0x8f8   : > { %3315 = vmatmul.bf16.vlgmr.msra.gmra.mxu1 %v3251_v60 }
 0x8fa   : > { %3411 = vmatpush.bf16.msrb.mxu2 %v4103_v0 }
 0x905   : > { %3974 = vmatmul.msk.bf16.gmra.mxu2 %vm754_vm5, %v3022_v7  ;;  %4002 = vmatmul.msk.bf16.gmra.mxu3 %vm754_vm5, %v3124_v16  ;;  %v3229_v7 = vld [vmem:[%s7008_s21 + $0x10] sm:$0xff]  ;;  %v3230_v16 = vld [vmem:[%s7008_s21 + $0x18] sm:$0xff] }
 0x906   : > { %v3252_v25 = vpack.c.bf16 %v3230_v16, %v3229_v7 }
 0x908   : > { %3320 = vmatmul.bf16.gmra.mxu1 %v3252_v25 }
 0x915   : > { %3975 = vmatmul.msk.bf16.gmra.mxu2 %vm754_vm5, %v3023_v11  ;;  %4003 = vmatmul.msk.bf16.gmra.mxu3 %vm754_vm5, %v3125_v17 }
 0x918   : > { %3325 = vmatmul.bf16.gmra.mxu1 %v3253_v54 }
 0x921   : > { %v2808_v12 = vpop.f32.mrf.mxu2 }
 0x925   : > { %3412 = vmatmul.bf16.vlgmr.msrb.gmra.mxu2 %v3251_v60 }
 0x926   : > { %v2873_v29 = vpop.f32.mrf.mxu3 }
 0x927   : > { %v2874_v39 = vadd.f32 %v2873_v29, %v2808_v12 }
 0x928   : > { %3330 = vmatmul.bf16.gmra.mxu1 %v3254_v37 }
 0x929   : > { %v2810_v50 = vpop.f32.mrf.mxu2 }
 0x92a   : > { %v2967_v34 = vpop.f32.mrf.mxu1 }
 0x92b   : > { %v2987_v27 = vadd.f32 %v2967_v34, %v2874_v39 }
 0x92e   : > { %v2875_v41 = vpop.f32.mrf.mxu3 }
 0x92f   : > { %v2876_v43 = vadd.f32 %v2875_v41, %v2810_v50 }
 0x932   : > { %v2969_v23 = vpop.f32.mrf.mxu1 }
 0x933   : > { %v2813_v53 = vpop.f32.mrf.mxu2  ;;  %v2988_v46 = vadd.f32 %v2969_v23, %v2876_v43 }
 0x935   : > { %3417 = vmatmul.bf16.gmra.mxu2 %v3252_v25 }
 0x936   : > { %v2878_v45 = vpop.f32.mrf.mxu3 }
 0x937   : > { %v2879_v35 = vadd.f32 %v2878_v45, %v2813_v53 }
 0x93a   : > { %v2972_v44 = vpop.f32.mrf.mxu1 }
 0x93b   : > { %v2815_v1 = vpop.f32.mrf.mxu2  ;;  %v2989_v4 = vadd.f32 %v2972_v44, %v2879_v35 }
 0x93e   : > { %v2880_v6 = vpop.f32.mrf.mxu3 }
 0x93f   : > { %v2881_v38 = vadd.f32 %v2880_v6, %v2815_v1 }
 0x942   : > { %v2974_v57 = vpop.f32.mrf.mxu1 }
 0x943   : > { %v2818_v32 = vpop.f32.mrf.mxu2  ;;  %v2990_v51 = vadd.f32 %v2974_v57, %v2881_v38  ;;  %v4556_v57 = vmov 64.0  }
 0x944   : > { %4298 = vrcp.f32 %v4556_v57 }
 0x945   : > { %3422 = vmatmul.bf16.gmra.mxu2 %v3253_v54 }
 0x946   : > { %v2883_v56 = vpop.f32.mrf.mxu3 }
 0x947   : > { %v2884_v8 = vadd.f32 %v2883_v56, %v2818_v32 }
 0x94a   : > { %v2977_v60 = vpop.f32.mrf.mxu1 }
 0x94b   : > { %v2820_v26 = vpop.f32.mrf.mxu2  ;;  %v2991_v53 = vadd.f32 %v2977_v60, %v2884_v8 }
 0x94e   : > { %v2885_v48 = vpop.f32.mrf.mxu3 }
 0x94f   : > { %v2886_v47 = vadd.f32 %v2885_v48, %v2820_v26 }
 0x952   : > { %v2979_v35 = vpop.f32.mrf.mxu1 }
 0x953   : > { %v2992_v58 = vadd.f32 %v2979_v35, %v2886_v47 }
 0x955   : > { %3427 = vmatmul.bf16.gmra.mxu2 %v3254_v37 }
 0x958   : > { %v2823_v5 = vpop.f32.mrf.mxu2  ;;  %v2888_v30 = vpop.f32.mrf.mxu3 }
 0x959   : > { %v7022_v3 = vadd.f32 %v2888_v30, %v2823_v5 }
 0x95a   : > { %v2982_v34 = vpop.f32.mrf.mxu1 }
 0x960   : > { %v7024_v14 = vpop.f32.mrf.mxu2  ;;  %v7026_v24 = vpop.f32.mrf.mxu3 }
 0x961   : > { %v2891_v47 = vadd.f32 %v7026_v24, %v7024_v14  ;;  %v4299_v14 = vpop.eup %4298 }
 0x962   : > { %vm3459_vm0 = vweird.f32 %v4299_v14 }
 0x968   : > { %v3069_v18 = vpop.f32.mrf.mxu2  ;;  %v3171_v49 = vpop.f32.mrf.mxu3 }
 0x969   : > { %v3089_v52 = vadd.f32 %v3069_v18, %v2987_v27  ;;  %v2993_v18 = vadd.f32 %v2982_v34, %v7022_v3 }
 0x96b   : > { %v3191_v19 = vadd.f32 %v3171_v49, %v3089_v52 }
 0x96d   : > { %v3203_v31 = vadd.f32 %v7031_v61, %v3191_v19 }
 0x96f   : > { %v3211_v21 = vmul.f32 0.2, %v3203_v31 }
 0x970   : > { %v3071_v11 = vpop.f32.mrf.mxu2  ;;  %v3173_v20 = vpop.f32.mrf.mxu3 }
 0x971   : > { %v3090_v17 = vadd.f32 %v3071_v11, %v2988_v46  ;;  %v7035_v28 = vmax.f32 %v3203_v31, %v3211_v21 }
 0x973   : > { %v3192_v33 = vadd.f32 %v3173_v20, %v3090_v17  ;;  %v3433_v15 = vsel %vm754_vm5, %v7035_v28, 0.0  ;;  %v2984_v20 = vpop.f32.mrf.mxu1 }
 0x975   : > { %v3204_v62 = vadd.f32 %v7031_v61, %v3192_v33  ;;  %v2994_v33 = vadd.f32 %v2984_v20, %v2891_v47 }
 0x977   : > { %v3212_v55 = vmul.f32 0.2, %v3204_v62 }
 0x978   : > { %v3074_v59 = vpop.f32.mrf.mxu2  ;;  %v3176_v22 = vpop.f32.mrf.mxu3 }
 0x979   : > { %v3091_v2 = vadd.f32 %v3074_v59, %v2989_v4  ;;  %v7037_v13 = vmax.f32 %v3204_v62, %v3212_v55 }
 0x97b   : > { %v3434_v42 = vsel %vm754_vm5, %v7037_v13, 0.0  ;;  %v3193_v0 = vadd.f32 %v3176_v22, %v3091_v2 }
 0x97c   : > { %v3435_v63 = vadd.f32 %v3434_v42, %v3433_v15 }
 0x97d   : > { %v3205_v10 = vadd.f32 %v7031_v61, %v3193_v0  ;;  %v3455_v0 = vmul.f32 64.0, %v4299_v14 }
 0x97f   : > { %v3213_v12 = vmul.f32 0.2, %v3205_v10 }
 0x980   : > { %v3076_v7 = vpop.f32.mrf.mxu2  ;;  %v3178_v39 = vpop.f32.mrf.mxu3 }
 0x981   : > { %v3092_v16 = vadd.f32 %v3076_v7, %v2990_v51  ;;  %v7044_v29 = vmax.f32 %v3205_v10, %v3213_v12  ;;  %v3456_v51 = vsub.f32 1.0, %v3455_v0 }
 0x983   : > { %v3436_v25 = vsel %vm754_vm5, %v7044_v29, 0.0  ;;  %v3194_v50 = vadd.f32 %v3178_v39, %v3092_v16  ;;  %v3457_v7 = vmul.f32 %v4299_v14, %v3456_v51 }
 0x984   : > { %v3437_v41 = vadd.f32 %v3436_v25, %v3435_v63  ;;  %v7064_v25 = vpop.f32.mrf.mxu1 }
 0x985   : > { %v3206_v43 = vadd.f32 %v7031_v61, %v3194_v50  ;;  %v3458_v50 = vadd.f32 %v4299_v14, %v3457_v7  ;;  %v4200_v7 = vld [vmem:[%s7152_s12] ss:$0 sm:$0xff] }
 0x987   : > { %v3214_v9 = vmul.f32 0.2, %v3206_v43 }
 0x988   : > { %v3079_v40 = vpop.f32.mrf.mxu2  ;;  %v3181_v1 = vpop.f32.mrf.mxu3 }
 0x989   : > { %v3093_v45 = vadd.f32 %v3079_v40, %v2991_v53  ;;  %v7049_v54 = vmax.f32 %v3206_v43, %v3214_v9 }
 0x98b   : > { %v3438_v6 = vsel %vm754_vm5, %v7049_v54, 0.0  ;;  %v3195_v38 = vadd.f32 %v3181_v1, %v3093_v45 }
 0x98c   : > { %v3439_v32 = vadd.f32 %v3438_v6, %v3437_v41 }
 0x98d   : > { %v3207_v36 = vadd.f32 %v7031_v61, %v3195_v38  ;;  %v3318_v38 = vpop.f32.mrf.mxu1 }
 0x98f   : > { %v3215_v56 = vmul.f32 0.2, %v3207_v36 }
 0x990   : > { %v3081_v37 = vpop.f32.mrf.mxu2  ;;  %v3183_v8 = vpop.f32.mrf.mxu3 }
 0x991   : > { %v3094_v26 = vadd.f32 %v3081_v37, %v2992_v58  ;;  %v3223_v48 = vmax.f32 %v3207_v36, %v3215_v56 }
 0x993   : > { %v3440_v5 = vsel %vm754_vm5, %v3223_v48, 0.0  ;;  %v3196_v30 = vadd.f32 %v3183_v8, %v3094_v26 }
 0x994   : > { %v3441_v23 = vadd.f32 %v3440_v5, %v3439_v32 }
 0x995   : > { %v3208_v27 = vadd.f32 %v7031_v61, %v3196_v30  ;;  %v3321_v30 = vpop.f32.mrf.mxu1 }
 0x997   : > { %v3216_v52 = vmul.f32 0.2, %v3208_v27 }
 0x998   : > { %v3084_v49 = vpop.f32.mrf.mxu2  ;;  %v3186_v46 = vpop.f32.mrf.mxu3 }
 0x999   : > { %v3095_v44 = vadd.f32 %v3084_v49, %v2993_v18  ;;  %v3224_v19 = vmax.f32 %v3208_v27, %v3216_v52 }
 0x99b   : > { %v3442_v31 = vsel %vm754_vm5, %v3224_v19, 0.0  ;;  %v3197_v11 = vadd.f32 %v3186_v46, %v3095_v44 }
 0x99c   : > { %v3443_v17 = vadd.f32 %v3442_v31, %v3441_v23 }
 0x99d   : > { %v3209_v21 = vadd.f32 %v7031_v61, %v3197_v11 }
 0x99f   : > { %v3217_v62 = vmul.f32 0.2, %v3209_v21 }
 0x9a0   : > { %v3086_v3 = vpop.f32.mrf.mxu2  ;;  %v3188_v59 = vpop.f32.mrf.mxu3 }
 0x9a1   : > { %v3096_v4 = vadd.f32 %v3086_v3, %v2994_v33  ;;  %v3225_v55 = vmax.f32 %v3209_v21, %v3217_v62  ;;  %v3323_v21 = vpop.f32.mrf.mxu1 }
 0x9a3   : > { %v3444_v2 = vsel %vm754_vm5, %v3225_v55, 0.0  ;;  %v3198_v22 = vadd.f32 %v3188_v59, %v3096_v4 }
 0x9a4   : > { %v3445_v24 = vadd.f32 %v3444_v2, %v3443_v17 }
 0x9a5   : > { %v3210_v15 = vadd.f32 %v7031_v61, %v3198_v22  ;;  %v3460_v61 = vsel %vm3459_vm0, %v4299_v14, %v3458_v50 }
 0x9a7   : > { %v3218_v42 = vmul.f32 0.2, %v3210_v15 }
 0x9a8   : > { %v7066_v53 = vpop.f32.mrf.mxu2 }
 0x9a9   : > { %v3226_v63 = vmax.f32 %v3210_v15, %v3218_v42  ;;  %v3326_v59 = vpop.f32.mrf.mxu1 }
 0x9ab   : > { %v3446_v10 = vsel %vm754_vm5, %v3226_v63, 0.0 }
 0x9ac   : > { %v3447_v60 = vadd.f32 %v3446_v10, %v3445_v24 }
 0x9ae   : > { %v3448_v12 = vrot.slane %v3447_v60, 4 }
 0x9b0   : > { %v3449_v16 = vadd.f32 %v3448_v12, %v3447_v60  ;;  %v3415_v56 = vpop.f32.mrf.mxu2 }
 0x9b1   : > { %v3328_v0 = vpop.f32.mrf.mxu1 }
 0x9b2   : > { %v3450_v39 = vrot.slane %v3449_v16, 2 }
 0x9b4   : > { %v3451_v41 = vadd.f32 %v3450_v39, %v3449_v16  ;;  %v4201_v16 = vld [vmem:[#allocation12] ss:$0 sm:$0xff] }
 0x9b6   : > { %v3452_v43 = vrot.slane %v3451_v41, 1 }
 0x9b8   : > { %v3453_v9 = vadd.f32 %v3452_v43, %v3451_v41  ;;  %v3418_v49 = vpop.f32.mrf.mxu2  ;;  %v3317_v43 = vadd.f32 %v4200_v7, %v7064_v25 }
 0x9b9   : > { %v3331_v60 = vpop.f32.mrf.mxu1 }
 0x9ba   : > { %v3461_v40 = vmul.f32 %v3460_v61, %v3453_v9 }
 0x9bc   : > { %v7069_v45 = vsub.f32 %v7037_v13, %v3461_v40  ;;  %v7072_v35 = vsub.f32 %v7044_v29, %v3461_v40  ;;  %v7075_v1 = vsub.f32 %v7049_v54, %v3461_v40  ;;  %v7077_v6 = vsub.f32 %v3223_v48, %v3461_v40 }
 0x9bd   : > { %v7080_v32 = vsub.f32 %v7035_v28, %v3461_v40  ;;  %v7082_v36 = vsub.f32 %v3224_v19, %v3461_v40  ;;  %v7084_v58 = vsub.f32 %v3225_v55, %v3461_v40  ;;  %v7099_v23 = vsub.f32 %v3226_v63, %v3461_v40 }
 0x9be   : > { %v3471_v13 = vmul.f32 %v7069_v45, %v7069_v45  ;;  %v3472_v54 = vmul.f32 %v7072_v35, %v7072_v35  ;;  %v3473_v28 = vmul.f32 %v7075_v1, %v7075_v1  ;;  %v3474_v8 = vmul.f32 %v7077_v6, %v7077_v6 }
 0x9bf   : > { %v3470_v29 = vmul.f32 %v7080_v32, %v7080_v32  ;;  %v3475_v27 = vmul.f32 %v7082_v36, %v7082_v36  ;;  %v3476_v44 = vmul.f32 %v7084_v58, %v7084_v58  ;;  %v3477_v46 = vmul.f32 %v7099_v23, %v7099_v23 }
 0x9c0   : > { %v3479_v37 = vsel %vm754_vm5, %v3471_v13, 0.0  ;;  %v3481_v34 = vsel %vm754_vm5, %v3472_v54, 0.0  ;;  %v3483_v18 = vsel %vm754_vm5, %v3473_v28, 0.0  ;;  %v3485_v19 = vsel %vm754_vm5, %v3474_v8, 0.0  ;;  %v3420_v62 = vpop.f32.mrf.mxu2 }
 0x9c1   : > { %v3478_v26 = vsel %vm754_vm5, %v3470_v29, 0.0  ;;  %v3487_v31 = vsel %vm754_vm5, %v3475_v27, 0.0  ;;  %v3489_v17 = vsel %vm754_vm5, %v3476_v44, 0.0  ;;  %v3491_v33 = vsel %vm754_vm5, %v3477_v46, 0.0 }
 0x9c2   : > { %v3480_v48 = vadd.f32 %v3479_v37, %v3478_v26  ;;  %v3319_v40 = vadd.f32 %v4200_v7, %v3318_v38  ;;  %v3416_v13 = vadd.f32 %v4201_v16, %v3415_v56  ;;  %v3322_v29 = vadd.f32 %v4200_v7, %v3321_v30  ;;  %v3333_v38 = vpop.f32.mrf.mxu1 }
 0x9c3   : > { %v3419_v54 = vadd.f32 %v4201_v16, %v3418_v49  ;;  %v3324_v37 = vadd.f32 %v4200_v7, %v3323_v21  ;;  %v3421_v28 = vadd.f32 %v4201_v16, %v3420_v62  ;;  %v3329_v8 = vadd.f32 %v4200_v7, %v3328_v0 }
 0x9c4   : > { %v3482_v5 = vadd.f32 %v3481_v34, %v3480_v48  ;;  %v3327_v48 = vadd.f32 %v4200_v7, %v3326_v59  ;;  %v3332_v34 = vadd.f32 %v4200_v7, %v3331_v60 }
 0x9c6   : > { %v3484_v52 = vadd.f32 %v3483_v18, %v3482_v5 }
 0x9c8   : > { %v3486_v47 = vadd.f32 %v3485_v19, %v3484_v52  ;;  %v3423_v14 = vpop.f32.mrf.mxu2 }
 0x9ca   : > { %v3488_v11 = vadd.f32 %v3487_v31, %v3486_v47 }
 0x9cc   : > { %v3490_v20 = vadd.f32 %v3489_v17, %v3488_v11 }
 0x9ce   : > { %v3492_v57 = vadd.f32 %v3491_v33, %v3490_v20 }
 0x9d0   : > { %v3493_v3 = vrot.slane %v3492_v57, 4  ;;  %v3425_v63 = vpop.f32.mrf.mxu2 }
 0x9d1   : > { %v3426_v17 = vadd.f32 %v4201_v16, %v3425_v63 }
 0x9d2   : > { %v3494_v4 = vadd.f32 %v3493_v3, %v3492_v57 }
 0x9d4   : > { %v3495_v55 = vrot.slane %v3494_v4, 2 }
 0x9d6   : > { %v3496_v2 = vadd.f32 %v3495_v55, %v3494_v4 }
 0x9d8   : > { %v3497_v22 = vrot.slane %v3496_v2, 1  ;;  %v3428_v50 = vpop.f32.mrf.mxu2 }
 0x9d9   : > { %v3429_v21 = vadd.f32 %v4201_v16, %v3428_v50 }
 0x9da   : > { %v3498_v24 = vadd.f32 %v3497_v22, %v3496_v2 }
 0x9dc   : > { %v3499_v15 = vmul.f32 %v3498_v24, %v3460_v61  ;;  %v3414_v61 = vadd.f32 %v4201_v16, %v7066_v53 }
 0x9de   : > { %v3500_v42 = vadd.f32 1e-05, %v3499_v15 }
 0x9e0   : > { %4300 = vrsqrt.f32 %v3500_v42  ;;  %vm3507_vm10 = vweird.f32 %v3500_v42  ;;  %v3430_v11 = vpop.f32.mrf.mxu2 }
 0x9e1   : > { %v3431_v57 = vadd.f32 %v4201_v16, %v3430_v11 }
 0x9e6   : > { %v4301_v10 = vpop.eup %4300 }
 0x9e7   : > { %v3502_v51 = vmul.f32 %v4301_v10, %v3500_v42  ;;  %vm3508_vm9 = vweird.f32 %v4301_v10 }
 0x9e8   : > { %vm3509_vm11 = vmor %vm3507_vm10, %vm3508_vm9 }
 0x9e9   : > { %v3503_v12 = vmul.f32 %v4301_v10, %v3502_v51 }
 0x9eb   : > { %v3504_v39 = vmul.f32 0.5, %v3503_v12 }
 0x9ed   : > { %v3505_v41 = vsub.f32 1.5, %v3504_v39 }
 0x9ef   : > { %v3506_v9 = vmul.f32 %v4301_v10, %v3505_v41 }
 0x9f1   : > { %v3510_v26 = vsel %vm3509_vm11, %v4301_v10, %v3506_v9 }
 0x9f2   : > { %v3511_v5 = vmul.f32 %v3510_v26, %v7080_v32  ;;  %v3512_v25 = vmul.f32 %v3510_v26, %v7069_v45  ;;  %v3513_v53 = vmul.f32 %v3510_v26, %v7072_v35  ;;  %v3514_v27 = vmul.f32 %v3510_v26, %v7075_v1 }
 0x9f3   : > { %v3515_v56 = vmul.f32 %v3510_v26, %v7077_v6  ;;  %v3516_v30 = vmul.f32 %v3510_v26, %v7082_v36  ;;  %v3517_v18 = vmul.f32 %v3510_v26, %v7084_v58  ;;  %v3518_v52 = vmul.f32 %v3510_v26, %v7099_v23 }
 0x9f4   : > { %v3519_v49 = vmul.f32 %v3511_v5, %v3317_v43  ;;  %v3520_v44 = vmul.f32 %v3512_v25, %v3319_v40  ;;  %v3521_v19 = vmul.f32 %v3513_v53, %v3322_v29  ;;  %v3522_v47 = vmul.f32 %v3514_v27, %v3324_v37 }
 0x9f5   : > { %v3523_v45 = vmul.f32 %v3515_v56, %v3327_v48  ;;  %v3424_v35 = vadd.f32 %v4201_v16, %v3423_v14  ;;  %v3524_v1 = vmul.f32 %v3516_v30, %v3329_v8  ;;  %v3334_v32 = vadd.f32 %v4200_v7, %v3333_v38 }
 0x9f6   : > { %v3527_v46 = vadd.f32 %v3519_v49, %v3414_v61  ;;  %v3528_v6 = vadd.f32 %v3520_v44, %v3416_v13  ;;  %v3529_v31 = vadd.f32 %v3521_v19, %v3419_v54  ;;  %v3525_v36 = vmul.f32 %v3517_v18, %v3332_v34 }
 0x9f7   : > { %v3530_v58 = vadd.f32 %v3522_v47, %v3421_v28  ;;  %v3526_v23 = vmul.f32 %v3518_v52, %v3334_v32  ;;  %v3531_v20 = vadd.f32 %v3523_v45, %v3424_v35  ;;  %v3532_v33 = vadd.f32 %v3524_v1, %v3426_v17 }
 0x9f8   : > { %3535 = vst.msk [vmem:[%s618_s26] sm:$0xff] %vm754_vm5, %v3527_v46  ;;  %v3533_v62 = vadd.f32 %v3525_v36, %v3429_v21 }
 0x9f9   : > { %3536 = vst.msk [vmem:[%s618_s26 + $0x8] sm:$0xff] %vm754_vm5, %v3528_v6  ;;  %v3534_v3 = vadd.f32 %v3526_v23, %v3431_v57 }
 0x9fa   : > { %3537 = vst.msk [vmem:[%s618_s26 + $0x10] sm:$0xff] %vm754_vm5, %v3529_v31 }
 0x9fb   : > { %3538 = vst.msk [vmem:[%s618_s26 + $0x18] sm:$0xff] %vm754_vm5, %v3530_v58 }
 0x9fc   : > { %3539 = vst.msk [vmem:[%s618_s26 + $0x20] sm:$0xff] %vm754_vm5, %v3531_v20 }
 0x9fd   : > { %3540 = vst.msk [vmem:[%s618_s26 + $0x28] sm:$0xff] %vm754_vm5, %v3532_v33 }
 0x9fe   : > { %3541 = vst.msk [vmem:[%s618_s26 + $0x30] sm:$0xff] %vm754_vm5, %v3533_v62 }
 0x9ff   : > { %3542 = vst.msk [vmem:[%s618_s26 + $0x38] sm:$0xff] %vm754_vm5, %v3534_v3 }
 0xa00 PF: > { %s7498_s8 = sld [smem:[#allocation17_spill]] }
 0xa06   : > { %s29_s18 = sadd.s32 1, %s7498_s8  }
 0xa07   : > { %p26_p7 = scmp.ge.s32.totalorder %s29_s18, 4  }
 0xa09   :  { %28 = sbr.rel (!%p26_p7) target bundleno = 9 (0x9), region = 146 }
 0xa0e   :  { %3564 = vsyncpa [#allocation3], 1 }
 0xa0f   :  { %3566 = vsyncpa [#allocation3 + $0x1], 1 }
 0xa10   :  { %3567 = vsyncpa [#allocation5], 1 }
 0xa11   :  { %3568 = vsyncpa [#allocation8], 1 }
 0xa12   :  { %3569 = vsyncpa [#allocation11], 1 }

// kernel: generator_forward.7
= control target key start
LH: loop header
LB: loop body
LE: loop exit
PB: predicated region body
PF: predicated region fallthrough
CT: control target
= control target key end

     0   :  { %s3337_s0 = inlined_call_operand.vmem [shape: f32[2,64,128], index: 0, kind: input, shape index: {}]   ;;  %s3338_s1 = inlined_call_operand.vmem [shape: bf16[128,128], index: 1, kind: input, shape index: {}]   ;;  %s3339_s2 = inlined_call_operand.hbm [shape: f32[1,128], index: 2, kind: input, shape index: {}]   ;;  %s3340_s3 = inlined_call_operand.hbm [shape: bf16[128,512], index: 3, kind: input, shape index: {}]   ;;  %s3341_s4 = inlined_call_operand.vmem [shape: f32[1,512], index: 4, kind: input, shape index: {}]   ;;  %s3342_s5 = inlined_call_operand.hbm [shape: bf16[512,256], index: 5, kind: input, shape index: {}]   ;;  %s3343_s6 = inlined_call_operand.hbm [shape: f32[1,256], index: 6, kind: input, shape index: {}]   ;;  %s3344_s7 = inlined_call_operand.vmem [shape: bf16[128,256], index: 7, kind: input, shape index: {}]   ;;  %s3345_s8 = inlined_call_operand.vmem [shape: bf16[256,64], index: 8, kind: input, shape index: {}]   ;;  %s3346_s9 = inlined_call_operand.hbm [shape: f32[1,64], index: 9, kind: input, shape index: {}]   ;;  %s3347_s10 = inlined_call_operand.hbm [shape: f32[3,64], index: 10, kind: input, shape index: {}]   ;;  %s3348_s11 = inlined_call_operand.vmem [shape: f32[3,1], index: 11, kind: input, shape index: {}]   ;;  %s3349_s12 = inlined_call_operand.vmem [shape: f32[2,3,64], index: 12, kind: output, shape index: {}]  }
   0x1   :  { %3350 = sst [smem:[#allocation16_spill]] %s3340_s3 }
   0x2   :  { %17 = vsyncpa [#allocation3], 0 }
   0x3   :  { %18 = vsyncpa [#allocation5], 0 }
   0x4   :  { %19 = vsyncpa [#allocation8], 0 }
   0x5   :  { %20 = vsyncpa [#allocation11], 0  ;;  %s3030_s21 = smov 0  }
   0x6 LB: > { %s3351_s3 = sld [smem:[#allocation16_spill]]  ;;  %s3039_s25 = sadd.s32 4294967295, %s2952_s21   ;;  %s2952_s21 = sphi %s3030_s21, %s26_s21  }
   0x7   : > { %p1946_p0 = scmp.ge.s32.totalorder %s2952_s21, 1  ;;  %p314_p1 = scmp.lt.s32.totalorder %s2952_s21, 3 }
   0x8   : > { %p2707_p2 = scmp.eq.s32.totalorder %s3039_s25, 0  ;;  %s2954_s27 = smov [#allocation4]  }
   0x9   : > { %p3044_p3 = pnand %p1946_p0, %p314_p1  ;;  %s342_s28 = sshll.u32 %s2954_s27, 4  ;;  %s343_s28 = int_to_ptr.vmem [resolvable:$true] %s342_s28 }
   0xa   : > { %s372_s13 = sshll.u32 %s3343_s6, 4  ;;  %s2955_s15 = smov [#allocation7]   ;;  %s373_s13 = int_to_ptr.hbm [resolvable:$true] %s372_s13 }
   0xb   : > { %p2688_p4 = pneg %p3044_p3  ;;  %s374_s16 = sshll.u32 %s2955_s15, 4  ;;  %s375_s16 = int_to_ptr.vmem [resolvable:$true] %s374_s16 }
   0xc   : > { %s340_s24 = sshll.u32 %s3351_s3, 4  ;;  %s329_s19 = sshll.u32 %s3339_s2, 4  ;;  %s341_s24 = int_to_ptr.hbm [resolvable:$true] %s340_s24  ;;  %s330_s19 = int_to_ptr.hbm [resolvable:$true] %s329_s19 }
   0xd   : > { %p3055_p5 = pnand %p2707_p2, %p2688_p4  ;;  %s2956_s20 = smov 256  }
   0xe   : > { %s2957_s22 = smov 16   ;;  %s2958_s23 = smov [#allocation2]  }
   0xf   : > { %2694 = dma.hbm_to_vmem [thread:$0]  (!%p3055_p5), %s341_s24, 4096, %s343_s28, [#allocation5], %s2956_s20, %s2956_s20, %s2957_s22  }
  0x10   : > { %2700 = dma.hbm_to_vmem [thread:$0]  (!%p3055_p5), %s373_s13, 32, %s375_s16, [#allocation8]  }
  0x11   : > { %s331_s27 = sshll.u32 %s2958_s23, 4  ;;  %s357_s3 = sshll.u32 %s3342_s5, 4  ;;  %s332_s27 = int_to_ptr.vmem [resolvable:$true] %s331_s27  ;;  %s358_s3 = int_to_ptr.hbm [resolvable:$true] %s357_s3 }
  0x12   : > { %2691 = dma.hbm_to_vmem [thread:$0]  (!%p3055_p5), %s330_s19, 16, %s332_s27, [#allocation3]  }
  0x13   : > { %s2959_s15 = smov [#allocation6]   ;;  %s390_s28 = sshll.u32 %s3346_s9, 4  ;;  %s391_s28 = int_to_ptr.hbm [resolvable:$true] %s390_s28 }
  0x14   : > { %s359_s17 = sshll.u32 %s2959_s15, 4  ;;  %s2960_s13 = smov 128   ;;  %s360_s17 = int_to_ptr.vmem [resolvable:$true] %s359_s17 }
  0x15   : > { %s2961_s16 = smov 8   ;;  %s2962_s20 = smov [#allocation9]  }
  0x16   : > { %2697 = dma.hbm_to_vmem [thread:$0]  (!%p3055_p5), %s358_s3, 8192, %s360_s17, [#allocation5], %s2960_s13, %s2960_s13, %s2961_s16  }
  0x17   : > { %s392_s22 = sshll.u32 %s2962_s20, 4  ;;  %s402_s30 = sshll.u32 %s3347_s10, 4  ;;  %s393_s22 = int_to_ptr.vmem [resolvable:$true] %s392_s22  ;;  %s403_s30 = int_to_ptr.hbm [resolvable:$true] %s402_s30 }
  0x18   : > { %2703 = dma.hbm_to_vmem [thread:$0]  (!%p3055_p5), %s391_s28, 16, %s393_s22, [#allocation8]  }
  0x19   : > { %s2963_s19 = smov [#allocation10]   ;;  %428 = sbr.rel (%p3044_p3) target bundleno = 884 (0x374), region = 68 }
  0x1a   : > { %s404_s27 = sshll.u32 %s2963_s19, 4  ;;  %s405_s27 = int_to_ptr.vmem [resolvable:$true] %s404_s27 }
  0x1b   : > { %2706 = dma.hbm_to_vmem [thread:$0]  (!%p3055_p5), %s403_s30, 64, %s405_s27, [#allocation11]  }
  0x1e   : > { %2935 = dma.done.wait (%p2707_p2), [#allocation3], 16  }
  0x1f   : > { %2937 = vsyncadd (%p2707_p2), [#allocation3], 4294967280 }
  0x20   : > { %2939 = dma.done.wait (%p2707_p2), [#allocation5], 12288  }
  0x21   : > { %2941 = vsyncadd (%p2707_p2), [#allocation5], 4294955008 }
  0x22   : > { %2943 = dma.done.wait (%p2707_p2), [#allocation8], 48  }
  0x23   : > { %2945 = vsyncadd (%p2707_p2), [#allocation8], 4294967248 }
  0x24   : > { %2947 = dma.done.wait (%p2707_p2), [#allocation11], 64  }
  0x25   : > { %2949 = vsyncadd (%p2707_p2), [#allocation11], 4294967232  ;;  %p495_p6 = scmp.lt.s32.totalorder %s3039_s25, 1  ;;  %v2527_v0 = vld [vmem:[%s3338_s1 + $0x38] sm:$0xff]  ;;  %v2526_v1 = vld [vmem:[%s3338_s1 + $0x30] sm:$0xff]  ;;  %vm1780_vm0 = vcmask 523264  }
  0x26   : > { %591 = vmatpush.bf16.msra.mxu0 %v2527_v0  ;;  %v2525_v6 = vld [vmem:[%s3338_s1 + $0x28] sm:$0xff]  ;;  %v2110_v14 = vld [vmem:[#allocation4 + $0xe0] sm:$0xf]  ;;  %v2558_v15 = vld [vmem:[#allocation4 + $0xec] sm:$0xf0]  ;;  %vm1829_vm1 = vcmask 518144  }
  0x27   : > { %s3355_s25 = smov (!%p495_p6, %s3039_s25), 1  ;;  %v2111_v17 = vor.u32 %v2558_v15, %v2110_v14  ;;  %v2556_v18 = vld [vmem:[#allocation4 + $0xe4] sm:$0xf]  ;;  %v2112_v19 = vld [vmem:[#allocation4 + $0xf0] sm:$0xf0] }
  0x28   : > { %s2519_s3 = sshll.u32 %s3355_s25, 6  ;;  %v2118_v20 = vld [vmem:[#allocation4 + $0xe8] sm:$0xf]  ;;  %v2115_v22 = vor.u32 %v2556_v18, %v2112_v19  ;;  %v2559_v23 = vld [vmem:[#allocation4 + $0xf4] sm:$0xf0]  ;;  %v2524_v33 = vld [vmem:[%s3338_s1 + $0x20] sm:$0xff] }
  0x29   : > { %s3109_s15 = scalar_lea.vmem %s3337_s0, %s2519_s3  ;;  %809 = vmatpush.bf16.msra.mxu1 %v2111_v17  ;;  %v2119_v25 = vor.u32 %v2559_v23, %v2118_v20  ;;  %v2094_v26 = vld [vmem:[#allocation4 + $0xc0] sm:$0xf]  ;;  %v2554_v27 = vld [vmem:[#allocation4 + $0xcc] sm:$0xf0]  ;;  %v2552_v28 = vld [vmem:[#allocation4 + $0xc4] sm:$0xf] }
  0x2a   : > { %v504_v2 = vld [vmem:[%s3109_s15] sm:$0xff]  ;;  %v505_v3 = vld [vmem:[%s3109_s15 + $0x8] sm:$0xff]  ;;  %v506_v4 = vld [vmem:[%s3109_s15 + $0x10] sm:$0xff]  ;;  %592 = vmatpush.bf16.msra.mxu0 %v2526_v1  ;;  %822 = vmatpush.bf16.msra.mxu2 %v2115_v22  ;;  %v2095_v29 = vor.u32 %v2554_v27, %v2094_v26  ;;  %s1963_s24 = sshll.u32 %s3355_s25, 2 }
  0x2b   : > { %v507_v5 = vld [vmem:[%s3109_s15 + $0x18] sm:$0xff]  ;;  %v508_v7 = vld [vmem:[%s3109_s15 + $0x20] sm:$0xff]  ;;  %v509_v8 = vld [vmem:[%s3109_s15 + $0x28] sm:$0xff]  ;;  %835 = vmatpush.bf16.msra.mxu3 %v2119_v25  ;;  %s503_s16 = scalar_lea.vmem %s3349_s12, %s1963_s24 }
  0x2c   : > { %v510_v9 = vld [vmem:[%s3109_s15 + $0x30] sm:$0xff]  ;;  %v511_v10 = vld [vmem:[%s3109_s15 + $0x38] sm:$0xff]  ;;  %v512_v11 = vmax.f32 %v504_v2, %v508_v7  ;;  %v513_v12 = vmax.f32 %v505_v3, %v509_v8  ;;  %v2102_v31 = vld [vmem:[#allocation4 + $0xc8] sm:$0xf] }
  0x2d   : > { %v514_v13 = vmax.f32 %v506_v4, %v510_v9  ;;  %v515_v16 = vmax.f32 %v507_v5, %v511_v10  ;;  %v2096_v30 = vld [vmem:[#allocation4 + $0xd0] sm:$0xf0]  ;;  %v2555_v32 = vld [vmem:[#allocation4 + $0xd4] sm:$0xf0]  ;;  %v2078_v37 = vld [vmem:[#allocation4 + $0xa0] sm:$0xf]  ;;  %810 = vmatpush.bf16.msra.mxu1 %v2095_v29 }
  0x2e   : > { %v516_v21 = vmax.f32 %v512_v11, %v513_v12  ;;  %593 = vmatpush.bf16.msra.mxu0 %v2525_v6  ;;  %v2099_v35 = vor.u32 %v2552_v28, %v2096_v30  ;;  %v2103_v36 = vor.u32 %v2555_v32, %v2102_v31  ;;  %v2550_v38 = vld [vmem:[#allocation4 + $0xac] sm:$0xf0]  ;;  %v2548_v39 = vld [vmem:[#allocation4 + $0xa4] sm:$0xf]  ;;  %v2080_v40 = vld [vmem:[#allocation4 + $0xb0] sm:$0xf0] }
  0x2f   : > { %v517_v24 = vmax.f32 %v514_v13, %v515_v16  ;;  %v2079_v42 = vor.u32 %v2550_v38, %v2078_v37  ;;  %v2086_v43 = vld [vmem:[#allocation4 + $0xa8] sm:$0xf]  ;;  %v2551_v44 = vld [vmem:[#allocation4 + $0xb4] sm:$0xf0]  ;;  %v2083_v46 = vor.u32 %v2548_v39, %v2080_v40  ;;  %v2062_v47 = vld [vmem:[#allocation4 + $0x80] sm:$0xf] }
  0x30   : > { %v2523_v45 = vld [vmem:[%s3338_s1 + $0x18] sm:$0xff]  ;;  %823 = vmatpush.bf16.msra.mxu2 %v2099_v35  ;;  %836 = vmatpush.bf16.msra.mxu3 %v2103_v36  ;;  %v2087_v49 = vor.u32 %v2551_v44, %v2086_v43  ;;  %v2546_v50 = vld [vmem:[#allocation4 + $0x8c] sm:$0xf0]  ;;  %v2544_v51 = vld [vmem:[#allocation4 + $0x84] sm:$0xf] }
  0x31   : > { %v518_v34 = vmax.f32 %v516_v21, %v517_v24  ;;  %v2064_v52 = vld [vmem:[#allocation4 + $0x90] sm:$0xf0]  ;;  %v2070_v53 = vld [vmem:[#allocation4 + $0x88] sm:$0xf]  ;;  %v2547_v54 = vld [vmem:[#allocation4 + $0x94] sm:$0xf0]  ;;  %811 = vmatpush.bf16.msra.mxu1 %v2079_v42  ;;  %v2063_v56 = vor.u32 %v2546_v50, %v2062_v47 }
  0x32   : > { %594 = vmatpush.bf16.msra.mxu0 %v2524_v33  ;;  %v2067_v57 = vor.u32 %v2544_v51, %v2064_v52  ;;  %v2046_v58 = vld [vmem:[#allocation4 + $0x60] sm:$0xf]  ;;  %v2542_v59 = vld [vmem:[#allocation4 + $0x6c] sm:$0xf0]  ;;  %v2071_v62 = vor.u32 %v2547_v54, %v2070_v53  ;;  %v2540_v63 = vld [vmem:[#allocation4 + $0x64] sm:$0xf] }
  0x33   : > { %v519_v41 = vrot.slane %v518_v34, 4  ;;  %v2522_v60 = vld [vmem:[%s3338_s1 + $0x10] sm:$0xff]  ;;  %v2054_v1 = vld [vmem:[#allocation4 + $0x68] sm:$0xf]  ;;  %v2543_v2 = vld [vmem:[#allocation4 + $0x74] sm:$0xf0]  ;;  %v2047_v3 = vor.u32 %v2542_v59, %v2046_v58 }
  0x34   : > { %824 = vmatpush.bf16.msra.mxu2 %v2083_v46  ;;  %837 = vmatpush.bf16.msra.mxu3 %v2087_v49  ;;  %v2048_v0 = vld [vmem:[#allocation4 + $0x70] sm:$0xf0]  ;;  %v2521_v4 = vld [vmem:[%s3338_s1 + $0x8] sm:$0xff]  ;;  %v2030_v7 = vld [vmem:[#allocation4 + $0x40] sm:$0xf]  ;;  %v2055_v9 = vor.u32 %v2543_v2, %v2054_v1 }
  0x35   : > { %v520_v48 = vmax.f32 %v518_v34, %v519_v41  ;;  %812 = vmatpush.bf16.msra.mxu1 %v2063_v56  ;;  %v2051_v6 = vor.u32 %v2540_v63, %v2048_v0  ;;  %v2538_v8 = vld [vmem:[#allocation4 + $0x4c] sm:$0xf0]  ;;  %v2536_v10 = vld [vmem:[#allocation4 + $0x44] sm:$0xf]  ;;  %v2032_v11 = vld [vmem:[#allocation4 + $0x50] sm:$0xf0] }
  0x36   : > { %595 = vmatpush.bf16.msra.mxu0 %v2523_v45  ;;  %v2038_v12 = vld [vmem:[#allocation4 + $0x48] sm:$0xf]  ;;  %v2539_v13 = vld [vmem:[#allocation4 + $0x54] sm:$0xf0]  ;;  %v2557_v14 = vld [vmem:[#allocation4 + $0xec] sm:$0xf]  ;;  %v2031_v16 = vor.u32 %v2538_v8, %v2030_v7  ;;  %v2035_v18 = vor.u32 %v2536_v10, %v2032_v11 }
  0x37   : > { %v521_v55 = vrot.slane %v520_v48, 2  ;;  %v2120_v15 = vld [vmem:[#allocation4 + $0xf8] sm:$0xf0]  ;;  %v2039_v20 = vor.u32 %v2539_v13, %v2038_v12  ;;  %v2553_v22 = vld [vmem:[#allocation4 + $0xcc] sm:$0xf] }
  0x38   : > { %825 = vmatpush.bf16.msra.mxu2 %v2067_v57  ;;  %838 = vmatpush.bf16.msra.mxu3 %v2071_v62  ;;  %v2520_v19 = vld [vmem:[%s3338_s1] sm:$0xff]  ;;  %v2123_v21 = vor.u32 %v2557_v14, %v2120_v15  ;;  %v2549_v26 = vld [vmem:[#allocation4 + $0xac] sm:$0xf]  ;;  %v2534_v39 = vld [vmem:[#allocation4 + $0x2c] sm:$0xf0] }
  0x39   : > { %v522_v61 = vmax.f32 %v520_v48, %v521_v55  ;;  %813 = vmatpush.bf16.msra.mxu1 %v2047_v3  ;;  %v2104_v23 = vld [vmem:[#allocation4 + $0xd8] sm:$0xf0]  ;;  %v2545_v29 = vld [vmem:[#allocation4 + $0x8c] sm:$0xf]  ;;  %v2014_v38 = vld [vmem:[#allocation4 + $0x20] sm:$0xf] }
  0x3a   : > { %596 = vmatpush.bf16.msra.mxu0 %v2522_v60  ;;  %v2107_v25 = vor.u32 %v2553_v22, %v2104_v23  ;;  %v2088_v27 = vld [vmem:[#allocation4 + $0xb8] sm:$0xf0]  ;;  %v2541_v32 = vld [vmem:[#allocation4 + $0x6c] sm:$0xf]  ;;  %v2532_v40 = vld [vmem:[#allocation4 + $0x24] sm:$0xf]  ;;  %v2015_v41 = vor.u32 %v2534_v39, %v2014_v38 }
  0x3b   : > { %v523_v5 = vrot.slane %v522_v61, 1  ;;  %v2091_v28 = vor.u32 %v2549_v26, %v2088_v27  ;;  %v2072_v30 = vld [vmem:[#allocation4 + $0x98] sm:$0xf0]  ;;  %v2537_v35 = vld [vmem:[#allocation4 + $0x4c] sm:$0xf] }
  0x3c   : > { %826 = vmatpush.bf16.msra.mxu2 %v2051_v6  ;;  %839 = vmatpush.bf16.msra.mxu3 %v2055_v9  ;;  %v2075_v31 = vor.u32 %v2545_v29, %v2072_v30  ;;  %v2056_v33 = vld [vmem:[#allocation4 + $0x78] sm:$0xf0]  ;;  %v2016_v42 = vld [vmem:[#allocation4 + $0x30] sm:$0xf0]  ;;  %v2022_v43 = vld [vmem:[#allocation4 + $0x28] sm:$0xf] }
  0x3d   : > { %v524_v17 = vmax.f32 %v522_v61, %v523_v5  ;;  %814 = vmatpush.bf16.msra.mxu1 %v2031_v16  ;;  %v2059_v34 = vor.u32 %v2541_v32, %v2056_v33  ;;  %v2040_v36 = vld [vmem:[#allocation4 + $0x58] sm:$0xf0]  ;;  %v2535_v44 = vld [vmem:[#allocation4 + $0x34] sm:$0xf0]  ;;  %v2019_v45 = vor.u32 %v2532_v40, %v2016_v42  ;;  %v2533_v47 = vld [vmem:[#allocation4 + $0x2c] sm:$0xf] }
  0x3e   : > { %597 = vmatpush.bf16.msra.mxu0 %v2521_v4  ;;  %v2043_v37 = vor.u32 %v2537_v35, %v2040_v36  ;;  %v2023_v46 = vor.u32 %v2535_v44, %v2022_v43  ;;  %v2024_v48 = vld [vmem:[#allocation4 + $0x38] sm:$0xf0]  ;;  %v1998_v50 = vld [vmem:[#allocation4] sm:$0xf]  ;;  %v2530_v51 = vld [vmem:[#allocation4 + $0xc] sm:$0xf0] }
  0x3f   : > { %v541_v24 = vpack.c.bf16 %v524_v17, %v524_v17  ;;  %v2027_v49 = vor.u32 %v2533_v47, %v2024_v48  ;;  %v2528_v52 = vld [vmem:[#allocation4 + $0x4] sm:$0xf]  ;;  %v1999_v53 = vor.u32 %v2530_v51, %v1998_v50  ;;  %v2000_v54 = vld [vmem:[#allocation4 + $0x10] sm:$0xf0]  ;;  %v2006_v55 = vld [vmem:[#allocation4 + $0x8] sm:$0xf] }
  0x40   : > { %827 = vmatpush.bf16.msra.mxu2 %v2035_v18  ;;  %840 = vmatpush.bf16.msra.mxu3 %v2039_v20  ;;  %v2531_v56 = vld [vmem:[#allocation4 + $0x14] sm:$0xf0]  ;;  %v2003_v57 = vor.u32 %v2528_v52, %v2000_v54  ;;  %v2529_v59 = vld [vmem:[#allocation4 + $0xc] sm:$0xf]  ;;  %v2008_v60 = vld [vmem:[#allocation4 + $0x18] sm:$0xf0] }
  0x41   : > { %815 = vmatpush.bf16.msra.mxu1 %v2015_v41  ;;  %v2007_v58 = vor.u32 %v2531_v56, %v2006_v55  ;;  %v2011_v61 = vor.u32 %v2529_v59, %v2008_v60  ;;  %v2182_v62 = vld [vmem:[#allocation6 + $0x70] sm:$0xf]  ;;  %v2575_v63 = vld [vmem:[#allocation6 + $0x74] sm:$0xf0]  ;;  %v2174_v0 = vld [vmem:[#allocation6 + $0x60] sm:$0xf] }
  0x42   : > { %598 = vmatpush.bf16.msra.mxu0 %v2520_v19  ;;  %v2183_v1 = vor.u32 %v2575_v63, %v2182_v62  ;;  %v2573_v2 = vld [vmem:[#allocation6 + $0x64] sm:$0xf0]  ;;  %v2246_v3 = vld [vmem:[#allocation6 + $0xf0] sm:$0xf]  ;;  %v2591_v4 = vld [vmem:[#allocation6 + $0xf4] sm:$0xf0] }
  0x43   : > { %v2247_v5 = vor.u32 %v2591_v4, %v2246_v3  ;;  %v2238_v6 = vld [vmem:[#allocation6 + $0xe0] sm:$0xf]  ;;  %v2175_v7 = vor.u32 %v2573_v2, %v2174_v0  ;;  %v2166_v8 = vld [vmem:[#allocation6 + $0x50] sm:$0xf]  ;;  %v2589_v9 = vld [vmem:[#allocation6 + $0xe4] sm:$0xf0] }
  0x44   : > { %828 = vmatpush.bf16.msra.mxu2 %v2019_v45  ;;  %841 = vmatpush.bf16.msra.mxu3 %v2023_v46  ;;  %v2571_v10 = vld [vmem:[#allocation6 + $0x54] sm:$0xf0]  ;;  %v2239_v11 = vor.u32 %v2589_v9, %v2238_v6  ;;  %v2374_v12 = vld [vmem:[#allocation6 + $0x1f0] sm:$0xf]  ;;  %v2366_v17 = vld [vmem:[#allocation6 + $0x1e0] sm:$0xf] }
  0x45   : > { %599 = vmatmul.bf16.vlgmr.msra.gmra.mxu0 %v541_v24  ;;  %816 = vmatpush.bf16.msra.mxu1 %v1999_v53  ;;  %v2623_v13 = vld [vmem:[#allocation6 + $0x1f4] sm:$0xf0]  ;;  %v2230_v15 = vld [vmem:[#allocation6 + $0xd0] sm:$0xf]  ;;  %v2621_v18 = vld [vmem:[#allocation6 + $0x1e4] sm:$0xf0]  ;;  %v2167_v19 = vor.u32 %v2571_v10, %v2166_v8 }
  0x46   : > { %848 = vmatpush.bf16.msrb.mxu0 %v2123_v21  ;;  %v2375_v14 = vor.u32 %v2623_v13, %v2374_v12  ;;  %v2587_v16 = vld [vmem:[#allocation6 + $0xd4] sm:$0xf0]  ;;  %v2367_v20 = vor.u32 %v2621_v18, %v2366_v17  ;;  %v2310_v21 = vld [vmem:[#allocation6 + $0x170] sm:$0xf]  ;;  %v2158_v23 = vld [vmem:[#allocation6 + $0x40] sm:$0xf] }
  0x47   : > { %v2607_v22 = vld [vmem:[#allocation6 + $0x174] sm:$0xf0]  ;;  %v2569_v24 = vld [vmem:[#allocation6 + $0x44] sm:$0xf0]  ;;  %v2358_v27 = vld [vmem:[#allocation6 + $0x1d0] sm:$0xf] }
  0x48   : > { %829 = vmatpush.bf16.msra.mxu2 %v2003_v57  ;;  %842 = vmatpush.bf16.msra.mxu3 %v2007_v58  ;;  %v2311_v26 = vor.u32 %v2607_v22, %v2310_v21  ;;  %v2585_v29 = vld [vmem:[#allocation6 + $0xc4] sm:$0xf0]  ;;  %v2619_v30 = vld [vmem:[#allocation6 + $0x1d4] sm:$0xf0]  ;;  %v2159_v33 = vor.u32 %v2569_v24, %v2158_v23  ;;  %v2350_v39 = vld [vmem:[#allocation6 + $0x1c0] sm:$0xf] }
  0x49   : > { %1263 = vmatpush.bf16.msrb.mxu1 %v2183_v1  ;;  %v2605_v32 = vld [vmem:[#allocation6 + $0x164] sm:$0xf0]  ;;  %v2567_v35 = vld [vmem:[#allocation6 + $0x34] sm:$0xf0]  ;;  %v2359_v36 = vor.u32 %v2619_v30, %v2358_v27  ;;  %v2294_v41 = vld [vmem:[#allocation6 + $0x150] sm:$0xf] }
  0x4a   : > { %849 = vmatpush.bf16.msrb.mxu0 %v2107_v25  ;;  %v2231_v25 = vor.u32 %v2587_v16, %v2230_v15  ;;  %v2617_v40 = vld [vmem:[#allocation6 + $0x1c4] sm:$0xf0]  ;;  %v2214_v42 = vld [vmem:[#allocation6 + $0xb0] sm:$0xf]  ;;  %v2583_v43 = vld [vmem:[#allocation6 + $0xb4] sm:$0xf0] }
  0x4b   : > { %v2603_v44 = vld [vmem:[#allocation6 + $0x154] sm:$0xf0]  ;;  %v2142_v47 = vld [vmem:[#allocation6 + $0x20] sm:$0xf]  ;;  %v2565_v48 = vld [vmem:[#allocation6 + $0x24] sm:$0xf0]  ;;  %v2215_v51 = vor.u32 %v2583_v43, %v2214_v42 }
  0x4c   : > { %1276 = vmatpush.bf16.msrb.mxu2 %v2247_v5  ;;  %1289 = vmatpush.bf16.msrb.mxu3 %v2311_v26  ;;  %v2295_v45 = vor.u32 %v2603_v44, %v2294_v41  ;;  %v2342_v50 = vld [vmem:[#allocation6 + $0x1b0] sm:$0xf]  ;;  %v2615_v52 = vld [vmem:[#allocation6 + $0x1b4] sm:$0xf0]  ;;  %v2286_v53 = vld [vmem:[#allocation6 + $0x140] sm:$0xf]  ;;  %v2143_v59 = vor.u32 %v2565_v48, %v2142_v47 }
  0x4d   : > { %1264 = vmatpush.bf16.msrb.mxu1 %v2175_v7  ;;  %v2601_v54 = vld [vmem:[#allocation6 + $0x144] sm:$0xf0]  ;;  %v2206_v55 = vld [vmem:[#allocation6 + $0xa0] sm:$0xf]  ;;  %v542_v57 = vld [vmem:[#allocation2] sm:$0x1] }
  0x4e   : > { %850 = vmatpush.bf16.msrb.mxu0 %v2091_v28  ;;  %v2222_v28 = vld [vmem:[#allocation6 + $0xc0] sm:$0xf]  ;;  %v2581_v56 = vld [vmem:[#allocation6 + $0xa4] sm:$0xf0]  ;;  %v2287_v58 = vor.u32 %v2601_v54, %v2286_v53  ;;  %v2134_v60 = vld [vmem:[#allocation6 + $0x10] sm:$0xf] }
  0x4f   : > { %v2223_v38 = vor.u32 %v2585_v29, %v2222_v28  ;;  %v2278_v62 = vld [vmem:[#allocation6 + $0x130] sm:$0xf]  ;;  %v2599_v63 = vld [vmem:[#allocation6 + $0x134] sm:$0xf0]  ;;  %v2207_v1 = vor.u32 %v2581_v56, %v2206_v55  ;;  %v2334_v2 = vld [vmem:[#allocation6 + $0x1a0] sm:$0xf] }
  0x50   : > { %1277 = vmatpush.bf16.msrb.mxu2 %v2239_v11  ;;  %v2563_v0 = vld [vmem:[#allocation6 + $0x14] sm:$0xf0]  ;;  %v2613_v3 = vld [vmem:[#allocation6 + $0x1a4] sm:$0xf0]  ;;  %v2198_v4 = vld [vmem:[#allocation6 + $0x90] sm:$0xf]  ;;  %v2279_v7 = vor.u32 %v2599_v63, %v2278_v62 }
  0x51   : > { %1265 = vmatpush.bf16.msrb.mxu1 %v2167_v19  ;;  %v2579_v5 = vld [vmem:[#allocation6 + $0x94] sm:$0xf0]  ;;  %v2135_v9 = vor.u32 %v2563_v0, %v2134_v60  ;;  %v2335_v10 = vor.u32 %v2613_v3, %v2334_v2  ;;  %v2270_v11 = vld [vmem:[#allocation6 + $0x120] sm:$0xf]  ;;  %v2597_v12 = vld [vmem:[#allocation6 + $0x124] sm:$0xf0] }
  0x52   : > { %851 = vmatpush.bf16.msrb.mxu0 %v2075_v31  ;;  %v2302_v31 = vld [vmem:[#allocation6 + $0x160] sm:$0xf]  ;;  %v2561_v16 = vld [vmem:[#allocation6 + $0x4] sm:$0xf0]  ;;  %v2574_v17 = vld [vmem:[#allocation6 + $0x74] sm:$0xf]  ;;  %v2271_v21 = vor.u32 %v2597_v12, %v2270_v11 }
  0x53   : > { %v2126_v13 = vld [vmem:[#allocation6] sm:$0xf]  ;;  %v2184_v18 = vld [vmem:[#allocation6 + $0x78] sm:$0xf0]  ;;  %v2590_v23 = vld [vmem:[#allocation6 + $0xf4] sm:$0xf] }
  0x54   : > { %1278 = vmatpush.bf16.msrb.mxu2 %v2231_v25  ;;  %v2190_v19 = vld [vmem:[#allocation6 + $0x80] sm:$0xf]  ;;  %v2248_v24 = vld [vmem:[#allocation6 + $0xf8] sm:$0xf0]  ;;  %v2326_v25 = vld [vmem:[#allocation6 + $0x190] sm:$0xf]  ;;  %v2127_v30 = vor.u32 %v2561_v16, %v2126_v13 }
  0x55   : > { %1266 = vmatpush.bf16.msrb.mxu1 %v2159_v33  ;;  %v2611_v26 = vld [vmem:[#allocation6 + $0x194] sm:$0xf0]  ;;  %v2262_v27 = vld [vmem:[#allocation6 + $0x110] sm:$0xf]  ;;  %v2187_v33 = vor.u32 %v2574_v17, %v2184_v18  ;;  %v2609_v42 = vld [vmem:[#allocation6 + $0x184] sm:$0xf0] }
  0x56   : > { %852 = vmatpush.bf16.msrb.mxu0 %v2059_v34  ;;  %v2150_v34 = vld [vmem:[#allocation6 + $0x30] sm:$0xf]  ;;  %v2595_v28 = vld [vmem:[#allocation6 + $0x114] sm:$0xf0]  ;;  %v2254_v43 = vld [vmem:[#allocation6 + $0x100] sm:$0xf] }
  0x57   : > { %v2151_v46 = vor.u32 %v2567_v35, %v2150_v34  ;;  %v2572_v34 = vld [vmem:[#allocation6 + $0x64] sm:$0xf]  ;;  %v2176_v35 = vld [vmem:[#allocation6 + $0x68] sm:$0xf0]  ;;  %v2263_v41 = vor.u32 %v2595_v28, %v2262_v27  ;;  %v2593_v44 = vld [vmem:[#allocation6 + $0x104] sm:$0xf0] }
  0x58   : > { %1279 = vmatpush.bf16.msrb.mxu2 %v2223_v38  ;;  %v2588_v38 = vld [vmem:[#allocation6 + $0xe4] sm:$0xf]  ;;  %v2179_v47 = vor.u32 %v2572_v34, %v2176_v35  ;;  %v2570_v48 = vld [vmem:[#allocation6 + $0x54] sm:$0xf]  ;;  %v2232_v53 = vld [vmem:[#allocation6 + $0xd8] sm:$0xf0]  ;;  %v2255_v54 = vor.u32 %v2593_v44, %v2254_v43 }
  0x59   : > { %1267 = vmatpush.bf16.msrb.mxu1 %v2151_v46  ;;  %v2376_v46 = vld [vmem:[#allocation6 + $0x1f8] sm:$0xf0]  ;;  %v2620_v56 = vld [vmem:[#allocation6 + $0x1e4] sm:$0xf]  ;;  %v2224_v63 = vld [vmem:[#allocation6 + $0xc8] sm:$0xf0] }
  0x5a   : > { %853 = vmatpush.bf16.msrb.mxu0 %v2043_v37  ;;  %v2303_v37 = vor.u32 %v2605_v32, %v2302_v31  ;;  %v2584_v62 = vld [vmem:[#allocation6 + $0xc4] sm:$0xf]  ;;  %v2566_v3 = vld [vmem:[#allocation6 + $0x34] sm:$0xf]  ;;  %v2360_v13 = vld [vmem:[#allocation6 + $0x1d8] sm:$0xf0] }
  0x5b   : > { %v2227_v2 = vor.u32 %v2584_v62, %v2224_v63  ;;  %v2618_v12 = vld [vmem:[#allocation6 + $0x1d4] sm:$0xf]  ;;  %v2216_v16 = vld [vmem:[#allocation6 + $0xb8] sm:$0xf0]  ;;  %v2604_v18 = vld [vmem:[#allocation6 + $0x164] sm:$0xf] }
  0x5c   : > { %1290 = vmatpush.bf16.msrb.mxu3 %v2303_v37  ;;  %1280 = vmatpush.bf16.msrb.mxu2 %v2215_v51  ;;  %v2327_v37 = vor.u32 %v2611_v26, %v2326_v25  ;;  %v2352_v25 = vld [vmem:[#allocation6 + $0x1c8] sm:$0xf0]  ;;  %v2580_v27 = vld [vmem:[#allocation6 + $0xa4] sm:$0xf]  ;;  %v2594_v63 = vld [vmem:[#allocation6 + $0x114] sm:$0xf] }
  0x5d   : > { %1268 = vmatpush.bf16.msrb.mxu1 %v2143_v59  ;;  %v2568_v59 = vld [vmem:[#allocation6 + $0x44] sm:$0xf]  ;;  %v2208_v28 = vld [vmem:[#allocation6 + $0xa8] sm:$0xf0] }
  0x5e   : > { %854 = vmatpush.bf16.msrb.mxu0 %v2027_v49  ;;  %v2351_v49 = vor.u32 %v2617_v40, %v2350_v39  ;;  %v2240_v39 = vld [vmem:[#allocation6 + $0xe8] sm:$0xf0]  ;;  %v2318_v40 = vld [vmem:[#allocation6 + $0x180] sm:$0xf] }
  0x5f   : > { %v2319_v51 = vor.u32 %v2609_v42, %v2318_v40  ;;  %v2128_v34 = vld [vmem:[#allocation6 + $0x8] sm:$0xf0]  ;;  %v2200_v40 = vld [vmem:[#allocation6 + $0x98] sm:$0xf0]  ;;  %v2600_v42 = vld [vmem:[#allocation6 + $0x144] sm:$0xf] }
  0x60   : > { %1291 = vmatpush.bf16.msrb.mxu3 %v2295_v45  ;;  %1281 = vmatpush.bf16.msrb.mxu2 %v2207_v1  ;;  %v2622_v45 = vld [vmem:[#allocation6 + $0x1f4] sm:$0xf]  ;;  %v2288_v43 = vld [vmem:[#allocation6 + $0x148] sm:$0xf0] }
  0x61   : > { %1269 = vmatpush.bf16.msrb.mxu1 %v2135_v9  ;;  %v2379_v55 = vor.u32 %v2622_v45, %v2376_v46  ;;  %v2564_v9 = vld [vmem:[#allocation6 + $0x24] sm:$0xf]  ;;  %v2291_v44 = vor.u32 %v2600_v42, %v2288_v43  ;;  %v2336_v46 = vld [vmem:[#allocation6 + $0x1a8] sm:$0xf0] }
  0x62   : > { %855 = vmatpush.bf16.msrb.mxu0 %v2011_v61  ;;  %v2343_v61 = vor.u32 %v2615_v52, %v2342_v50  ;;  %v2168_v50 = vld [vmem:[#allocation6 + $0x58] sm:$0xf0]  ;;  %v2586_v52 = vld [vmem:[#allocation6 + $0xd4] sm:$0xf]  ;;  %v2612_v45 = vld [vmem:[#allocation6 + $0x1a4] sm:$0xf] }
  0x63   : > { %v2235_v60 = vor.u32 %v2586_v52, %v2232_v53  ;;  %v2280_v52 = vld [vmem:[#allocation6 + $0x138] sm:$0xf0]  ;;  %v2636_v42 = vld [vmem:[%s3344_s7 + $0x64] sm:$0xf]  ;;  %v2432_v43 = vld [vmem:[%s3344_s7 + $0x68] sm:$0xf0] }
  0x64   : > { %1292 = vmatpush.bf16.msrb.mxu3 %v2287_v58  ;;  %v2171_v58 = vor.u32 %v2570_v48, %v2168_v50  ;;  %v2576_v48 = vld [vmem:[#allocation6 + $0x84] sm:$0xf] }
  0x65   : > { %1270 = vmatpush.bf16.msrb.mxu1 %v2127_v30  ;;  %v2602_v30 = vld [vmem:[#allocation6 + $0x154] sm:$0xf] }
  0x66   : > { %1302 = vmatpush.bf16.msra.mxu0 %v2375_v14  ;;  %v2199_v14 = vor.u32 %v2579_v5, %v2198_v4  ;;  %v2152_v4 = vld [vmem:[#allocation6 + $0x38] sm:$0xf0] }
  0x67   : > { %v2155_v5 = vor.u32 %v2566_v3, %v2152_v4  ;;  %v2592_v3 = vld [vmem:[#allocation6 + $0x104] sm:$0xf]  ;;  %v2256_v4 = vld [vmem:[#allocation6 + $0x108] sm:$0xf0] }
  0x68   : > { %1293 = vmatpush.bf16.msrb.mxu3 %v2279_v7  ;;  %1282 = vmatpush.bf16.msrb.mxu2 %v2199_v14  ;;  %v2312_v7 = vld [vmem:[#allocation6 + $0x178] sm:$0xf0]  ;;  %v2363_v14 = vor.u32 %v2618_v12, %v2360_v13 }
  0x6a   : > { %1303 = vmatpush.bf16.msra.mxu0 %v2367_v20  ;;  %v2577_v20 = vld [vmem:[#allocation6 + $0x84] sm:$0xf0] }
  0x6b   : > { %v2191_v31 = vor.u32 %v2577_v20, %v2190_v19  ;;  %v2304_v19 = vld [vmem:[#allocation6 + $0x168] sm:$0xf0] }
  0x6c   : > { %1294 = vmatpush.bf16.msrb.mxu3 %v2271_v21  ;;  %v2307_v20 = vor.u32 %v2604_v18, %v2304_v19  ;;  %v2562_v21 = vld [vmem:[#allocation6 + $0x14] sm:$0xf] }
  0x6d   : > { %1283 = vmatpush.bf16.msrb.mxu2 %v2191_v31  ;;  %v2296_v31 = vld [vmem:[#allocation6 + $0x158] sm:$0xf0] }
  0x6e   : > { %1304 = vmatpush.bf16.msra.mxu0 %v2359_v36  ;;  %v2251_v36 = vor.u32 %v2590_v23, %v2248_v24  ;;  %v2616_v24 = vld [vmem:[#allocation6 + $0x1c4] sm:$0xf] }
  0x6f   : > { %v2355_v26 = vor.u32 %v2616_v24, %v2352_v25  ;;  %v2430_v25 = vld [vmem:[%s3344_s7 + $0x60] sm:$0xf] }
  0x70   : > { %1295 = vmatpush.bf16.msrb.mxu3 %v2263_v41 }
  0x72   : > { %1305 = vmatpush.bf16.msra.mxu0 %v2351_v49  ;;  %v2243_v49 = vor.u32 %v2588_v38, %v2240_v39  ;;  %v2578_v39 = vld [vmem:[#allocation6 + $0x94] sm:$0xf] }
  0x73   : > { %v2203_v41 = vor.u32 %v2578_v39, %v2200_v40 }
  0x74   : > { %1296 = vmatpush.bf16.msrb.mxu3 %v2255_v54  ;;  %v2610_v54 = vld [vmem:[#allocation6 + $0x194] sm:$0xf] }
  0x76   : > { %1306 = vmatpush.bf16.msra.mxu0 %v2343_v61  ;;  %v2160_v61 = vld [vmem:[#allocation6 + $0x48] sm:$0xf0] }
  0x77   : > { %v2163_v1 = vor.u32 %v2568_v59, %v2160_v61  ;;  %v2320_v61 = vld [vmem:[#allocation6 + $0x188] sm:$0xf0] }
  0x7a   : > { %1307 = vmatpush.bf16.msra.mxu0 %v2335_v10  ;;  %v2144_v10 = vld [vmem:[#allocation6 + $0x28] sm:$0xf0] }
  0x7b   : > { %v2147_v11 = vor.u32 %v2564_v9, %v2144_v10 }
  0x7e   : > { %1308 = vmatpush.bf16.msra.mxu0 %v2327_v37  ;;  %v2344_v37 = vld [vmem:[#allocation6 + $0x1b8] sm:$0xf0] }
  0x82   : > { %1309 = vmatpush.bf16.msra.mxu0 %v2319_v51  ;;  %v2598_v51 = vld [vmem:[#allocation6 + $0x134] sm:$0xf] }
  0x83   : > { %v2283_v53 = vor.u32 %v2598_v51, %v2280_v52  ;;  %v2634_v51 = vld [vmem:[%s3344_s7 + $0x54] sm:$0xf]  ;;  %v2424_v52 = vld [vmem:[%s3344_s7 + $0x58] sm:$0xf0] }
  0xc2   : > { %v600_v6 = vpop.f32.mrf.mxu0 }
  0xc3   : > { %v601_v8 = vadd.f32 %v600_v6, %v542_v57  ;;  %v2368_v57 = vld [vmem:[#allocation6 + $0x1e8] sm:$0xf0]  ;;  %v2606_v6 = vld [vmem:[#allocation6 + $0x174] sm:$0xf] }
  0xc4   : > { %v2371_v0 = vor.u32 %v2620_v56, %v2368_v57  ;;  %v2596_v57 = vld [vmem:[#allocation6 + $0x124] sm:$0xf] }
  0xc5   : > { %v604_v15 = vmul.f32 0.01, %v601_v8 }
  0xc7   : > { %v605_v22 = vmax.f32 %v601_v8, %v604_v15  ;;  %v2315_v8 = vor.u32 %v2606_v6, %v2312_v7  ;;  %v2582_v15 = vld [vmem:[#allocation6 + $0xb4] sm:$0xf] }
  0xc8   : > { %v2219_v17 = vor.u32 %v2582_v15, %v2216_v16  ;;  %v2639_v15 = vld [vmem:[%s3344_s7 + $0x74] sm:$0xf0] }
  0xc9   : > { %v638_v29 = vpack.c.bf16 %v605_v22, %v605_v22  ;;  %v2136_v22 = vld [vmem:[#allocation6 + $0x18] sm:$0xf0] }
  0xca   : > { %v602_v32 = vpop.f32.mrf.mxu0  ;;  %v2139_v23 = vor.u32 %v2562_v21, %v2136_v22 }
  0xcb   : > { %817 = vmatmul.bf16.vlgmr.msra.gmra.mxu1 %v638_v29  ;;  %830 = vmatmul.bf16.vlgmr.msra.gmra.mxu2 %v638_v29  ;;  %v2299_v32 = vor.u32 %v2602_v30, %v2296_v31 }
  0xcc   : > { %843 = vmatmul.bf16.vlgmr.msra.gmra.mxu3 %v638_v29  ;;  %856 = vmatmul.bf16.vlgmr.msrb.gmra.mxu0 %v638_v29  ;;  %v2211_v29 = vor.u32 %v2580_v27, %v2208_v28 }
  0xcd   : > { %1315 = vmatpush.bf16.msra.mxu1 %v2187_v33  ;;  %1328 = vmatpush.bf16.msra.mxu2 %v2251_v36  ;;  %v2560_v33 = vld [vmem:[#allocation6 + $0x4] sm:$0xf]  ;;  %v2614_v36 = vld [vmem:[#allocation6 + $0x1b4] sm:$0xf] }
  0xce   : > { %1354 = vmatpush.bf16.msrb.mxu0 %v2379_v55  ;;  %1341 = vmatpush.bf16.msra.mxu3 %v2315_v8  ;;  %v2131_v35 = vor.u32 %v2560_v33, %v2128_v34  ;;  %v2347_v38 = vor.u32 %v2614_v36, %v2344_v37  ;;  %v2328_v55 = vld [vmem:[#allocation6 + $0x198] sm:$0xf0]  ;;  %v2422_v37 = vld [vmem:[%s3344_s7 + $0x50] sm:$0xf] }
  0xcf   : > { %v2331_v56 = vor.u32 %v2610_v54, %v2328_v55  ;;  %v2440_v33 = vld [vmem:[%s3344_s7 + $0x78] sm:$0xf0]  ;;  %v2406_v54 = vld [vmem:[%s3344_s7 + $0x30] sm:$0xf]  ;;  %v2631_v55 = vld [vmem:[%s3344_s7 + $0x34] sm:$0xf0] }
  0xd1   : > { %1316 = vmatpush.bf16.msra.mxu1 %v2179_v47  ;;  %1329 = vmatpush.bf16.msra.mxu2 %v2243_v49  ;;  %v2339_v47 = vor.u32 %v2612_v45, %v2336_v46  ;;  %v2192_v49 = vld [vmem:[#allocation6 + $0x88] sm:$0xf0] }
  0xd2   : > { %1355 = vmatpush.bf16.msrb.mxu0 %v2371_v0  ;;  %1342 = vmatpush.bf16.msra.mxu3 %v2307_v20  ;;  %v2195_v50 = vor.u32 %v2576_v48, %v2192_v49  ;;  %v2264_v0 = vld [vmem:[#allocation6 + $0x118] sm:$0xf0]  ;;  %v2633_v49 = vld [vmem:[%s3344_s7 + $0x44] sm:$0xf0] }
  0xd3   : > { %v2414_v48 = vld [vmem:[%s3344_s7 + $0x40] sm:$0xf] }
  0xd5   : > { %1317 = vmatpush.bf16.msra.mxu1 %v2171_v58  ;;  %1330 = vmatpush.bf16.msra.mxu2 %v2235_v60  ;;  %v2272_v58 = vld [vmem:[#allocation6 + $0x128] sm:$0xf0]  ;;  %v2608_v60 = vld [vmem:[#allocation6 + $0x184] sm:$0xf] }
  0xd6   : > { %1356 = vmatpush.bf16.msrb.mxu0 %v2363_v14  ;;  %1343 = vmatpush.bf16.msra.mxu3 %v2299_v32  ;;  %v2275_v59 = vor.u32 %v2596_v57, %v2272_v58  ;;  %v2323_v62 = vor.u32 %v2608_v60, %v2320_v61  ;;  %v2438_v14 = vld [vmem:[%s3344_s7 + $0x70] sm:$0xf]  ;;  %v2638_v32 = vld [vmem:[%s3344_s7 + $0x74] sm:$0xf]  ;;  %v2632_v57 = vld [vmem:[%s3344_s7 + $0x44] sm:$0xf] }
  0xd7   : > { %v2439_v21 = vor.u32 %v2639_v15, %v2438_v14  ;;  %v2443_v40 = vor.u32 %v2638_v32, %v2440_v33  ;;  %v2416_v58 = vld [vmem:[%s3344_s7 + $0x48] sm:$0xf0]  ;;  %v2398_v60 = vld [vmem:[%s3344_s7 + $0x20] sm:$0xf]  ;;  %v2629_v61 = vld [vmem:[%s3344_s7 + $0x24] sm:$0xf0] }
  0xd8   : > { %v2742_v15 = vld [vmem:[%s3109_s15] sm:$0xff]  ;;  %v2645_v32 = vld [vmem:[%s3345_s8 + $0x28] sm:$0xff] }
  0xd9   : > { %1318 = vmatpush.bf16.msra.mxu1 %v2163_v1  ;;  %1331 = vmatpush.bf16.msra.mxu2 %v2227_v2  ;;  %v2267_v1 = vor.u32 %v2594_v63, %v2264_v0  ;;  %v639_v2 = vld [vmem:[%s3341_s4] sm:$0xf]  ;;  %v2630_v63 = vld [vmem:[%s3344_s7 + $0x34] sm:$0xf]  ;;  %v2408_v0 = vld [vmem:[%s3344_s7 + $0x38] sm:$0xf0] }
  0xda   : > { %1357 = vmatpush.bf16.msrb.mxu0 %v2355_v26  ;;  %1344 = vmatpush.bf16.msra.mxu3 %v2291_v44  ;;  %v801_v6 = vperm.slane %v639_v2, 0  ;;  %v804_v7 = vperm.slane %v639_v2, 3  ;;  %v802_v12 = vperm.slane %v639_v2, 1  ;;  %v2637_v26 = vld [vmem:[%s3344_s7 + $0x64] sm:$0xf0]  ;;  %v2644_v33 = vld [vmem:[%s3345_s8 + $0x20] sm:$0xff] }
  0xdd   : > { %1319 = vmatpush.bf16.msra.mxu1 %v2155_v5  ;;  %1332 = vmatpush.bf16.msra.mxu2 %v2219_v17  ;;  %v2259_v5 = vor.u32 %v2592_v3, %v2256_v4  ;;  %v803_v17 = vperm.slane %v639_v2, 2  ;;  %v2390_v2 = vld [vmem:[%s3344_s7 + $0x10] sm:$0xf]  ;;  %v2627_v3 = vld [vmem:[%s3344_s7 + $0x14] sm:$0xf0]  ;;  %v2411_v4 = vor.u32 %v2630_v63, %v2408_v0 }
  0xde   : > { %1358 = vmatpush.bf16.msrb.mxu0 %v2347_v38  ;;  %1345 = vmatpush.bf16.msra.mxu3 %v2283_v53  ;;  %v2635_v38 = vld [vmem:[%s3344_s7 + $0x54] sm:$0xf0]  ;;  %v2415_v53 = vor.u32 %v2633_v49, %v2414_v48  ;;  %v937_v49 = vld [vmem:[#allocation7] sm:$0x3] }
  0xdf   : > { %v2423_v46 = vor.u32 %v2635_v38, %v2422_v37  ;;  %v2643_v37 = vld [vmem:[%s3345_s8 + $0x18] sm:$0xff]  ;;  %v2654_v38 = vld [vmem:[%s3345_s8 + $0x70] sm:$0xff]  ;;  %v1260_v0 = vperm.slane %v937_v49, 1 }
  0xe0   : > { %v2651_v48 = vld [vmem:[%s3345_s8 + $0x58] sm:$0xff] }
  0xe1   : > { %1320 = vmatpush.bf16.msra.mxu1 %v2147_v11  ;;  %1333 = vmatpush.bf16.msra.mxu2 %v2211_v29 }
  0xe2   : > { %1359 = vmatpush.bf16.msrb.mxu0 %v2339_v47  ;;  %1346 = vmatpush.bf16.msra.mxu3 %v2275_v59  ;;  %v2407_v59 = vor.u32 %v2631_v55, %v2406_v54 }
  0xe5   : > { %1321 = vmatpush.bf16.msra.mxu1 %v2139_v23  ;;  %1334 = vmatpush.bf16.msra.mxu2 %v2203_v41 }
  0xe6   : > { %1360 = vmatpush.bf16.msrb.mxu0 %v2331_v56  ;;  %1347 = vmatpush.bf16.msra.mxu3 %v2267_v1  ;;  %v2427_v56 = vor.u32 %v2634_v51, %v2424_v52  ;;  %v2399_v1 = vor.u32 %v2629_v61, %v2398_v60  ;;  %v1259_v51 = vperm.slane %v937_v49, 0  ;;  %v2648_v61 = vld [vmem:[%s3345_s8 + $0x40] sm:$0xff] }
  0xe9   : > { %1322 = vmatpush.bf16.msra.mxu1 %v2131_v35  ;;  %1335 = vmatpush.bf16.msra.mxu2 %v2195_v50  ;;  %v2431_v35 = vor.u32 %v2637_v26, %v2430_v25  ;;  %v2435_v50 = vor.u32 %v2636_v42, %v2432_v43  ;;  %v2747_v25 = vld [vmem:[%s3109_s15 + $0x28] sm:$0xff] }
  0xea   : > { %1361 = vmatpush.bf16.msrb.mxu0 %v2323_v62  ;;  %1348 = vmatpush.bf16.msra.mxu3 %v2259_v5  ;;  %v2419_v62 = vor.u32 %v2632_v57, %v2416_v58  ;;  %v2628_v5 = vld [vmem:[%s3344_s7 + $0x24] sm:$0xf]  ;;  %v2641_v43 = vld [vmem:[%s3345_s8 + $0x8] sm:$0xff] }
  0xeb   : > { %v2649_v57 = vld [vmem:[%s3345_s8 + $0x48] sm:$0xff] }
 0x148   : > { %v818_v8 = vpop.f32.mrf.mxu1 }
 0x149   : > { %v819_v9 = vadd.f32 %v818_v8, %v801_v6  ;;  %v857_v10 = vpop.f32.mrf.mxu0  ;;  %v2400_v6 = vld [vmem:[%s3344_s7 + $0x28] sm:$0xf0]  ;;  %v2382_v8 = vld [vmem:[%s3344_s7] sm:$0xf] }
 0x14a   : > { %v858_v11 = vadd.f32 %v857_v10, %v804_v7  ;;  %v2391_v7 = vor.u32 %v2627_v3, %v2390_v2  ;;  %v2403_v10 = vor.u32 %v2628_v5, %v2400_v6 }
 0x14b   : > { %v861_v13 = vmul.f32 0.01, %v819_v9 }
 0x14c   : > { %v864_v16 = vmul.f32 0.01, %v858_v11 }
 0x14d   : > { %v865_v18 = vmax.f32 %v819_v9, %v861_v13  ;;  %v2625_v9 = vld [vmem:[%s3344_s7 + $0x4] sm:$0xf0] }
 0x14e   : > { %v868_v19 = vmax.f32 %v858_v11, %v864_v16  ;;  %v831_v20 = vpop.f32.mrf.mxu2  ;;  %v2626_v11 = vld [vmem:[%s3344_s7 + $0x14] sm:$0xf]  ;;  %v2383_v13 = vor.u32 %v2625_v9, %v2382_v8  ;;  %v2743_v16 = vld [vmem:[%s3109_s15 + $0x8] sm:$0xff] }
 0x14f   : > { %v933_v22 = vpack.c.bf16 %v865_v18, %v865_v18  ;;  %v832_v23 = vadd.f32 %v831_v20, %v802_v12  ;;  %v844_v24 = vpop.f32.mrf.mxu3  ;;  %v2392_v12 = vld [vmem:[%s3344_s7 + $0x18] sm:$0xf0]  ;;  %v2624_v18 = vld [vmem:[%s3344_s7 + $0x4] sm:$0xf] }
 0x150   : > { %v936_v27 = vpack.c.bf16 %v868_v19, %v868_v19  ;;  %v845_v28 = vadd.f32 %v844_v24, %v803_v17  ;;  %v820_v29 = vpop.f32.mrf.mxu1  ;;  %v2395_v14 = vor.u32 %v2626_v11, %v2392_v12  ;;  %v1383_v17 = vpack.c.bf16 %v2743_v16, %v2742_v15  ;;  %v2384_v19 = vld [vmem:[%s3344_s7 + $0x8] sm:$0xf0]  ;;  %v2746_v24 = vld [vmem:[%s3109_s15 + $0x20] sm:$0xff] }
 0x151   : > { %v862_v30 = vmul.f32 0.01, %v832_v23  ;;  %v859_v31 = vpop.f32.mrf.mxu0  ;;  %1271 = vmatmul.bf16.vlgmr.msrb.gmra.mxu1 %v933_v22  ;;  %v2387_v20 = vor.u32 %v2624_v18, %v2384_v19  ;;  %v1385_v26 = vpack.c.bf16 %v2747_v25, %v2746_v24 }
 0x152   : > { %v863_v34 = vmul.f32 0.01, %v845_v28  ;;  %1310 = vmatmul.bf16.vlgmr.msra.gmra.mxu0 %v936_v27  ;;  %1469 = vmatpush.bf16.msrb.mxu1 %v2439_v21  ;;  %v2744_v21 = vld [vmem:[%s3109_s15 + $0x10] sm:$0xff] }
 0x153   : > { %v866_v36 = vmax.f32 %v832_v23, %v862_v30  ;;  %v2647_v30 = vld [vmem:[%s3345_s8 + $0x38] sm:$0xff]  ;;  %v2646_v31 = vld [vmem:[%s3345_s8 + $0x30] sm:$0xff] }
 0x154   : > { %v867_v39 = vmax.f32 %v845_v28, %v863_v34  ;;  %v2749_v28 = vld [vmem:[%s3109_s15 + $0x38] sm:$0xff] }
 0x155   : > { %v934_v41 = vpack.c.bf16 %v866_v36, %v866_v36  ;;  %v2655_v34 = vld [vmem:[%s3345_s8 + $0x78] sm:$0xff] }
 0x156   : > { %v935_v44 = vpack.c.bf16 %v867_v39, %v867_v39  ;;  %v833_v45 = vpop.f32.mrf.mxu2  ;;  %1470 = vmatpush.bf16.msrb.mxu1 %v2431_v35  ;;  %1728 = vmatpush.bf16.msra.mxu0 %v2655_v34  ;;  %v2642_v39 = vld [vmem:[%s3345_s8 + $0x10] sm:$0xff] }
 0x157   : > { %v846_v47 = vpop.f32.mrf.mxu3  ;;  %1284 = vmatmul.bf16.vlgmr.msrb.gmra.mxu2 %v934_v41 }
 0x158   : > { %1297 = vmatmul.bf16.vlgmr.msrb.gmra.mxu3 %v935_v44  ;;  %1498 = vmatpush.bf16.msrb.mxu2 %v2443_v40  ;;  %v2653_v40 = vld [vmem:[%s3345_s8 + $0x68] sm:$0xff]  ;;  %v2640_v47 = vld [vmem:[%s3345_s8] sm:$0xff] }
 0x159   : > { %1699 = vmatpush.bf16.msrb.mxu3 %v2647_v30 }
 0x15a   : > { %1471 = vmatpush.bf16.msrb.mxu1 %v2423_v46  ;;  %1729 = vmatpush.bf16.msra.mxu0 %v2654_v38 }
 0x15c   : > { %1499 = vmatpush.bf16.msrb.mxu2 %v2435_v50 }
 0x15d   : > { %1700 = vmatpush.bf16.msrb.mxu3 %v2646_v31 }
 0x15e   : > { %1472 = vmatpush.bf16.msrb.mxu1 %v2415_v53  ;;  %1730 = vmatpush.bf16.msra.mxu0 %v2653_v40  ;;  %v2650_v53 = vld [vmem:[%s3345_s8 + $0x50] sm:$0xff] }
 0x160   : > { %1500 = vmatpush.bf16.msrb.mxu2 %v2427_v56 }
 0x161   : > { %1323 = vmatmul.bf16.vlgmr.msra.gmra.mxu1 %v933_v22  ;;  %v2745_v22 = vld [vmem:[%s3109_s15 + $0x18] sm:$0xff]  ;;  %1701 = vmatpush.bf16.msrb.mxu3 %v2645_v32 }
 0x162   : > { %1362 = vmatmul.bf16.vlgmr.msrb.gmra.mxu0 %v936_v27  ;;  %1473 = vmatpush.bf16.msrb.mxu1 %v2407_v59  ;;  %v1384_v23 = vpack.c.bf16 %v2745_v22, %v2744_v21  ;;  %v2748_v27 = vld [vmem:[%s3109_s15 + $0x30] sm:$0xff] }
 0x163   : > { %v1386_v29 = vpack.c.bf16 %v2749_v28, %v2748_v27 }
 0x164   : > { %1501 = vmatpush.bf16.msrb.mxu2 %v2419_v62 }
 0x165   : > { %1702 = vmatpush.bf16.msrb.mxu3 %v2644_v33 }
 0x166   : > { %1474 = vmatpush.bf16.msrb.mxu1 %v2399_v1 }
 0x167   : > { %1336 = vmatmul.bf16.vlgmr.msra.gmra.mxu2 %v934_v41 }
 0x168   : > { %1349 = vmatmul.bf16.vlgmr.msra.gmra.mxu3 %v935_v44  ;;  %1502 = vmatpush.bf16.msrb.mxu2 %v2411_v4  ;;  %v2652_v44 = vld [vmem:[%s3345_s8 + $0x60] sm:$0xff] }
 0x169   : > { %1703 = vmatpush.bf16.msrb.mxu3 %v2643_v37  ;;  %1731 = vmatpush.bf16.msra.mxu0 %v2652_v44 }
 0x16a   : > { %1475 = vmatpush.bf16.msrb.mxu1 %v2391_v7 }
 0x16c   : > { %1503 = vmatpush.bf16.msrb.mxu2 %v2403_v10 }
 0x16d   : > { %1704 = vmatpush.bf16.msrb.mxu3 %v2642_v39  ;;  %1732 = vmatpush.bf16.msra.mxu0 %v2651_v48 }
 0x16e   : > { %1476 = vmatpush.bf16.msrb.mxu1 %v2383_v13 }
 0x170   : > { %1504 = vmatpush.bf16.msrb.mxu2 %v2395_v14 }
 0x171   : > { %1477 = vmatmul.bf16.vlgmr.msrb.gmra.mxu1 %v1383_v17  ;;  %1705 = vmatpush.bf16.msrb.mxu3 %v2641_v43 }
 0x172   : > { %1733 = vmatpush.bf16.msra.mxu0 %v2650_v53 }
 0x174   : > { %1505 = vmatpush.bf16.msrb.mxu2 %v2387_v20 }
 0x175   : > { %1706 = vmatpush.bf16.msrb.mxu3 %v2640_v47 }
 0x176   : > { %1734 = vmatpush.bf16.msra.mxu0 %v2649_v57 }
 0x177   : > { %1506 = vmatmul.bf16.vlgmr.msrb.gmra.mxu2 %v1383_v17 }
 0x178   : > { %2656 = vmatpush.bf16.msra.mxu2 %v2655_v34 }
 0x17a   : > { %1735 = vmatpush.bf16.msra.mxu0 %v2648_v61 }
 0x17c   : > { %2657 = vmatpush.bf16.msra.mxu2 %v2654_v38 }
 0x180   : > { %2658 = vmatpush.bf16.msra.mxu2 %v2653_v40 }
 0x181   : > { %1482 = vmatmul.bf16.gmra.mxu1 %v1384_v23 }
 0x184   : > { %2659 = vmatpush.bf16.msra.mxu2 %v2652_v44 }
 0x187   : > { %1511 = vmatmul.bf16.gmra.mxu2 %v1384_v23 }
 0x188   : > { %2660 = vmatpush.bf16.msra.mxu2 %v2651_v48 }
 0x18c   : > { %2661 = vmatpush.bf16.msra.mxu2 %v2650_v53 }
 0x190   : > { %2662 = vmatpush.bf16.msra.mxu2 %v2649_v57 }
 0x191   : > { %1487 = vmatmul.bf16.gmra.mxu1 %v1385_v26 }
 0x194   : > { %2663 = vmatpush.bf16.msra.mxu2 %v2648_v61 }
 0x197   : > { %1516 = vmatmul.bf16.gmra.mxu2 %v1385_v26 }
 0x1a1   : > { %1492 = vmatmul.bf16.gmra.mxu1 %v1386_v29 }
 0x1a7   : > { %1521 = vmatmul.bf16.gmra.mxu2 %v1386_v29 }
 0x1ce   : > { %v1272_v35 = vpop.f32.mrf.mxu1 }
 0x1cf   : > { %v1311_v36 = vpop.f32.mrf.mxu0  ;;  %v1273_v55 = vadd.f32 %v1272_v35, %v1259_v51 }
 0x1d6   : > { %v1274_v41 = vpop.f32.mrf.mxu1 }
 0x1d7   : > { %v1313_v42 = vpop.f32.mrf.mxu0 }
 0x1da   : > { %v1285_v45 = vpop.f32.mrf.mxu2 }
 0x1db   : > { %v1298_v46 = vpop.f32.mrf.mxu3  ;;  %v1286_v58 = vadd.f32 %v1285_v45, %v1273_v55 }
 0x1dd   : > { %v1299_v62 = vadd.f32 %v1298_v46, %v1286_v58 }
 0x1de   : > { %v1324_v50 = vpop.f32.mrf.mxu1 }
 0x1df   : > { %v1363_v52 = vpop.f32.mrf.mxu0  ;;  %v1312_v2 = vadd.f32 %v1311_v36, %v1299_v62  ;;  %v1325_v4 = vadd.f32 %v1324_v50, %v1260_v0 }
 0x1e1   : > { %v3298_v5 = vperm.slane %v1312_v2, 0 }
 0x1e2   : > { %v1287_v54 = vpop.f32.mrf.mxu2 }
 0x1e3   : > { %v1300_v56 = vpop.f32.mrf.mxu3 }
 0x1e6   : > { %v1326_v59 = vpop.f32.mrf.mxu1 }
 0x1e7   : > { %v1365_v60 = vpop.f32.mrf.mxu0 }
 0x1ea   : > { %v1337_v63 = vpop.f32.mrf.mxu2 }
 0x1eb   : > { %v1350_v1 = vpop.f32.mrf.mxu3  ;;  %v1338_v6 = vadd.f32 %v1337_v63, %v1325_v4 }
 0x1ed   : > { %v1351_v10 = vadd.f32 %v1350_v1, %v1338_v6 }
 0x1ee   : > { %v1478_v3 = vpop.f32.mrf.mxu1 }
 0x1ef   : > { %v1479_v8 = vadd.f32 %v1478_v3, %v3298_v5  ;;  %v1364_v14 = vadd.f32 %v1363_v52, %v1351_v10 }
 0x1f1   : > { %v1527_v12 = vmul.f32 0.01, %v1479_v8  ;;  %v3302_v19 = vperm.slane %v1364_v14, 0 }
 0x1f2   : > { %v1339_v7 = vpop.f32.mrf.mxu2 }
 0x1f3   : > { %v1352_v9 = vpop.f32.mrf.mxu3  ;;  %v1543_v17 = vmax.f32 %v1479_v8, %v1527_v12 }
 0x1f6   : > { %v1480_v11 = vpop.f32.mrf.mxu1 }
 0x1f7   : > { %v1481_v13 = vadd.f32 %v1480_v11, %v3298_v5 }
 0x1f9   : > { %v1529_v15 = vmul.f32 0.01, %v1481_v13 }
 0x1fa   : > { %v1507_v16 = vpop.f32.mrf.mxu2 }
 0x1fb   : > { %v1545_v18 = vmax.f32 %v1481_v13, %v1529_v15  ;;  %v1508_v22 = vadd.f32 %v1507_v16, %v3302_v19 }
 0x1fd   : > { %v1591_v20 = vpack.c.bf16 %v1545_v18, %v1543_v17  ;;  %v1528_v24 = vmul.f32 0.01, %v1508_v22 }
 0x1fe   : > { %v1483_v21 = vpop.f32.mrf.mxu1 }
 0x1ff   : > { %1707 = vmatmul.bf16.vlgmr.msrb.gmra.mxu3 %v1591_v20  ;;  %v1484_v25 = vadd.f32 %v1483_v21, %v3298_v5  ;;  %v1544_v29 = vmax.f32 %v1508_v22, %v1528_v24 }
 0x201   : > { %v1531_v30 = vmul.f32 0.01, %v1484_v25 }
 0x202   : > { %v1509_v23 = vpop.f32.mrf.mxu2 }
 0x203   : > { %v1510_v26 = vadd.f32 %v1509_v23, %v3302_v19  ;;  %v1547_v36 = vmax.f32 %v1484_v25, %v1531_v30 }
 0x205   : > { %v1530_v27 = vmul.f32 0.01, %v1510_v26 }
 0x206   : > { %v1485_v28 = vpop.f32.mrf.mxu1 }
 0x207   : > { %v1546_v31 = vmax.f32 %v1510_v26, %v1530_v27  ;;  %v1486_v32 = vadd.f32 %v1485_v28, %v3298_v5 }
 0x209   : > { %v1592_v33 = vpack.c.bf16 %v1546_v31, %v1544_v29  ;;  %v1533_v34 = vmul.f32 0.01, %v1486_v32 }
 0x20a   : > { %v1512_v35 = vpop.f32.mrf.mxu2 }
 0x20b   : > { %v1549_v37 = vmax.f32 %v1486_v32, %v1533_v34  ;;  %1736 = vmatmul.bf16.vlgmr.msra.gmra.mxu0 %v1592_v33  ;;  %v1513_v40 = vadd.f32 %v1512_v35, %v3302_v19 }
 0x20d   : > { %v1593_v38 = vpack.c.bf16 %v1549_v37, %v1547_v36  ;;  %v1532_v42 = vmul.f32 0.01, %v1513_v40 }
 0x20e   : > { %v1488_v39 = vpop.f32.mrf.mxu1 }
 0x20f   : > { %1712 = vmatmul.bf16.gmra.mxu3 %v1593_v38  ;;  %v1489_v43 = vadd.f32 %v1488_v39, %v3298_v5  ;;  %v1548_v47 = vmax.f32 %v1513_v40, %v1532_v42 }
 0x211   : > { %v1535_v48 = vmul.f32 0.01, %v1489_v43 }
 0x212   : > { %v1514_v41 = vpop.f32.mrf.mxu2 }
 0x213   : > { %v1515_v44 = vadd.f32 %v1514_v41, %v3302_v19  ;;  %v1551_v54 = vmax.f32 %v1489_v43, %v1535_v48 }
 0x215   : > { %v1534_v45 = vmul.f32 0.01, %v1515_v44 }
 0x216   : > { %v1490_v46 = vpop.f32.mrf.mxu1 }
 0x217   : > { %v1550_v49 = vmax.f32 %v1515_v44, %v1534_v45  ;;  %v1491_v50 = vadd.f32 %v1490_v46, %v3298_v5  ;;  %v1774_v45 = vld [vmem:[%s3348_s11] sm:$0x7] }
 0x219   : > { %v1537_v51 = vmul.f32 0.01, %v1491_v50  ;;  %v1594_v52 = vpack.c.bf16 %v1550_v49, %v1548_v47  ;;  %v2964_v47 = vmov 0  }
 0x21a   : > { %v1517_v53 = vpop.f32.mrf.mxu2  ;;  %2738 = vset.pattern.permute.xlu0 %v2964_v47 }
 0x21b   : > { %v1553_v55 = vmax.f32 %v1491_v50, %v1537_v51  ;;  %1741 = vmatmul.bf16.gmra.mxu0 %v1594_v52  ;;  %v1518_v58 = vadd.f32 %v1517_v53, %v3302_v19  ;;  %1777 = vperm.xlu0 %2738, %v1774_v45  }
 0x21d   : > { %v1595_v56 = vpack.c.bf16 %v1553_v55, %v1551_v54  ;;  %v1536_v60 = vmul.f32 0.01, %v1518_v58 }
 0x21e   : > { %v1493_v57 = vpop.f32.mrf.mxu1 }
 0x21f   : > { %1717 = vmatmul.bf16.gmra.mxu3 %v1595_v56  ;;  %v1494_v61 = vadd.f32 %v1493_v57, %v3298_v5  ;;  %v1552_v1 = vmax.f32 %v1518_v58, %v1536_v60 }
 0x221   : > { %v1539_v2 = vmul.f32 0.01, %v1494_v61 }
 0x222   : > { %v1519_v59 = vpop.f32.mrf.mxu2 }
 0x223   : > { %v1520_v62 = vadd.f32 %v1519_v59, %v3302_v19  ;;  %v1555_v9 = vmax.f32 %v1494_v61, %v1539_v2 }
 0x225   : > { %v1538_v63 = vmul.f32 0.01, %v1520_v62 }
 0x226   : > { %v1495_v0 = vpop.f32.mrf.mxu1 }
 0x227   : > { %v1554_v3 = vmax.f32 %v1520_v62, %v1538_v63  ;;  %v1496_v4 = vadd.f32 %v1495_v0, %v3298_v5 }
 0x229   : > { %v1541_v6 = vmul.f32 0.01, %v1496_v4  ;;  %v1596_v7 = vpack.c.bf16 %v1554_v3, %v1552_v1 }
 0x22a   : > { %v1522_v8 = vpop.f32.mrf.mxu2 }
 0x22b   : > { %v1557_v10 = vmax.f32 %v1496_v4, %v1541_v6  ;;  %1746 = vmatmul.bf16.gmra.mxu0 %v1596_v7  ;;  %v1523_v12 = vadd.f32 %v1522_v8, %v3302_v19  ;;  %v1773_v7 = vld [vmem:[#allocation10] sm:$0x7] }
 0x22d   : > { %v1597_v11 = vpack.c.bf16 %v1557_v10, %v1555_v9  ;;  %v1540_v14 = vmul.f32 0.01, %v1523_v12 }
 0x22f   : > { %1722 = vmatmul.bf16.gmra.mxu3 %v1597_v11  ;;  %v1556_v17 = vmax.f32 %v1523_v12, %v1540_v14 }
 0x232   : > { %v1524_v13 = vpop.f32.mrf.mxu2 }
 0x233   : > { %v1525_v15 = vadd.f32 %v1524_v13, %v3302_v19  ;;  %v2739_v19 = vld [vmem:[#allocation9] ss:$0 sm:$0xff] }
 0x235   : > { %v1542_v16 = vmul.f32 0.01, %v1525_v15 }
 0x237   : > { %v1558_v18 = vmax.f32 %v1525_v15, %v1542_v16 }
 0x239   : > { %v1598_v20 = vpack.c.bf16 %v1558_v18, %v1556_v17 }
 0x23b   : > { %1751 = vmatmul.bf16.vlgmr.msra.gmra.mxu2 %v1598_v20 }
 0x282   : > { %v1708_v5 = vpop.f32.mrf.mxu3 }
 0x283   : > { %v1709_v63 = vadd.f32 %v2739_v19, %v1708_v5 }
 0x288   : > { %v1737_v23 = vpop.f32.mrf.mxu0 }
 0x289   : > { %v1738_v0 = vadd.f32 %v1737_v23, %v1709_v63 }
 0x28a   : > { %v1710_v21 = vpop.f32.mrf.mxu3 }
 0x28b   : > { %v1711_v59 = vadd.f32 %v2739_v19, %v1710_v21  ;;  %v1757_v3 = vmul.f32 0.01, %v1738_v0 }
 0x28d   : > { %v1765_v6 = vmax.f32 %v1738_v0, %v1757_v3  ;;  %v1778_v8 = vpop.permute.xlu0 %1777 }
 0x290   : > { %v1739_v25 = vpop.f32.mrf.mxu0 }
 0x291   : > { %v1740_v60 = vadd.f32 %v1739_v25, %v1711_v59 }
 0x292   : > { %v1713_v22 = vpop.f32.mrf.mxu3 }
 0x293   : > { %v1714_v55 = vadd.f32 %v2739_v19, %v1713_v22  ;;  %v1758_v1 = vmul.f32 0.01, %v1740_v60 }
 0x295   : > { %v1766_v4 = vmax.f32 %v1740_v60, %v1758_v1 }
 0x298   : > { %v1742_v27 = vpop.f32.mrf.mxu0 }
 0x299   : > { %v1743_v56 = vadd.f32 %v1742_v27, %v1714_v55 }
 0x29a   : > { %v1715_v24 = vpop.f32.mrf.mxu3 }
 0x29b   : > { %v1716_v51 = vadd.f32 %v2739_v19, %v1715_v24  ;;  %v1759_v61 = vmul.f32 0.01, %v1743_v56 }
 0x29d   : > { %v1767_v2 = vmax.f32 %v1743_v56, %v1759_v61 }
 0x2a0   : > { %v1744_v29 = vpop.f32.mrf.mxu0 }
 0x2a1   : > { %v1745_v52 = vadd.f32 %v1744_v29, %v1716_v51 }
 0x2a2   : > { %v1718_v26 = vpop.f32.mrf.mxu3 }
 0x2a3   : > { %v1719_v46 = vadd.f32 %v2739_v19, %v1718_v26  ;;  %v1760_v57 = vmul.f32 0.01, %v1745_v52 }
 0x2a5   : > { %v1768_v62 = vmax.f32 %v1745_v52, %v1760_v57 }
 0x2a8   : > { %v1747_v31 = vpop.f32.mrf.mxu0 }
 0x2a9   : > { %v1748_v48 = vadd.f32 %v1747_v31, %v1719_v46 }
 0x2aa   : > { %v1720_v28 = vpop.f32.mrf.mxu3 }
 0x2ab   : > { %v1721_v40 = vadd.f32 %v2739_v19, %v1720_v28  ;;  %v1761_v53 = vmul.f32 0.01, %v1748_v48 }
 0x2ad   : > { %v1769_v58 = vmax.f32 %v1748_v48, %v1761_v53 }
 0x2b0   : > { %v1749_v39 = vpop.f32.mrf.mxu0 }
 0x2b1   : > { %v1750_v42 = vadd.f32 %v1749_v39, %v1721_v40 }
 0x2b2   : > { %v1723_v30 = vpop.f32.mrf.mxu3 }
 0x2b3   : > { %v1724_v34 = vadd.f32 %v2739_v19, %v1723_v30  ;;  %v1762_v49 = vmul.f32 0.01, %v1750_v42 }
 0x2b5   : > { %v1770_v54 = vmax.f32 %v1750_v42, %v1762_v49 }
 0x2ba   : > { %v1725_v33 = vpop.f32.mrf.mxu3 }
 0x2bb   : > { %v1726_v35 = vadd.f32 %v2739_v19, %v1725_v33 }
 0x2be   : > { %v1752_v32 = vpop.f32.mrf.mxu2 }
 0x2bf   : > { %v1753_v37 = vadd.f32 %v1752_v32, %v1724_v34 }
 0x2c1   : > { %v1763_v43 = vmul.f32 0.01, %v1753_v37 }
 0x2c3   : > { %v1771_v50 = vmax.f32 %v1753_v37, %v1763_v43 }
 0x2c6   : > { %v1754_v36 = vpop.f32.mrf.mxu2 }
 0x2c7   : > { %v1755_v38 = vadd.f32 %v1754_v36, %v1726_v35 }
 0x2c9   : > { %v1764_v41 = vmul.f32 0.01, %v1755_v38 }
 0x2cb   : > { %v1772_v44 = vmax.f32 %v1755_v38, %v1764_v41 }
 0x2cd   : > { %2508 = vmatpush.xpose.msk.msra.mxu1 %vm1780_vm0, %v1772_v44 }
 0x2d1   : > { %2509 = vmatpush.xpose.msk.msra.mxu1 %vm1780_vm0, %v1771_v50 }
 0x2d5   : > { %2510 = vmatpush.xpose.msk.msra.mxu1 %vm1780_vm0, %v1770_v54 }
 0x2d9   : > { %2511 = vmatpush.xpose.msk.msra.mxu1 %vm1780_vm0, %v1769_v58 }
 0x2dd   : > { %2512 = vmatpush.xpose.msk.msra.mxu1 %vm1780_vm0, %v1768_v62 }
 0x2e1   : > { %2513 = vmatpush.xpose.msk.msra.mxu1 %vm1780_vm0, %v1767_v2 }
 0x2e5   : > { %2514 = vmatpush.xpose.msk.msra.mxu1 %vm1780_vm0, %v1766_v4 }
 0x2e9   : > { %2515 = vmatpush.xpose.msk.msra.mxu1 %vm1780_vm0, %v1765_v6 }
 0x2ec   : > { %2516 = vmatmul.msk.f32.vlgmr.msra.gmra.mxu1 %vm1780_vm0, %v1773_v7 }
 0x369   : > { %v1825_v9 = vpop.f32.mrf.mxu1 }
 0x36a   : > { %v1826_v10 = vadd.f32 %v1825_v9, %v1778_v8 }
 0x36c   : > { %2740 = vtanh.f32 %v1826_v10 }
 0x372   : > { %v2741_v11 = vpop.eup %2740 }
 0x373   : > { %1830 = vst.msk [vmem:[%s503_s16] sm:$0x7] %vm1829_vm1, %v2741_v11 }
 0x374 PF: > { %s26_s21 = sadd.s32 1, %s2952_s21  }
 0x375   : > { %p23_p7 = scmp.ge.s32.totalorder %s26_s21, 4  }
 0x377   :  { %25 = sbr.rel (!%p23_p7) target bundleno = 6 (0x6), region = 123 }
 0x37c   :  { %1850 = vsyncpa [#allocation3], 1 }
 0x37d   :  { %1852 = vsyncpa [#allocation3 + $0x1], 1 }
 0x37e   :  { %1853 = vsyncpa [#allocation5], 1 }
 0x37f   :  { %1854 = vsyncpa [#allocation8], 1 }
 0x380   :  { %1855 = vsyncpa [#allocation11], 1 }

// kernel: generator_forward.6
= control target key start
LH: loop header
LB: loop body
LE: loop exit
PB: predicated region body
PF: predicated region fallthrough
CT: control target
= control target key end

     0   :  { %s7242_s0 = inlined_call_operand.vmem [shape: f32[2,64,64], index: 0, kind: input, shape index: {}]   ;;  %s7243_s1 = inlined_call_operand.vmem [shape: f32[2,64,128], index: 1, kind: input, shape index: {}]   ;;  %s7244_s2 = inlined_call_operand.vmem [shape: bf16[64,64], index: 2, kind: input, shape index: {}]   ;;  %s7245_s3 = inlined_call_operand.hbm [shape: f32[1,64], index: 3, kind: input, shape index: {}]   ;;  %s7246_s4 = inlined_call_operand.hbm [shape: bf16[64,128], index: 4, kind: input, shape index: {}]   ;;  %s7247_s5 = inlined_call_operand.hbm [shape: f32[1,128], index: 5, kind: input, shape index: {}]   ;;  %s7248_s6 = inlined_call_operand.hbm [shape: bf16[64,128], index: 6, kind: input, shape index: {}]   ;;  %s7249_s7 = inlined_call_operand.hbm [shape: bf16[64,128], index: 7, kind: input, shape index: {}]   ;;  %s7250_s8 = inlined_call_operand.hbm [shape: f32[1,128], index: 8, kind: input, shape index: {}]   ;;  %s7251_s9 = inlined_call_operand.vmem [shape: bf16[5,128,128], index: 9, kind: input, shape index: {}]   ;;  %s7252_s10 = inlined_call_operand.hbm [shape: f32[1,128], index: 10, kind: input, shape index: {}]   ;;  %s7253_s11 = inlined_call_operand.hbm [shape: bf16[128,128], index: 11, kind: input, shape index: {}]   ;;  %s7254_s12 = inlined_call_operand.hbm [shape: f32[1,128], index: 12, kind: input, shape index: {}]   ;;  %s7255_s13 = inlined_call_operand.hbm [shape: bf16[128,128], index: 13, kind: input, shape index: {}]   ;;  %s7256_s14 = inlined_call_operand.hbm [shape: f32[1,128], index: 14, kind: input, shape index: {}]   ;;  %s7257_s15 = inlined_call_operand.vmem [shape: f32[2,64,128], index: 15, kind: output, shape index: {}]  }
   0x1   :  { %7280 = sst [smem:[#allocation72_spill]] %s7246_s4 }
   0x2   :  { %7281 = sst [smem:[#allocation73_spill]] %s7248_s6 }
   0x3   :  { %7282 = sst [smem:[#allocation74_spill]] %s7250_s8 }
   0x4   :  { %20 = vsyncpa [#allocation3], 0 }
   0x5   :  { %21 = vsyncpa [#allocation5], 0 }
   0x6   :  { %22 = vsyncpa [#allocation8], 0 }
   0x7   :  { %23 = vsyncpa [#allocation11], 0 }
   0x8   :  { %24 = vsyncpa [#allocation14], 0 }
   0x9   :  { %25 = vsyncpa [#allocation17], 0  ;;  %s5209_s18 = smov 0  }
   0xa LB: > { %7283 = sst [smem:[#allocation25_spill]] %s5112_s18  ;;  %s5218_s22 = sadd.s32 4294967295, %s5112_s18   ;;  %s5112_s18 = sphi %s5209_s18, %s31_s18  }
   0xb   : > { %s7284_s4 = sld [smem:[#allocation72_spill]]  ;;  %p3883_p0 = scmp.ge.s32.totalorder %s5112_s18, 1 }
   0xc   : > { %p387_p1 = scmp.lt.s32.totalorder %s5112_s18, 3  ;;  %p4589_p2 = scmp.eq.s32.totalorder %s5218_s22, 0 }
   0xd   : > { %s5114_s24 = smov [#allocation4]   ;;  %s7286_s6 = sld [smem:[#allocation73_spill]] }
   0xe   : > { %p5223_p3 = pnand %p3883_p0, %p387_p1  ;;  %s415_s25 = sshll.u32 %s5114_s24, 4  ;;  %s416_s25 = int_to_ptr.vmem [resolvable:$true] %s415_s25 }
   0xf   : > { %s5115_s30 = smov [#allocation7]   ;;  %s7288_s8 = sld [smem:[#allocation74_spill]] }
  0x10   : > { %p4555_p4 = pneg %p5223_p3  ;;  %s441_s16 = sshll.u32 %s5115_s30, 4  ;;  %s442_s16 = int_to_ptr.vmem [resolvable:$true] %s441_s16 }
  0x11   : > { %s413_s21 = sshll.u32 %s7284_s4, 4  ;;  %s5116_s24 = smov 64   ;;  %s414_s21 = int_to_ptr.hbm [resolvable:$true] %s413_s21 }
  0x12   : > { %p5234_p5 = pnand %p4589_p2, %p4555_p4  ;;  %s5117_s26 = smov 4  }
  0x13   : > { %s439_s28 = sshll.u32 %s7286_s6, 4  ;;  %s5118_s27 = smov [#allocation10]   ;;  %s440_s28 = int_to_ptr.hbm [resolvable:$true] %s439_s28 }
  0x14   : > { %4561 = dma.hbm_to_vmem [thread:$0]  (!%p5234_p5), %s414_s21, 512, %s416_s25, [#allocation5], %s5116_s24, %s5116_s24, %s5117_s26  }
  0x15   : > { %s468_s20 = sshll.u32 %s7288_s8, 4  ;;  %s470_s30 = sshll.u32 %s5118_s27, 4  ;;  %s469_s20 = int_to_ptr.hbm [resolvable:$true] %s468_s20  ;;  %s471_s30 = int_to_ptr.vmem [resolvable:$true] %s470_s30 }
  0x16   : > { %4567 = dma.hbm_to_vmem [thread:$0]  (!%p5234_p5), %s440_s28, 512, %s442_s16, [#allocation8], %s5116_s24, %s5116_s24, %s5117_s26  }
  0x17   : > { %s494_s19 = sshll.u32 %s7253_s11, 4  ;;  %s520_s21 = sshll.u32 %s7255_s13, 4  ;;  %s495_s19 = int_to_ptr.hbm [resolvable:$true] %s494_s19  ;;  %s521_s21 = int_to_ptr.hbm [resolvable:$true] %s520_s21 }
  0x18   : > { %4573 = dma.hbm_to_vmem [thread:$0]  (!%p5234_p5), %s469_s20, 16, %s471_s30, [#allocation11]  }
  0x19   : > { %s5119_s25 = smov [#allocation13]   ;;  %s5120_s4 = smov [#allocation16]  }
  0x1a   : > { %s496_s18 = sshll.u32 %s5119_s25, 4  ;;  %s522_s28 = sshll.u32 %s5120_s4, 4  ;;  %s497_s18 = int_to_ptr.vmem [resolvable:$true] %s496_s18  ;;  %s523_s28 = int_to_ptr.vmem [resolvable:$true] %s522_s28 }
  0x1b   : > { %4579 = dma.hbm_to_vmem [thread:$0]  (!%p5234_p5), %s495_s19, 1024, %s497_s18, [#allocation14], %s5116_s24, %s5116_s24, %s5117_s26  }
  0x1c   : > { %s402_s20 = sshll.u32 %s7245_s3, 4  ;;  %s428_s30 = sshll.u32 %s7247_s5, 4  ;;  %s403_s20 = int_to_ptr.hbm [resolvable:$true] %s402_s20  ;;  %s429_s30 = int_to_ptr.hbm [resolvable:$true] %s428_s30 }
  0x1d   : > { %4585 = dma.hbm_to_vmem [thread:$0]  (!%p5234_p5), %s521_s21, 1024, %s523_s28, [#allocation17], %s5116_s24, %s5116_s24, %s5117_s26  }
  0x1e   : > { %s5121_s17 = smov [#allocation2]   ;;  %s5122_s19 = smov [#allocation6]  }
  0x1f   : > { %s404_s18 = sshll.u32 %s5121_s17, 4  ;;  %s430_s25 = sshll.u32 %s5122_s19, 4  ;;  %s405_s18 = int_to_ptr.vmem [resolvable:$true] %s404_s18  ;;  %s431_s25 = int_to_ptr.vmem [resolvable:$true] %s430_s25 }
  0x20   : > { %4558 = dma.hbm_to_vmem [thread:$0]  (!%p5234_p5), %s403_s20, 16, %s405_s18, [#allocation3]  }
  0x21   : > { %s453_s27 = sshll.u32 %s7249_s7, 4  ;;  %s483_s6 = sshll.u32 %s7252_s10, 4  ;;  %s454_s27 = int_to_ptr.hbm [resolvable:$true] %s453_s27  ;;  %s484_s6 = int_to_ptr.hbm [resolvable:$true] %s483_s6 }
  0x22   : > { %4564 = dma.hbm_to_vmem [thread:$0]  (!%p5234_p5), %s429_s30, 16, %s431_s25, [#allocation5]  }
  0x23   : > { %s5123_s8 = smov [#allocation9]   ;;  %s5124_s20 = smov [#allocation12]  }
  0x24   : > { %s455_s17 = sshll.u32 %s5123_s8, 4  ;;  %s485_s18 = sshll.u32 %s5124_s20, 4  ;;  %s456_s17 = int_to_ptr.vmem [resolvable:$true] %s455_s17  ;;  %s486_s18 = int_to_ptr.vmem [resolvable:$true] %s485_s18 }
  0x25   : > { %4570 = dma.hbm_to_vmem [thread:$0]  (!%p5234_p5), %s454_s27, 512, %s456_s17, [#allocation8], %s5116_s24, %s5116_s24, %s5117_s26  }
  0x26   : > { %s509_s30 = sshll.u32 %s7254_s12, 4  ;;  %s535_s21 = sshll.u32 %s7256_s14, 4  ;;  %s510_s30 = int_to_ptr.hbm [resolvable:$true] %s509_s30  ;;  %s536_s21 = int_to_ptr.hbm [resolvable:$true] %s535_s21 }
  0x27   : > { %4576 = dma.hbm_to_vmem [thread:$0]  (!%p5234_p5), %s484_s6, 16, %s486_s18, [#allocation11]  }
  0x28   : > { %s5125_s28 = smov [#allocation15]   ;;  %s5126_s24 = smov [#allocation18]  }
  0x29   : > { %s511_s8 = sshll.u32 %s5125_s28, 4  ;;  %s537_s26 = sshll.u32 %s5126_s24, 4  ;;  %s512_s8 = int_to_ptr.vmem [resolvable:$true] %s511_s8  ;;  %s538_s26 = int_to_ptr.vmem [resolvable:$true] %s537_s26 }
  0x2a   : > { %4582 = dma.hbm_to_vmem [thread:$0]  (!%p5234_p5), %s510_s30, 16, %s512_s8, [#allocation14]  }
  0x2b   : > { %4588 = dma.hbm_to_vmem [thread:$0]  (!%p5234_p5), %s536_s21, 16, %s538_s26, [#allocation17]  }
  0x2c   : > { %566 = sbr.rel (%p5223_p3) target bundleno = 2439 (0x987), region = 80 }
  0x31   : > { %5087 = dma.done.wait (%p4589_p2), [#allocation3], 16  }
  0x32   : > { %5089 = vsyncadd (%p4589_p2), [#allocation3], 4294967280 }
  0x33   : > { %5091 = dma.done.wait (%p4589_p2), [#allocation5], 528  }
  0x34   : > { %5093 = vsyncadd (%p4589_p2), [#allocation5], 4294966768 }
  0x35   : > { %5095 = dma.done.wait (%p4589_p2), [#allocation8], 1024  }
  0x36   : > { %5097 = vsyncadd (%p4589_p2), [#allocation8], 4294966272 }
  0x37   : > { %5099 = dma.done.wait (%p4589_p2), [#allocation11], 32  }
  0x38   : > { %5101 = vsyncadd (%p4589_p2), [#allocation11], 4294967264 }
  0x39   : > { %5103 = dma.done.wait (%p4589_p2), [#allocation14], 1040  }
  0x3a   : > { %5105 = vsyncadd (%p4589_p2), [#allocation14], 4294966256 }
  0x3b   : > { %5107 = dma.done.wait (%p4589_p2), [#allocation17], 1040  }
  0x3c   : > { %5109 = vsyncadd (%p4589_p2), [#allocation17], 4294966256  ;;  %p670_p6 = scmp.lt.s32.totalorder %s5218_s22, 1  ;;  %vm694_vm0 = vcmask 523264   ;;  %v760_v26 = vlaneseq }
  0x3e   : > { %s7402_s22 = smov (!%p670_p6, %s5218_s22), 1  ;;  %v5425_v27 = vshrl.u32 %v760_v26, 7  ;;  %v5432_v30 = vand.u32 127, %v760_v26 }
  0x3f   : > { %s5330_s23 = sshll.u32 %s7402_s22, 6 }
  0x40   : > { %s5336_s6 = scalar_lea.vmem %s7242_s0, %s5330_s23  ;;  %v5430_v29 = vadd.s32 8, %v5425_v27  ;;  %v5435_v31 = vadd.s32 16, %v5425_v27  ;;  %v5440_v32 = vadd.s32 24, %v5425_v27  ;;  %vm771_vm2 = vcmp.eq.s32.totalorder %v5425_v27, %v5432_v30  ;;  %s7155_s4 = scalar_lea.vmem %s7243_s1, %s5330_s23 }
  0x41   : > { %v5339_v0 = vld [vmem:[%s5336_s6 + $0x38] sm:$0xff]  ;;  %v5345_v1 = vld [vmem:[%s5336_s6 + $0x30] sm:$0xff]  ;;  %v5349_v2 = vld [vmem:[%s5336_s6 + $0x28] sm:$0xff]  ;;  %v5447_v33 = vadd.s32 32, %v5425_v27  ;;  %v5455_v36 = vadd.s32 40, %v5425_v27  ;;  %v5467_v40 = vadd.s32 48, %v5425_v27  ;;  %s684_s16 = scalar_lea.vmem %s7257_s15, %s5330_s23 }
  0x42   : > { %3914 = vmatpush.xpose.msk.msra.mxu0 %vm694_vm0, %v5339_v0  ;;  %1473 = vmatpush.msra.mxu1 %v5339_v0  ;;  %v5355_v3 = vld [vmem:[%s5336_s6 + $0x20] sm:$0xff]  ;;  %v5359_v4 = vld [vmem:[%s5336_s6 + $0x18] sm:$0xff]  ;;  %v5365_v5 = vld [vmem:[%s5336_s6 + $0x10] sm:$0xff]  ;;  %v785_v15 = vmul.f32 %v5349_v2, %v5349_v2  ;;  %v786_v20 = vmul.f32 %v5345_v1, %v5345_v1  ;;  %vm772_vm1 = vcmp.eq.s32.totalorder %v5430_v29, %v5432_v30  ;;  %v5491_v51 = vadd.s32 56, %v5425_v27 }
  0x43   : > { %v5369_v6 = vld [vmem:[%s5336_s6 + $0x8] sm:$0xff]  ;;  %v5375_v7 = vld [vmem:[%s5336_s6] sm:$0xff]  ;;  %v782_v8 = vmul.f32 %v5365_v5, %v5365_v5  ;;  %v784_v9 = vmul.f32 %v5355_v3, %v5355_v3  ;;  %v783_v14 = vmul.f32 %v5359_v4, %v5359_v4  ;;  %vm773_vm3 = vcmp.eq.s32.totalorder %v5435_v31, %v5432_v30 }
  0x44   : > { %1474 = vmatpush.msra.mxu1 %v5345_v1  ;;  %v780_v10 = vmul.f32 %v5375_v7, %v5375_v7  ;;  %v781_v16 = vmul.f32 %v5369_v6, %v5369_v6  ;;  %v803_v18 = vsel %vm694_vm0, %v785_v15, 0.0  ;;  %v806_v21 = vsel %vm694_vm0, %v786_v20, 0.0 }
  0x45   : > { %v794_v11 = vsel %vm694_vm0, %v782_v8, 0.0  ;;  %v800_v12 = vsel %vm694_vm0, %v784_v9, 0.0  ;;  %v797_v17 = vsel %vm694_vm0, %v783_v14, 0.0  ;;  %vm774_vm4 = vcmp.eq.s32.totalorder %v5440_v32, %v5432_v30 }
  0x46   : > { %3915 = vmatpush.xpose.msk.msra.mxu0 %vm694_vm0, %v5345_v1  ;;  %1475 = vmatpush.msra.mxu1 %v5349_v2  ;;  %v788_v13 = vsel %vm694_vm0, %v780_v10, 0.0  ;;  %v791_v19 = vsel %vm694_vm0, %v781_v16, 0.0  ;;  %vm775_vm5 = vcmp.eq.s32.totalorder %v5447_v33, %v5432_v30  ;;  %vm776_vm6 = vcmp.eq.s32.totalorder %v5455_v36, %v5432_v30 }
  0x47   : > { %795 = vadd.xlane.f32.xlu1 %v794_v11  ;;  %801 = vadd.xlane.f32.xlu2 %v800_v12  ;;  %vm777_vm7 = vcmp.eq.s32.totalorder %v5467_v40, %v5432_v30  ;;  %vm778_vm8 = vcmp.eq.s32.totalorder %v5491_v51, %v5432_v30  ;;  %v787_v31 = vmul.f32 %v5339_v0, %v5339_v0  ;;  %v5573_v33 = vcvt.s32.f32 %v5432_v30 }
  0x48   : > { %1476 = vmatpush.msra.mxu1 %v5355_v3  ;;  %789 = vadd.xlane.f32.xlu0 %v788_v13 }
  0x4a   : > { %3916 = vmatpush.xpose.msk.msra.mxu0 %vm694_vm0, %v5349_v2  ;;  %1477 = vmatpush.msra.mxu1 %v5359_v4 }
  0x4c   : > { %1478 = vmatpush.msra.mxu1 %v5365_v5 }
  0x4e   : > { %3917 = vmatpush.xpose.msk.msra.mxu0 %vm694_vm0, %v5355_v3  ;;  %1479 = vmatpush.msra.mxu1 %v5369_v6 }
  0x4f   : > { %798 = vadd.xlane.f32.xlu1 %v797_v17  ;;  %804 = vadd.xlane.f32.xlu2 %v803_v18 }
  0x50   : > { %1480 = vmatpush.msra.mxu1 %v5375_v7  ;;  %792 = vadd.xlane.f32.xlu0 %v791_v19 }
  0x52   : > { %3918 = vmatpush.xpose.msk.msra.mxu0 %vm694_vm0, %v5359_v4 }
  0x56   : > { %3919 = vmatpush.xpose.msk.msra.mxu0 %vm694_vm0, %v5365_v5 }
  0x57   : > { %807 = vadd.xlane.f32.xlu1 %v806_v21 }
  0x5a   : > { %3920 = vmatpush.xpose.msk.msra.mxu0 %vm694_vm0, %v5369_v6 }
  0x5e   : > { %3921 = vmatpush.xpose.msk.msra.mxu0 %vm694_vm0, %v5375_v7 }
  0x61   : > { %3922 = vmatmul.msk.f32.vlgmr.msra.gmra.mxu0 %vm694_vm0, %v5375_v7 }
  0x69   : > { %3923 = vmatmul.msk.f32.gmra.mxu0 %vm694_vm0, %v5369_v6 }
  0x71   : > { %3924 = vmatmul.msk.f32.gmra.mxu0 %vm694_vm0, %v5365_v5 }
  0x79   : > { %3925 = vmatmul.msk.f32.gmra.mxu0 %vm694_vm0, %v5359_v4 }
  0x81   : > { %3926 = vmatmul.msk.f32.gmra.mxu0 %vm694_vm0, %v5355_v3 }
  0x89   : > { %3927 = vmatmul.msk.f32.gmra.mxu0 %vm694_vm0, %v5349_v2 }
  0x91   : > { %3928 = vmatmul.msk.f32.gmra.mxu0 %vm694_vm0, %v5345_v1 }
  0x99   : > { %3929 = vmatmul.msk.f32.gmra.mxu0 %vm694_vm0, %v5339_v0 }
  0xba   : > { %v802_v10 = vpop.xlane.xlu2 %801  ;;  %v796_v11 = vpop.xlane.xlu1 %795 }
  0xbb   : > { %v790_v8 = vpop.xlane.xlu0 %789 }
  0xc2   : > { %v805_v19 = vpop.xlane.xlu2 %804 }
  0xc3   : > { %v793_v16 = vpop.xlane.xlu0 %792 }
  0xde   : > { %v736_v22 = vpop.f32.mrf.mxu0 }
  0xdf   : > { %v812_v37 = vsel %vm771_vm2, %v736_v22, 0.0  ;;  %v849_v17 = vmul.f32 2.0, %v736_v22 }
  0xe0   : > { %v820_v42 = vsel %vm694_vm0, %v812_v37, 0.0  ;;  %v799_v37 = vpop.xlane.xlu1 %798 }
  0xe6   : > { %v739_v23 = vpop.f32.mrf.mxu0 }
  0xe7   : > { %v813_v35 = vsel %vm772_vm1, %v739_v23, 0.0  ;;  %v850_v20 = vmul.f32 2.0, %v739_v23 }
  0xe8   : > { %v821_v39 = vsel %vm694_vm0, %v813_v35, 0.0  ;;  %v808_v36 = vpop.xlane.xlu1 %807 }
  0xe9   : > { %v822_v44 = vadd.f32 %v821_v39, %v820_v42 }
  0xee   : > { %v742_v24 = vpop.f32.mrf.mxu0 }
  0xef   : > { %v814_v38 = vsel %vm773_vm3, %v742_v24, 0.0  ;;  %v851_v21 = vmul.f32 2.0, %v742_v24 }
  0xf0   : > { %v823_v43 = vsel %vm694_vm0, %v814_v38, 0.0 }
  0xf1   : > { %v824_v48 = vadd.f32 %v823_v43, %v822_v44 }
  0xf6   : > { %v5423_v25 = vpop.f32.mrf.mxu0 }
  0xf7   : > { %v815_v41 = vsel %vm774_vm4, %v5423_v25, 0.0  ;;  %v852_v44 = vmul.f32 2.0, %v5423_v25 }
  0xf8   : > { %v825_v46 = vsel %vm694_vm0, %v815_v41, 0.0 }
  0xf9   : > { %v826_v52 = vadd.f32 %v825_v46, %v824_v48 }
  0xfe   : > { %v5427_v28 = vpop.f32.mrf.mxu0 }
  0xff   : > { %v816_v45 = vsel %vm775_vm5, %v5427_v28, 0.0 }
 0x100   : > { %v827_v50 = vsel %vm694_vm0, %v816_v45, 0.0 }
 0x101   : > { %v828_v55 = vadd.f32 %v827_v50, %v826_v52  ;;  %v809_v52 = vsel %vm694_vm0, %v787_v31, 0.0 }
 0x106   : > { %v751_v34 = vpop.f32.mrf.mxu0 }
 0x107   : > { %v817_v49 = vsel %vm776_vm6, %v751_v34, 0.0  ;;  %v854_v23 = vmul.f32 2.0, %v751_v34 }
 0x108   : > { %v829_v54 = vsel %vm694_vm0, %v817_v49, 0.0 }
 0x109   : > { %v830_v57 = vadd.f32 %v829_v54, %v828_v55 }
 0x10e   : > { %v5482_v47 = vpop.f32.mrf.mxu0 }
 0x10f   : > { %v818_v53 = vsel %vm777_vm7, %v5482_v47, 0.0 }
 0x110   : > { %v831_v56 = vsel %vm694_vm0, %v818_v53, 0.0  ;;  %v853_v53 = vmul.f32 2.0, %v5427_v28  ;;  %v855_v28 = vmul.f32 2.0, %v5482_v47 }
 0x111   : > { %v832_v59 = vadd.f32 %v831_v56, %v830_v57 }
 0x116   : > { %v5501_v58 = vpop.f32.mrf.mxu0 }
 0x117   : > { %v819_v60 = vsel %vm778_vm8, %v5501_v58, 0.0 }
 0x118   : > { %v833_v61 = vsel %vm694_vm0, %v819_v60, 0.0 }
 0x119   : > { %v834_v62 = vadd.f32 %v833_v61, %v832_v59 }
 0x11b   : > { %v835_v63 = vrot.slane %v834_v62, 4 }
 0x11d   : > { %v836_v9 = vadd.f32 %v835_v63, %v834_v62 }
 0x11f   : > { %v837_v12 = vrot.slane %v836_v9, 2 }
 0x121   : > { %v838_v13 = vadd.f32 %v837_v12, %v836_v9 }
 0x123   : > { %v839_v14 = vrot.slane %v838_v13, 1 }
 0x125   : > { %v5508_v15 = vadd.f32 %v839_v14, %v838_v13 }
 0x127   : > { %v841_v18 = vadd.f32 %v5508_v15, %v790_v8  ;;  %v842_v26 = vadd.f32 %v5508_v15, %v793_v16  ;;  %v843_v35 = vadd.f32 %v5508_v15, %v796_v11  ;;  %v844_v39 = vadd.f32 %v5508_v15, %v799_v37 }
 0x128   : > { %v846_v41 = vadd.f32 %v5508_v15, %v805_v19  ;;  %v845_v29 = vadd.f32 %v5508_v15, %v802_v10  ;;  %v847_v57 = vadd.f32 %v5508_v15, %v808_v36  ;;  %v856_v16 = vmul.f32 2.0, %v5501_v58 }
 0x129   : > { %v857_v38 = vsub.f32 %v841_v18, %v849_v17  ;;  %v858_v42 = vsub.f32 %v842_v26, %v850_v20  ;;  %v859_v43 = vsub.f32 %v843_v35, %v851_v21  ;;  %v860_v34 = vsub.f32 %v844_v39, %v852_v44 }
 0x12a   : > { %v862_v48 = vsub.f32 %v846_v41, %v854_v23  ;;  %v861_v54 = vsub.f32 %v845_v29, %v853_v53  ;;  %v863_v60 = vsub.f32 %v847_v57, %v855_v28 }
 0x12b   : > { %v5519_v22 = vsel %vm771_vm2, inf, %v857_v38  ;;  %v5524_v24 = vsel %vm773_vm3, inf, %v859_v43  ;;  %v5529_v45 = vsel %vm772_vm1, inf, %v858_v42  ;;  %v5548_v50 = vsel %vm774_vm4, inf, %v860_v34 }
 0x12c   : > { %v873_v46 = vsel %vm694_vm0, %v5519_v22, inf  ;;  %v879_v25 = vsel %vm694_vm0, %v5524_v24, inf  ;;  %v876_v27 = vsel %vm694_vm0, %v5529_v45, inf  ;;  %v5543_v49 = vsel %vm776_vm6, inf, %v862_v48 }
 0x12d   : > { %874 = vmin.xlane.f32.xlu0 %v873_v46  ;;  %880 = vmin.xlane.f32.xlu1 %v879_v25  ;;  %v888_v55 = vsel %vm694_vm0, %v5543_v49, inf  ;;  %v882_v56 = vsel %vm694_vm0, %v5548_v50, inf  ;;  %v5560_v32 = vsel %vm775_vm5, inf, %v861_v54  ;;  %v5568_v61 = vsel %vm777_vm7, inf, %v863_v60 }
 0x12e   : > { %877 = vmin.xlane.f32.xlu2 %v876_v27  ;;  %v885_v59 = vsel %vm694_vm0, %v5560_v32, inf  ;;  %v891_v62 = vsel %vm694_vm0, %v5568_v61, inf  ;;  %v5127_v46 = vmov 0.0  }
 0x135   : > { %810 = vadd.xlane.f32.xlu0 %v809_v52  ;;  %889 = vmin.xlane.f32.xlu1 %v888_v55 }
 0x136   : > { %883 = vmin.xlane.f32.xlu2 %v882_v56 }
 0x13d   : > { %886 = vmin.xlane.f32.xlu0 %v885_v59  ;;  %v4442_v59 = vld [vmem:[#allocation7 + $0x18] sm:$0xff] }
 0x13e   : > { %2308 = vmatpush.bf16.msrb.mxu0 %v4442_v59 }
 0x145   : > { %892 = vmin.xlane.f32.xlu0 %v891_v62  ;;  %v4441_v62 = vld [vmem:[#allocation7 + $0x10] sm:$0xff] }
 0x146   : > { %2309 = vmatpush.bf16.msrb.mxu0 %v4441_v62 }
 0x1a0   : > { %v875_v63 = vpop.xlane.xlu0 %874  ;;  %v881_v8 = vpop.xlane.xlu1 %880 }
 0x1a1   : > { %v878_v47 = vpop.xlane.xlu2 %877  ;;  %vm897_vm9 = vcmp.le.f32.partialorder %v5519_v22, %v875_v63  ;;  %vm899_vm10 = vcmp.le.f32.partialorder %v5524_v24, %v881_v8  ;;  %v4440_v8 = vld [vmem:[#allocation7 + $0x8] sm:$0xff] }
 0x1a2   : > { %vm898_vm11 = vcmp.le.f32.partialorder %v5529_v45, %v878_v47  ;;  %v905_v40 = vsel %vm897_vm9, %v5573_v33, 64.0  ;;  %v907_v10 = vsel %vm899_vm10, %v5573_v33, 64.0  ;;  %2310 = vmatpush.bf16.msrb.mxu0 %v4440_v8 }
 0x1a3   : > { %v906_v9 = vsel %vm898_vm11, %v5573_v33, 64.0  ;;  %v913_v11 = vsel %vm694_vm0, %v905_v40, inf  ;;  %v919_v13 = vsel %vm694_vm0, %v907_v10, inf }
 0x1a4   : > { %v916_v12 = vsel %vm694_vm0, %v906_v9, inf  ;;  %914 = vmin.xlane.f32.xlu2 %v913_v11  ;;  %920 = vmin.xlane.f32.xlu0 %v919_v13  ;;  %v4439_v9 = vld [vmem:[#allocation7] sm:$0xff]  ;;  %v2260_v11 = vpack.c.bf16 %v5369_v6, %v5375_v7  ;;  %v2261_v13 = vpack.c.bf16 %v5359_v4, %v5365_v5 }
 0x1a5   : > { %917 = vmin.xlane.f32.xlu1 %v916_v12 }
 0x1a6   : > { %2311 = vmatpush.bf16.msrb.mxu0 %v4439_v9 }
 0x1a8   : > { %v811_v14 = vpop.xlane.xlu0 %810  ;;  %v890_v17 = vpop.xlane.xlu1 %889 }
 0x1a9   : > { %v884_v18 = vpop.xlane.xlu2 %883  ;;  %v848_v19 = vadd.f32 %v5508_v15, %v811_v14  ;;  %vm902_vm12 = vcmp.le.f32.partialorder %v5543_v49, %v890_v17  ;;  %4098 = vmatmul.msk.bf16.vlgmr.msrb.gmra.mxu0 %vm694_vm0, %v2260_v11  ;;  %v2263_v17 = vpack.c.bf16 %v5339_v0, %v5345_v1 }
 0x1aa   : > { %vm900_vm13 = vcmp.le.f32.partialorder %v5548_v50, %v884_v18  ;;  %v910_v26 = vsel %vm902_vm12, %v5573_v33, 64.0  ;;  %v4434_v18 = vld [vmem:[%s7244_s2 + $0x18] sm:$0xff] }
 0x1ab   : > { %v864_v20 = vsub.f32 %v848_v19, %v856_v16  ;;  %v908_v21 = vsel %vm900_vm13, %v5573_v33, 64.0  ;;  %v928_v37 = vsel %vm694_vm0, %v910_v26, inf  ;;  %v2262_v16 = vpack.c.bf16 %v5349_v2, %v5355_v3  ;;  %v4446_v19 = vld [vmem:[#allocation9 + $0x18] sm:$0xff]  ;;  %1762 = vmatpush.bf16.msra.mxu2 %v4434_v18  ;;  %v4432_v26 = vld [vmem:[%s7244_s2 + $0x8] sm:$0xff] }
 0x1ac   : > { %v922_v35 = vsel %vm694_vm0, %v908_v21, inf  ;;  %929 = vmin.xlane.f32.xlu0 %v928_v37  ;;  %2369 = vmatpush.bf16.msra.mxu0 %v4446_v19  ;;  %v4445_v21 = vld [vmem:[#allocation9 + $0x10] sm:$0xff]  ;;  %v4431_v37 = vld [vmem:[%s7244_s2] sm:$0xff] }
 0x1ad   : > { %923 = vmin.xlane.f32.xlu1 %v922_v35  ;;  %v5595_v58 = vsel %vm778_vm8, inf, %v864_v20  ;;  %v4433_v20 = vld [vmem:[%s7244_s2 + $0x10] sm:$0xff] }
 0x1ae   : > { %v894_v15 = vsel %vm694_vm0, %v5595_v58, inf  ;;  %v4444_v35 = vld [vmem:[#allocation9 + $0x8] sm:$0xff] }
 0x1af   : > { %895 = vmin.xlane.f32.xlu2 %v894_v15  ;;  %1763 = vmatpush.bf16.msra.mxu2 %v4433_v20  ;;  %v4443_v15 = vld [vmem:[#allocation9] sm:$0xff] }
 0x1b0   : > { %v887_v38 = vpop.xlane.xlu0 %886  ;;  %2370 = vmatpush.bf16.msra.mxu0 %v4445_v21 }
 0x1b1   : > { %vm901_vm14 = vcmp.le.f32.partialorder %v5560_v32, %v887_v38 }
 0x1b2   : > { %v909_v39 = vsel %vm901_vm14, %v5573_v33, 64.0 }
 0x1b3   : > { %v925_v41 = vsel %vm694_vm0, %v909_v39, inf  ;;  %1764 = vmatpush.bf16.msra.mxu2 %v4432_v26 }
 0x1b4   : > { %2371 = vmatpush.bf16.msra.mxu0 %v4444_v35 }
 0x1b7   : > { %926 = vmin.xlane.f32.xlu2 %v925_v41  ;;  %1765 = vmatpush.bf16.msra.mxu2 %v4431_v37 }
 0x1b8   : > { %v893_v42 = vpop.xlane.xlu0 %892  ;;  %2372 = vmatpush.bf16.msra.mxu0 %v4443_v15 }
 0x1b9   : > { %vm903_vm15 = vcmp.le.f32.partialorder %v5568_v61, %v893_v42  ;;  %4099 = vmatmul.msk.bf16.gmra.mxu0 %vm694_vm0, %v2261_v13 }
 0x1ba   : > { %v911_v43 = vsel %vm903_vm15, %v5573_v33, 64.0 }
 0x1bb   : > { %v931_v30 = vsel %vm694_vm0, %v911_v43, inf }
 0x1bf   : > { %932 = vmin.xlane.f32.xlu2 %v931_v30 }
 0x1c9   : > { %4100 = vmatmul.msk.bf16.gmra.mxu0 %vm694_vm0, %v2262_v16 }
 0x1d9   : > { %4101 = vmatmul.msk.bf16.gmra.mxu0 %vm694_vm0, %v2263_v17 }
 0x217   : > { %v915_v51 = vpop.xlane.xlu2 %914  ;;  %v921_v23 = vpop.xlane.xlu0 %920 }
 0x218   : > { %v918_v44 = vpop.xlane.xlu1 %917  ;;  %vm937_vm1 = vcmp.eq.f32.partialorder %v5573_v33, %v915_v51  ;;  %vm939_vm3 = vcmp.eq.f32.partialorder %v5573_v33, %v921_v23 }
 0x219   : > { %vm938_vm2 = vcmp.eq.f32.partialorder %v5573_v33, %v918_v44  ;;  %v3930_v25 = vsel %vm937_vm1, 1.0, %v5127_v46  ;;  %v5609_v27 = vsel %vm937_vm1, inf, %v5519_v22  ;;  %v5620_v48 = vsel %vm939_vm3, inf, %v5524_v24 }
 0x21a   : > { %v5615_v34 = vsel %vm938_vm2, inf, %v5529_v45  ;;  %3970 = vmatmul.msk.f32.vlgmr.msra.gmra.mxu1 %vm694_vm0, %v3930_v25  ;;  %v969_v22 = vsel %vm694_vm0, %v5609_v27, inf  ;;  %v975_v29 = vsel %vm694_vm0, %v5620_v48, inf  ;;  %v3931_v24 = vsel %vm938_vm2, 1.0, %v5127_v46 }
 0x21b   : > { %v972_v31 = vsel %vm694_vm0, %v5615_v34, inf  ;;  %970 = vmin.xlane.f32.xlu1 %v969_v22  ;;  %976 = vmin.xlane.f32.xlu2 %v975_v29 }
 0x21c   : > { %973 = vmin.xlane.f32.xlu0 %v972_v31 }
 0x21f   : > { %v930_v52 = vpop.xlane.xlu0 %929 }
 0x220   : > { %v924_v45 = vpop.xlane.xlu1 %923  ;;  %vm942_vm5 = vcmp.eq.f32.partialorder %v5573_v33, %v930_v52 }
 0x221   : > { %vm940_vm4 = vcmp.eq.f32.partialorder %v5573_v33, %v924_v45  ;;  %v5642_v54 = vsel %vm942_vm5, inf, %v5543_v49  ;;  %v3932_v49 = vsel %vm939_vm3, 1.0, %v5127_v46 }
 0x222   : > { %v5637_v53 = vsel %vm940_vm4, inf, %v5548_v50  ;;  %3971 = vmatmul.msk.f32.gmra.mxu1 %vm694_vm0, %v3931_v24  ;;  %v896_v55 = vpop.xlane.xlu2 %895  ;;  %v984_v36 = vsel %vm694_vm0, %v5642_v54, inf  ;;  %v3933_v47 = vsel %vm940_vm4, 1.0, %v5127_v46 }
 0x223   : > { %vm904_vm6 = vcmp.le.f32.partialorder %v5595_v58, %v896_v55  ;;  %v978_v56 = vsel %vm694_vm0, %v5637_v53, inf  ;;  %985 = vmin.xlane.f32.xlu2 %v984_v36 }
 0x224   : > { %979 = vmin.xlane.f32.xlu0 %v978_v56  ;;  %v912_v50 = vsel %vm904_vm6, %v5573_v33, 64.0 }
 0x225   : > { %v934_v57 = vsel %vm694_vm0, %v912_v50, inf }
 0x226   : > { %935 = vmin.xlane.f32.xlu1 %v934_v57 }
 0x22a   : > { %v927_v28 = vpop.xlane.xlu2 %926  ;;  %3972 = vmatmul.msk.f32.gmra.mxu1 %vm694_vm0, %v3932_v49 }
 0x22b   : > { %vm941_vm7 = vcmp.eq.f32.partialorder %v5573_v33, %v927_v28 }
 0x22c   : > { %v5660_v60 = vsel %vm941_vm7, inf, %v5560_v32  ;;  %v3934_v12 = vsel %vm941_vm7, 1.0, %v5127_v46 }
 0x22d   : > { %v981_v63 = vsel %vm694_vm0, %v5660_v60, inf }
 0x22e   : > { %982 = vmin.xlane.f32.xlu1 %v981_v63 }
 0x232   : > { %v933_v40 = vpop.xlane.xlu2 %932  ;;  %3973 = vmatmul.msk.f32.gmra.mxu1 %vm694_vm0, %v3933_v47 }
 0x233   : > { %vm943_vm8 = vcmp.eq.f32.partialorder %v5573_v33, %v933_v40 }
 0x234   : > { %v5670_v32 = vsel %vm943_vm8, inf, %v5568_v61  ;;  %v3935_v61 = vsel %vm942_vm5, 1.0, %v5127_v46  ;;  %v3936_v14 = vsel %vm943_vm8, 1.0, %v5127_v46 }
 0x235   : > { %v987_v10 = vsel %vm694_vm0, %v5670_v32, inf }
 0x236   : > { %988 = vmin.xlane.f32.xlu1 %v987_v10 }
 0x23a   : > { %3974 = vmatmul.msk.f32.gmra.mxu1 %vm694_vm0, %v3934_v12 }
 0x242   : > { %3975 = vmatmul.msk.f32.gmra.mxu1 %vm694_vm0, %v3935_v61 }
 0x24a   : > { %3976 = vmatmul.msk.f32.gmra.mxu1 %vm694_vm0, %v3936_v14 }
 0x28e   : > { %v971_v38 = vpop.xlane.xlu1 %970  ;;  %v977_v41 = vpop.xlane.xlu2 %976 }
 0x28f   : > { %v974_v39 = vpop.xlane.xlu0 %973  ;;  %vm993_vm9 = vcmp.le.f32.partialorder %v5609_v27, %v971_v38  ;;  %vm995_vm11 = vcmp.le.f32.partialorder %v5620_v48, %v977_v41  ;;  %v4437_v41 = vld [vmem:[#allocation4 + $0x10] sm:$0xff] }
 0x290   : > { %vm994_vm10 = vcmp.le.f32.partialorder %v5615_v34, %v974_v39  ;;  %v1001_v42 = vsel %vm993_vm9, %v5573_v33, 64.0  ;;  %v1003_v51 = vsel %vm995_vm11, %v5573_v33, 64.0  ;;  %v4438_v39 = vld [vmem:[#allocation4 + $0x18] sm:$0xff] }
 0x291   : > { %v1002_v43 = vsel %vm994_vm10, %v5573_v33, 64.0  ;;  %v1009_v30 = vsel %vm694_vm0, %v1001_v42, inf  ;;  %v1015_v23 = vsel %vm694_vm0, %v1003_v51, inf  ;;  %2067 = vmatpush.bf16.msra.mxu3 %v4438_v39 }
 0x292   : > { %v1012_v44 = vsel %vm694_vm0, %v1002_v43, inf  ;;  %1010 = vmin.xlane.f32.xlu0 %v1009_v30  ;;  %1016 = vmin.xlane.f32.xlu1 %v1015_v23 }
 0x293   : > { %1013 = vmin.xlane.f32.xlu2 %v1012_v44 }
 0x295   : > { %2068 = vmatpush.bf16.msra.mxu3 %v4437_v41 }
 0x296   : > { %v986_v22 = vpop.xlane.xlu2 %985 }
 0x297   : > { %v980_v25 = vpop.xlane.xlu0 %979  ;;  %v1482_v31 = vpop.f32.mrf.mxu1  ;;  %vm998_vm13 = vcmp.le.f32.partialorder %v5642_v54, %v986_v22 }
 0x298   : > { %vm996_vm12 = vcmp.le.f32.partialorder %v5637_v53, %v980_v25  ;;  %v1006_v52 = vsel %vm998_vm13, %v5573_v33, 64.0  ;;  %v1602_v49 = vsub.f32 %v1482_v31, %v5375_v7  ;;  %v4436_v31 = vld [vmem:[#allocation4 + $0x8] sm:$0xff] }
 0x299   : > { %v936_v29 = vpop.xlane.xlu1 %935  ;;  %v1004_v45 = vsel %vm996_vm12, %v5573_v33, 64.0  ;;  %v1024_v36 = vsel %vm694_vm0, %v1006_v52, inf  ;;  %2069 = vmatpush.bf16.msra.mxu3 %v4436_v31 }
 0x29a   : > { %vm944_vm14 = vcmp.eq.f32.partialorder %v5573_v33, %v936_v29  ;;  %v1018_v24 = vsel %vm694_vm0, %v1004_v45, inf  ;;  %1025 = vmin.xlane.f32.xlu1 %v1024_v36 }
 0x29b   : > { %v3937_v55 = vsel %vm944_vm14, 1.0, %v5127_v46  ;;  %v5725_v56 = vsel %vm944_vm14, inf, %v5595_v58  ;;  %1019 = vmin.xlane.f32.xlu2 %v1018_v24 }
 0x29c   : > { %3977 = vmatmul.msk.f32.gmra.mxu1 %vm694_vm0, %v3937_v55  ;;  %v990_v50 = vsel %vm694_vm0, %v5725_v56, inf }
 0x29d   : > { %991 = vmin.xlane.f32.xlu0 %v990_v50 }
 0x29f   : > { %v1485_v57 = vpop.f32.mrf.mxu1 }
 0x2a0   : > { %v1603_v28 = vsub.f32 %v1485_v57, %v5369_v6 }
 0x2a1   : > { %v983_v59 = vpop.xlane.xlu1 %982 }
 0x2a2   : > { %v1650_v62 = vpack.c.bf16 %v1603_v28, %v1602_v49  ;;  %vm997_vm15 = vcmp.le.f32.partialorder %v5660_v60, %v983_v59 }
 0x2a3   : > { %v1005_v58 = vsel %vm997_vm15, %v5573_v33, 64.0 }
 0x2a4   : > { %4026 = vmatmul.msk.bf16.vlgmr.msra.gmra.mxu2 %vm694_vm0, %v1650_v62  ;;  %4118 = vmatmul.msk.bf16.vlgmr.msra.gmra.mxu0 %vm694_vm0, %v1650_v62  ;;  %v1021_v63 = vsel %vm694_vm0, %v1005_v58, inf  ;;  %v5827_v62 = vld [vmem:[#allocation2] ss:$0 sm:$0xff] }
 0x2a5   : > { %1022 = vmin.xlane.f32.xlu0 %v1021_v63 }
 0x2a7   : > { %v1488_v8 = vpop.f32.mrf.mxu1 }
 0x2a8   : > { %v1604_v11 = vsub.f32 %v1488_v8, %v5365_v5 }
 0x2a9   : > { %v989_v47 = vpop.xlane.xlu1 %988 }
 0x2aa   : > { %vm999_vm1 = vcmp.le.f32.partialorder %v5670_v32, %v989_v47 }
 0x2ab   : > { %v1007_v40 = vsel %vm999_vm1, %v5573_v33, 64.0 }
 0x2ac   : > { %v1027_v9 = vsel %vm694_vm0, %v1007_v40, inf }
 0x2ad   : > { %1028 = vmin.xlane.f32.xlu0 %v1027_v9 }
 0x2af   : > { %v1491_v10 = vpop.f32.mrf.mxu1 }
 0x2b0   : > { %v1605_v12 = vsub.f32 %v1491_v10, %v5359_v4 }
 0x2b2   : > { %v1651_v61 = vpack.c.bf16 %v1605_v12, %v1604_v11 }
 0x2b4   : > { %4027 = vmatmul.msk.bf16.gmra.mxu2 %vm694_vm0, %v1651_v61  ;;  %4119 = vmatmul.msk.bf16.gmra.mxu0 %vm694_vm0, %v1651_v61 }
 0x2b7   : > { %v1494_v13 = vpop.f32.mrf.mxu1 }
 0x2b8   : > { %v1606_v16 = vsub.f32 %v1494_v13, %v5355_v3 }
 0x2bf   : > { %v1497_v14 = vpop.f32.mrf.mxu1 }
 0x2c0   : > { %v1607_v17 = vsub.f32 %v1497_v14, %v5349_v2 }
 0x2c2   : > { %v1652_v18 = vpack.c.bf16 %v1607_v17, %v1606_v16 }
 0x2c4   : > { %4028 = vmatmul.msk.bf16.gmra.mxu2 %vm694_vm0, %v1652_v18  ;;  %4120 = vmatmul.msk.bf16.gmra.mxu0 %vm694_vm0, %v1652_v18 }
 0x2c7   : > { %v1500_v51 = vpop.f32.mrf.mxu1 }
 0x2c8   : > { %v1608_v24 = vsub.f32 %v1500_v51, %v5345_v1 }
 0x305   : > { %v1011_v20 = vpop.xlane.xlu0 %1010  ;;  %v1017_v21 = vpop.xlane.xlu1 %1016 }
 0x306   : > { %v1014_v19 = vpop.xlane.xlu2 %1013  ;;  %vm1033_vm3 = vcmp.eq.f32.partialorder %v5573_v33, %v1011_v20  ;;  %vm1035_vm4 = vcmp.eq.f32.partialorder %v5573_v33, %v1017_v21 }
 0x307   : > { %vm1034_vm2 = vcmp.eq.f32.partialorder %v5573_v33, %v1014_v19  ;;  %v3938_v2 = vsel %vm1033_vm3, 1.0, %v5127_v46  ;;  %v5761_v35 = vsel %vm1035_vm4, inf, %v5620_v48  ;;  %v5764_v37 = vsel %vm1033_vm3, inf, %v5609_v27 }
 0x308   : > { %v5755_v26 = vsel %vm1034_vm2, inf, %v5615_v34  ;;  %3978 = vmatmul.msk.f32.gmra.mxu1 %vm694_vm0, %v3938_v2  ;;  %v1071_v38 = vsel %vm694_vm0, %v5761_v35, inf  ;;  %v1065_v34 = vsel %vm694_vm0, %v5764_v37, inf  ;;  %v3939_v42 = vsel %vm1034_vm2, 1.0, %v5127_v46 }
 0x309   : > { %v1068_v15 = vsel %vm694_vm0, %v5755_v26, inf  ;;  %1072 = vmin.xlane.f32.xlu0 %v1071_v38  ;;  %1066 = vmin.xlane.f32.xlu2 %v1065_v34  ;;  %v3940_v29 = vsel %vm1035_vm4, 1.0, %v5127_v46 }
 0x30a   : > { %1069 = vmin.xlane.f32.xlu1 %v1068_v15 }
 0x30d   : > { %v1026_v27 = vpop.xlane.xlu1 %1025 }
 0x30e   : > { %v1020_v48 = vpop.xlane.xlu2 %1019  ;;  %vm1038_vm6 = vcmp.eq.f32.partialorder %v5573_v33, %v1026_v27 }
 0x30f   : > { %vm1036_vm5 = vcmp.eq.f32.partialorder %v5573_v33, %v1020_v48  ;;  %v5786_v44 = vsel %vm1038_vm6, inf, %v5642_v54  ;;  %v4435_v54 = vld [vmem:[#allocation4] sm:$0xff] }
 0x310   : > { %v5781_v43 = vsel %vm1036_vm5, inf, %v5637_v53  ;;  %v992_v30 = vpop.xlane.xlu0 %991  ;;  %3979 = vmatmul.msk.f32.gmra.mxu1 %vm694_vm0, %v3939_v42  ;;  %v1080_v25 = vsel %vm694_vm0, %v5786_v44, inf  ;;  %2070 = vmatpush.bf16.msra.mxu3 %v4435_v54  ;;  %v3941_v1 = vsel %vm1036_vm5, 1.0, %v5127_v46 }
 0x311   : > { %vm1000_vm7 = vcmp.le.f32.partialorder %v5725_v56, %v992_v30  ;;  %v1074_v23 = vsel %vm694_vm0, %v5781_v43, inf  ;;  %1081 = vmin.xlane.f32.xlu0 %v1080_v25 }
 0x312   : > { %1075 = vmin.xlane.f32.xlu1 %v1074_v23  ;;  %v1008_v53 = vsel %vm1000_vm7, %v5573_v33, 64.0 }
 0x313   : > { %v1030_v22 = vsel %vm694_vm0, %v1008_v53, inf }
 0x314   : > { %1031 = vmin.xlane.f32.xlu2 %v1030_v22 }
 0x318   : > { %v1023_v45 = vpop.xlane.xlu0 %1022  ;;  %3980 = vmatmul.msk.f32.gmra.mxu1 %vm694_vm0, %v3940_v29 }
 0x319   : > { %vm1037_vm8 = vcmp.eq.f32.partialorder %v5573_v33, %v1023_v45  ;;  %v1503_v52 = vpop.f32.mrf.mxu1 }
 0x31a   : > { %v5805_v55 = vsel %vm1037_vm8, inf, %v5660_v60  ;;  %v1609_v36 = vsub.f32 %v1503_v52, %v5339_v0  ;;  %v3942_v59 = vsel %vm1037_vm8, 1.0, %v5127_v46 }
 0x31b   : > { %v1077_v50 = vsel %vm694_vm0, %v5805_v55, inf }
 0x31c   : > { %v1653_v57 = vpack.c.bf16 %v1609_v36, %v1608_v24  ;;  %1078 = vmin.xlane.f32.xlu2 %v1077_v50 }
 0x31e   : > { %4029 = vmatmul.msk.bf16.gmra.mxu2 %vm694_vm0, %v1653_v57  ;;  %4121 = vmatmul.msk.bf16.gmra.mxu0 %vm694_vm0, %v1653_v57 }
 0x320   : > { %v1029_v49 = vpop.xlane.xlu0 %1028  ;;  %3981 = vmatmul.msk.f32.gmra.mxu1 %vm694_vm0, %v3941_v1 }
 0x321   : > { %vm1039_vm9 = vcmp.eq.f32.partialorder %v5573_v33, %v1029_v49 }
 0x322   : > { %v5820_v0 = vsel %vm1039_vm9, inf, %v5670_v32  ;;  %v3943_v32 = vsel %vm1038_vm6, 1.0, %v5127_v46  ;;  %v3944_v61 = vsel %vm1039_vm9, 1.0, %v5127_v46 }
 0x323   : > { %v1083_v60 = vsel %vm694_vm0, %v5820_v0, inf }
 0x324   : > { %1084 = vmin.xlane.f32.xlu2 %v1083_v60 }
 0x327   : > { %v1767_v28 = vpop.f32.mrf.mxu2 }
 0x328   : > { %3982 = vmatmul.msk.f32.gmra.mxu1 %vm694_vm0, %v3942_v59  ;;  %v1768_v58 = vadd.f32 %v5827_v62, %v1767_v28 }
 0x32a   : > { %v1867_v8 = vmul.f32 0.01, %v1768_v58 }
 0x32c   : > { %v1907_v9 = vmax.f32 %v1768_v58, %v1867_v8 }
 0x32f   : > { %v1769_v63 = vpop.f32.mrf.mxu2 }
 0x330   : > { %v1770_v47 = vadd.f32 %v5827_v62, %v1769_v63  ;;  %3983 = vmatmul.msk.f32.gmra.mxu1 %vm694_vm0, %v3943_v32 }
 0x332   : > { %v1868_v40 = vmul.f32 0.01, %v1770_v47 }
 0x334   : > { %v1908_v10 = vmax.f32 %v1770_v47, %v1868_v40 }
 0x336   : > { %v1955_v11 = vpack.c.bf16 %v1908_v10, %v1907_v9 }
 0x337   : > { %v1772_v12 = vpop.f32.mrf.mxu2 }
 0x338   : > { %4062 = vmatmul.msk.bf16.vlgmr.msra.gmra.mxu3 %vm694_vm0, %v1955_v11  ;;  %3984 = vmatmul.msk.f32.gmra.mxu1 %vm694_vm0, %v3944_v61  ;;  %v1773_v13 = vadd.f32 %v5827_v62, %v1772_v12 }
 0x33a   : > { %v1869_v16 = vmul.f32 0.01, %v1773_v13 }
 0x33c   : > { %v1909_v19 = vmax.f32 %v1773_v13, %v1869_v16 }
 0x33f   : > { %v1774_v14 = vpop.f32.mrf.mxu2 }
 0x340   : > { %v1775_v17 = vadd.f32 %v5827_v62, %v1774_v14 }
 0x342   : > { %v1870_v18 = vmul.f32 0.01, %v1775_v17 }
 0x344   : > { %v1910_v20 = vmax.f32 %v1775_v17, %v1870_v18 }
 0x346   : > { %v1956_v21 = vpack.c.bf16 %v1910_v20, %v1909_v19 }
 0x347   : > { %v1777_v2 = vpop.f32.mrf.mxu2 }
 0x348   : > { %4063 = vmatmul.msk.bf16.gmra.mxu3 %vm694_vm0, %v1956_v21  ;;  %v1778_v15 = vadd.f32 %v5827_v62, %v1777_v2 }
 0x34a   : > { %v1871_v34 = vmul.f32 0.01, %v1778_v15 }
 0x34c   : > { %v1911_v41 = vmax.f32 %v1778_v15, %v1871_v34 }
 0x34f   : > { %v1779_v38 = vpop.f32.mrf.mxu2 }
 0x350   : > { %v1780_v39 = vadd.f32 %v5827_v62, %v1779_v38 }
 0x352   : > { %v1872_v48 = vmul.f32 0.01, %v1780_v39 }
 0x354   : > { %v1912_v27 = vmax.f32 %v1780_v39, %v1872_v48 }
 0x356   : > { %v1957_v42 = vpack.c.bf16 %v1912_v27, %v1911_v41 }
 0x358   : > { %4064 = vmatmul.msk.bf16.gmra.mxu3 %vm694_vm0, %v1957_v42 }
 0x37c   : > { %v1067_v51 = vpop.xlane.xlu2 %1066  ;;  %v1073_v23 = vpop.xlane.xlu0 %1072 }
 0x37d   : > { %v1070_v30 = vpop.xlane.xlu1 %1069  ;;  %vm1089_vm11 = vcmp.le.f32.partialorder %v5764_v37, %v1067_v51  ;;  %vm1091_vm12 = vcmp.le.f32.partialorder %v5761_v35, %v1073_v23 }
 0x37e   : > { %vm1090_vm10 = vcmp.le.f32.partialorder %v5755_v26, %v1070_v30  ;;  %v1097_v31 = vsel %vm1089_vm11, %v5573_v33, 64.0  ;;  %v1099_v22 = vsel %vm1091_vm12, %v5573_v33, 64.0 }
 0x37f   : > { %v1098_v25 = vsel %vm1090_vm10, %v5573_v33, 64.0  ;;  %v1105_v54 = vsel %vm694_vm0, %v1097_v31, inf  ;;  %v1111_v29 = vsel %vm694_vm0, %v1099_v22, inf }
 0x380   : > { %v1108_v53 = vsel %vm694_vm0, %v1098_v25, inf  ;;  %1106 = vmin.xlane.f32.xlu1 %v1105_v54  ;;  %1112 = vmin.xlane.f32.xlu2 %v1111_v29 }
 0x381   : > { %1109 = vmin.xlane.f32.xlu0 %v1108_v53 }
 0x384   : > { %v1082_v52 = vpop.xlane.xlu0 %1081 }
 0x385   : > { %v1076_v45 = vpop.xlane.xlu1 %1075  ;;  %v1506_v24 = vpop.f32.mrf.mxu1  ;;  %vm1094_vm14 = vcmp.le.f32.partialorder %v5786_v44, %v1082_v52 }
 0x386   : > { %vm1092_vm13 = vcmp.le.f32.partialorder %v5781_v43, %v1076_v45  ;;  %v1102_v1 = vsel %vm1094_vm14, %v5573_v33, 64.0  ;;  %v1610_v63 = vsub.f32 %v1506_v24, %v5375_v7 }
 0x387   : > { %v1032_v36 = vpop.xlane.xlu2 %1031  ;;  %v1100_v50 = vsel %vm1092_vm13, %v5573_v33, 64.0  ;;  %v1120_v28 = vsel %vm694_vm0, %v1102_v1, inf  ;;  %v5945_v1 = vld [vmem:[%s5336_s6 + $0x30] sm:$0xff] }
 0x388   : > { %vm1040_vm15 = vcmp.eq.f32.partialorder %v5573_v33, %v1032_v36  ;;  %v1114_v57 = vsel %vm694_vm0, %v1100_v50, inf  ;;  %1121 = vmin.xlane.f32.xlu2 %v1120_v28  ;;  %v5951_v28 = vld [vmem:[%s5336_s6 + $0x38] sm:$0xff] }
 0x389   : > { %v3945_v49 = vsel %vm1040_vm15, 1.0, %v5127_v46  ;;  %v5864_v60 = vsel %vm1040_vm15, inf, %v5725_v56  ;;  %1115 = vmin.xlane.f32.xlu0 %v1114_v57 }
 0x38a   : > { %3985 = vmatmul.msk.f32.gmra.mxu1 %vm694_vm0, %v3945_v49  ;;  %v1086_v59 = vsel %vm694_vm0, %v5864_v60, inf }
 0x38b   : > { %1087 = vmin.xlane.f32.xlu1 %v1086_v59 }
 0x38d   : > { %v1509_v58 = vpop.f32.mrf.mxu1 }
 0x38e   : > { %v1611_v32 = vsub.f32 %v1509_v58, %v5369_v6 }
 0x38f   : > { %v1079_v8 = vpop.xlane.xlu2 %1078 }
 0x390   : > { %vm1093_vm1 = vcmp.le.f32.partialorder %v5805_v55, %v1079_v8  ;;  %v1654_v56 = vpack.c.bf16 %v1611_v32, %v1610_v63 }
 0x391   : > { %v1101_v47 = vsel %vm1093_vm1, %v5573_v33, 64.0 }
 0x392   : > { %v1117_v40 = vsel %vm694_vm0, %v1101_v47, inf  ;;  %4030 = vmatmul.msk.bf16.gmra.mxu2 %vm694_vm0, %v1654_v56  ;;  %4122 = vmatmul.msk.bf16.gmra.mxu0 %vm694_vm0, %v1654_v56 }
 0x393   : > { %1118 = vmin.xlane.f32.xlu1 %v1117_v40 }
 0x395   : > { %v1512_v9 = vpop.f32.mrf.mxu1 }
 0x396   : > { %v1612_v12 = vsub.f32 %v1512_v9, %v5365_v5 }
 0x397   : > { %v1085_v10 = vpop.xlane.xlu2 %1084 }
 0x398   : > { %vm1095_vm2 = vcmp.le.f32.partialorder %v5820_v0, %v1085_v10 }
 0x399   : > { %v1103_v7 = vsel %vm1095_vm2, %v5573_v33, 64.0 }
 0x39a   : > { %v1123_v6 = vsel %vm694_vm0, %v1103_v7, inf }
 0x39b   : > { %1124 = vmin.xlane.f32.xlu1 %v1123_v6 }
 0x39d   : > { %v1515_v11 = vpop.f32.mrf.mxu1 }
 0x39e   : > { %v1613_v61 = vsub.f32 %v1515_v11, %v5359_v4  ;;  %v5888_v4 = vld [vmem:[%s5336_s6 + $0x28] sm:$0xff] }
 0x3a0   : > { %v1655_v13 = vpack.c.bf16 %v1613_v61, %v1612_v12 }
 0x3a1   : > { %v1782_v14 = vpop.f32.mrf.mxu2 }
 0x3a2   : > { %4031 = vmatmul.msk.bf16.gmra.mxu2 %vm694_vm0, %v1655_v13  ;;  %4123 = vmatmul.msk.bf16.gmra.mxu0 %vm694_vm0, %v1655_v13  ;;  %v1783_v16 = vadd.f32 %v5827_v62, %v1782_v14 }
 0x3a4   : > { %v1873_v19 = vmul.f32 0.01, %v1783_v16 }
 0x3a5   : > { %v1518_v17 = vpop.f32.mrf.mxu1 }
 0x3a6   : > { %v1913_v2 = vmax.f32 %v1783_v16, %v1873_v19  ;;  %v1614_v38 = vsub.f32 %v1518_v17, %v5355_v3 }
 0x3a9   : > { %v1784_v18 = vpop.f32.mrf.mxu2 }
 0x3aa   : > { %v1785_v20 = vadd.f32 %v5827_v62, %v1784_v18 }
 0x3ac   : > { %v1874_v21 = vmul.f32 0.01, %v1785_v20 }
 0x3ad   : > { %v1521_v5 = vpop.f32.mrf.mxu1 }
 0x3ae   : > { %v1914_v15 = vmax.f32 %v1785_v20, %v1874_v21  ;;  %v1615_v34 = vsub.f32 %v1521_v5, %v5888_v4 }
 0x3b0   : > { %v1958_v39 = vpack.c.bf16 %v1914_v15, %v1913_v2  ;;  %v1656_v48 = vpack.c.bf16 %v1615_v34, %v1614_v38 }
 0x3b2   : > { %4065 = vmatmul.msk.bf16.gmra.mxu3 %vm694_vm0, %v1958_v39  ;;  %4032 = vmatmul.msk.bf16.gmra.mxu2 %vm694_vm0, %v1656_v48 }
 0x3b3   : > { %4124 = vmatmul.msk.bf16.gmra.mxu0 %vm694_vm0, %v1656_v48 }
 0x3b5   : > { %v1524_v54 = vpop.f32.mrf.mxu1 }
 0x3b6   : > { %v1616_v49 = vsub.f32 %v1524_v54, %v5945_v1 }
 0x3f3   : > { %v1107_v27 = vpop.xlane.xlu1 %1106  ;;  %v1113_v42 = vpop.xlane.xlu2 %1112 }
 0x3f4   : > { %v1110_v41 = vpop.xlane.xlu0 %1109  ;;  %vm1129_vm4 = vcmp.eq.f32.partialorder %v5573_v33, %v1107_v27  ;;  %vm1131_vm5 = vcmp.eq.f32.partialorder %v5573_v33, %v1113_v42 }
 0x3f5   : > { %vm1130_vm3 = vcmp.eq.f32.partialorder %v5573_v33, %v1110_v41  ;;  %v3946_v30 = vsel %vm1129_vm4, 1.0, %v5127_v46  ;;  %v5904_v51 = vsel %vm1129_vm4, inf, %v5764_v37  ;;  %v5909_v23 = vsel %vm1131_vm5, inf, %v5761_v35 }
 0x3f6   : > { %v5900_v3 = vsel %vm1130_vm3, inf, %v5755_v26  ;;  %3986 = vmatmul.msk.f32.gmra.mxu1 %vm694_vm0, %v3946_v30  ;;  %v1161_v25 = vsel %vm694_vm0, %v5904_v51, inf  ;;  %v1167_v53 = vsel %vm694_vm0, %v5909_v23, inf  ;;  %v3947_v29 = vsel %vm1130_vm3, 1.0, %v5127_v46 }
 0x3f7   : > { %v1164_v26 = vsel %vm694_vm0, %v5900_v3, inf  ;;  %1162 = vmin.xlane.f32.xlu0 %v1161_v25  ;;  %1168 = vmin.xlane.f32.xlu1 %v1167_v53 }
 0x3f8   : > { %1165 = vmin.xlane.f32.xlu2 %v1164_v26  ;;  %v5996_v26 = vpop.f32.mrf.mxu3 }
 0x3fb   : > { %v1122_v31 = vpop.xlane.xlu2 %1121 }
 0x3fc   : > { %v1116_v37 = vpop.xlane.xlu0 %1115  ;;  %vm1134_vm7 = vcmp.eq.f32.partialorder %v5573_v33, %v1122_v31 }
 0x3fd   : > { %vm1132_vm6 = vcmp.eq.f32.partialorder %v5573_v33, %v1116_v37  ;;  %v5931_v45 = vsel %vm1134_vm7, inf, %v5786_v44  ;;  %v3948_v44 = vsel %vm1131_vm5, 1.0, %v5127_v46  ;;  %v3951_v6 = vsel %vm1134_vm7, 1.0, %v5127_v46 }
 0x3fe   : > { %v5923_v35 = vsel %vm1132_vm6, inf, %v5781_v43  ;;  %v1088_v22 = vpop.xlane.xlu1 %1087  ;;  %3987 = vmatmul.msk.f32.gmra.mxu1 %vm694_vm0, %v3947_v29  ;;  %v1176_v43 = vsel %vm694_vm0, %v5931_v45, inf  ;;  %v3949_v8 = vsel %vm1132_vm6, 1.0, %v5127_v46 }
 0x3ff   : > { %vm1096_vm8 = vcmp.le.f32.partialorder %v5864_v60, %v1088_v22  ;;  %v1170_v52 = vsel %vm694_vm0, %v5923_v35, inf  ;;  %1177 = vmin.xlane.f32.xlu1 %v1176_v43 }
 0x400   : > { %v1104_v24 = vsel %vm1096_vm8, %v5573_v33, 64.0  ;;  %1171 = vmin.xlane.f32.xlu2 %v1170_v52  ;;  %v5998_v37 = vpop.f32.mrf.mxu3 }
 0x401   : > { %v1126_v36 = vsel %vm694_vm0, %v1104_v24, inf }
 0x402   : > { %1127 = vmin.xlane.f32.xlu0 %v1126_v36 }
 0x406   : > { %v1119_v50 = vpop.xlane.xlu1 %1118  ;;  %3988 = vmatmul.msk.f32.gmra.mxu1 %vm694_vm0, %v3948_v44  ;;  %v6008_v44 = vpop.f32.mrf.mxu0 }
 0x407   : > { %v1527_v57 = vpop.f32.mrf.mxu1  ;;  %vm1133_vm9 = vcmp.eq.f32.partialorder %v5573_v33, %v1119_v50 }
 0x408   : > { %v1617_v59 = vsub.f32 %v1527_v57, %v5951_v28  ;;  %v5957_v58 = vsel %vm1133_vm9, inf, %v5805_v55  ;;  %v3950_v9 = vsel %vm1133_vm9, 1.0, %v5127_v46  ;;  %v6011_v57 = vpop.f32.mrf.mxu3 }
 0x409   : > { %v1173_v32 = vsel %vm694_vm0, %v5957_v58, inf }
 0x40a   : > { %v1657_v63 = vpack.c.bf16 %v1617_v59, %v1616_v49  ;;  %1174 = vmin.xlane.f32.xlu0 %v1173_v32 }
 0x40c   : > { %4033 = vmatmul.msk.bf16.gmra.mxu2 %vm694_vm0, %v1657_v63  ;;  %4125 = vmatmul.msk.bf16.gmra.mxu0 %vm694_vm0, %v1657_v63 }
 0x40e   : > { %v1125_v56 = vpop.xlane.xlu1 %1124  ;;  %3989 = vmatmul.msk.f32.gmra.mxu1 %vm694_vm0, %v3949_v8 }
 0x40f   : > { %vm1135_vm10 = vcmp.eq.f32.partialorder %v5573_v33, %v1125_v56 }
 0x410   : > { %v5971_v55 = vsel %vm1135_vm10, inf, %v5820_v0  ;;  %v3952_v17 = vsel %vm1135_vm10, 1.0, %v5127_v46 }
 0x411   : > { %v1179_v47 = vsel %vm694_vm0, %v5971_v55, inf }
 0x412   : > { %1180 = vmin.xlane.f32.xlu0 %v1179_v47 }
 0x415   : > { %v1787_v40 = vpop.f32.mrf.mxu2 }
 0x416   : > { %3990 = vmatmul.msk.f32.gmra.mxu1 %vm694_vm0, %v3950_v9  ;;  %v1788_v10 = vadd.f32 %v5827_v62, %v1787_v40 }
 0x418   : > { %v1875_v0 = vmul.f32 0.01, %v1788_v10 }
 0x41a   : > { %v1915_v61 = vmax.f32 %v1788_v10, %v1875_v0  ;;  %v6029_v0 = vpop.f32.mrf.mxu3 }
 0x41d   : > { %v1789_v7 = vpop.f32.mrf.mxu2 }
 0x41e   : > { %v1790_v11 = vadd.f32 %v5827_v62, %v1789_v7  ;;  %3991 = vmatmul.msk.f32.gmra.mxu1 %vm694_vm0, %v3951_v6  ;;  %v6027_v6 = vpop.f32.mrf.mxu0 }
 0x420   : > { %v1876_v12 = vmul.f32 0.01, %v1790_v11 }
 0x422   : > { %v1916_v13 = vmax.f32 %v1790_v11, %v1876_v12  ;;  %v6032_v12 = vld [vmem:[%s5336_s6] sm:$0xff] }
 0x424   : > { %v1959_v14 = vpack.c.bf16 %v1916_v13, %v1915_v61  ;;  %v6036_v61 = vld [vmem:[%s5336_s6 + $0x8] sm:$0xff] }
 0x425   : > { %v1792_v16 = vpop.f32.mrf.mxu2 }
 0x426   : > { %4066 = vmatmul.msk.bf16.gmra.mxu3 %vm694_vm0, %v1959_v14  ;;  %3992 = vmatmul.msk.f32.gmra.mxu1 %vm694_vm0, %v3952_v17  ;;  %v1793_v18 = vadd.f32 %v5827_v62, %v1792_v16 }
 0x428   : > { %v1877_v20 = vmul.f32 0.01, %v1793_v18 }
 0x42a   : > { %v1917_v15 = vmax.f32 %v1793_v18, %v1877_v20 }
 0x42d   : > { %v1794_v19 = vpop.f32.mrf.mxu2 }
 0x42e   : > { %v1795_v21 = vadd.f32 %v5827_v62, %v1794_v19  ;;  %v6044_v19 = vpop.f32.mrf.mxu0 }
 0x430   : > { %v1878_v2 = vmul.f32 0.01, %v1795_v21 }
 0x432   : > { %v1918_v5 = vmax.f32 %v1795_v21, %v1878_v2  ;;  %v2082_v21 = vpop.f32.mrf.mxu3 }
 0x434   : > { %v1960_v38 = vpack.c.bf16 %v1918_v5, %v1917_v15 }
 0x435   : > { %v1797_v34 = vpop.f32.mrf.mxu2 }
 0x436   : > { %4067 = vmatmul.msk.bf16.gmra.mxu3 %vm694_vm0, %v1960_v38  ;;  %v1798_v39 = vadd.f32 %v5827_v62, %v1797_v34  ;;  %v6049_v34 = vpop.f32.mrf.mxu0 }
 0x438   : > { %v1879_v41 = vmul.f32 0.01, %v1798_v39 }
 0x43a   : > { %v1919_v30 = vmax.f32 %v1798_v39, %v1879_v41  ;;  %v6052_v39 = vld [vmem:[%s5336_s6 + $0x10] sm:$0xff]  ;;  %v6056_v41 = vld [vmem:[%s5336_s6 + $0x18] sm:$0xff] }
 0x43d   : > { %v1799_v48 = vpop.f32.mrf.mxu2 }
 0x43e   : > { %v1800_v27 = vadd.f32 %v5827_v62, %v1799_v48 }
 0x440   : > { %v1880_v42 = vmul.f32 0.01, %v1800_v27 }
 0x442   : > { %v1920_v25 = vmax.f32 %v1800_v27, %v1880_v42 }
 0x444   : > { %v1961_v53 = vpack.c.bf16 %v1920_v25, %v1919_v30  ;;  %v6059_v30 = vpop.f32.mrf.mxu3 }
 0x446   : > { %4068 = vmatmul.msk.bf16.gmra.mxu3 %vm694_vm0, %v1961_v53 }
 0x46a   : > { %v1169_v31 = vpop.xlane.xlu1 %1168  ;;  %v1163_v22 = vpop.xlane.xlu0 %1162 }
 0x46b   : > { %vm1187_vm11 = vcmp.le.f32.partialorder %v5909_v23, %v1169_v31  ;;  %v1166_v54 = vpop.xlane.xlu2 %1165  ;;  %vm1185_vm12 = vcmp.le.f32.partialorder %v5904_v51, %v1163_v22 }
 0x46c   : > { %vm1186_vm13 = vcmp.le.f32.partialorder %v5900_v3, %v1166_v54  ;;  %v1195_v29 = vsel %vm1187_vm11, %v5573_v33, 64.0  ;;  %v1193_v52 = vsel %vm1185_vm12, %v5573_v33, 64.0  ;;  %v6064_v54 = vpop.f32.mrf.mxu0 }
 0x46d   : > { %v1207_v43 = vsel %vm694_vm0, %v1195_v29, inf  ;;  %v1194_v24 = vsel %vm1186_vm13, %v5573_v33, 64.0  ;;  %v1201_v36 = vsel %vm694_vm0, %v1193_v52, inf  ;;  %v6066_v29 = vpop.f32.mrf.mxu3 }
 0x46e   : > { %1208 = vmin.xlane.f32.xlu0 %v1207_v43  ;;  %v1204_v50 = vsel %vm694_vm0, %v1194_v24, inf  ;;  %1202 = vmin.xlane.f32.xlu2 %v1201_v36 }
 0x46f   : > { %1205 = vmin.xlane.f32.xlu1 %v1204_v50 }
 0x472   : > { %v1178_v49 = vpop.xlane.xlu1 %1177 }
 0x473   : > { %vm1190_vm14 = vcmp.le.f32.partialorder %v5931_v45, %v1178_v49  ;;  %v1172_v59 = vpop.xlane.xlu2 %1171  ;;  %v1530_v63 = vpop.f32.mrf.mxu1 }
 0x474   : > { %vm1188_vm15 = vcmp.le.f32.partialorder %v5923_v35, %v1172_v59  ;;  %v1198_v8 = vsel %vm1190_vm14, %v5573_v33, 64.0  ;;  %v6070_v59 = vld [vmem:[%s5336_s6 + $0x20] sm:$0xff] }
 0x475   : > { %v1128_v32 = vpop.xlane.xlu0 %1127  ;;  %v1216_v56 = vsel %vm694_vm0, %v1198_v8, inf  ;;  %v1196_v47 = vsel %vm1188_vm15, %v5573_v33, 64.0 }
 0x476   : > { %vm1136_vm1 = vcmp.eq.f32.partialorder %v5573_v33, %v1128_v32  ;;  %1217 = vmin.xlane.f32.xlu0 %v1216_v56  ;;  %v1210_v10 = vsel %vm694_vm0, %v1196_v47, inf  ;;  %v6075_v47 = vpop.f32.mrf.mxu0 }
 0x477   : > { %v3953_v40 = vsel %vm1136_vm1, 1.0, %v5127_v46  ;;  %v6021_v9 = vsel %vm1136_vm1, inf, %v5864_v60  ;;  %1211 = vmin.xlane.f32.xlu1 %v1210_v10  ;;  %v1618_v60 = vsub.f32 %v1530_v63, %v6032_v12  ;;  %v6081_v10 = vld [vmem:[#allocation6] ss:$0 sm:$0xff] }
 0x478   : > { %3993 = vmatmul.msk.f32.gmra.mxu1 %vm694_vm0, %v3953_v40  ;;  %v1182_v7 = vsel %vm694_vm0, %v6021_v9, inf  ;;  %v6077_v40 = vpop.f32.mrf.mxu3 }
 0x479   : > { %1183 = vmin.xlane.f32.xlu2 %v1182_v7  ;;  %7289 = vst [vmem:[#allocation26_spill] sm:$0xff] %v6077_v40  ;;  %v2073_v7 = vadd.f32 %v6081_v10, %v5996_v26 }
 0x47b   : > { %v1533_v11 = vpop.f32.mrf.mxu1 }
 0x47c   : > { %v1619_v13 = vsub.f32 %v1533_v11, %v6036_v61 }
 0x47d   : > { %v1175_v14 = vpop.xlane.xlu0 %1174 }
 0x47e   : > { %vm1189_vm2 = vcmp.le.f32.partialorder %v5957_v58, %v1175_v14  ;;  %v1658_v16 = vpack.c.bf16 %v1619_v13, %v1618_v60  ;;  %v2172_v60 = vmul.f32 0.01, %v2073_v7 }
 0x47f   : > { %v1197_v17 = vsel %vm1189_vm2, %v5573_v33, 64.0 }
 0x480   : > { %v1213_v18 = vsel %vm694_vm0, %v1197_v17, inf  ;;  %4034 = vmatmul.msk.bf16.gmra.mxu2 %vm694_vm0, %v1658_v16  ;;  %4126 = vmatmul.msk.bf16.gmra.mxu0 %vm694_vm0, %v1658_v16  ;;  %v6086_v16 = vmax.f32 %v2073_v7, %v2172_v60 }
 0x481   : > { %1214 = vmin.xlane.f32.xlu2 %v1213_v18 }
 0x483   : > { %v1536_v20 = vpop.f32.mrf.mxu1 }
 0x484   : > { %v1620_v48 = vsub.f32 %v1536_v20, %v6052_v39 }
 0x485   : > { %v1181_v2 = vpop.xlane.xlu0 %1180 }
 0x486   : > { %vm1191_vm3 = vcmp.le.f32.partialorder %v5971_v55, %v1181_v2  ;;  %v2078_v2 = vadd.f32 %v6081_v10, %v6011_v57 }
 0x487   : > { %v1199_v15 = vsel %vm1191_vm3, %v5573_v33, 64.0 }
 0x488   : > { %v1219_v5 = vsel %vm694_vm0, %v1199_v15, inf }
 0x489   : > { %1220 = vmin.xlane.f32.xlu2 %v1219_v5  ;;  %v2174_v5 = vmul.f32 0.01, %v2078_v2 }
 0x48b   : > { %v1539_v38 = vpop.f32.mrf.mxu1 }
 0x48c   : > { %v1621_v27 = vsub.f32 %v1539_v38, %v6056_v41 }
 0x48e   : > { %v1659_v25 = vpack.c.bf16 %v1621_v27, %v1620_v48  ;;  %v6097_v48 = vmax.f32 %v2078_v2, %v2174_v5 }
 0x48f   : > { %v1802_v42 = vpop.f32.mrf.mxu2 }
 0x490   : > { %4035 = vmatmul.msk.bf16.gmra.mxu2 %vm694_vm0, %v1659_v25  ;;  %4127 = vmatmul.msk.bf16.gmra.mxu0 %vm694_vm0, %v1659_v25  ;;  %v1803_v53 = vadd.f32 %v5827_v62, %v1802_v42 }
 0x492   : > { %v1881_v52 = vmul.f32 0.01, %v1803_v53 }
 0x493   : > { %v1542_v31 = vpop.f32.mrf.mxu1 }
 0x494   : > { %v1921_v36 = vmax.f32 %v1803_v53, %v1881_v52  ;;  %v1622_v63 = vsub.f32 %v1542_v31, %v6070_v59  ;;  %v2083_v53 = vadd.f32 %v6081_v10, %v2082_v21 }
 0x497   : > { %v1804_v22 = vpop.f32.mrf.mxu2 }
 0x498   : > { %v1805_v43 = vadd.f32 %v5827_v62, %v1804_v22  ;;  %v2176_v22 = vmul.f32 0.01, %v2083_v53 }
 0x49a   : > { %v1882_v24 = vmul.f32 0.01, %v1805_v43 }
 0x49b   : > { %v1545_v49 = vpop.f32.mrf.mxu1 }
 0x49c   : > { %v1922_v50 = vmax.f32 %v1805_v43, %v1882_v24  ;;  %v1623_v32 = vsub.f32 %v1545_v49, %v5888_v4  ;;  %v6107_v43 = vmax.f32 %v2083_v53, %v2176_v22  ;;  %v6156_v53 = vpop.f32.mrf.mxu0 }
 0x49d   : > { %7290 = vst [vmem:[#allocation27_spill] sm:$0xff] %v6156_v53 }
 0x49e   : > { %v1962_v8 = vpack.c.bf16 %v1922_v50, %v1921_v36  ;;  %v1660_v56 = vpack.c.bf16 %v1623_v32, %v1622_v63 }
 0x4a0   : > { %4069 = vmatmul.msk.bf16.gmra.mxu3 %vm694_vm0, %v1962_v8  ;;  %4036 = vmatmul.msk.bf16.gmra.mxu2 %vm694_vm0, %v1660_v56 }
 0x4a1   : > { %4128 = vmatmul.msk.bf16.gmra.mxu0 %vm694_vm0, %v1660_v56 }
 0x4a3   : > { %v1548_v2 = vpop.f32.mrf.mxu1 }
 0x4a9   : > { %v2092_v11 = vpop.f32.mrf.mxu3 }
 0x4aa   : > { %v2093_v13 = vadd.f32 %v6081_v10, %v2092_v11 }
 0x4ac   : > { %v2180_v14 = vmul.f32 0.01, %v2093_v13 }
 0x4ae   : > { %v6088_v17 = vmax.f32 %v2093_v13, %v2180_v14 }
 0x4b0   : > { %v2594_v18 = vmax.f32 %v6086_v16, %v6088_v17 }
 0x4b1   : > { %v6092_v20 = vpop.f32.mrf.mxu3 }
 0x4b9   : > { %v2097_v15 = vpop.f32.mrf.mxu3 }
 0x4ba   : > { %v2098_v26 = vadd.f32 %v6081_v10, %v2097_v15 }
 0x4bc   : > { %v2182_v38 = vmul.f32 0.01, %v2098_v26 }
 0x4be   : > { %v6099_v27 = vmax.f32 %v2098_v26, %v2182_v38 }
 0x4c0   : > { %v2602_v42 = vmax.f32 %v6097_v48, %v6099_v27 }
 0x4c1   : > { %v6103_v25 = vpop.f32.mrf.mxu3 }
 0x4c9   : > { %v2102_v31 = vpop.f32.mrf.mxu3 }
 0x4ca   : > { %v2103_v57 = vadd.f32 %v6081_v10, %v2102_v31 }
 0x4cc   : > { %v2184_v52 = vmul.f32 0.01, %v2103_v57 }
 0x4ce   : > { %v6109_v24 = vmax.f32 %v2103_v57, %v2184_v52  ;;  %v1624_v57 = vsub.f32 %v1548_v2, %v5945_v1 }
 0x4d0   : > { %v2610_v36 = vmax.f32 %v6107_v43, %v6109_v24 }
 0x4e1   : > { %v1203_v50 = vpop.xlane.xlu2 %1202  ;;  %v1209_v49 = vpop.xlane.xlu0 %1208 }
 0x4e2   : > { %v1206_v63 = vpop.xlane.xlu1 %1205  ;;  %vm1225_vm4 = vcmp.eq.f32.partialorder %v5573_v33, %v1203_v50  ;;  %vm1227_vm5 = vcmp.eq.f32.partialorder %v5573_v33, %v1209_v49 }
 0x4e3   : > { %vm1226_vm6 = vcmp.eq.f32.partialorder %v5573_v33, %v1206_v63  ;;  %v3954_v21 = vsel %vm1225_vm4, 1.0, %v5127_v46  ;;  %v6118_v32 = vsel %vm1225_vm4, inf, %v5904_v51  ;;  %v6129_v7 = vsel %vm1227_vm5, inf, %v5909_v23 }
 0x4e4   : > { %3994 = vmatmul.msk.f32.gmra.mxu1 %vm694_vm0, %v3954_v21  ;;  %v6122_v8 = vsel %vm1226_vm6, inf, %v5900_v3  ;;  %v1257_v56 = vsel %vm694_vm0, %v6118_v32, inf  ;;  %v1263_v51 = vsel %vm694_vm0, %v6129_v7, inf  ;;  %v3955_v13 = vsel %vm1226_vm6, 1.0, %v5127_v46  ;;  %v6172_v21 = vpop.f32.mrf.mxu0 }
 0x4e5   : > { %v1260_v11 = vsel %vm694_vm0, %v6122_v8, inf  ;;  %1258 = vmin.xlane.f32.xlu1 %v1257_v56  ;;  %1264 = vmin.xlane.f32.xlu2 %v1263_v51  ;;  %7291 = vst [vmem:[#allocation28_spill] sm:$0xff] %v6172_v21 }
 0x4e6   : > { %1261 = vmin.xlane.f32.xlu0 %v1260_v11 }
 0x4e9   : > { %v1218_v60 = vpop.xlane.xlu0 %1217 }
 0x4ea   : > { %v1212_v3 = vpop.xlane.xlu1 %1211  ;;  %vm1230_vm7 = vcmp.eq.f32.partialorder %v5573_v33, %v1218_v60 }
 0x4eb   : > { %vm1228_vm8 = vcmp.eq.f32.partialorder %v5573_v33, %v1212_v3  ;;  %v6141_v23 = vsel %vm1230_vm7, inf, %v5931_v45  ;;  %v3959_v2 = vsel %vm1230_vm7, 1.0, %v5127_v46 }
 0x4ec   : > { %v1184_v14 = vpop.xlane.xlu2 %1183  ;;  %3995 = vmatmul.msk.f32.gmra.mxu1 %vm694_vm0, %v3955_v13  ;;  %v6148_v15 = vsel %vm1228_vm8, inf, %v5923_v35  ;;  %v1272_v5 = vsel %vm694_vm0, %v6141_v23, inf  ;;  %v3956_v35 = vsel %vm1227_vm5, 1.0, %v5127_v46  ;;  %v3957_v56 = vsel %vm1228_vm8, 1.0, %v5127_v46 }
 0x4ed   : > { %vm1192_vm9 = vcmp.le.f32.partialorder %v6021_v9, %v1184_v14  ;;  %v1266_v26 = vsel %vm694_vm0, %v6148_v15, inf  ;;  %1273 = vmin.xlane.f32.xlu2 %v1272_v5 }
 0x4ee   : > { %v1200_v38 = vsel %vm1192_vm9, %v5573_v33, 64.0  ;;  %1267 = vmin.xlane.f32.xlu0 %v1266_v26 }
 0x4ef   : > { %v1222_v45 = vsel %vm694_vm0, %v1200_v38, inf }
 0x4f0   : > { %1223 = vmin.xlane.f32.xlu1 %v1222_v45 }
 0x4f4   : > { %v1215_v31 = vpop.xlane.xlu2 %1214  ;;  %3996 = vmatmul.msk.f32.gmra.mxu1 %vm694_vm0, %v3956_v35 }
 0x4f5   : > { %v1551_v22 = vpop.f32.mrf.mxu1  ;;  %vm1229_vm10 = vcmp.eq.f32.partialorder %v5573_v33, %v1215_v31 }
 0x4f6   : > { %v1625_v52 = vsub.f32 %v1551_v22, %v5951_v28  ;;  %v6168_v50 = vsel %vm1229_vm10, inf, %v5957_v58  ;;  %v3958_v13 = vsel %vm1229_vm10, 1.0, %v5127_v46 }
 0x4f7   : > { %v1269_v49 = vsel %vm694_vm0, %v6168_v50, inf }
 0x4f8   : > { %v1661_v63 = vpack.c.bf16 %v1625_v52, %v1624_v57  ;;  %1270 = vmin.xlane.f32.xlu1 %v1269_v49  ;;  %v6204_v52 = vpop.f32.mrf.mxu3 }
 0x4fa   : > { %4037 = vmatmul.msk.bf16.gmra.mxu2 %vm694_vm0, %v1661_v63  ;;  %4129 = vmatmul.msk.bf16.gmra.mxu0 %vm694_vm0, %v1661_v63 }
 0x4fc   : > { %v1221_v11 = vpop.xlane.xlu2 %1220  ;;  %3997 = vmatmul.msk.f32.gmra.mxu1 %vm694_vm0, %v3957_v56 }
 0x4fd   : > { %vm1231_vm11 = vcmp.eq.f32.partialorder %v5573_v33, %v1221_v11 }
 0x4fe   : > { %v6184_v58 = vsel %vm1231_vm11, inf, %v5971_v55  ;;  %v3960_v22 = vsel %vm1231_vm11, 1.0, %v5127_v46 }
 0x4ff   : > { %v1275_v51 = vsel %vm694_vm0, %v6184_v58, inf }
 0x500   : > { %1276 = vmin.xlane.f32.xlu1 %v1275_v51  ;;  %v2088_v51 = vadd.f32 %v6081_v10, %v6066_v29 }
 0x503   : > { %v1807_v3 = vpop.f32.mrf.mxu2 }
 0x504   : > { %3998 = vmatmul.msk.f32.gmra.mxu1 %vm694_vm0, %v3958_v13  ;;  %v1808_v14 = vadd.f32 %v5827_v62, %v1807_v3 }
 0x506   : > { %v1883_v55 = vmul.f32 0.01, %v1808_v14 }
 0x508   : > { %v1923_v45 = vmax.f32 %v1808_v14, %v1883_v55 }
 0x50b   : > { %v1809_v5 = vpop.f32.mrf.mxu2 }
 0x50c   : > { %v1810_v26 = vadd.f32 %v5827_v62, %v1809_v5  ;;  %3999 = vmatmul.msk.f32.gmra.mxu1 %vm694_vm0, %v3959_v2  ;;  %v2178_v2 = vmul.f32 0.01, %v2088_v51 }
 0x50e   : > { %v1884_v38 = vmul.f32 0.01, %v1810_v26 }
 0x510   : > { %v1924_v35 = vmax.f32 %v1810_v26, %v1884_v38 }
 0x512   : > { %v1963_v31 = vpack.c.bf16 %v1924_v35, %v1923_v45  ;;  %v6211_v45 = vmax.f32 %v2088_v51, %v2178_v2 }
 0x513   : > { %v1812_v57 = vpop.f32.mrf.mxu2 }
 0x514   : > { %4000 = vmatmul.msk.f32.gmra.mxu1 %vm694_vm0, %v3960_v22  ;;  %4070 = vmatmul.msk.bf16.gmra.mxu3 %vm694_vm0, %v1963_v31  ;;  %v1813_v60 = vadd.f32 %v5827_v62, %v1812_v57  ;;  %7292 = vst [vmem:[#allocation29_spill] sm:$0xff] %v6211_v45 }
 0x516   : > { %v1885_v49 = vmul.f32 0.01, %v1813_v60 }
 0x518   : > { %v1925_v3 = vmax.f32 %v1813_v60, %v1885_v49 }
 0x51b   : > { %v1814_v63 = vpop.f32.mrf.mxu2 }
 0x51c   : > { %v1815_v56 = vadd.f32 %v5827_v62, %v1814_v63 }
 0x51e   : > { %v1886_v13 = vmul.f32 0.01, %v1815_v56 }
 0x520   : > { %v1926_v11 = vmax.f32 %v1815_v56, %v1886_v13 }
 0x522   : > { %v1964_v55 = vpack.c.bf16 %v1926_v11, %v1925_v3 }
 0x523   : > { %v2107_v14 = vpop.f32.mrf.mxu3  ;;  %v1817_v26 = vpop.f32.mrf.mxu2 }
 0x524   : > { %v2108_v5 = vadd.f32 %v6081_v10, %v2107_v14  ;;  %4071 = vmatmul.msk.bf16.gmra.mxu3 %vm694_vm0, %v1964_v55  ;;  %v1818_v31 = vadd.f32 %v5827_v62, %v1817_v26 }
 0x526   : > { %v2186_v38 = vmul.f32 0.01, %v2108_v5  ;;  %v1887_v57 = vmul.f32 0.01, %v1818_v31 }
 0x528   : > { %v6213_v35 = vmax.f32 %v2108_v5, %v2186_v38  ;;  %v1927_v49 = vmax.f32 %v1818_v31, %v1887_v57 }
 0x52a   : > { %7293 = vst [vmem:[#allocation30_spill] sm:$0xff] %v6213_v35 }
 0x52b   : > { %v1819_v22 = vpop.f32.mrf.mxu2 }
 0x52c   : > { %v1820_v60 = vadd.f32 %v5827_v62, %v1819_v22 }
 0x52e   : > { %v1888_v63 = vmul.f32 0.01, %v1820_v60 }
 0x530   : > { %v1928_v56 = vmax.f32 %v1820_v60, %v1888_v63 }
 0x532   : > { %v1965_v13 = vpack.c.bf16 %v1928_v56, %v1927_v49 }
 0x534   : > { %4072 = vmatmul.msk.bf16.gmra.mxu3 %vm694_vm0, %v1965_v13 }
 0x558   : > { %v1259_v3 = vpop.xlane.xlu1 %1258  ;;  %v1265_v51 = vpop.xlane.xlu2 %1264 }
 0x559   : > { %vm1281_vm12 = vcmp.le.f32.partialorder %v6118_v32, %v1259_v3  ;;  %v1262_v11 = vpop.xlane.xlu0 %1261  ;;  %vm1283_vm13 = vcmp.le.f32.partialorder %v6129_v7, %v1265_v51  ;;  %v6229_v32 = vpop.f32.mrf.mxu0 }
 0x55a   : > { %vm1282_vm14 = vcmp.le.f32.partialorder %v6122_v8, %v1262_v11  ;;  %v1289_v14 = vsel %vm1281_vm12, %v5573_v33, 64.0  ;;  %v1291_v5 = vsel %vm1283_vm13, %v5573_v33, 64.0 }
 0x55b   : > { %v1297_v2 = vsel %vm694_vm0, %v1289_v14, inf  ;;  %v1290_v55 = vsel %vm1282_vm14, %v5573_v33, 64.0  ;;  %v1303_v26 = vsel %vm694_vm0, %v1291_v5, inf }
 0x55c   : > { %1298 = vmin.xlane.f32.xlu0 %v1297_v2  ;;  %v1300_v38 = vsel %vm694_vm0, %v1290_v55, inf  ;;  %1304 = vmin.xlane.f32.xlu1 %v1303_v26 }
 0x55d   : > { %1301 = vmin.xlane.f32.xlu2 %v1300_v38 }
 0x560   : > { %v1274_v7 = vpop.xlane.xlu2 %1273 }
 0x561   : > { %v1268_v31 = vpop.xlane.xlu0 %1267  ;;  %vm1286_vm15 = vcmp.le.f32.partialorder %v6141_v23, %v1274_v7  ;;  %v1554_v8 = vpop.f32.mrf.mxu1 }
 0x562   : > { %vm1284_vm1 = vcmp.le.f32.partialorder %v6148_v15, %v1268_v31  ;;  %v1294_v57 = vsel %vm1286_vm15, %v5573_v33, 64.0  ;;  %v6245_v15 = vpop.f32.mrf.mxu0  ;;  %v1626_v51 = vsub.f32 %v1554_v8, %v6032_v12 }
 0x563   : > { %v1224_v22 = vpop.xlane.xlu1 %1223  ;;  %v1292_v60 = vsel %vm1284_vm1, %v5573_v33, 64.0  ;;  %v1312_v49 = vsel %vm694_vm0, %v1294_v57, inf }
 0x564   : > { %vm1232_vm2 = vcmp.eq.f32.partialorder %v5573_v33, %v1224_v22  ;;  %v1306_v56 = vsel %vm694_vm0, %v1292_v60, inf  ;;  %1313 = vmin.xlane.f32.xlu1 %v1312_v49 }
 0x565   : > { %v3961_v63 = vsel %vm1232_vm2, 1.0, %v5127_v46  ;;  %v6240_v13 = vsel %vm1232_vm2, inf, %v6021_v9  ;;  %1307 = vmin.xlane.f32.xlu2 %v1306_v56 }
 0x566   : > { %v1278_v23 = vsel %vm694_vm0, %v6240_v13, inf  ;;  %4001 = vmatmul.msk.f32.gmra.mxu1 %vm694_vm0, %v3961_v63 }
 0x567   : > { %1279 = vmin.xlane.f32.xlu0 %v1278_v23 }
 0x569   : > { %v1557_v3 = vpop.f32.mrf.mxu1 }
 0x56a   : > { %v1627_v11 = vsub.f32 %v1557_v3, %v6036_v61  ;;  %v6254_v55 = vpop.f32.mrf.mxu0 }
 0x56b   : > { %v1271_v14 = vpop.xlane.xlu1 %1270 }
 0x56c   : > { %vm1285_vm3 = vcmp.le.f32.partialorder %v6168_v50, %v1271_v14  ;;  %v1662_v9 = vpack.c.bf16 %v1627_v11, %v1626_v51 }
 0x56d   : > { %v1293_v2 = vsel %vm1285_vm3, %v5573_v33, 64.0 }
 0x56e   : > { %v1309_v5 = vsel %vm694_vm0, %v1293_v2, inf  ;;  %4038 = vmatmul.msk.bf16.gmra.mxu2 %vm694_vm0, %v1662_v9  ;;  %4130 = vmatmul.msk.bf16.gmra.mxu0 %vm694_vm0, %v1662_v9 }
 0x56f   : > { %1310 = vmin.xlane.f32.xlu0 %v1309_v5 }
 0x571   : > { %v1560_v26 = vpop.f32.mrf.mxu1 }
 0x572   : > { %v6259_v8 = vpop.f32.mrf.mxu0  ;;  %v1628_v22 = vsub.f32 %v1560_v26, %v6052_v39 }
 0x573   : > { %v1277_v38 = vpop.xlane.xlu1 %1276 }
 0x574   : > { %vm1287_vm4 = vcmp.le.f32.partialorder %v6184_v58, %v1277_v38 }
 0x575   : > { %v1295_v7 = vsel %vm1287_vm4, %v5573_v33, 64.0 }
 0x576   : > { %v1315_v50 = vsel %vm694_vm0, %v1295_v7, inf }
 0x577   : > { %1316 = vmin.xlane.f32.xlu2 %v1315_v50 }
 0x579   : > { %v1563_v31 = vpop.f32.mrf.mxu1 }
 0x57a   : > { %v1629_v57 = vsub.f32 %v1563_v31, %v6056_v41  ;;  %v6266_v23 = vpop.f32.mrf.mxu0  ;;  %v6274_v31 = vpop.f32.mrf.mxu3 }
 0x57b   : > { %7295 = vst [vmem:[#allocation32_spill] sm:$0xff] %v6274_v31 }
 0x57c   : > { %v1663_v63 = vpack.c.bf16 %v1629_v57, %v1628_v22 }
 0x57d   : > { %v1822_v60 = vpop.f32.mrf.mxu2 }
 0x57e   : > { %4039 = vmatmul.msk.bf16.gmra.mxu2 %vm694_vm0, %v1663_v63  ;;  %4131 = vmatmul.msk.bf16.gmra.mxu0 %vm694_vm0, %v1663_v63  ;;  %v1823_v58 = vadd.f32 %v5827_v62, %v1822_v60 }
 0x580   : > { %v1889_v3 = vmul.f32 0.01, %v1823_v58 }
 0x581   : > { %v1566_v49 = vpop.f32.mrf.mxu1 }
 0x582   : > { %v1929_v14 = vmax.f32 %v1823_v58, %v1889_v3  ;;  %v1630_v5 = vsub.f32 %v1566_v49, %v6070_v59  ;;  %v6272_v50 = vpop.f32.mrf.mxu0 }
 0x583   : > { %7294 = vst [vmem:[#allocation31_spill] sm:$0xff] %v6272_v50 }
 0x585   : > { %v1824_v56 = vpop.f32.mrf.mxu2 }
 0x586   : > { %v1825_v51 = vadd.f32 %v5827_v62, %v1824_v56 }
 0x588   : > { %v1890_v11 = vmul.f32 0.01, %v1825_v51 }
 0x589   : > { %v1569_v2 = vpop.f32.mrf.mxu1 }
 0x58a   : > { %v1930_v9 = vmax.f32 %v1825_v51, %v1890_v11  ;;  %v1631_v26 = vsub.f32 %v1569_v2, %v5888_v4 }
 0x58c   : > { %v1966_v38 = vpack.c.bf16 %v1930_v9, %v1929_v14  ;;  %v1664_v7 = vpack.c.bf16 %v1631_v26, %v1630_v5 }
 0x58e   : > { %4073 = vmatmul.msk.bf16.gmra.mxu3 %vm694_vm0, %v1966_v38  ;;  %4040 = vmatmul.msk.bf16.gmra.mxu2 %vm694_vm0, %v1664_v7 }
 0x58f   : > { %4132 = vmatmul.msk.bf16.gmra.mxu0 %vm694_vm0, %v1664_v7 }
 0x597   : > { %v2112_v62 = vpop.f32.mrf.mxu3 }
 0x598   : > { %v2113_v22 = vadd.f32 %v6081_v10, %v2112_v62 }
 0x59a   : > { %v2188_v57 = vmul.f32 0.01, %v2113_v22 }
 0x59c   : > { %v6279_v60 = vmax.f32 %v2113_v22, %v2188_v57  ;;  %v1572_v22 = vpop.f32.mrf.mxu1 }
 0x59e   : > { %v6285_v4 = vmax.f32 %v2594_v18, %v6279_v60 }
 0x59f   : > { %v6287_v63 = vpop.f32.mrf.mxu3 }
 0x5a7   : > { %v2117_v58 = vpop.f32.mrf.mxu3 }
 0x5a8   : > { %v2118_v49 = vadd.f32 %v6081_v10, %v2117_v58 }
 0x5aa   : > { %v2190_v56 = vmul.f32 0.01, %v2118_v49 }
 0x5ac   : > { %v6290_v3 = vmax.f32 %v2118_v49, %v2190_v56  ;;  %v6318_v49 = vpop.f32.mrf.mxu0 }
 0x5ad   : > { %7296 = vst [vmem:[#allocation33_spill] sm:$0xff] %v6318_v49 }
 0x5ae   : > { %v6296_v51 = vmax.f32 %v2602_v42, %v6290_v3 }
 0x5af   : > { %v6298_v11 = vpop.f32.mrf.mxu3 }
 0x5b7   : > { %v2122_v14 = vpop.f32.mrf.mxu3 }
 0x5b8   : > { %v2123_v18 = vadd.f32 %v6081_v10, %v2122_v14 }
 0x5ba   : > { %v2192_v9 = vmul.f32 0.01, %v2123_v18 }
 0x5bc   : > { %v6301_v2 = vmax.f32 %v2123_v18, %v2192_v9  ;;  %v1632_v9 = vsub.f32 %v1572_v22, %v5945_v1 }
 0x5be   : > { %v6307_v5 = vmax.f32 %v2610_v36, %v6301_v2 }
 0x5cf   : > { %v1299_v26 = vpop.xlane.xlu0 %1298  ;;  %v1305_v36 = vpop.xlane.xlu1 %1304 }
 0x5d0   : > { %vm1321_vm5 = vcmp.eq.f32.partialorder %v5573_v33, %v1299_v26  ;;  %v1302_v38 = vpop.xlane.xlu2 %1301  ;;  %vm1323_vm8 = vcmp.eq.f32.partialorder %v5573_v33, %v1305_v36 }
 0x5d1   : > { %v3962_v42 = vsel %vm1321_vm5, 1.0, %v5127_v46  ;;  %vm1322_vm6 = vcmp.eq.f32.partialorder %v5573_v33, %v1302_v38  ;;  %v3964_v56 = vsel %vm1323_vm8, 1.0, %v5127_v46 }
 0x5d2   : > { %4002 = vmatmul.msk.f32.gmra.mxu1 %vm694_vm0, %v3962_v42  ;;  %v3963_v7 = vsel %vm1322_vm6, 1.0, %v5127_v46  ;;  %v6326_v42 = vpop.f32.mrf.mxu0 }
 0x5d3   : > { %7297 = vst [vmem:[#allocation34_spill] sm:$0xff] %v6326_v42 }
 0x5d7   : > { %v1314_v36 = vpop.xlane.xlu1 %1313 }
 0x5d8   : > { %v1308_v14 = vpop.xlane.xlu2 %1307  ;;  %vm1326_vm11 = vcmp.eq.f32.partialorder %v5573_v33, %v1314_v36 }
 0x5d9   : > { %vm1324_vm9 = vcmp.eq.f32.partialorder %v5573_v33, %v1308_v14 }
 0x5da   : > { %v1280_v62 = vpop.xlane.xlu0 %1279  ;;  %4003 = vmatmul.msk.f32.gmra.mxu1 %vm694_vm0, %v3963_v7  ;;  %v3965_v38 = vsel %vm1324_vm9, 1.0, %v5127_v46 }
 0x5db   : > { %vm1288_vm7 = vcmp.le.f32.partialorder %v6240_v13, %v1280_v62 }
 0x5dc   : > { %v1296_v57 = vsel %vm1288_vm7, %v5573_v33, 64.0 }
 0x5dd   : > { %v1318_v58 = vsel %vm694_vm0, %v1296_v57, inf  ;;  %v6336_v57 = vld [vmem:[#allocation2] ss:$0 sm:$0xff] }
 0x5de   : > { %1319 = vmin.xlane.f32.xlu0 %v1318_v58 }
 0x5e2   : > { %4004 = vmatmul.msk.f32.gmra.mxu1 %vm694_vm0, %v3964_v56  ;;  %v1311_v7 = vpop.xlane.xlu0 %1310  ;;  %v3967_v56 = vsel %vm1326_vm11, 1.0, %v5127_v46 }
 0x5e3   : > { %v1575_v18 = vpop.f32.mrf.mxu1  ;;  %vm1325_vm10 = vcmp.eq.f32.partialorder %v5573_v33, %v1311_v7 }
 0x5e4   : > { %v1633_v13 = vsub.f32 %v1575_v18, %v5951_v28  ;;  %v3966_v62 = vsel %vm1325_vm10, 1.0, %v5127_v46 }
 0x5e6   : > { %v1665_v26 = vpack.c.bf16 %v1633_v13, %v1632_v9 }
 0x5e8   : > { %4041 = vmatmul.msk.bf16.gmra.mxu2 %vm694_vm0, %v1665_v26  ;;  %4133 = vmatmul.msk.bf16.gmra.mxu0 %vm694_vm0, %v1665_v26 }
 0x5ea   : > { %4005 = vmatmul.msk.f32.gmra.mxu1 %vm694_vm0, %v3965_v38  ;;  %v1317_v18 = vpop.xlane.xlu2 %1316 }
 0x5eb   : > { %vm1327_vm12 = vcmp.eq.f32.partialorder %v5573_v33, %v1317_v18 }
 0x5f1   : > { %v1827_v22 = vpop.f32.mrf.mxu2 }
 0x5f2   : > { %4006 = vmatmul.msk.f32.gmra.mxu1 %vm694_vm0, %v3966_v62  ;;  %v1828_v58 = vadd.f32 %v6336_v57, %v1827_v22  ;;  %v3968_v62 = vsel %vm1327_vm12, 1.0, %v5127_v46 }
 0x5f4   : > { %v1891_v9 = vmul.f32 0.01, %v1828_v58 }
 0x5f6   : > { %v1931_v38 = vmax.f32 %v1828_v58, %v1891_v9 }
 0x5f9   : > { %v1829_v14 = vpop.f32.mrf.mxu2 }
 0x5fa   : > { %4007 = vmatmul.msk.f32.gmra.mxu1 %vm694_vm0, %v3967_v56  ;;  %v1830_v13 = vadd.f32 %v6336_v57, %v1829_v14  ;;  %v6347_v56 = vpop.f32.mrf.mxu3 }
 0x5fc   : > { %v1892_v26 = vmul.f32 0.01, %v1830_v13 }
 0x5fe   : > { %v1932_v7 = vmax.f32 %v1830_v13, %v1892_v26 }
 0x600   : > { %v1967_v36 = vpack.c.bf16 %v1932_v7, %v1931_v38 }
 0x601   : > { %v1832_v29 = vpop.f32.mrf.mxu2 }
 0x602   : > { %4008 = vmatmul.msk.f32.gmra.mxu1 %vm694_vm0, %v3968_v62  ;;  %4074 = vmatmul.msk.bf16.gmra.mxu3 %vm694_vm0, %v1967_v36  ;;  %v1833_v22 = vadd.f32 %v6336_v57, %v1832_v29  ;;  %v7299_v36 = vmax.f32 %v6211_v45, %v6213_v35 }
 0x604   : > { %v1893_v21 = vmul.f32 0.01, %v1833_v22 }
 0x606   : > { %v1933_v18 = vmax.f32 %v1833_v22, %v1893_v21 }
 0x609   : > { %v1834_v42 = vpop.f32.mrf.mxu2 }
 0x60a   : > { %v1835_v14 = vadd.f32 %v6336_v57, %v1834_v42 }
 0x60c   : > { %v1894_v49 = vmul.f32 0.01, %v1835_v14 }
 0x60e   : > { %v1934_v58 = vmax.f32 %v1835_v14, %v1894_v49 }
 0x610   : > { %v1968_v13 = vpack.c.bf16 %v1934_v58, %v1933_v18 }
 0x611   : > { %v2127_v9 = vpop.f32.mrf.mxu3  ;;  %v1837_v38 = vpop.f32.mrf.mxu2 }
 0x612   : > { %v2128_v26 = vadd.f32 %v6081_v10, %v2127_v9  ;;  %4075 = vmatmul.msk.bf16.gmra.mxu3 %vm694_vm0, %v1968_v13  ;;  %v1838_v29 = vadd.f32 %v6336_v57, %v1837_v38  ;;  %v6363_v13 = vpop.f32.mrf.mxu0 }
 0x614   : > { %v2194_v7 = vmul.f32 0.01, %v2128_v26  ;;  %v1895_v49 = vmul.f32 0.01, %v1838_v29 }
 0x616   : > { %v6352_v62 = vmax.f32 %v2128_v26, %v2194_v7  ;;  %v1935_v18 = vmax.f32 %v1838_v29, %v1895_v49 }
 0x618   : > { %7298 = vst [vmem:[#allocation35_spill] sm:$0xff] %v6352_v62  ;;  %v6359_v42 = vmax.f32 %v7299_v36, %v6352_v62 }
 0x619   : > { %v1839_v21 = vpop.f32.mrf.mxu2 }
 0x61a   : > { %7300 = vst [vmem:[#allocation36_spill] sm:$0xff] %v6359_v42  ;;  %v1840_v22 = vadd.f32 %v6336_v57, %v1839_v21  ;;  %v6368_v36 = vpop.f32.mrf.mxu0 }
 0x61c   : > { %v1896_v14 = vmul.f32 0.01, %v1840_v22 }
 0x61e   : > { %v1936_v58 = vmax.f32 %v1840_v22, %v1896_v14 }
 0x620   : > { %v1969_v9 = vpack.c.bf16 %v1936_v58, %v1935_v18 }
 0x622   : > { %4076 = vmatmul.msk.bf16.gmra.mxu3 %vm694_vm0, %v1969_v9  ;;  %v6374_v22 = vpop.f32.mrf.mxu0 }
 0x62a   : > { %v6378_v58 = vpop.f32.mrf.mxu0 }
 0x64f   : > { %v1578_v26 = vpop.f32.mrf.mxu1 }
 0x650   : > { %v1634_v21 = vsub.f32 %v1578_v26, %v6032_v12  ;;  %v6383_v26 = vpop.f32.mrf.mxu0 }
 0x651   : > { %v1320_v38 = vpop.xlane.xlu0 %1319  ;;  %7301 = vst [vmem:[#allocation37_spill] sm:$0xff] %v6383_v26 }
 0x652   : > { %vm1328_vm13 = vcmp.eq.f32.partialorder %v5573_v33, %v1320_v38 }
 0x653   : > { %v3969_v7 = vsel %vm1328_vm13, 1.0, %v5127_v46 }
 0x654   : > { %4009 = vmatmul.msk.f32.gmra.mxu1 %vm694_vm0, %v3969_v7 }
 0x657   : > { %v1581_v53 = vpop.f32.mrf.mxu1 }
 0x658   : > { %v1635_v29 = vsub.f32 %v1581_v53, %v6036_v61 }
 0x65a   : > { %v1666_v49 = vpack.c.bf16 %v1635_v29, %v1634_v21 }
 0x65c   : > { %4042 = vmatmul.msk.bf16.gmra.mxu2 %vm694_vm0, %v1666_v49  ;;  %4134 = vmatmul.msk.bf16.gmra.mxu0 %vm694_vm0, %v1666_v49 }
 0x65f   : > { %v1584_v14 = vpop.f32.mrf.mxu1 }
 0x660   : > { %v1636_v46 = vsub.f32 %v1584_v14, %v6052_v39 }
 0x667   : > { %v1587_v33 = vpop.f32.mrf.mxu1 }
 0x668   : > { %v1637_v18 = vsub.f32 %v1587_v33, %v6056_v41  ;;  %v4749_v33 = vld [vmem:[%s5336_s6 + $0x28] sm:$0xff] }
 0x66a   : > { %v1667_v9 = vpack.c.bf16 %v1637_v18, %v1636_v46 }
 0x66b   : > { %v1842_v12 = vpop.f32.mrf.mxu2 }
 0x66c   : > { %4043 = vmatmul.msk.bf16.gmra.mxu2 %vm694_vm0, %v1667_v9  ;;  %4135 = vmatmul.msk.bf16.gmra.mxu0 %vm694_vm0, %v1667_v9  ;;  %v1843_v53 = vadd.f32 %v6336_v57, %v1842_v12  ;;  %v6390_v9 = vpop.f32.mrf.mxu0  ;;  %v6393_v12 = vpop.f32.mrf.mxu3 }
 0x66d   : > { %7302 = vst [vmem:[#allocation38_spill] sm:$0xff] %v6390_v9 }
 0x66e   : > { %v1897_v7 = vmul.f32 0.01, %v1843_v53  ;;  %7303 = vst [vmem:[#allocation39_spill] sm:$0xff] %v6393_v12 }
 0x66f   : > { %v1590_v61 = vpop.f32.mrf.mxu1 }
 0x670   : > { %v1937_v29 = vmax.f32 %v1843_v53, %v1897_v7  ;;  %v1638_v49 = vsub.f32 %v1590_v61, %v6070_v59 }
 0x673   : > { %v1844_v38 = vpop.f32.mrf.mxu2 }
 0x674   : > { %v1845_v39 = vadd.f32 %v6336_v57, %v1844_v38  ;;  %v6417_v61 = vpop.f32.mrf.mxu0 }
 0x675   : > { %7304 = vst [vmem:[#allocation40_spill] sm:$0xff] %v6417_v61 }
 0x676   : > { %v1898_v21 = vmul.f32 0.01, %v1845_v39 }
 0x677   : > { %v1593_v41 = vpop.f32.mrf.mxu1 }
 0x678   : > { %v1938_v14 = vmax.f32 %v1845_v39, %v1898_v21  ;;  %v1639_v46 = vsub.f32 %v1593_v41, %v4749_v33  ;;  %v4462_v21 = vld [vmem:[%s7251_s9 + $0x78] sm:$0xff] }
 0x679   : > { %4503 = vmatpush.bf16.msrb.mxu2 %v4462_v21  ;;  %2907 = vmatpush.bf16.msrb.mxu1 %v4462_v21 }
 0x67a   : > { %v1970_v18 = vpack.c.bf16 %v1938_v14, %v1937_v29  ;;  %v1668_v62 = vpack.c.bf16 %v1639_v46, %v1638_v49 }
 0x67c   : > { %4044 = vmatmul.msk.bf16.gmra.mxu2 %vm694_vm0, %v1668_v62  ;;  %4077 = vmatmul.msk.bf16.gmra.mxu3 %vm694_vm0, %v1970_v18  ;;  %v6421_v35 = vpop.f32.mrf.mxu0 }
 0x67d   : > { %4136 = vmatmul.msk.bf16.gmra.mxu0 %vm694_vm0, %v1668_v62  ;;  %7305 = vst [vmem:[#allocation41_spill] sm:$0xff] %v6421_v35 }
 0x685   : > { %v2132_v38 = vpop.f32.mrf.mxu3 }
 0x686   : > { %v2133_v53 = vadd.f32 %v6081_v10, %v2132_v38 }
 0x688   : > { %v2196_v7 = vmul.f32 0.01, %v2133_v53 }
 0x68a   : > { %v6396_v59 = vmax.f32 %v2133_v53, %v2196_v7 }
 0x68d   : > { %v6400_v39 = vpop.f32.mrf.mxu3 }
 0x695   : > { %v2137_v41 = vpop.f32.mrf.mxu3 }
 0x696   : > { %v2138_v62 = vadd.f32 %v6081_v10, %v2137_v41  ;;  %v1596_v41 = vpop.f32.mrf.mxu1 }
 0x698   : > { %v2198_v29 = vmul.f32 0.01, %v2138_v62 }
 0x69a   : > { %v6406_v49 = vmax.f32 %v2138_v62, %v2198_v29  ;;  %v1640_v62 = vsub.f32 %v1596_v41, %v5945_v1 }
 0x69d   : > { %v6410_v33 = vpop.f32.mrf.mxu3 }
 0x6a5   : > { %v2142_v46 = vpop.f32.mrf.mxu3 }
 0x6a6   : > { %v2143_v18 = vadd.f32 %v6081_v10, %v2142_v46  ;;  %v4461_v46 = vld [vmem:[%s7251_s9 + $0x70] sm:$0xff] }
 0x6a7   : > { %4504 = vmatpush.bf16.msrb.mxu2 %v4461_v46  ;;  %2908 = vmatpush.bf16.msrb.mxu1 %v4461_v46  ;;  %v4460_v46 = vld [vmem:[%s7251_s9 + $0x68] sm:$0xff] }
 0x6a8   : > { %v2200_v38 = vmul.f32 0.01, %v2143_v18 }
 0x6aa   : > { %v6413_v53 = vmax.f32 %v2143_v18, %v2200_v38 }
 0x6ab   : > { %4505 = vmatpush.bf16.msrb.mxu2 %v4460_v46  ;;  %2909 = vmatpush.bf16.msrb.mxu1 %v4460_v46 }
 0x6d1   : > { %v1599_v21 = vpop.f32.mrf.mxu1 }
 0x6d2   : > { %v1641_v29 = vsub.f32 %v1599_v21, %v5951_v28  ;;  %v6430_v21 = vpop.f32.mrf.mxu0 }
 0x6d4   : > { %v1669_v14 = vpack.c.bf16 %v1641_v29, %v1640_v62 }
 0x6d6   : > { %4045 = vmatmul.msk.bf16.gmra.mxu2 %vm694_vm0, %v1669_v14  ;;  %4137 = vmatmul.msk.bf16.gmra.mxu0 %vm694_vm0, %v1669_v14 }
 0x6df   : > { %v1847_v18 = vpop.f32.mrf.mxu2 }
 0x6e0   : > { %v1848_v38 = vadd.f32 %v6336_v57, %v1847_v18  ;;  %v4470_v18 = vld [vmem:[%s7251_s9 + $0xb8] sm:$0xff] }
 0x6e1   : > { %3098 = vmatpush.bf16.msrb.mxu3 %v4470_v18 }
 0x6e2   : > { %v1899_v1 = vmul.f32 0.01, %v1848_v38 }
 0x6e4   : > { %v1939_v62 = vmax.f32 %v1848_v38, %v1899_v1  ;;  %v4459_v38 = vld [vmem:[%s7251_s9 + $0x60] sm:$0xff]  ;;  %v6446_v1 = vpop.f32.mrf.mxu0 }
 0x6e5   : > { %4506 = vmatpush.bf16.msrb.mxu2 %v4459_v38  ;;  %2910 = vmatpush.bf16.msrb.mxu1 %v4459_v38 }
 0x6e7   : > { %v1849_v7 = vpop.f32.mrf.mxu2 }
 0x6e8   : > { %v1850_v28 = vadd.f32 %v6336_v57, %v1849_v7  ;;  %v4469_v7 = vld [vmem:[%s7251_s9 + $0xb0] sm:$0xff] }
 0x6e9   : > { %3099 = vmatpush.bf16.msrb.mxu3 %v4469_v7 }
 0x6ea   : > { %v1900_v41 = vmul.f32 0.01, %v1850_v28 }
 0x6ec   : > { %v1940_v29 = vmax.f32 %v1850_v28, %v1900_v41  ;;  %v6448_v28 = vpop.f32.mrf.mxu3 }
 0x6ee   : > { %v1971_v35 = vpack.c.bf16 %v1940_v29, %v1939_v62 }
 0x6ef   : > { %v1852_v14 = vpop.f32.mrf.mxu2 }
 0x6f0   : > { %4078 = vmatmul.msk.bf16.gmra.mxu3 %vm694_vm0, %v1971_v35  ;;  %v1853_v35 = vadd.f32 %v6336_v57, %v1852_v14  ;;  %v6453_v14 = vpop.f32.mrf.mxu0 }
 0x6f2   : > { %v1901_v62 = vmul.f32 0.01, %v1853_v35 }
 0x6f4   : > { %v1941_v61 = vmax.f32 %v1853_v35, %v1901_v62 }
 0x6f7   : > { %v1854_v41 = vpop.f32.mrf.mxu2 }
 0x6f8   : > { %v1855_v29 = vadd.f32 %v6336_v57, %v1854_v41  ;;  %v6461_v62 = vpop.f32.mrf.mxu0 }
 0x6fa   : > { %v1902_v18 = vmul.f32 0.01, %v1855_v29 }
 0x6fc   : > { %v1942_v45 = vmax.f32 %v1855_v29, %v1902_v18 }
 0x6fe   : > { %v1972_v12 = vpack.c.bf16 %v1942_v45, %v1941_v61 }
 0x6ff   : > { %v1857_v40 = vpop.f32.mrf.mxu2  ;;  %v2147_v31 = vpop.f32.mrf.mxu3 }
 0x700   : > { %v2148_v46 = vadd.f32 %v6081_v10, %v2147_v31  ;;  %4079 = vmatmul.msk.bf16.gmra.mxu3 %vm694_vm0, %v1972_v12  ;;  %v1858_v9 = vadd.f32 %v6336_v57, %v1857_v40  ;;  %v6464_v18 = vpop.f32.mrf.mxu0 }
 0x701   : > { %7307 = vst [vmem:[#allocation43_spill] sm:$0xff] %v6464_v18 }
 0x702   : > { %v2202_v7 = vmul.f32 0.01, %v2148_v46  ;;  %v1903_v35 = vmul.f32 0.01, %v1858_v9 }
 0x704   : > { %v6456_v50 = vmax.f32 %v2148_v46, %v2202_v7  ;;  %v1943_v31 = vmax.f32 %v1858_v9, %v1903_v35  ;;  %v4458_v9 = vld [vmem:[%s7251_s9 + $0x58] sm:$0xff] }
 0x705   : > { %4507 = vmatpush.bf16.msrb.mxu2 %v4458_v9  ;;  %2911 = vmatpush.bf16.msrb.mxu1 %v4458_v9 }
 0x706   : > { %7306 = vst [vmem:[#allocation42_spill] sm:$0xff] %v6456_v50 }
 0x707   : > { %v1859_v41 = vpop.f32.mrf.mxu2 }
 0x708   : > { %v1860_v45 = vadd.f32 %v6336_v57, %v1859_v41  ;;  %v6466_v40 = vpop.f32.mrf.mxu0 }
 0x709   : > { %7308 = vst [vmem:[#allocation44_spill] sm:$0xff] %v6466_v40 }
 0x70a   : > { %v1904_v61 = vmul.f32 0.01, %v1860_v45 }
 0x70c   : > { %v1944_v29 = vmax.f32 %v1860_v45, %v1904_v61 }
 0x70e   : > { %v1973_v12 = vpack.c.bf16 %v1944_v29, %v1943_v31 }
 0x710   : > { %4080 = vmatmul.msk.bf16.gmra.mxu3 %vm694_vm0, %v1973_v12  ;;  %v6468_v46 = vpop.f32.mrf.mxu0 }
 0x711   : > { %7309 = vst [vmem:[#allocation45_spill] sm:$0xff] %v6468_v46  ;;  %v4634_v46 = vld [vmem:[#allocation10] ss:$0 sm:$0xff] }
 0x712   : > { %v6488_v40 = vadd.f32 %v4634_v46, %v6008_v44  ;;  %v6506_v44 = vpop.f32.mrf.mxu3 }
 0x713   : > { %7319 = vst [vmem:[#allocation55_spill] sm:$0xff] %v6506_v44 }
 0x714   : > { %7316 = vst [vmem:[#allocation52_spill] sm:$0xff] %v6488_v40 }
 0x718   : > { %v6470_v7 = vpop.f32.mrf.mxu0 }
 0x719   : > { %7310 = vst [vmem:[#allocation46_spill] sm:$0xff] %v6470_v7 }
 0x720   : > { %v6472_v38 = vpop.f32.mrf.mxu0 }
 0x721   : > { %7311 = vst [vmem:[#allocation47_spill] sm:$0xff] %v6472_v38 }
 0x728   : > { %v6474_v50 = vpop.f32.mrf.mxu0 }
 0x729   : > { %7312 = vst [vmem:[#allocation48_spill] sm:$0xff] %v6474_v50 }
 0x730   : > { %v6479_v41 = vpop.f32.mrf.mxu0 }
 0x731   : > { %7313 = vst [vmem:[#allocation49_spill] sm:$0xff] %v6479_v41  ;;  %v6491_v41 = vadd.f32 %v4634_v46, %v6027_v6 }
 0x733   : > { %7317 = vst [vmem:[#allocation53_spill] sm:$0xff] %v6491_v41  ;;  %v6510_v6 = vadd.f32 %v6245_v15, %v6491_v41  ;;  %v2075_v15 = vadd.f32 %v6081_v10, %v5998_v37  ;;  %v6547_v37 = vadd.f32 %v6363_v13, %v6488_v40 }
 0x738   : > { %v6481_v35 = vpop.f32.mrf.mxu0 }
 0x739   : > { %7314 = vst [vmem:[#allocation50_spill] sm:$0xff] %v6481_v35  ;;  %v2135_v35 = vadd.f32 %v6081_v10, %v6400_v39 }
 0x740   : > { %v6484_v29 = vpop.f32.mrf.mxu0 }
 0x741   : > { %7315 = vst [vmem:[#allocation51_spill] sm:$0xff] %v6484_v29  ;;  %v6499_v29 = vadd.f32 %v4634_v46, %v6044_v19 }
 0x743   : > { %v6589_v39 = vadd.f32 %v6374_v22, %v6499_v29  ;;  %v4466_v22 = vld [vmem:[%s7251_s9 + $0x98] sm:$0xff] }
 0x759   : > { %v1862_v45 = vpop.f32.mrf.mxu2 }
 0x75a   : > { %v1863_v61 = vadd.f32 %v6336_v57, %v1862_v45  ;;  %v6496_v45 = vadd.f32 %v6229_v32, %v6488_v40  ;;  %v6517_v32 = vadd.f32 %v6254_v55, %v6499_v29  ;;  %v6534_v55 = vmul.f32 0.01, %v6510_v6 }
 0x75c   : > { %v1905_v12 = vmul.f32 0.01, %v1863_v61  ;;  %7320 = vst [vmem:[#allocation56_spill] sm:$0xff] %v6517_v32 }
 0x75d   : > { %7323 = vst [vmem:[#allocation59_spill] sm:$0xff] %v6534_v55 }
 0x75e   : > { %v1945_v50 = vmax.f32 %v1863_v61, %v1905_v12  ;;  %v2095_v61 = vadd.f32 %v6081_v10, %v6092_v20 }
 0x761   : > { %v1864_v31 = vpop.f32.mrf.mxu2 }
 0x762   : > { %v1865_v7 = vadd.f32 %v6336_v57, %v1864_v31  ;;  %v6502_v57 = vadd.f32 %v4634_v46, %v6049_v34  ;;  %v4468_v34 = vld [vmem:[%s7251_s9 + $0xa8] sm:$0xff]  ;;  %v6541_v31 = vadd.f32 %v4634_v46, %v6075_v47  ;;  %v2115_v47 = vadd.f32 %v6081_v10, %v6287_v63  ;;  %v4467_v63 = vld [vmem:[%s7251_s9 + $0xa0] sm:$0xff] }
 0x763   : > { %3100 = vmatpush.bf16.msrb.mxu3 %v4468_v34 }
 0x764   : > { %v1906_v42 = vmul.f32 0.01, %v1865_v7  ;;  %v6521_v19 = vadd.f32 %v6259_v8, %v6502_v57  ;;  %v2085_v8 = vadd.f32 %v6081_v10, %v6059_v30  ;;  %7324 = vst [vmem:[#allocation60_spill] sm:$0xff] %v6541_v31  ;;  %v6557_v30 = vadd.f32 %v6368_v36, %v6491_v41 }
 0x765   : > { %v2181_v36 = vmul.f32 0.01, %v2095_v61  ;;  %v2189_v26 = vmul.f32 0.01, %v2115_v47 }
 0x766   : > { %v1946_v38 = vmax.f32 %v1865_v7, %v1906_v42  ;;  %v6504_v42 = vpop.f32.mrf.mxu0  ;;  %7321 = vst [vmem:[#allocation57_spill] sm:$0xff] %v6521_v19  ;;  %v2080_v7 = vadd.f32 %v6081_v10, %v6029_v0  ;;  %v6550_v0 = vmul.f32 0.01, %v6517_v32  ;;  %v6553_v12 = vmul.f32 0.01, %v6521_v19 }
 0x767   : > { %7318 = vst [vmem:[#allocation54_spill] sm:$0xff] %v6504_v42  ;;  %v2177_v42 = vmul.f32 0.01, %v2085_v8  ;;  %v6585_v31 = vmul.f32 0.01, %v6557_v30  ;;  %3101 = vmatpush.bf16.msrb.mxu3 %v4467_v63 }
 0x768   : > { %v1974_v9 = vpack.c.bf16 %v1946_v38, %v1945_v50  ;;  %v6513_v50 = vmul.f32 0.01, %v6496_v45  ;;  %v6527_v38 = vadd.f32 %v4634_v46, %v6064_v54  ;;  %7325 = vst [vmem:[#allocation61_spill] sm:$0xff] %v6550_v0  ;;  %v2175_v34 = vmul.f32 0.01, %v2080_v7 }
 0x769   : > { %7326 = vst [vmem:[#allocation62_spill] sm:$0xff] %v6553_v12  ;;  %v6600_v44 = vmax.f32 %v2085_v8, %v2177_v42  ;;  %v6602_v0 = vmax.f32 %v2095_v61, %v2181_v36  ;;  %v2197_v32 = vmul.f32 0.01, %v2135_v35  ;;  %v6619_v8 = vadd.f32 %v6430_v21, %v6488_v40 }
 0x76a   : > { %4081 = vmatmul.msk.bf16.gmra.mxu3 %vm694_vm0, %v1974_v9  ;;  %7322 = vst [vmem:[#allocation58_spill] sm:$0xff] %v6527_v38  ;;  %v6565_v13 = vadd.f32 %v6266_v23, %v6527_v38  ;;  %v2173_v9 = vmul.f32 0.01, %v2075_v15  ;;  %v2100_v23 = vadd.f32 %v6081_v10, %v6103_v25  ;;  %v6598_v55 = vmax.f32 %v2080_v7, %v2175_v34 }
 0x76b   : > { %v6615_v7 = vmul.f32 0.01, %v6589_v39  ;;  %v6621_v61 = vmax.f32 %v2115_v47, %v2189_v26  ;;  %3102 = vmatpush.bf16.msrb.mxu3 %v4466_v22  ;;  %v6635_v26 = vmax.f32 %v2135_v35, %v2197_v32  ;;  %v6637_v47 = vld [vmem:[#allocation6] ss:$0 sm:$0xff]  ;;  %v6656_v12 = vadd.f32 %v6446_v1, %v6491_v41 }
 0x76c   : > { %7328 = vst [vmem:[#allocation64_spill] sm:$0xff] %v6565_v13  ;;  %v6594_v25 = vmul.f32 0.01, %v6565_v13  ;;  %v2183_v38 = vmul.f32 0.01, %v2100_v23 }
 0x76e   : > { %v6561_v20 = vpop.f32.mrf.mxu0  ;;  %7329 = vst [vmem:[#allocation65_spill] sm:$0xff] %v6594_v25 }
 0x76f   : > { %7327 = vst [vmem:[#allocation63_spill] sm:$0xff] %v6561_v20  ;;  %v6576_v20 = vmul.f32 0.01, %v6547_v37 }
 0x773   : > { %v2152_v46 = vpop.f32.mrf.mxu3 }
 0x774   : > { %v2153_v54 = vadd.f32 %v6081_v10, %v2152_v46  ;;  %v2105_v46 = vadd.f32 %v6081_v10, %v6204_v52  ;;  %v6596_v10 = vmax.f32 %v2075_v15, %v2173_v9  ;;  %v7330_v15 = vmax.f32 %v6285_v4, %v6396_v59 }
 0x776   : > { %v2204_v18 = vmul.f32 0.01, %v2153_v54  ;;  %v2185_v13 = vmul.f32 0.01, %v2105_v46  ;;  %v2598_v21 = vmax.f32 %v6596_v10, %v6602_v0  ;;  %v6633_v42 = vpop.f32.mrf.mxu0 }
 0x777   : > { %7332 = vst [vmem:[#allocation67_spill] sm:$0xff] %v6633_v42 }
 0x778   : > { %v2244_v52 = vmax.f32 %v2153_v54, %v2204_v18  ;;  %v2599_v35 = vmax.f32 %v2598_v21, %v6621_v61 }
 0x77a   : > { %v2597_v18 = vmax.f32 %v7330_v15, %v2244_v52  ;;  %v6629_v15 = vadd.f32 %v6378_v58, %v6502_v57  ;;  %v6646_v58 = vmax.f32 %v2100_v23, %v2183_v38  ;;  %v2600_v23 = vmax.f32 %v2599_v35, %v6635_v26 }
 0x77b   : > { %v2154_v54 = vpop.f32.mrf.mxu3 }
 0x77c   : > { %v2626_v9 = vsub.f32 %v6086_v16, %v2597_v18  ;;  %v2634_v34 = vsub.f32 %v6088_v17, %v2597_v18  ;;  %v2642_v4 = vsub.f32 %v6279_v60, %v2597_v18  ;;  %v2650_v36 = vsub.f32 %v6396_v59, %v2597_v18  ;;  %7331 = vst [vmem:[#allocation66_spill] sm:$0xff] %v6629_v15  ;;  %v4457_v17 = vld [vmem:[%s7251_s9 + $0x50] sm:$0xff] }
 0x77d   : > { %v2155_v16 = vadd.f32 %v6637_v47, %v2154_v54  ;;  %v4465_v60 = vld [vmem:[%s7251_s9 + $0x90] sm:$0xff]  ;;  %v6648_v59 = vmax.f32 %v2105_v46, %v2185_v13  ;;  %v2658_v32 = vsub.f32 %v2244_v52, %v2597_v18  ;;  %4508 = vmatpush.bf16.msrb.mxu2 %v4457_v17  ;;  %2912 = vmatpush.bf16.msrb.mxu1 %v4457_v17  ;;  %v6652_v54 = vmul.f32 0.01, %v6619_v8  ;;  %v4456_v52 = vld [vmem:[%s7251_s9 + $0x48] sm:$0xff] }
 0x77e   : > { %v2666_v22 = vmul.f32 1.442695, %v2626_v9  ;;  %v2682_v63 = vmul.f32 1.442695, %v2634_v34  ;;  %v2698_v42 = vmul.f32 1.442695, %v2642_v4  ;;  %3103 = vmatpush.bf16.msrb.mxu3 %v4465_v60  ;;  %v2120_v34 = vadd.f32 %v6637_v47, %v6298_v11 }
 0x77f   : > { %v2205_v25 = vmul.f32 0.01, %v2155_v16  ;;  %v2714_v38 = vmul.f32 1.442695, %v2650_v36  ;;  %v4464_v18 = vld [vmem:[%s7251_s9 + $0x88] sm:$0xff] }
 0x780   : > { %4640 = vpow2.f32 %v2666_v22  ;;  %v6668_v1 = vmul.f32 0.01, %v6629_v15  ;;  %v2730_v4 = vmul.f32 1.442695, %v2658_v32  ;;  %v6681_v17 = vmul.f32 0.01, %v6656_v12 }
 0x781   : > { %4642 = vpow2.f32 %v2682_v63  ;;  %v2245_v46 = vmax.f32 %v2155_v16, %v2205_v25  ;;  %v2140_v25 = vadd.f32 %v6637_v47, %v6410_v33  ;;  %2913 = vmatpush.bf16.msrb.mxu1 %v4456_v52  ;;  %4509 = vmatpush.bf16.msrb.mxu2 %v4456_v52  ;;  %v6684_v33 = vpop.f32.mrf.mxu0  ;;  %v4455_v32 = vld [vmem:[%s7251_s9 + $0x40] sm:$0xff]  ;;  %v2191_v52 = vmul.f32 0.01, %v2120_v34 }
 0x782   : > { %4644 = vpow2.f32 %v2698_v42  ;;  %3104 = vmatpush.bf16.msrb.mxu3 %v4464_v18  ;;  %v6710_v15 = vadd.f32 %v6453_v14, %v6499_v29  ;;  %v7335_v14 = vmax.f32 %v6296_v51, %v6406_v49 }
 0x783   : > { %v2601_v36 = vmax.f32 %v2600_v23, %v2245_v46  ;;  %v2157_v21 = vpop.f32.mrf.mxu3  ;;  %4646 = vpow2.f32 %v2714_v38  ;;  %v4463_v38 = vld [vmem:[%s7251_s9 + $0x80] sm:$0xff]  ;;  %v2199_v18 = vmul.f32 0.01, %v2140_v25 }
 0x784   : > { %v2158_v11 = vadd.f32 %v6637_v47, %v2157_v21  ;;  %4648 = vpow2.f32 %v2730_v4  ;;  %7333 = vst [vmem:[#allocation68_spill] sm:$0xff] %v6710_v15 }
 0x785   : > { %v2627_v60 = vsub.f32 %v6596_v10, %v2601_v36  ;;  %v2635_v42 = vsub.f32 %v6602_v0, %v2601_v36  ;;  %v2643_v22 = vsub.f32 %v6621_v61, %v2601_v36  ;;  %v2651_v35 = vsub.f32 %v6635_v26, %v2601_v36  ;;  %2914 = vmatpush.bf16.msrb.mxu1 %v4455_v32 }
 0x786   : > { %v6696_v23 = vpop.eup %4640  ;;  %v2125_v10 = vadd.f32 %v6637_v47, %v6347_v56  ;;  %v2206_v0 = vmul.f32 0.01, %v2158_v11  ;;  %v2659_v61 = vsub.f32 %v2245_v46, %v2601_v36  ;;  %4510 = vmatpush.bf16.msrb.mxu2 %v4455_v32  ;;  %3105 = vmatpush.bf16.msrb.mxu3 %v4463_v38  ;;  %v6714_v46 = vadd.f32 %v6461_v62, %v6502_v57  ;;  %v4478_v36 = vld [vmem:[%s7251_s9 + $0xf8] sm:$0xff] }
 0x787   : > { %v6700_v21 = vpop.eup %4642  ;;  %v2668_v26 = vmul.f32 1.442695, %v2627_v60  ;;  %v2684_v13 = vmul.f32 1.442695, %v2635_v42  ;;  %v2700_v9 = vmul.f32 1.442695, %v2643_v22  ;;  %v6727_v62 = vmax.f32 %v2140_v25, %v2199_v18 }
 0x788   : > { %v2746_v63 = vadd.f32 %v6700_v21, %v6696_v23  ;;  %v2246_v19 = vmax.f32 %v2158_v11, %v2206_v0  ;;  %v6706_v56 = vpop.eup %4644  ;;  %7334 = vst [vmem:[#allocation69_spill] sm:$0xff] %v6714_v46  ;;  %v2716_v4 = vmul.f32 1.442695, %v2651_v35  ;;  %v6721_v11 = vmax.f32 %v2120_v34, %v2191_v52 }
 0x789   : > { %4650 = vpow2.f32 %v2668_v26  ;;  %v6719_v60 = vpop.eup %4646  ;;  %v2193_v32 = vmul.f32 0.01, %v2125_v10  ;;  %v2145_v35 = vadd.f32 %v6637_v47, %v6448_v28  ;;  %v2732_v38 = vmul.f32 1.442695, %v2659_v61  ;;  %3220 = vmatpush.bf16.msra.mxu1 %v4478_v36  ;;  %v4477_v28 = vld [vmem:[%s7251_s9 + $0xf0] sm:$0xff] }
 0x78a   : > { %v2747_v42 = vadd.f32 %v6706_v56, %v2746_v63  ;;  %4652 = vpow2.f32 %v2684_v13  ;;  %v2605_v22 = vmax.f32 %v7335_v14, %v2246_v19  ;;  %v4649_v63 = vpop.eup %4648 }
 0x78b   : > { %v2159_v0 = vpop.f32.mrf.mxu3  ;;  %4654 = vpow2.f32 %v2700_v9  ;;  %v2201_v14 = vmul.f32 0.01, %v2145_v35 }
 0x78c   : > { %v2748_v26 = vadd.f32 %v6719_v60, %v2747_v42  ;;  %v2628_v34 = vsub.f32 %v6097_v48, %v2605_v22  ;;  %v2636_v13 = vsub.f32 %v6099_v27, %v2605_v22  ;;  %4656 = vpow2.f32 %v2716_v4 }
 0x78d   : > { %v2644_v51 = vsub.f32 %v6290_v3, %v2605_v22  ;;  %v2652_v25 = vsub.f32 %v6406_v49, %v2605_v22  ;;  %v2660_v52 = vsub.f32 %v2246_v19, %v2605_v22  ;;  %v2160_v9 = vadd.f32 %v6637_v47, %v2159_v0  ;;  %v2456_v49 = vpop.f32.mrf.mxu0  ;;  %3221 = vmatpush.bf16.msra.mxu1 %v4477_v28 }
 0x78e   : > { %v2749_v18 = vadd.f32 %v4649_v63, %v2748_v26  ;;  %v2670_v61 = vmul.f32 1.442695, %v2628_v34  ;;  %v2686_v36 = vmul.f32 1.442695, %v2636_v13  ;;  %v7336_v48 = vmax.f32 %v6598_v55, %v6646_v58 }
 0x78f   : > { %v6740_v42 = vpop.eup %4650  ;;  %v6746_v3 = vmax.f32 %v2125_v10, %v2193_v32  ;;  %4658 = vpow2.f32 %v2732_v38  ;;  %v2702_v19 = vmul.f32 1.442695, %v2644_v51  ;;  %v2718_v22 = vmul.f32 1.442695, %v2652_v25  ;;  %v4476_v32 = vld [vmem:[%s7251_s9 + $0xe8] sm:$0xff] }
 0x790   : > { %v2607_v27 = vmax.f32 %v7336_v48, %v6721_v11  ;;  %v6748_v4 = vpop.eup %4652  ;;  %4660 = vrcp.f32 %v2749_v18  ;;  %v2207_v26 = vmul.f32 0.01, %v2160_v9  ;;  %v6752_v0 = vadd.f32 %v6684_v33, %v6488_v40 }
 0x791   : > { %v2750_v34 = vadd.f32 %v6748_v4, %v6740_v42  ;;  %4662 = vpow2.f32 %v2670_v61  ;;  %v2734_v10 = vmul.f32 1.442695, %v2660_v52  ;;  %v6759_v38 = vpop.eup %4654  ;;  %v6762_v13 = vmul.f32 0.01, %v6710_v15  ;;  %3222 = vmatpush.bf16.msra.mxu1 %v4476_v32 }
 0x792   : > { %v2608_v51 = vmax.f32 %v2607_v27, %v6727_v62  ;;  %4664 = vpow2.f32 %v2686_v36  ;;  %v2247_v25 = vmax.f32 %v2160_v9, %v2207_v26  ;;  %v6765_v33 = vpop.eup %4656  ;;  %v6768_v28 = vmul.f32 0.01, %v6714_v46 }
 0x793   : > { %7337 = vst [vmem:[#allocation70_spill] sm:$0xff] %v6765_v33  ;;  %v7339_v52 = vmax.f32 %v6600_v44, %v6648_v59  ;;  %v2751_v61 = vadd.f32 %v6759_v38, %v2750_v34  ;;  %4666 = vpow2.f32 %v2702_v19  ;;  %v2162_v48 = vpop.f32.mrf.mxu3  ;;  %v6777_v16 = vmax.f32 %v2145_v35, %v2201_v14  ;;  %v4475_v19 = vld [vmem:[%s7251_s9 + $0xe0] sm:$0xff] }
 0x794   : > { %7338 = vst [vmem:[#allocation71_spill] sm:$0xff] %v6768_v28  ;;  %4668 = vpow2.f32 %v2718_v22  ;;  %v2609_v36 = vmax.f32 %v2608_v51, %v2247_v25  ;;  %v2163_v9 = vadd.f32 %v6637_v47, %v2162_v48  ;;  %v6781_v26 = vmul.f32 0.01, %v6752_v0 }
 0x795   : > { %v6774_v18 = vmax.f32 %v7339_v52, %v6746_v3  ;;  %v4659_v27 = vpop.eup %4658  ;;  %v6784_v40 = vadd.f32 %v2456_v49, %v6491_v41  ;;  %v2752_v52 = vadd.f32 %v6765_v33, %v2751_v61  ;;  %4670 = vpow2.f32 %v2734_v10  ;;  %3223 = vmatpush.bf16.msra.mxu1 %v4475_v19 }
 0x796   : > { %v4661_v35 = vpop.eup %4660  ;;  %v2629_v14 = vsub.f32 %v6598_v55, %v2609_v36  ;;  %v2637_v22 = vsub.f32 %v6646_v58, %v2609_v36  ;;  %v2645_v34 = vsub.f32 %v6721_v11, %v2609_v36  ;;  %v2653_v32 = vsub.f32 %v6727_v62, %v2609_v36  ;;  %v2459_v11 = vpop.f32.mrf.mxu0 }
 0x797   : > { %v6794_v51 = vpop.eup %4662  ;;  %v6796_v49 = vmul.f32 %v4661_v35, %v4649_v63  ;;  %v2753_v48 = vadd.f32 %v4659_v27, %v2752_v52  ;;  %v2661_v61 = vsub.f32 %v2247_v25, %v2609_v36  ;;  %v2208_v10 = vmul.f32 0.01, %v2163_v9  ;;  %v4474_v25 = vld [vmem:[%s7251_s9 + $0xd8] sm:$0xff] }
 0x798   : > { %v6798_v33 = vpop.eup %4664  ;;  %v2672_v41 = vmul.f32 1.442695, %v2629_v14  ;;  %v2688_v46 = vmul.f32 1.442695, %v2637_v22  ;;  %v2704_v28 = vmul.f32 1.442695, %v2645_v34  ;;  %v2822_v55 = vmul.f32 %v4661_v35, %v6700_v21 }
 0x799   : > { %v6801_v58 = vpop.eup %4666  ;;  %4672 = vrcp.f32 %v2753_v48  ;;  %v2754_v62 = vadd.f32 %v6798_v33, %v6794_v51  ;;  %v2720_v63 = vmul.f32 1.442695, %v2653_v32  ;;  %v2736_v15 = vmul.f32 1.442695, %v2661_v61  ;;  %3224 = vmatpush.bf16.msra.mxu1 %v4474_v25 }
 0x79a   : > { %v6808_v36 = vpop.eup %4668  ;;  %4674 = vpow2.f32 %v2672_v41  ;;  %v2248_v52 = vmax.f32 %v2163_v9, %v2208_v10  ;;  %v7340_v21 = vmax.f32 %v6547_v37, %v6576_v20  ;;  %v6816_v14 = vmul.f32 %v4661_v35, %v6706_v56  ;;  %v4473_v41 = vld [vmem:[%s7251_s9 + $0xd0] sm:$0xff] }
 0x79b   : > { %v6818_v22 = vpop.eup %4670  ;;  %v2755_v34 = vadd.f32 %v6801_v58, %v2754_v62  ;;  %4676 = vpow2.f32 %v2688_v46  ;;  %v2164_v32 = vpop.f32.mrf.mxu3  ;;  %v6825_v9 = vmul.f32 %v4661_v35, %v6719_v60  ;;  %v2786_v37 = vmul.f32 %v4661_v35, %v6696_v23 }
 0x79c   : > { %v6813_v19 = vmul.f32 %v2822_v55, %v7340_v21  ;;  %v2616_v20 = vmax.f32 %v6774_v18, %v6777_v16  ;;  %v2586_v56 = vmax.f32 %v6752_v0, %v6781_v26  ;;  %v7341_v46 = vmax.f32 %v6307_v5, %v6413_v53  ;;  %v7351_v0 = vld [vmem:[#allocation37_spill] sm:$0xff] }
 0x79d   : > { %v2165_v61 = vadd.f32 %v6637_v47, %v2164_v32  ;;  %v6837_v10 = vmul.f32 0.01, %v6784_v40  ;;  %v2756_v60 = vadd.f32 %v6808_v36, %v2755_v34  ;;  %4678 = vpow2.f32 %v2704_v28  ;;  %3225 = vmatpush.bf16.msra.mxu1 %v4473_v41 }
 0x79e   : > { %v2613_v48 = vmax.f32 %v7341_v46, %v2248_v52  ;;  %v7342_v23 = vmax.f32 %v6496_v45, %v6513_v50  ;;  %4680 = vpow2.f32 %v2720_v63  ;;  %v4472_v45 = vld [vmem:[%s7251_s9 + $0xc8] sm:$0xff] }
 0x79f   : > { %v6848_v62 = vpop.eup %4672  ;;  %v2757_v25 = vadd.f32 %v6818_v22, %v2756_v60  ;;  %4682 = vpow2.f32 %v2736_v15  ;;  %v2209_v28 = vmul.f32 0.01, %v2165_v61 }
 0x7a0   : > { %v6843_v35 = vmul.f32 %v2786_v37, %v7342_v23  ;;  %v2630_v18 = vsub.f32 %v6107_v43, %v2613_v48  ;;  %v2638_v55 = vsub.f32 %v6109_v24, %v2613_v48  ;;  %v2646_v5 = vsub.f32 %v6301_v2, %v2613_v48  ;;  %v6855_v50 = vpop.eup %4674 }
 0x7a1   : > { %v2654_v21 = vsub.f32 %v6413_v53, %v2613_v48  ;;  %v6858_v43 = vmul.f32 %v6848_v62, %v4659_v27  ;;  %v2662_v24 = vsub.f32 %v2248_v52, %v2613_v48  ;;  %v6860_v34 = vpop.eup %4676  ;;  %4684 = vrcp.f32 %v2757_v25  ;;  %v2461_v48 = vpop.f32.mrf.mxu0  ;;  %3226 = vmatpush.bf16.msra.mxu1 %v4472_v45 }
 0x7a2   : > { %v2674_v2 = vmul.f32 1.442695, %v2630_v18  ;;  %v2690_v63 = vmul.f32 1.442695, %v2638_v55  ;;  %v2706_v15 = vmul.f32 1.442695, %v2646_v5  ;;  %v2249_v53 = vmax.f32 %v2165_v61, %v2209_v28 }
 0x7a3   : > { %v2722_v32 = vmul.f32 1.442695, %v2654_v21  ;;  %v2758_v41 = vadd.f32 %v6860_v34, %v6855_v50  ;;  %v2823_v37 = vmul.f32 %v6848_v62, %v6748_v4  ;;  %v3014_v27 = vmul.f32 %v6848_v62, %v6759_v38  ;;  %v6868_v46 = vpop.eup %4678  ;;  %v4471_v61 = vld [vmem:[%s7251_s9 + $0xc0] sm:$0xff] }
 0x7a4   : > { %4686 = vpow2.f32 %v2674_v2  ;;  %v6871_v52 = vadd.f32 %v2459_v11, %v6499_v29  ;;  %v2617_v60 = vmax.f32 %v2616_v20, %v2249_v53  ;;  %v2787_v23 = vmul.f32 %v6848_v62, %v6740_v42  ;;  %v6878_v4 = vpop.eup %4680 }
 0x7a5   : > { %4688 = vpow2.f32 %v2690_v63  ;;  %v2759_v38 = vadd.f32 %v6868_v46, %v2758_v41  ;;  %v2738_v18 = vmul.f32 1.442695, %v2662_v24  ;;  %v7343_v11 = vmax.f32 %v6557_v30, %v6585_v31  ;;  %v6887_v25 = vpop.eup %4682  ;;  %3227 = vmatpush.bf16.msra.mxu1 %v4471_v61 }
 0x7a6   : > { %v7344_v20 = vmax.f32 %v6656_v12, %v6681_v17  ;;  %4690 = vpow2.f32 %v2706_v15  ;;  %v2631_v21 = vsub.f32 %v6600_v44, %v2617_v60  ;;  %v2639_v42 = vsub.f32 %v6648_v59, %v2617_v60 }
 0x7a7   : > { %v2831_v55 = vmul.f32 %v2823_v37, %v7343_v11  ;;  %v2647_v28 = vsub.f32 %v6746_v3, %v2617_v60  ;;  %v6893_v45 = vadd.f32 %v2461_v48, %v6502_v57  ;;  %v2760_v24 = vadd.f32 %v6878_v4, %v2759_v38  ;;  %v4685_v30 = vpop.eup %4684 }
 0x7a8   : > { %v3022_v5 = vmul.f32 %v3014_v27, %v7344_v20  ;;  %4692 = vpow2.f32 %v2722_v32  ;;  %v7345_v31 = vmax.f32 %v6619_v8, %v6652_v54  ;;  %v2655_v17 = vsub.f32 %v6777_v16, %v2617_v60 }
 0x7a9   : > { %v2676_v2 = vmul.f32 1.442695, %v2631_v21  ;;  %v2692_v44 = vmul.f32 1.442695, %v2639_v42  ;;  %v2855_v59 = vpack.c.bf16 %v2831_v55, %v6813_v19  ;;  %v2761_v63 = vadd.f32 %v6887_v25, %v2760_v24  ;;  %v2464_v11 = vpop.f32.mrf.mxu0  ;;  %v7349_v55 = vld [vmem:[#allocation66_spill] sm:$0xff] }
 0x7aa   : > { %v3021_v12 = vmul.f32 %v6816_v14, %v7345_v31  ;;  %v6902_v3 = vpop.eup %4686  ;;  %4694 = vpow2.f32 %v2738_v18  ;;  %v2663_v15 = vsub.f32 %v2249_v53, %v2617_v60  ;;  %v2708_v8 = vmul.f32 1.442695, %v2647_v28  ;;  %v7346_v53 = vld [vmem:[#allocation59_spill] sm:$0xff]  ;;  %v7350_v28 = vld [vmem:[#allocation58_spill] sm:$0xff] }
 0x7ab   : > { %v6905_v41 = vpop.eup %4688  ;;  %4696 = vpow2.f32 %v2676_v2  ;;  %2915 = vmatmul.bf16.vlgmr.msrb.gmra.mxu1 %v2855_v59  ;;  %v2824_v54 = vmul.f32 %v4685_v30, %v6798_v33  ;;  %v3015_v16 = vmul.f32 %v4685_v30, %v6801_v58  ;;  %v6912_v14 = vmul.f32 %v4685_v30, %v6808_v36 }
 0x7ac   : > { %v3046_v32 = vpack.c.bf16 %v3022_v5, %v3021_v12  ;;  %4698 = vrcp.f32 %v2761_v63  ;;  %v2762_v19 = vadd.f32 %v6905_v41, %v6902_v3  ;;  %v7347_v37 = vmax.f32 %v6510_v6, %v7346_v53  ;;  %v6919_v48 = vpop.eup %4690  ;;  %v7355_v12 = vld [vmem:[#allocation68_spill] sm:$0xff] }
 0x7ad   : > { %v2587_v33 = vmax.f32 %v6784_v40, %v6837_v10  ;;  %4700 = vpow2.f32 %v2692_v44  ;;  %v2724_v58 = vmul.f32 1.442695, %v2655_v17  ;;  %v7348_v60 = vmax.f32 %v6589_v39, %v6615_v7 }
 0x7ae   : > { %3106 = vmatmul.bf16.vlgmr.msrb.gmra.mxu3 %v3046_v32  ;;  %v6917_v27 = vmul.f32 %v2787_v23, %v7347_v37  ;;  %v6926_v38 = vpop.eup %4692  ;;  %v2548_v36 = vmul.f32 0.01, %v6871_v52  ;;  %v2763_v18 = vadd.f32 %v6919_v48, %v2762_v19  ;;  %v2740_v6 = vmul.f32 1.442695, %v2663_v15 }
 0x7af   : > { %v2832_v61 = vmul.f32 %v2824_v54, %v7348_v60  ;;  %4702 = vpow2.f32 %v2708_v8  ;;  %v2788_v40 = vmul.f32 %v4685_v30, %v6794_v51  ;;  %v6937_v39 = vmul.f32 %v6796_v49, %v2586_v56  ;;  %v7352_v49 = vld [vmem:[#allocation56_spill] sm:$0xff]  ;;  %v7353_v56 = vld [vmem:[#allocation61_spill] sm:$0xff] }
 0x7b0   : > { %v2818_v23 = vpack.c.bf16 %v6917_v27, %v6843_v35  ;;  %v6940_v7 = vmul.f32 %v6858_v43, %v2587_v33  ;;  %v4695_v10 = vpop.eup %4694  ;;  %v2565_v20 = vmax.f32 %v7349_v55, %v6668_v1  ;;  %v2549_v5 = vmul.f32 0.01, %v6893_v45  ;;  %v7361_v55 = vld [vmem:[#allocation65_spill] sm:$0xff] }
 0x7b1   : > { %v2764_v21 = vadd.f32 %v6926_v38, %v2763_v18  ;;  %v3259_v42 = vmul.f32 %v4685_v30, %v6818_v22  ;;  %v6947_v51 = vpop.eup %4696  ;;  %v2486_v26 = vadd.f32 %v7351_v0, %v7350_v28  ;;  %4704 = vpow2.f32 %v2724_v58  ;;  %v7356_v22 = vld [vmem:[#allocation71_spill] sm:$0xff]  ;;  %v7357_v30 = vld [vmem:[#allocation69_spill] sm:$0xff]  ;;  %v7359_v58 = vld [vmem:[#allocation62_spill] sm:$0xff] }
 0x7b2   : > { %v7354_v43 = vmax.f32 %v7352_v49, %v7353_v56  ;;  %v6958_v31 = vpop.eup %4698  ;;  %v2572_v17 = vmax.f32 %v7355_v12, %v6762_v13  ;;  %v2573_v2 = vmax.f32 %v7357_v30, %v7356_v22  ;;  %v2588_v44 = vmax.f32 %v6871_v52, %v2548_v36  ;;  %v7364_v56 = vld [vmem:[#allocation31_spill] sm:$0xff]  ;;  %v4479_v35 = vld [vmem:[%s7251_s9 + $0x100] sm:$0xff] }
 0x7b3   : > { %v2765_v59 = vadd.f32 %v4695_v10, %v2764_v21  ;;  %v6965_v63 = vpop.eup %4700  ;;  %4706 = vpow2.f32 %v2740_v6  ;;  %v2825_v15 = vmul.f32 %v6958_v31, %v6860_v34  ;;  %v3016_v32 = vmul.f32 %v6958_v31, %v6868_v46  ;;  %v7358_v34 = vld [vmem:[#allocation57_spill] sm:$0xff]  ;;  %v7366_v22 = vld [vmem:[#allocation43_spill] sm:$0xff] }
 0x7b4   : > { %v6954_v24 = vmul.f32 %v2788_v40, %v7354_v43  ;;  %v2789_v8 = vmul.f32 %v6958_v31, %v6855_v50  ;;  %v2589_v13 = vmax.f32 %v6893_v45, %v2549_v5  ;;  %v2766_v54 = vadd.f32 %v6965_v63, %v6947_v51  ;;  %v4494_v27 = vld [vmem:[#allocation13 + $0x38] sm:$0xff] }
 0x7b5   : > { %4708 = vrcp.f32 %v2765_v59  ;;  %v3260_v52 = vmul.f32 %v6958_v31, %v6887_v25  ;;  %v4703_v19 = vpop.eup %4702  ;;  %v2526_v53 = vmul.f32 0.01, %v2486_v26  ;;  %v2833_v37 = vmul.f32 %v2825_v15, %v2565_v20  ;;  %v7362_v20 = vld [vmem:[#allocation64_spill] sm:$0xff]  ;;  %3487 = vmatpush.bf16.msra.mxu3 %v4494_v27 }
 0x7b6   : > { %v3024_v33 = vmul.f32 %v3016_v32, %v2573_v2  ;;  %v7360_v60 = vmax.f32 %v7358_v34, %v7359_v58  ;;  %v2767_v36 = vadd.f32 %v4703_v19, %v2766_v54  ;;  %v3023_v50 = vmul.f32 %v3015_v16, %v2572_v17  ;;  %v7365_v17 = vld [vmem:[#allocation38_spill] sm:$0xff]  ;;  %v2466_v2 = vpop.f32.mrf.mxu0  ;;  %v7367_v59 = vld [vmem:[#allocation44_spill] sm:$0xff]  ;;  %v7370_v54 = vld [vmem:[#allocation53_spill] sm:$0xff] }
 0x7b7   : > { %v6983_v18 = vmul.f32 %v3259_v42, %v2588_v44  ;;  %v6985_v45 = vmul.f32 %v3260_v52, %v2589_v13  ;;  %v6987_v6 = vpop.eup %4704  ;;  %v2856_v40 = vpack.c.bf16 %v2833_v37, %v2832_v61  ;;  %v2558_v5 = vmax.f32 %v7362_v20, %v7361_v55  ;;  %v7363_v42 = vld [vmem:[#allocation60_spill] sm:$0xff] }
 0x7b8   : > { %v6981_v46 = vmul.f32 %v2789_v8, %v7360_v60  ;;  %v2768_v21 = vadd.f32 %v6987_v6, %v2767_v36  ;;  %v3047_v0 = vpack.c.bf16 %v3024_v33, %v3023_v50  ;;  %v2479_v43 = vadd.f32 %v7364_v56, %v7363_v42  ;;  %v7368_v32 = vld [vmem:[#allocation52_spill] sm:$0xff]  ;;  %v7369_v8 = vld [vmem:[#allocation47_spill] sm:$0xff] }
 0x7b9   : > { %v4707_v16 = vpop.eup %4706  ;;  %v2566_v12 = vmax.f32 %v2486_v26, %v2526_v53  ;;  %v2487_v61 = vadd.f32 %v7365_v17, %v7363_v42  ;;  %v2494_v30 = vadd.f32 %v7366_v22, %v7350_v28  ;;  %v2495_v15 = vadd.f32 %v7367_v59, %v7363_v42  ;;  %v7371_v52 = vld [vmem:[#allocation48_spill] sm:$0xff]  ;;  %v7372_v59 = vld [vmem:[#allocation70_spill] sm:$0xff] }
 0x7ba   : > { %v2498_v13 = vadd.f32 %v7369_v8, %v7368_v32  ;;  %v2499_v37 = vadd.f32 %v7371_v52, %v7370_v54  ;;  %v2769_v33 = vadd.f32 %v4707_v16, %v2768_v21  ;;  %v2510_v60 = vadd.f32 %v2464_v11, %v7350_v28 }
 0x7bb   : > { %v4709_v44 = vpop.eup %4708  ;;  %2920 = vmatmul.bf16.gmra.mxu1 %v2856_v40  ;;  %v2511_v36 = vadd.f32 %v2466_v2, %v7363_v42  ;;  %v2519_v55 = vmul.f32 0.01, %v2479_v43  ;;  %v2527_v40 = vmul.f32 0.01, %v2487_v61  ;;  %v2535_v56 = vmul.f32 0.01, %v2495_v15 }
 0x7bc   : > { %v2826_v26 = vmul.f32 %v4709_v44, %v6905_v41  ;;  %v3017_v53 = vmul.f32 %v4709_v44, %v6919_v48  ;;  %v7011_v34 = vmul.f32 %v4709_v44, %v6926_v38  ;;  %v2790_v58 = vmul.f32 %v4709_v44, %v6902_v3 }
 0x7bd   : > { %4710 = vrcp.f32 %v2769_v33  ;;  %v3261_v50 = vmul.f32 %v4709_v44, %v4695_v10  ;;  %v2534_v41 = vmul.f32 0.01, %v2494_v30  ;;  %v2539_v48 = vmul.f32 0.01, %v2499_v37 }
 0x7be   : > { %3111 = vmatmul.bf16.gmra.mxu3 %v3047_v0  ;;  %v2834_v20 = vmul.f32 %v2826_v26, %v2566_v12  ;;  %v7016_v21 = vmul.f32 %v2790_v58, %v2558_v5  ;;  %v2538_v17 = vmul.f32 0.01, %v2498_v13  ;;  %v2550_v38 = vmul.f32 0.01, %v2510_v60 }
 0x7bf   : > { %v2551_v22 = vmul.f32 0.01, %v2511_v36  ;;  %v3136_v3 = vmul.f32 %v6848_v62, %v7372_v59  ;;  %v2559_v32 = vmax.f32 %v2479_v43, %v2519_v55  ;;  %v2567_v2 = vmax.f32 %v2487_v61, %v2527_v40 }
 0x7c0   : > { %v2574_v8 = vmax.f32 %v2494_v30, %v2534_v41  ;;  %v2575_v0 = vmax.f32 %v2495_v15, %v2535_v56  ;;  %v2579_v10 = vmax.f32 %v2499_v37, %v2539_v48  ;;  %v2578_v54 = vmax.f32 %v2498_v13, %v2538_v17  ;;  %v7373_v13 = vld [vmem:[#allocation50_spill] sm:$0xff] }
 0x7c1   : > { %v2590_v52 = vmax.f32 %v2510_v60, %v2550_v38  ;;  %v2591_v33 = vmax.f32 %v2511_v36, %v2551_v22  ;;  %v2501_v37 = vadd.f32 %v7373_v13, %v6502_v57  ;;  %v7376_v57 = vld [vmem:[#allocation51_spill] sm:$0xff] }
 0x7c2   : > { %v3144_v1 = vmul.f32 %v3136_v3, %v2579_v10  ;;  %v3025_v62 = vmul.f32 %v3017_v53, %v2574_v8  ;;  %v7374_v53 = vld [vmem:[#allocation49_spill] sm:$0xff]  ;;  %v2502_v48 = vadd.f32 %v7376_v57, %v7350_v28  ;;  %v7379_v8 = vld [vmem:[#allocation39_spill] sm:$0xff] }
 0x7c3   : > { %v4711_v11 = vpop.eup %4710  ;;  %v7024_v43 = vmul.f32 %v3261_v50, %v2590_v52  ;;  %v2500_v60 = vadd.f32 %v7374_v53, %v6499_v29  ;;  %v2541_v36 = vmul.f32 0.01, %v2501_v37  ;;  %v2130_v28 = vadd.f32 %v6637_v47, %v7379_v8  ;;  %v7384_v53 = vld [vmem:[#allocation29_spill] sm:$0xff] }
 0x7c4   : > { %v2827_v12 = vmul.f32 %v4711_v11, %v6965_v63  ;;  %v3018_v5 = vmul.f32 %v4711_v11, %v4703_v19  ;;  %v2791_v44 = vmul.f32 %v4711_v11, %v6947_v51  ;;  %v3262_v26 = vmul.f32 %v4711_v11, %v4707_v16 }
 0x7c5   : > { %v3143_v63 = vmul.f32 %v6825_v9, %v2578_v54  ;;  %v2540_v50 = vmul.f32 0.01, %v2500_v60  ;;  %v3138_v9 = vmul.f32 %v6958_v31, %v6878_v4  ;;  %v2581_v55 = vmax.f32 %v2501_v37, %v2541_v36  ;;  %v4453_v37 = vld [vmem:[%s7251_s9 + $0x30] sm:$0xff] }
 0x7c6   : > { %v2835_v58 = vmul.f32 %v2827_v12, %v2567_v2  ;;  %v3026_v49 = vmul.f32 %v3018_v5, %v2575_v0  ;;  %v7022_v25 = vmul.f32 %v2791_v44, %v2559_v32  ;;  %v7026_v61 = vmul.f32 %v3262_v26, %v2591_v33  ;;  %v7378_v2 = vld [vmem:[#allocation26_spill] sm:$0xff]  ;;  %v4454_v26 = vld [vmem:[%s7251_s9 + $0x38] sm:$0xff] }
 0x7c7   : > { %v3168_v15 = vpack.c.bf16 %v3144_v1, %v3143_v63  ;;  %v7375_v1 = vld [vmem:[#allocation54_spill] sm:$0xff]  ;;  %v2542_v29 = vmul.f32 0.01, %v2502_v48  ;;  %v3140_v38 = vmul.f32 %v4711_v11, %v6987_v6  ;;  %v7380_v11 = vld [vmem:[#allocation55_spill] sm:$0xff]  ;;  %v2195_v44 = vmul.f32 0.01, %v2130_v28  ;;  %2984 = vmatpush.bf16.msra.mxu2 %v4454_v26 }
 0x7c8   : > { %v2857_v30 = vpack.c.bf16 %v2835_v58, %v2834_v20  ;;  %v2820_v51 = vpack.c.bf16 %v7022_v25, %v7016_v21  ;;  %v3048_v19 = vpack.c.bf16 %v3026_v49, %v3025_v62  ;;  %v3292_v16 = vpack.c.bf16 %v7026_v61, %v7024_v43  ;;  %v7381_v58 = vld [vmem:[#allocation36_spill] sm:$0xff]  ;;  %v7382_v62 = vld [vmem:[#allocation42_spill] sm:$0xff]  ;;  %v7387_v26 = vld [vmem:[#allocation27_spill] sm:$0xff] }
 0x7c9   : > { %v2580_v49 = vmax.f32 %v2500_v60, %v2540_v50  ;;  %v3146_v20 = vmul.f32 %v3138_v9, %v2581_v55  ;;  %v2503_v56 = vadd.f32 %v7375_v1, %v7363_v42  ;;  %v2582_v59 = vmax.f32 %v2502_v48, %v2542_v29  ;;  %v7385_v36 = vld [vmem:[#allocation30_spill] sm:$0xff]  ;;  %v7386_v9 = vld [vmem:[#allocation35_spill] sm:$0xff]  ;;  %v4490_v25 = vld [vmem:[#allocation13 + $0x18] sm:$0xff] }
 0x7ca   : > { %2925 = vmatmul.bf16.vlgmr.msrb.gmra.mxu2 %v2857_v30  ;;  %v2090_v42 = vadd.f32 %v6637_v47, %v7378_v2  ;;  %v2150_v12 = vadd.f32 %v6637_v47, %v7380_v11  ;;  %v7383_v30 = vmax.f32 %v7381_v58, %v7382_v62  ;;  %v4450_v11 = vld [vmem:[%s7251_s9 + $0x18] sm:$0xff]  ;;  %v4499_v21 = vld [vmem:[#allocation16 + $0x20] sm:$0xff] }
 0x7cb   : > { %3228 = vmatmul.bf16.vlgmr.msra.gmra.mxu1 %v3168_v15  ;;  %v3145_v40 = vmul.f32 %v6912_v14, %v2580_v49  ;;  %v2543_v17 = vmul.f32 0.01, %v2503_v56  ;;  %v3147_v31 = vmul.f32 %v7011_v34, %v2582_v59  ;;  %v7377_v14 = vld [vmem:[#allocation32_spill] sm:$0xff]  ;;  %v2235_v15 = vmax.f32 %v2130_v28, %v2195_v44  ;;  %2985 = vmatpush.bf16.msra.mxu2 %v4453_v37  ;;  %v4449_v37 = vld [vmem:[%s7251_s9 + $0x10] sm:$0xff] }
 0x7cc   : > { %v2110_v32 = vadd.f32 %v6637_v47, %v7377_v14  ;;  %v2179_v34 = vmul.f32 0.01, %v2090_v42  ;;  %v2203_v33 = vmul.f32 0.01, %v2150_v12  ;;  %v4495_v43 = vld [vmem:[#allocation16] sm:$0xff] }
 0x7cd   : > { %v3169_v41 = vpack.c.bf16 %v3146_v20, %v3145_v40  ;;  %v2583_v22 = vmax.f32 %v2503_v56, %v2543_v17 }
 0x7ce   : > { %3116 = vmatmul.bf16.gmra.mxu3 %v3048_v19  ;;  %v2187_v6 = vmul.f32 0.01, %v2110_v32  ;;  %v2219_v19 = vmax.f32 %v2090_v42, %v2179_v34  ;;  %v2243_v40 = vmax.f32 %v2150_v12, %v2203_v33  ;;  %v4751_v33 = vld [vmem:[#allocation10] ss:$0 sm:$0xff] }
 0x7cf   : > { %v3148_v4 = vmul.f32 %v3140_v38, %v2583_v22  ;;  %v4452_v38 = vld [vmem:[%s7251_s9 + $0x28] sm:$0xff]  ;;  %v2329_v58 = vadd.f32 %v4751_v33, %v7387_v26 }
 0x7d0   : > { %v2227_v52 = vmax.f32 %v2110_v32, %v2187_v6  ;;  %2986 = vmatpush.bf16.msra.mxu2 %v4452_v38 }
 0x7d1   : > { %v3170_v3 = vpack.c.bf16 %v3148_v4, %v3147_v31 }
 0x7d2   : > { %v2622_v20 = vmax.f32 %v2219_v19, %v2227_v52 }
 0x7d4   : > { %v2623_v57 = vmax.f32 %v2622_v20, %v2235_v15 }
 0x7d6   : > { %v2624_v22 = vmax.f32 %v2623_v57, %v2243_v40 }
 0x7db   : > { %3233 = vmatmul.bf16.gmra.mxu1 %v3169_v41 }
 0x7eb   : > { %3238 = vmatmul.bf16.gmra.mxu1 %v3170_v3 }
 0x7ed   : > { %v2167_v0 = vpop.f32.mrf.mxu3 }
 0x7ee   : > { %v2168_v10 = vadd.f32 %v6637_v47, %v2167_v0 }
 0x7f0   : > { %v2210_v5 = vmul.f32 0.01, %v2168_v10 }
 0x7f2   : > { %v2250_v54 = vmax.f32 %v2168_v10, %v2210_v5 }
 0x7f4   : > { %v2621_v63 = vmax.f32 %v7383_v30, %v2250_v54  ;;  %v2469_v30 = vpop.f32.mrf.mxu0 }
 0x7f5   : > { %v2169_v13 = vpop.f32.mrf.mxu3 }
 0x7f6   : > { %v2632_v60 = vsub.f32 %v7384_v53, %v2621_v63  ;;  %v2640_v50 = vsub.f32 %v7385_v36, %v2621_v63  ;;  %v2648_v55 = vsub.f32 %v7386_v9, %v2621_v63  ;;  %v2656_v49 = vsub.f32 %v7382_v62, %v2621_v63  ;;  %v7389_v53 = vld [vmem:[#allocation45_spill] sm:$0xff] }
 0x7f7   : > { %v2170_v41 = vadd.f32 %v6637_v47, %v2169_v13  ;;  %v2664_v48 = vsub.f32 %v2250_v54, %v2621_v63  ;;  %v4451_v47 = vld [vmem:[%s7251_s9 + $0x20] sm:$0xff]  ;;  %v4448_v9 = vld [vmem:[%s7251_s9 + $0x8] sm:$0xff] }
 0x7f8   : > { %v2678_v1 = vmul.f32 1.442695, %v2632_v60  ;;  %v2694_v56 = vmul.f32 1.442695, %v2640_v50  ;;  %v2710_v17 = vmul.f32 1.442695, %v2648_v55  ;;  %2987 = vmatpush.bf16.msra.mxu2 %v4451_v47  ;;  %v2496_v60 = vadd.f32 %v7389_v53, %v2329_v58 }
 0x7f9   : > { %v2211_v29 = vmul.f32 0.01, %v2170_v41  ;;  %v2726_v59 = vmul.f32 1.442695, %v2656_v49  ;;  %v2742_v31 = vmul.f32 1.442695, %v2664_v48 }
 0x7fa   : > { %4712 = vpow2.f32 %v2678_v1  ;;  %v7390_v49 = vld [vmem:[#allocation33_spill] sm:$0xff]  ;;  %v2536_v48 = vmul.f32 0.01, %v2496_v60 }
 0x7fb   : > { %4714 = vpow2.f32 %v2694_v56  ;;  %v2251_v4 = vmax.f32 %v2170_v41, %v2211_v29  ;;  %v2480_v20 = vadd.f32 %v7390_v49, %v2329_v58 }
 0x7fc   : > { %4716 = vpow2.f32 %v2710_v17  ;;  %2988 = vmatpush.bf16.msra.mxu2 %v4450_v11 }
 0x7fd   : > { %v2625_v3 = vmax.f32 %v2624_v22, %v2251_v4  ;;  %4718 = vpow2.f32 %v2726_v59  ;;  %v2520_v38 = vmul.f32 0.01, %v2480_v20  ;;  %v7392_v59 = vld [vmem:[#allocation34_spill] sm:$0xff] }
 0x7fe   : > { %4720 = vpow2.f32 %v2742_v31 }
 0x7ff   : > { %v2633_v14 = vsub.f32 %v2219_v19, %v2625_v3  ;;  %v2641_v32 = vsub.f32 %v2227_v52, %v2625_v3  ;;  %v2649_v2 = vsub.f32 %v2235_v15, %v2625_v3  ;;  %v2657_v8 = vsub.f32 %v2243_v40, %v2625_v3  ;;  %v7388_v15 = vld [vmem:[#allocation40_spill] sm:$0xff] }
 0x800   : > { %v7075_v42 = vpop.eup %4712  ;;  %v2665_v0 = vsub.f32 %v2251_v4, %v2625_v3  ;;  %v2488_v13 = vadd.f32 %v7388_v15, %v2329_v58  ;;  %2989 = vmatpush.bf16.msra.mxu2 %v4449_v37  ;;  %v7391_v40 = vld [vmem:[#allocation28_spill] sm:$0xff]  ;;  %v7393_v3 = vld [vmem:[#allocation41_spill] sm:$0xff]  ;;  %v2560_v15 = vmax.f32 %v2480_v20, %v2520_v38 }
 0x801   : > { %v4715_v28 = vpop.eup %4714  ;;  %v2680_v10 = vmul.f32 1.442695, %v2633_v14  ;;  %v2696_v6 = vmul.f32 1.442695, %v2641_v32  ;;  %v2712_v5 = vmul.f32 1.442695, %v2649_v2  ;;  %v2331_v41 = vadd.f32 %v4751_v33, %v7391_v40 }
 0x802   : > { %v2770_v12 = vadd.f32 %v4715_v28, %v7075_v42  ;;  %v4717_v34 = vpop.eup %4716  ;;  %v2728_v54 = vmul.f32 1.442695, %v2657_v8  ;;  %v2744_v62 = vmul.f32 1.442695, %v2665_v0  ;;  %v2528_v1 = vmul.f32 0.01, %v2488_v13 }
 0x803   : > { %4722 = vpow2.f32 %v2680_v10  ;;  %v4719_v52 = vpop.eup %4718  ;;  %v2481_v4 = vadd.f32 %v7392_v59, %v2331_v41  ;;  %v2489_v47 = vadd.f32 %v7393_v3, %v2331_v41  ;;  %v4447_v32 = vld [vmem:[%s7251_s9] sm:$0xff]  ;;  %v2576_v8 = vmax.f32 %v2496_v60, %v2536_v48  ;;  %v7394_v0 = vld [vmem:[#allocation46_spill] sm:$0xff] }
 0x804   : > { %v2771_v44 = vadd.f32 %v4717_v34, %v2770_v12  ;;  %4724 = vpow2.f32 %v2696_v6  ;;  %v4721_v19 = vpop.eup %4720  ;;  %2990 = vmatpush.bf16.msra.mxu2 %v4448_v9  ;;  %v2568_v31 = vmax.f32 %v2488_v13, %v2528_v1  ;;  %v2497_v10 = vadd.f32 %v7394_v0, %v2331_v41  ;;  %v7395_v6 = vld [vmem:[#allocation63_spill] sm:$0xff] }
 0x805   : > { %4726 = vpow2.f32 %v2712_v5  ;;  %v2504_v11 = vadd.f32 %v7395_v6, %v2329_v58  ;;  %v7396_v12 = vld [vmem:[#allocation67_spill] sm:$0xff]  ;;  %v2512_v13 = vadd.f32 %v2469_v30, %v2329_v58  ;;  %v2521_v49 = vmul.f32 0.01, %v2481_v4 }
 0x806   : > { %v2772_v63 = vadd.f32 %v4719_v52, %v2771_v44  ;;  %4728 = vpow2.f32 %v2728_v54  ;;  %v2505_v5 = vadd.f32 %v7396_v12, %v2331_v41  ;;  %v2471_v44 = vpop.f32.mrf.mxu0  ;;  %v4486_v54 = vld [vmem:[%s7251_s9 + $0x138] sm:$0xff]  ;;  %v2529_v40 = vmul.f32 0.01, %v2489_v47 }
 0x807   : > { %4730 = vpow2.f32 %v2744_v62  ;;  %v2513_v60 = vadd.f32 %v2471_v44, %v2331_v41  ;;  %v2544_v48 = vmul.f32 0.01, %v2504_v11  ;;  %v2561_v58 = vmax.f32 %v2481_v4, %v2521_v49 }
 0x808   : > { %v2773_v36 = vadd.f32 %v4721_v19, %v2772_v63  ;;  %2991 = vmatpush.bf16.msra.mxu2 %v4447_v32 }
 0x809   : > { %v4723_v50 = vpop.eup %4722  ;;  %v2584_v20 = vmax.f32 %v2504_v11, %v2544_v48 }
 0x80a   : > { %v4725_v55 = vpop.eup %4724  ;;  %4732 = vrcp.f32 %v2773_v36 }
 0x80b   : > { %v2774_v56 = vadd.f32 %v4725_v55, %v4723_v50  ;;  %v4727_v57 = vpop.eup %4726 }
 0x80c   : > { %v4729_v29 = vpop.eup %4728  ;;  %3342 = vmatpush.bf16.msrb.mxu2 %v4486_v54 }
 0x80d   : > { %v2775_v17 = vadd.f32 %v4727_v57, %v2774_v56  ;;  %v4731_v22 = vpop.eup %4730  ;;  %v2537_v56 = vmul.f32 0.01, %v2497_v10 }
 0x80f   : > { %v2776_v14 = vadd.f32 %v4729_v29, %v2775_v17  ;;  %v2545_v17 = vmul.f32 0.01, %v2505_v5 }
 0x810   : > { %v4733_v2 = vpop.eup %4732 }
 0x811   : > { %v2777_v33 = vadd.f32 %v4731_v22, %v2776_v14  ;;  %v2828_v26 = vmul.f32 %v4733_v2, %v4715_v28  ;;  %v3019_v62 = vmul.f32 %v4733_v2, %v4717_v34  ;;  %v3141_v63 = vmul.f32 %v4733_v2, %v4719_v52  ;;  %v4485_v52 = vld [vmem:[%s7251_s9 + $0x130] sm:$0xff] }
 0x812   : > { %v2792_v37 = vmul.f32 %v4733_v2, %v7075_v42  ;;  %v3263_v53 = vmul.f32 %v4733_v2, %v4721_v19  ;;  %v2552_v28 = vmul.f32 0.01, %v2512_v13  ;;  %v2553_v34 = vmul.f32 0.01, %v2513_v60  ;;  %3343 = vmatpush.bf16.msrb.mxu2 %v4485_v52  ;;  %v3412_v52 = vld [vmem:[%s7155_s4 + $0x28] sm:$0xff] }
 0x813   : > { %4734 = vrcp.f32 %v2777_v33  ;;  %v2836_v36 = vmul.f32 %v2828_v26, %v2568_v31  ;;  %v3027_v9 = vmul.f32 %v3019_v62, %v2576_v8  ;;  %v2569_v42 = vmax.f32 %v2489_v47, %v2529_v40  ;;  %v4480_v26 = vld [vmem:[%s7251_s9 + $0x108] sm:$0xff]  ;;  %v4501_v62 = vld [vmem:[#allocation16 + $0x30] sm:$0xff]  ;;  %v3409_v40 = vld [vmem:[%s7155_s4 + $0x10] sm:$0xff] }
 0x814   : > { %v2800_v1 = vmul.f32 %v2792_v37, %v2560_v15  ;;  %v2577_v19 = vmax.f32 %v2497_v10, %v2537_v56  ;;  %v2585_v41 = vmax.f32 %v2505_v5, %v2545_v17  ;;  %v2592_v14 = vmax.f32 %v2512_v13, %v2552_v28  ;;  %v4491_v15 = vld [vmem:[#allocation13 + $0x20] sm:$0xff]  ;;  %v4500_v13 = vld [vmem:[#allocation16 + $0x28] sm:$0xff] }
 0x815   : > { %v2593_v32 = vmax.f32 %v2513_v60, %v2553_v34  ;;  %v3149_v2 = vmul.f32 %v3141_v63, %v2584_v20  ;;  %v7397_v33 = vpack.c.bf16 %v6981_v46, %v6954_v24  ;;  %v4502_v24 = vld [vmem:[#allocation16 + $0x38] sm:$0xff]  ;;  %v4492_v46 = vld [vmem:[#allocation13 + $0x28] sm:$0xff]  ;;  %v7398_v63 = vpack.c.bf16 %v6940_v7, %v6937_v39  ;;  %v4489_v37 = vld [vmem:[#allocation13 + $0x10] sm:$0xff] }
 0x816   : > { %v7107_v54 = vmul.f32 %v3263_v53, %v2592_v14  ;;  %3584 = vmatpush.bf16.msrb.mxu1 %v4502_v24  ;;  %v4498_v53 = vld [vmem:[#allocation16 + $0x18] sm:$0xff]  ;;  %v4488_v60 = vld [vmem:[#allocation13 + $0x8] sm:$0xff]  ;;  %v4497_v39 = vld [vmem:[#allocation16 + $0x10] sm:$0xff] }
 0x817   : > { %v4487_v7 = vld [vmem:[#allocation13] sm:$0xff]  ;;  %v3411_v34 = vld [vmem:[%s7155_s4 + $0x20] sm:$0xff] }
 0x819   : > { %v4735_v30 = vpop.eup %4734 }
 0x81a   : > { %v2829_v38 = vmul.f32 %v4735_v30, %v4725_v55  ;;  %v3020_v59 = vmul.f32 %v4735_v30, %v4727_v57  ;;  %v3142_v31 = vmul.f32 %v4735_v30, %v4729_v29  ;;  %v2793_v3 = vmul.f32 %v4735_v30, %v4723_v50  ;;  %v4484_v50 = vld [vmem:[%s7251_s9 + $0x128] sm:$0xff]  ;;  %v4483_v57 = vld [vmem:[%s7251_s9 + $0x120] sm:$0xff]  ;;  %v4482_v29 = vld [vmem:[%s7251_s9 + $0x118] sm:$0xff]  ;;  %3585 = vmatpush.bf16.msrb.mxu1 %v4501_v62 }
 0x81b   : > { %v3264_v8 = vmul.f32 %v4735_v30, %v4731_v22  ;;  %3344 = vmatpush.bf16.msrb.mxu2 %v4484_v50  ;;  %v4481_v22 = vld [vmem:[%s7251_s9 + $0x110] sm:$0xff] }
 0x81c   : > { %v2837_v0 = vmul.f32 %v2829_v38, %v2569_v42  ;;  %v3028_v6 = vmul.f32 %v3020_v59, %v2577_v19  ;;  %v3150_v12 = vmul.f32 %v3142_v31, %v2585_v41  ;;  %v2801_v44 = vmul.f32 %v2793_v3, %v2561_v58  ;;  %v3413_v41 = vld [vmem:[%s7155_s4 + $0x30] sm:$0xff]  ;;  %v3414_v38 = vld [vmem:[%s7155_s4 + $0x38] sm:$0xff] }
 0x81d   : > { %v7109_v4 = vmul.f32 %v3264_v8, %v2593_v32  ;;  %v3433_v58 = vpack.c.bf16 %v3412_v52, %v3411_v34  ;;  %v3434_v59 = vpack.c.bf16 %v3414_v38, %v3413_v41 }
 0x81e   : > { %v2858_v47 = vpack.c.bf16 %v2837_v0, %v2836_v36  ;;  %v3049_v10 = vpack.c.bf16 %v3028_v6, %v3027_v9  ;;  %v3171_v11 = vpack.c.bf16 %v3150_v12, %v3149_v2  ;;  %v2821_v5 = vpack.c.bf16 %v2801_v44, %v2800_v1  ;;  %3586 = vmatpush.bf16.msrb.mxu1 %v4500_v13  ;;  %v4496_v9 = vld [vmem:[#allocation16 + $0x8] sm:$0xff] }
 0x81f   : > { %v3293_v55 = vpack.c.bf16 %v7109_v4, %v7107_v54  ;;  %3345 = vmatpush.bf16.msrb.mxu2 %v4483_v57  ;;  %v3410_v1 = vld [vmem:[%s7155_s4 + $0x18] sm:$0xff] }
 0x820   : > { %2930 = vmatmul.bf16.gmra.mxu2 %v2858_v47  ;;  %3121 = vmatmul.bf16.gmra.mxu3 %v3049_v10  ;;  %v3432_v56 = vpack.c.bf16 %v3410_v1, %v3409_v40 }
 0x821   : > { %3243 = vmatmul.bf16.gmra.mxu1 %v3171_v11 }
 0x822   : > { %3587 = vmatpush.bf16.msrb.mxu1 %v4499_v21 }
 0x823   : > { %3346 = vmatpush.bf16.msrb.mxu2 %v4482_v29 }
 0x826   : > { %3588 = vmatpush.bf16.msrb.mxu1 %v4498_v53 }
 0x827   : > { %3347 = vmatpush.bf16.msrb.mxu2 %v4481_v22  ;;  %v7169_v22 = vld [vmem:[#allocation12] ss:$0 sm:$0xff] }
 0x828   : > { %v2916_v17 = vpop.f32.mrf.mxu1 }
 0x82a   : > { %3589 = vmatpush.bf16.msrb.mxu1 %v4497_v39 }
 0x82b   : > { %3348 = vmatpush.bf16.msrb.mxu2 %v4480_v26 }
 0x82e   : > { %3590 = vmatpush.bf16.msrb.mxu1 %v4496_v9 }
 0x82f   : > { %3349 = vmatpush.bf16.msrb.mxu2 %v4479_v35 }
 0x830   : > { %2992 = vmatmul.bf16.vlgmr.msra.gmra.mxu2 %v2818_v23  ;;  %v4493_v23 = vld [vmem:[#allocation13 + $0x30] sm:$0xff]  ;;  %v2918_v30 = vpop.f32.mrf.mxu1 }
 0x831   : > { %3488 = vmatpush.bf16.msra.mxu3 %v4493_v23  ;;  %v3107_v0 = vpop.f32.mrf.mxu3 }
 0x832   : > { %3591 = vmatpush.bf16.msrb.mxu1 %v4495_v43 }
 0x835   : > { %3489 = vmatpush.bf16.msra.mxu3 %v4492_v46 }
 0x838   : > { %v2921_v3 = vpop.f32.mrf.mxu1 }
 0x839   : > { %3490 = vmatpush.bf16.msra.mxu3 %v4491_v15  ;;  %v3109_v54 = vpop.f32.mrf.mxu3 }
 0x83d   : > { %3491 = vmatpush.bf16.msra.mxu3 %v4490_v25 }
 0x840   : > { %2997 = vmatmul.bf16.gmra.mxu2 %v7397_v33  ;;  %v2923_v32 = vpop.f32.mrf.mxu1 }
 0x841   : > { %3492 = vmatpush.bf16.msra.mxu3 %v4489_v37  ;;  %v3112_v50 = vpop.f32.mrf.mxu3 }
 0x845   : > { %3493 = vmatpush.bf16.msra.mxu3 %v4488_v60 }
 0x848   : > { %v3229_v44 = vpop.f32.mrf.mxu1 }
 0x849   : > { %3494 = vmatpush.bf16.msra.mxu3 %v4487_v7  ;;  %v3114_v15 = vpop.f32.mrf.mxu3 }
 0x84d   : > { %v7149_v36 = vpop.f32.mrf.mxu2 }
 0x850   : > { %3002 = vmatmul.bf16.gmra.mxu2 %v2820_v51  ;;  %v7399_v51 = vpack.c.bf16 %v6985_v45, %v6983_v18  ;;  %v3407_v18 = vld [vmem:[%s7155_s4] sm:$0xff]  ;;  %v3408_v45 = vld [vmem:[%s7155_s4 + $0x8] sm:$0xff]  ;;  %v3231_v10 = vpop.f32.mrf.mxu1 }
 0x851   : > { %v3431_v49 = vpack.c.bf16 %v3408_v45, %v3407_v18 }
 0x853   : > { %3495 = vmatmul.bf16.vlgmr.msra.gmra.mxu3 %v3431_v49  ;;  %3592 = vmatmul.bf16.vlgmr.msrb.gmra.mxu1 %v3431_v49  ;;  %v3117_v49 = vpop.f32.mrf.mxu3 }
 0x855   : > { %v2928_v61 = vpop.f32.mrf.mxu2 }
 0x858   : > { %v3234_v33 = vpop.f32.mrf.mxu1 }
 0x860   : > { %3007 = vmatmul.bf16.gmra.mxu2 %v2821_v5  ;;  %v3236_v53 = vpop.f32.mrf.mxu1 }
 0x863   : > { %3500 = vmatmul.bf16.gmra.mxu3 %v3432_v56  ;;  %3597 = vmatmul.bf16.gmra.mxu1 %v3432_v56 }
 0x870   : > { %3350 = vmatmul.bf16.vlgmr.msrb.gmra.mxu2 %v7398_v63 }
 0x873   : > { %3505 = vmatmul.bf16.gmra.mxu3 %v3433_v58  ;;  %3602 = vmatmul.bf16.gmra.mxu1 %v3433_v58 }
 0x880   : > { %3355 = vmatmul.bf16.gmra.mxu2 %v7399_v51 }
 0x883   : > { %3510 = vmatmul.bf16.gmra.mxu3 %v3434_v59  ;;  %3607 = vmatmul.bf16.gmra.mxu1 %v3434_v59 }
 0x890   : > { %3360 = vmatmul.bf16.gmra.mxu2 %v3292_v16 }
 0x8a0   : > { %3365 = vmatmul.bf16.gmra.mxu2 %v3293_v55 }
 0x8a3   : > { %v2931_v16 = vpop.f32.mrf.mxu2 }
 0x8ab   : > { %v7161_v48 = vpop.f32.mrf.mxu2 }
 0x8b3   : > { %v2993_v28 = vpop.f32.mrf.mxu2 }
 0x8b4   : > { %v2994_v47 = vadd.f32 %v2993_v28, %v2916_v17  ;;  %v3239_v17 = vpop.f32.mrf.mxu1 }
 0x8b6   : > { %v3127_v11 = vadd.f32 %v3107_v0, %v2994_v47 }
 0x8b8   : > { %v3249_v55 = vadd.f32 %v3229_v44, %v3127_v11 }
 0x8bb   : > { %v2995_v42 = vpop.f32.mrf.mxu2 }
 0x8bc   : > { %v2996_v19 = vadd.f32 %v2995_v42, %v2918_v30  ;;  %v3119_v42 = vpop.f32.mrf.mxu3  ;;  %v3241_v59 = vpop.f32.mrf.mxu1 }
 0x8be   : > { %v3128_v57 = vadd.f32 %v3109_v54, %v2996_v19 }
 0x8c0   : > { %v3250_v27 = vadd.f32 %v3231_v10, %v3128_v57 }
 0x8c3   : > { %v2998_v20 = vpop.f32.mrf.mxu2 }
 0x8c4   : > { %v2999_v26 = vadd.f32 %v2998_v20, %v2921_v3  ;;  %v3244_v47 = vpop.f32.mrf.mxu1 }
 0x8c6   : > { %v3129_v46 = vadd.f32 %v3112_v50, %v2999_v26 }
 0x8c8   : > { %v3251_v37 = vadd.f32 %v3234_v33, %v3129_v46 }
 0x8cb   : > { %v3000_v31 = vpop.f32.mrf.mxu2 }
 0x8cc   : > { %v3001_v25 = vadd.f32 %v3000_v31, %v2923_v32  ;;  %v3122_v32 = vpop.f32.mrf.mxu3 }
 0x8ce   : > { %v3130_v18 = vadd.f32 %v3114_v15, %v3001_v25 }
 0x8d3   : > { %v3003_v14 = vpop.f32.mrf.mxu2 }
 0x8d4   : > { %v3004_v43 = vadd.f32 %v3003_v14, %v7149_v36 }
 0x8d6   : > { %v3131_v28 = vadd.f32 %v3117_v49, %v3004_v43 }
 0x8d8   : > { %v3253_v30 = vadd.f32 %v3239_v17, %v3131_v28 }
 0x8db   : > { %v3005_v2 = vpop.f32.mrf.mxu2 }
 0x8dc   : > { %v3006_v8 = vadd.f32 %v3005_v2, %v2928_v61 }
 0x8de   : > { %v3132_v38 = vadd.f32 %v3119_v42, %v3006_v8 }
 0x8e0   : > { %v3254_v14 = vadd.f32 %v3241_v59, %v3132_v38 }
 0x8e3   : > { %v3008_v6 = vpop.f32.mrf.mxu2 }
 0x8e4   : > { %v3009_v12 = vadd.f32 %v3008_v6, %v2931_v16  ;;  %v3252_v16 = vadd.f32 %v3236_v53, %v3130_v18 }
 0x8e6   : > { %v3133_v44 = vadd.f32 %v3122_v32, %v3009_v12  ;;  %v3246_v12 = vpop.f32.mrf.mxu1 }
 0x8e8   : > { %v3255_v8 = vadd.f32 %v3244_v47, %v3133_v44 }
 0x8eb   : > { %v7167_v4 = vpop.f32.mrf.mxu2 }
 0x8ec   : > { %v3011_v11 = vadd.f32 %v7167_v4, %v7161_v48 }
 0x8ee   : > { %v7193_v18 = vpop.f32.mrf.mxu1 }
 0x8f3   : > { %v3351_v5 = vpop.f32.mrf.mxu2 }
 0x8f4   : > { %v3371_v29 = vadd.f32 %v3351_v5, %v3249_v55 }
 0x8f6   : > { %v3383_v35 = vadd.f32 %v7169_v22, %v3371_v29  ;;  %v3124_v29 = vpop.f32.mrf.mxu3 }
 0x8f7   : > { %v3134_v33 = vadd.f32 %v3124_v29, %v3011_v11 }
 0x8f8   : > { %v3391_v62 = vmul.f32 0.2, %v3383_v35 }
 0x8fa   : > { %v7173_v21 = vmax.f32 %v3383_v35, %v3391_v62  ;;  %v5128_v35 = vmov 64.0  }
 0x8fb   : > { %v3353_v23 = vpop.f32.mrf.mxu2  ;;  %4736 = vrcp.f32 %v5128_v35 }
 0x8fc   : > { %v3372_v24 = vadd.f32 %v3353_v23, %v3250_v27 }
 0x8fe   : > { %v3384_v63 = vadd.f32 %v7169_v22, %v3372_v24  ;;  %v3256_v24 = vadd.f32 %v3246_v12, %v3134_v33  ;;  %v7191_v53 = vpop.f32.mrf.mxu3 }
 0x900   : > { %v3392_v13 = vmul.f32 0.2, %v3384_v63 }
 0x901   : > { %v4737_v62 = vpop.eup %4736 }
 0x902   : > { %v7175_v51 = vmax.f32 %v3384_v63, %v3392_v13  ;;  %v3627_v4 = vmul.f32 64.0, %v4737_v62  ;;  %vm3631_vm0 = vweird.f32 %v4737_v62 }
 0x903   : > { %v3356_v60 = vpop.f32.mrf.mxu2 }
 0x904   : > { %v3613_v39 = vadd.f32 %v7175_v51, %v7173_v21  ;;  %v3373_v7 = vadd.f32 %v3356_v60, %v3251_v37  ;;  %v3628_v37 = vsub.f32 1.0, %v3627_v4  ;;  %v4639_v4 = vld [vmem:[#allocation18] ss:$0 sm:$0xff] }
 0x906   : > { %v3385_v45 = vadd.f32 %v7169_v22, %v3373_v7  ;;  %v3629_v7 = vmul.f32 %v4737_v62, %v3628_v37 }
 0x908   : > { %v3393_v9 = vmul.f32 0.2, %v3385_v45  ;;  %v3630_v49 = vadd.f32 %v4737_v62, %v3629_v7  ;;  %v3594_v7 = vadd.f32 %v4639_v4, %v7193_v18 }
 0x90a   : > { %v7181_v61 = vmax.f32 %v3385_v45, %v3393_v9 }
 0x90b   : > { %v3358_v40 = vpop.f32.mrf.mxu2 }
 0x90c   : > { %v3614_v1 = vadd.f32 %v3613_v39, %v7181_v61  ;;  %v3374_v56 = vadd.f32 %v3358_v40, %v3252_v16  ;;  %v3498_v16 = vpop.f32.mrf.mxu3 }
 0x90e   : > { %v3386_v34 = vadd.f32 %v7169_v22, %v3374_v56  ;;  %v3595_v56 = vpop.f32.mrf.mxu1 }
 0x910   : > { %v3394_v52 = vmul.f32 0.2, %v3386_v34 }
 0x912   : > { %v3402_v58 = vmax.f32 %v3386_v34, %v3394_v52 }
 0x913   : > { %v3361_v19 = vpop.f32.mrf.mxu2 }
 0x914   : > { %v3615_v20 = vadd.f32 %v3614_v1, %v3402_v58  ;;  %v3375_v41 = vadd.f32 %v3361_v19, %v3253_v30  ;;  %v3632_v1 = vsel %vm3631_vm0, %v4737_v62, %v3630_v49 }
 0x916   : > { %v3387_v36 = vadd.f32 %v7169_v22, %v3375_v41 }
 0x918   : > { %v3395_v31 = vmul.f32 0.2, %v3387_v36 }
 0x91a   : > { %v3403_v3 = vmax.f32 %v3387_v36, %v3395_v31  ;;  %v3501_v36 = vpop.f32.mrf.mxu3 }
 0x91b   : > { %v3363_v2 = vpop.f32.mrf.mxu2 }
 0x91c   : > { %v3616_v0 = vadd.f32 %v3615_v20, %v3403_v3  ;;  %v3376_v6 = vadd.f32 %v3363_v2, %v3254_v14 }
 0x91e   : > { %v3388_v54 = vadd.f32 %v7169_v22, %v3376_v6 }
 0x920   : > { %v3396_v10 = vmul.f32 0.2, %v3388_v54 }
 0x922   : > { %v3404_v5 = vmax.f32 %v3388_v54, %v3396_v10  ;;  %v3503_v44 = vpop.f32.mrf.mxu3 }
 0x923   : > { %v3366_v55 = vpop.f32.mrf.mxu2 }
 0x924   : > { %v3617_v50 = vadd.f32 %v3616_v0, %v3404_v5  ;;  %v3377_v57 = vadd.f32 %v3366_v55, %v3255_v8 }
 0x926   : > { %v3389_v26 = vadd.f32 %v7169_v22, %v3377_v57 }
 0x928   : > { %v3397_v27 = vmul.f32 0.2, %v3389_v26 }
 0x92a   : > { %v3405_v23 = vmax.f32 %v3389_v26, %v3397_v27 }
 0x92b   : > { %v3368_v46 = vpop.f32.mrf.mxu2 }
 0x92c   : > { %v3618_v63 = vadd.f32 %v3617_v50, %v3405_v23  ;;  %v3378_v15 = vadd.f32 %v3368_v46, %v3256_v24  ;;  %v3506_v50 = vpop.f32.mrf.mxu3 }
 0x92e   : > { %v3390_v48 = vadd.f32 %v7169_v22, %v3378_v15  ;;  %v4638_v15 = vld [vmem:[#allocation15] ss:$0 sm:$0xff] }
 0x92f   : > { %v3497_v37 = vadd.f32 %v4638_v15, %v7191_v53 }
 0x930   : > { %v3398_v13 = vmul.f32 0.2, %v3390_v48 }
 0x932   : > { %v3406_v25 = vmax.f32 %v3390_v48, %v3398_v13 }
 0x934   : > { %v3619_v60 = vadd.f32 %v3618_v63, %v3406_v25  ;;  %v3508_v12 = vpop.f32.mrf.mxu3 }
 0x936   : > { %v3620_v39 = vrot.slane %v3619_v60, 4 }
 0x938   : > { %v3621_v45 = vadd.f32 %v3620_v39, %v3619_v60  ;;  %v3499_v60 = vadd.f32 %v4638_v15, %v3498_v16 }
 0x93a   : > { %v3622_v9 = vrot.slane %v3621_v45, 2 }
 0x93c   : > { %v3623_v43 = vadd.f32 %v3622_v9, %v3621_v45  ;;  %v3511_v62 = vpop.f32.mrf.mxu3  ;;  %v3596_v45 = vadd.f32 %v4639_v4, %v3595_v56  ;;  %v3502_v9 = vadd.f32 %v4638_v15, %v3501_v36 }
 0x93e   : > { %v3624_v40 = vrot.slane %v3623_v43, 1 }
 0x940   : > { %v3625_v22 = vadd.f32 %v3624_v40, %v3623_v43  ;;  %v3504_v43 = vadd.f32 %v4638_v15, %v3503_v44 }
 0x942   : > { %v3633_v17 = vmul.f32 %v3632_v1, %v3625_v22  ;;  %v3507_v22 = vadd.f32 %v4638_v15, %v3506_v50 }
 0x944   : > { %v7196_v28 = vsub.f32 %v7175_v51, %v3633_v17  ;;  %v7199_v34 = vsub.f32 %v7181_v61, %v3633_v17  ;;  %v7201_v52 = vsub.f32 %v3402_v58, %v3633_v17  ;;  %v7203_v30 = vsub.f32 %v3403_v3, %v3633_v17  ;;  %v3598_v3 = vpop.f32.mrf.mxu1 }
 0x945   : > { %v7205_v42 = vsub.f32 %v3406_v25, %v3633_v17  ;;  %v3634_v19 = vsub.f32 %v7173_v21, %v3633_v17  ;;  %v7208_v20 = vsub.f32 %v3404_v5, %v3633_v17  ;;  %v7210_v41 = vsub.f32 %v3405_v23, %v3633_v17 }
 0x946   : > { %v3643_v38 = vmul.f32 %v7196_v28, %v7196_v28  ;;  %v3644_v61 = vmul.f32 %v7199_v34, %v7199_v34  ;;  %v3645_v59 = vmul.f32 %v7201_v52, %v7201_v52  ;;  %v3646_v21 = vmul.f32 %v7203_v30, %v7203_v30 }
 0x947   : > { %v3642_v51 = vmul.f32 %v3634_v19, %v3634_v19  ;;  %v3647_v32 = vmul.f32 %v7208_v20, %v7208_v20  ;;  %v3648_v0 = vmul.f32 %v7210_v41, %v7210_v41  ;;  %v3649_v54 = vmul.f32 %v7205_v42, %v7205_v42 }
 0x948   : > { %v3599_v49 = vadd.f32 %v4639_v4, %v3598_v3  ;;  %v3509_v17 = vadd.f32 %v4638_v15, %v3508_v12 }
 0x949   : > { %v3650_v58 = vadd.f32 %v3643_v38, %v3642_v51  ;;  %v3512_v38 = vadd.f32 %v4638_v15, %v3511_v62 }
 0x94b   : > { %v3651_v31 = vadd.f32 %v3650_v58, %v3644_v61  ;;  %v3513_v58 = vpop.f32.mrf.mxu3 }
 0x94c   : > { %v3600_v11 = vpop.f32.mrf.mxu1 }
 0x94d   : > { %v3652_v14 = vadd.f32 %v3651_v31, %v3645_v59  ;;  %v3601_v40 = vadd.f32 %v4639_v4, %v3600_v11 }
 0x94f   : > { %v3653_v2 = vadd.f32 %v3652_v14, %v3646_v21 }
 0x951   : > { %v3654_v6 = vadd.f32 %v3653_v2, %v3647_v32 }
 0x953   : > { %v3655_v47 = vadd.f32 %v3654_v6, %v3648_v0 }
 0x954   : > { %v3603_v33 = vpop.f32.mrf.mxu1 }
 0x955   : > { %v3656_v10 = vadd.f32 %v3655_v47, %v3649_v54 }
 0x957   : > { %v3657_v5 = vrot.slane %v3656_v10, 4 }
 0x959   : > { %v3658_v8 = vadd.f32 %v3657_v5, %v3656_v10 }
 0x95b   : > { %v3659_v55 = vrot.slane %v3658_v8, 2 }
 0x95c   : > { %v3605_v23 = vpop.f32.mrf.mxu1 }
 0x95d   : > { %v3660_v57 = vadd.f32 %v3659_v55, %v3658_v8  ;;  %v3606_v6 = vadd.f32 %v4639_v4, %v3605_v23 }
 0x95f   : > { %v3661_v29 = vrot.slane %v3660_v57, 1 }
 0x961   : > { %v3662_v26 = vadd.f32 %v3661_v29, %v3660_v57 }
 0x963   : > { %v3663_v35 = vmul.f32 %v3662_v26, %v3632_v1 }
 0x964   : > { %v3608_v13 = vpop.f32.mrf.mxu1 }
 0x965   : > { %v3664_v27 = vadd.f32 1e-05, %v3663_v35  ;;  %v3609_v54 = vadd.f32 %v4639_v4, %v3608_v13 }
 0x967   : > { %4738 = vrsqrt.f32 %v3664_v27  ;;  %vm3671_vm15 = vweird.f32 %v3664_v27 }
 0x96c   : > { %v3610_v0 = vpop.f32.mrf.mxu1 }
 0x96d   : > { %v4739_v24 = vpop.eup %4738  ;;  %v3611_v10 = vadd.f32 %v4639_v4, %v3610_v0 }
 0x96e   : > { %v3666_v46 = vmul.f32 %v4739_v24, %v3664_v27  ;;  %vm3672_vm14 = vweird.f32 %v4739_v24 }
 0x96f   : > { %vm3673_vm1 = vmor %vm3671_vm15, %vm3672_vm14 }
 0x970   : > { %v3667_v63 = vmul.f32 %v4739_v24, %v3666_v46 }
 0x972   : > { %v3668_v48 = vmul.f32 0.5, %v3667_v63 }
 0x974   : > { %v3669_v25 = vsub.f32 1.5, %v3668_v48 }
 0x976   : > { %v3670_v39 = vmul.f32 %v4739_v24, %v3669_v25 }
 0x978   : > { %v3674_v1 = vsel %vm3673_vm1, %v4739_v24, %v3670_v39 }
 0x979   : > { %v3675_v51 = vmul.f32 %v3674_v1, %v3634_v19  ;;  %v3676_v61 = vmul.f32 %v3674_v1, %v7196_v28  ;;  %v3677_v53 = vmul.f32 %v3674_v1, %v7199_v34  ;;  %v3678_v16 = vmul.f32 %v3674_v1, %v7201_v52 }
 0x97a   : > { %v3679_v18 = vmul.f32 %v3674_v1, %v7203_v30  ;;  %v3680_v56 = vmul.f32 %v3674_v1, %v7208_v20  ;;  %v3681_v36 = vmul.f32 %v3674_v1, %v7210_v41  ;;  %v3682_v59 = vmul.f32 %v3674_v1, %v7205_v42 }
 0x97b   : > { %v3683_v31 = vmul.f32 %v3675_v51, %v3497_v37  ;;  %v3684_v3 = vmul.f32 %v3676_v61, %v3499_v60  ;;  %v3685_v21 = vmul.f32 %v3677_v53, %v3502_v9  ;;  %v3686_v14 = vmul.f32 %v3678_v16, %v3504_v43 }
 0x97c   : > { %v3687_v28 = vmul.f32 %v3679_v18, %v3507_v22  ;;  %v3604_v34 = vadd.f32 %v4639_v4, %v3603_v33  ;;  %v3688_v52 = vmul.f32 %v3680_v56, %v3509_v17  ;;  %v3514_v19 = vadd.f32 %v4638_v15, %v3513_v58 }
 0x97d   : > { %v3691_v32 = vadd.f32 %v3683_v31, %v3594_v7  ;;  %v3692_v30 = vadd.f32 %v3684_v3, %v3596_v45  ;;  %v3693_v2 = vadd.f32 %v3685_v21, %v3599_v49  ;;  %v3689_v20 = vmul.f32 %v3681_v36, %v3512_v38 }
 0x97e   : > { %v3694_v41 = vadd.f32 %v3686_v14, %v3601_v40  ;;  %v3690_v42 = vmul.f32 %v3682_v59, %v3514_v19  ;;  %v3695_v44 = vadd.f32 %v3687_v28, %v3604_v34  ;;  %v3696_v47 = vadd.f32 %v3688_v52, %v3606_v6 }
 0x97f   : > { %3699 = vst [vmem:[%s684_s16] sm:$0xff] %v3691_v32  ;;  %v3697_v11 = vadd.f32 %v3689_v20, %v3609_v54 }
 0x980   : > { %3700 = vst [vmem:[%s684_s16 + $0x8] sm:$0xff] %v3692_v30  ;;  %v3698_v5 = vadd.f32 %v3690_v42, %v3611_v10 }
 0x981   : > { %3701 = vst [vmem:[%s684_s16 + $0x10] sm:$0xff] %v3693_v2 }
 0x982   : > { %3702 = vst [vmem:[%s684_s16 + $0x18] sm:$0xff] %v3694_v41 }
 0x983   : > { %3703 = vst [vmem:[%s684_s16 + $0x20] sm:$0xff] %v3695_v44 }
 0x984   : > { %3704 = vst [vmem:[%s684_s16 + $0x28] sm:$0xff] %v3696_v47 }
 0x985   : > { %3705 = vst [vmem:[%s684_s16 + $0x30] sm:$0xff] %v3697_v11 }
 0x986   : > { %3706 = vst [vmem:[%s684_s16 + $0x38] sm:$0xff] %v3698_v5 }
 0x987 PF: > { %s7400_s23 = sld [smem:[#allocation25_spill]] }
 0x98d   : > { %s31_s18 = sadd.s32 1, %s7400_s23  }
 0x98e   : > { %p28_p7 = scmp.ge.s32.totalorder %s31_s18, 4  }
 0x990   :  { %30 = sbr.rel (!%p28_p7) target bundleno = 10 (0xa), region = 162 }
 0x995   :  { %3728 = vsyncpa [#allocation3], 1 }
 0x996   :  { %3730 = vsyncpa [#allocation3 + $0x1], 1 }
 0x997   :  { %3731 = vsyncpa [#allocation5], 1 }
 0x998   :  { %3732 = vsyncpa [#allocation8], 1 }
 0x999   :  { %3733 = vsyncpa [#allocation11], 1 }
 0x99a   :  { %3734 = vsyncpa [#allocation14], 1 }
 0x99b   :  { %3735 = vsyncpa [#allocation17], 1 }

</bundles_post_ra>
